<compile_context>
chip_gen: v6e
topology: v6e:2x2x1
jax: 0.10.0
libtpu: 0.0.40
codegen_flags: <defaults>
</compile_context>

<pallas_src>
import jax
import jax.numpy as jnp
from jax.experimental import pallas as pl
from jax.experimental.pallas import tpu as pltpu

FEAT_C, FEAT_H, FEAT_W = 2048, 8, 8
IN_FEATURES, OUT_FEATURES = 2048, 512


def _fc_relu_kernel(x_ref, w_ref, b_ref, o_ref):
    # One full (tm, K) x (K, N) MXU pass; bias + ReLU in f32; write once.
    x = x_ref[...]
    if x.dtype != w_ref.dtype:
        x = x.astype(w_ref.dtype)          # f32 -> bf16 cast in VMEM (no HBM cost)
    y = jnp.dot(x, w_ref[...], preferred_element_type=jnp.float32)
    y = y + b_ref[...]                     # (1, N) broadcast bias, f32
    o_ref[...] = jnp.maximum(y, 0.0).astype(o_ref.dtype)


def _tpu_config():
    """Per-generation tiling / VMEM budget (host-side, trace-time only)."""
    try:
        kind = jax.devices()[0].device_kind.lower()
    except Exception:
        kind = ""
    if "v7" in kind or "7x" in kind:
        # 2 TensorCores, 64 MiB physical VMEM per TC.
        return {"num_tensorcores": 2, "max_tm": 1024,
                "vmem_limit_bytes": 48 * 1024 * 1024}
    if any(t in kind for t in ("v5 lite", "v5e", "v6 lite", "v6e")):
        # Single TensorCore, 128 MiB physical VMEM (default scoped limit is
        # only 16/32 MiB -- raise it explicitly so large tiles fit).
        return {"num_tensorcores": 1, "max_tm": 1024,
                "vmem_limit_bytes": 100 * 1024 * 1024}
    # Unknown / older generation: conservative tiles, default VMEM limit.
    return {"num_tensorcores": 2, "max_tm": 256, "vmem_limit_bytes": None}


def _pick_tm(M, num_tensorcores, max_tm):
    """Tile size along M (M = B*64, so always a multiple of 64)."""
    cands = [t for t in (2048, 1024, 512, 256, 128, 64) if t <= max_tm and t <= M]
    if not cands:
        cands = [64]
    if num_tensorcores <= 1:
        # Single-TC chips: the grid is a serial loop -> largest divisor wins
        # (no reason to split a small batch into multiple tiny MXU passes).
        for tm in cands:
            if M % tm == 0:
                return tm
        return 64
    # 2-TC (v7x megacore): both cores should get comparable, MXU-sized work.
    pool = cands
    if M >= 256:
        pool = [t for t in cands if t >= 128] or cands
    even = [t for t in pool if M % t == 0 and (M // t) >= 2 and (M // t) % 2 == 0]
    if even:
        return even[0]
    multi = [t for t in pool if M % t == 0 and (M // t) >= 2]
    if multi:
        return multi[0]
    return 64  # M == 64 (B == 1): a single block is all there is.


def _in_specs(tm, K, N, single_buffer_resident):
    resident_kwargs = {}
    if single_buffer_resident:
        # Constant index_map -> never re-DMA'd; one buffer reclaims ~2 MiB.
        resident_kwargs = dict(pipeline_mode=pl.Buffered(1))
    return [
        pl.BlockSpec((tm, K), lambda i: (i, 0)),                     # activations stream
        pl.BlockSpec((K, N), lambda i: (0, 0), **resident_kwargs),   # weights: resident
        pl.BlockSpec((1, N), lambda i: (0, 0), **resident_kwargs),   # bias: resident
    ]


def fc_relu_pallas(x2d, w_t_bf16, b, *, out_dtype=None):
    """y = relu(x2d @ W^T + b).

    x2d:      (M, 2048) float32 or bfloat16 activations (M = B*64)
    w_t_bf16: (2048, 512) bfloat16 pre-transposed weight (load-time prep)
    b:        (512,) float32 bias
    out_dtype: output dtype; defaults to x2d.dtype (bf16 I/O halves HBM bytes).
    """
    M, K = x2d.shape
    N = w_t_bf16.shape[1]
    assert K == IN_FEATURES and N == OUT_FEATURES and M % 64 == 0
    if out_dtype is None:
        out_dtype = x2d.dtype
    out_dtype = jnp.dtype(out_dtype)

    cfg = _tpu_config()
    tm = _pick_tm(M, cfg["num_tensorcores"], cfg["max_tm"])
    b2 = b.reshape(1, N).astype(jnp.float32)

    cost = pl.CostEstimate(
        flops=2 * M * K * N,
        transcendentals=0,
        bytes_accessed=(x2d.size * x2d.dtype.itemsize
                        + w_t_bf16.size * w_t_bf16.dtype.itemsize
                        + b2.size * 4
                        + M * N * out_dtype.itemsize),
    )

    cp_kwargs = dict(dimension_semantics=("parallel",))
    if cfg["vmem_limit_bytes"] is not None:
        cp_kwargs["vmem_limit_bytes"] = cfg["vmem_limit_bytes"]
    compiler_params = pltpu.CompilerParams(**cp_kwargs)

    def _call(single_buffer_resident):
        return pl.pallas_call(
            _fc_relu_kernel,
            out_shape=jax.ShapeDtypeStruct((M, N), out_dtype),
            grid=(M // tm,),
            in_specs=_in_specs(tm, K, N, single_buffer_resident),
            out_specs=pl.BlockSpec((tm, N), lambda i: (i, 0)),
            compiler_params=compiler_params,
            cost_estimate=cost,
        )(x2d, w_t_bf16, b2)

    try:
        return _call(True)
    except Exception:
        # Fallback: default double-buffering for the resident operands if the
        # installed Pallas rejects Buffered(1).
        return _call(False)


def prepare_fc_weight(fc_weight):
    """One-time (model-load) weight prep: (512,2048) f32 -> (2048,512) bf16."""
    return fc_weight.T.astype(jnp.bfloat16)


def encoder_forward(feat_nchw, w_t_bf16, fc_bias, *, out_dtype=None):
    """Encoder forward, post-backbone portion.

    feat_nchw: (B, 2048, 8, 8) output of the inception_v3 `features` trunk
    (children[:-4]); PyTorch's `.reshape((B, 64, -1))` mixes 32 channels x 8x8
    spatial per row -- reproduced here with the same row-major reshape.
    """
    # TODO(synk): the torchvision inception_v3 `features` backbone (~94
    # pretrained conv+BN layers) is not reproduced here; the kernel implements
    # the Encoder's own compute: reshape + Linear(2048, 512) + ReLU.
    B = feat_nchw.shape[0]
    x2d = feat_nchw.reshape(B * 64, IN_FEATURES)   # row-major == torch.reshape
    y = fc_relu_pallas(x2d, w_t_bf16, fc_bias, out_dtype=out_dtype)
    return y.reshape(B, 64, OUT_FEATURES)


if __name__ == "__main__":
    key = jax.random.PRNGKey(0)
    k_feat, k_w, k_b = jax.random.split(key, 3)

    B = 2
    feat = jax.random.normal(k_feat, (B, FEAT_C, FEAT_H, FEAT_W), jnp.float32)

    # Deterministic Linear(2048, 512) parameters (PyTorch-style uniform init).
    bound = 1.0 / (IN_FEATURES ** 0.5)
    fc_weight = jax.random.uniform(
        k_w, (OUT_FEATURES, IN_FEATURES), jnp.float32, -bound, bound)
    fc_bias = jax.random.uniform(
        k_b, (OUT_FEATURES,), jnp.float32, -bound, bound)

    # Load-time prep (outside the per-call path): transpose + bf16 cast.
    w_t_bf16 = prepare_fc_weight(fc_weight)

    # ---- Path 1: f32 in / f32 out (matches PyTorch boundary dtypes). ----
    out = jax.block_until_ready(encoder_forward(feat, w_t_bf16, fc_bias))
    assert out.shape == (B, 64, OUT_FEATURES)
    assert out.dtype == jnp.float32

    x3d = feat.reshape(B, 64, IN_FEATURES)

    # Reference with the same bf16 operand precision (tight tolerance).
    ref_bf16 = jnp.maximum(
        jnp.einsum("bsk,kn->bsn", x3d.astype(jnp.bfloat16), w_t_bf16,
                   preferred_element_type=jnp.float32) + fc_bias, 0.0)
    assert jnp.allclose(out, ref_bf16, rtol=1e-3, atol=1e-3)

    # Full-f32 reference (looser tolerance due to bf16 matmul operands).
    ref_f32 = jnp.maximum(x3d @ fc_weight.T + fc_bias, 0.0)
    assert jnp.allclose(out, ref_f32, rtol=5e-2, atol=5e-2)

    # ---- Path 2: bf16 producer / bf16 consumer (halves streamed HBM bytes). ----
    out_bf16 = jax.block_until_ready(
        encoder_forward(feat.astype(jnp.bfloat16), w_t_bf16, fc_bias,
                        out_dtype=jnp.bfloat16))
    assert out_bf16.shape == (B, 64, OUT_FEATURES)
    assert out_bf16.dtype == jnp.bfloat16
    assert jnp.allclose(out_bf16.astype(jnp.float32), ref_bf16,
                        rtol=2e-2, atol=2e-2)

    print("KERNEL_OK")
</pallas_src>

<mosaic_0001>
module attributes {stable_mosaic.version = 11 : i64} {
  func.func @_fc_relu_kernel(%arg0: i32, %arg1: memref<64x2048xf32, #tpu.memory_space<vmem>>, %arg2: memref<2048x512xbf16, #tpu.memory_space<vmem>>, %arg3: memref<1x512xf32, #tpu.memory_space<vmem>>, %arg4: memref<64x512xf32, #tpu.memory_space<vmem>>) attributes {dimension_semantics = [#tpu.dimension_semantics<parallel>], iteration_bounds = array<i64: 2>, scalar_prefetch = 0 : i64, scratch_operands = 0 : i64, tpu.core_type = #tpu.core_type<tc>, window_params = [{transform_indices = @transform_0, window_bounds = array<i64: 64, 2048>}, {pipeline_mode = #tpu.pipeline_mode<synchronous>, transform_indices = @transform_1, window_bounds = array<i64: 2048, 512>}, {pipeline_mode = #tpu.pipeline_mode<synchronous>, transform_indices = @transform_2, window_bounds = array<i64: 1, 512>}, {transform_indices = @transform_3, window_bounds = array<i64: 64, 512>}]} {
    %c0 = arith.constant 0 : index
    %c0_0 = arith.constant 0 : index
    %0 = vector.load %arg1[%c0, %c0_0] : memref<64x2048xf32, #tpu.memory_space<vmem>>, vector<64x2048xf32>
    %1 = arith.truncf %0 : vector<64x2048xf32> to vector<64x2048xbf16>
    %c0_1 = arith.constant 0 : index
    %c0_2 = arith.constant 0 : index
    %2 = vector.load %arg2[%c0_1, %c0_2] : memref<2048x512xbf16, #tpu.memory_space<vmem>>, vector<2048x512xbf16>
    %cst = arith.constant dense<0.000000e+00> : vector<64x512xf32>
    %3 = tpu.matmul %1, %2, %cst {dimension_numbers = #tpu.dot_dimension_numbers<[1], [0], [0], [1], [0, 0, 1, 1], [], []>} : vector<64x2048xbf16>, vector<2048x512xbf16>, vector<64x512xf32> -> vector<64x512xf32>
    %c0_3 = arith.constant 0 : index
    %c0_4 = arith.constant 0 : index
    %4 = vector.load %arg3[%c0_3, %c0_4] : memref<1x512xf32, #tpu.memory_space<vmem>>, vector<1x512xf32>
    %5 = vector.broadcast %4 : vector<1x512xf32> to vector<64x512xf32>
    %6 = arith.addf %3, %5 : vector<64x512xf32>
    %cst_5 = arith.constant 0.000000e+00 : f32
    %7 = vector.broadcast %cst_5 : f32 to vector<64x512xf32>
    %8 = arith.maximumf %6, %7 : vector<64x512xf32>
    %c0_6 = arith.constant 0 : index
    %c0_7 = arith.constant 0 : index
    %9 = vector.load %arg4[%c0_6, %c0_7] : memref<64x512xf32, #tpu.memory_space<vmem>>, vector<64x512xf32>
    tpu.vector_store %arg4[%c0_6, %c0_7], %8 {strides = array<i32>} : memref<64x512xf32, #tpu.memory_space<vmem>>, vector<64x512xf32>,
    return
  }
  func.func @transform_0(%arg0: i32) -> (i32, i32) {
    %c0_i32 = arith.constant 0 : i32
    %c0_i32_0 = arith.constant 0 : i32
    return %arg0, %c0_i32 : i32, i32
  }
  func.func @transform_1(%arg0: i32) -> (i32, i32) {
    %c0_i32 = arith.constant 0 : i32
    %c0_i32_0 = arith.constant 0 : i32
    %c0_i32_1 = arith.constant 0 : i32
    return %c0_i32, %c0_i32_0 : i32, i32
  }
  func.func @transform_2(%arg0: i32) -> (i32, i32) {
    %c0_i32 = arith.constant 0 : i32
    %c0_i32_0 = arith.constant 0 : i32
    %c0_i32_1 = arith.constant 0 : i32
    return %c0_i32, %c0_i32_0 : i32, i32
  }
  func.func @transform_3(%arg0: i32) -> (i32, i32) {
    %c0_i32 = arith.constant 0 : i32
    %c0_i32_0 = arith.constant 0 : i32
    return %arg0, %c0_i32 : i32, i32
  }
}

module attributes {stable_mosaic.version = 11 : i64} {
  func.func @_fc_relu_kernel(%arg0: i32, %arg1: memref<64x2048xf32, #tpu.memory_space<vmem>>, %arg2: memref<2048x512xbf16, #tpu.memory_space<vmem>>, %arg3: memref<1x512xf32, #tpu.memory_space<vmem>>, %arg4: memref<64x512xf32, #tpu.memory_space<vmem>>) attributes {dimension_semantics = [#tpu.dimension_semantics<parallel>], iteration_bounds = array<i64: 2>, scalar_prefetch = 0 : i64, scratch_operands = 0 : i64, tpu.core_type = #tpu.core_type<tc>, window_params = [{transform_indices = @transform_0, window_bounds = array<i64: 64, 2048>}, {pipeline_mode = #tpu.pipeline_mode<synchronous>, transform_indices = @transform_1, window_bounds = array<i64: 2048, 512>}, {pipeline_mode = #tpu.pipeline_mode<synchronous>, transform_indices = @transform_2, window_bounds = array<i64: 1, 512>}, {transform_indices = @transform_3, window_bounds = array<i64: 64, 512>}]} {
    %c0 = arith.constant 0 : index
    %c0_0 = arith.constant 0 : index
    %0 = vector.load %arg1[%c0, %c0_0] : memref<64x2048xf32, #tpu.memory_space<vmem>>, vector<64x2048xf32>
    %1 = arith.truncf %0 : vector<64x2048xf32> to vector<64x2048xbf16>
    %c0_1 = arith.constant 0 : index
    %c0_2 = arith.constant 0 : index
    %2 = vector.load %arg2[%c0_1, %c0_2] : memref<2048x512xbf16, #tpu.memory_space<vmem>>, vector<2048x512xbf16>
    %cst = arith.constant dense<0.000000e+00> : vector<64x512xf32>
    %3 = tpu.matmul %1, %2, %cst {dimension_numbers = #tpu.dot_dimension_numbers<[1], [0], [0], [1], [0, 0, 1, 1], [], []>} : vector<64x2048xbf16>, vector<2048x512xbf16>, vector<64x512xf32> -> vector<64x512xf32>
    %c0_3 = arith.constant 0 : index
    %c0_4 = arith.constant 0 : index
    %4 = vector.load %arg3[%c0_3, %c0_4] : memref<1x512xf32, #tpu.memory_space<vmem>>, vector<1x512xf32>
    %5 = vector.broadcast %4 : vector<1x512xf32> to vector<64x512xf32>
    %6 = arith.addf %3, %5 : vector<64x512xf32>
    %cst_5 = arith.constant 0.000000e+00 : f32
    %7 = vector.broadcast %cst_5 : f32 to vector<64x512xf32>
    %8 = arith.maximumf %6, %7 : vector<64x512xf32>
    %c0_6 = arith.constant 0 : index
    %c0_7 = arith.constant 0 : index
    %9 = vector.load %arg4[%c0_6, %c0_7] : memref<64x512xf32, #tpu.memory_space<vmem>>, vector<64x512xf32>
    tpu.vector_store %arg4[%c0_6, %c0_7], %8 {strides = array<i32>} : memref<64x512xf32, #tpu.memory_space<vmem>>, vector<64x512xf32>,
    return
  }
  func.func @transform_0(%arg0: i32) -> (i32, i32) {
    %c0_i32 = arith.constant 0 : i32
    %c0_i32_0 = arith.constant 0 : i32
    return %arg0, %c0_i32 : i32, i32
  }
  func.func @transform_1(%arg0: i32) -> (i32, i32) {
    %c0_i32 = arith.constant 0 : i32
    %c0_i32_0 = arith.constant 0 : i32
    %c0_i32_1 = arith.constant 0 : i32
    return %c0_i32, %c0_i32_0 : i32, i32
  }
  func.func @transform_2(%arg0: i32) -> (i32, i32) {
    %c0_i32 = arith.constant 0 : i32
    %c0_i32_0 = arith.constant 0 : i32
    %c0_i32_1 = arith.constant 0 : i32
    return %c0_i32, %c0_i32_0 : i32, i32
  }
  func.func @transform_3(%arg0: i32) -> (i32, i32) {
    %c0_i32 = arith.constant 0 : i32
    %c0_i32_0 = arith.constant 0 : i32
    return %arg0, %c0_i32 : i32, i32
  }
}

</mosaic_0001>

<bundles_post_ra>
// kernel: tpu_custom_call.1
= control target key start
LH: loop header
LB: loop body
LE: loop exit
PB: predicated region body
PF: predicated region fallthrough
CT: control target
= control target key end

     0   :  { %8 = vsyncpa [#allocation3], 0  ;;  %s7504_s0 = inlined_call_operand.hbm [shape: f32[128,2048], index: 0, kind: input, shape index: {}]   ;;  %s7505_s1 = inlined_call_operand.hbm [shape: bf16[2048,512], index: 1, kind: input, shape index: {}]   ;;  %s7506_s2 = inlined_call_operand.hbm [shape: f32[1,512], index: 2, kind: input, shape index: {}]   ;;  %s7507_s3 = inlined_call_operand.hbm [shape: f32[128,512], index: 3, kind: output, shape index: {}]  }
   0x1   :  { %10 = vsyncpa [#allocation3 + $0x1], 0 }
   0x2   :  { %11 = vsyncpa [#allocation6], 0 }
   0x3   :  { %12 = vsyncpa [#allocation4], 0 }
   0x4   :  { %14 = vsyncpa [#allocation4 + $0x1], 0  ;;  %s6402_s12 = smov 0   ;;  %s6404_s13 = smov 0  }
   0x5   :  { %s6406_s14 = smov 0   ;;  %s6408_s15 = smov 0  }
   0x6 LB: > { %s6423_s16 = sadd.s32 4294967295, %s6370_s15   ;;  %s4844_s17 = sadd.s32 4294967294, %s6370_s15   ;;  %s6370_s15 = sphi %s6408_s15, %s7731_s15   ;;  %s6366_s14 = sphi %s6406_s14, %s7730_s14   ;;  %s6362_s13 = sphi %s6404_s13, %s7729_s13   ;;  %s6358_s12 = sphi %s6402_s12, %s7728_s12  }
   0x7   : > { %p40_p0 = scmp.ne.s32.totalorder %s6362_s13, %s6358_s12  ;;  %p7508_p1 = scmp.eq.s32.totalorder %s6423_s16, 0 }
   0x8   : > { %p112_p3 = scmp.eq.s32.totalorder %s4844_s17, 1  ;;  %p4845_p5 = scmp.ge.s32.totalorder %s6370_s15, 1 }
   0x9   : > { %p6432_p4 = por %p7508_p1, %p40_p0  ;;  %p119_p7 = scmp.lt.s32.totalorder %s6370_s15, 3 }
   0xa   : > { %p6437_p6 = por %p112_p3, %p40_p0  ;;  %s6372_s21 = smov [#allocation5]  }
   0xb   : > { %s7544_s18 = scalar_select %p6432_p4, 1, 0 }
   0xc   : > { %s7545_s19 = scalar_select %p6437_p6, 1, 0 }
   0xd   : > { %p6442_p8 = pnand %p4845_p5, %p119_p7  ;;  %s131_s22 = sshll.u32 %s6372_s21, 4  ;;  %s132_s22 = int_to_ptr.vmem [resolvable:$true] %s131_s22 }
   0xe   : > { %s6373_s24 = smov [#allocation7]   ;;  %s6233_s26 = scalar_lea.vmem %s132_s22, 65536 }
   0xf   : > { %s7546_s20 = scalar_select %p6442_p8, 1, 0 }
  0x10   : > { %p5392_p9 = pneg %p6442_p8  ;;  %s145_s25 = sshll.u32 %s6373_s24, 4  ;;  %s146_s25 = int_to_ptr.vmem [resolvable:$true] %s145_s25 }
  0x11   : > { %p6234_p13 = scmp.ne.s32.totalorder %s132_s22, %s6233_s26  ;;  %p6241_p5 = scmp.lt.s32.totalorder %s132_s22, %s132_s22 }
  0x12   : > { %p6451_p11 = pnand %p5392_p9, %p7508_p1  ;;  %p6242_p7 = scmp.lt.s32.totalorder %s6233_s26, %s6233_s26 }
  0x14   : > { %p6224_p12 = pneg %p6451_p11  ;;  %p6243_p10 = por %p6242_p7, %p6241_p5 }
  0x16   : > { %p6236_p0 = pnand %p6234_p13, %p6224_p12 }
  0x18   : > { %p6237_p3 = pneg %p6236_p0 }
  0x1a   : > { %p6244_p9 = pnand %p6243_p10, %p6237_p3 }
  0x1c   : > { %6247 = shalt.err (!%p6244_p9)
}
  0x1d   : > { %s6374_s27 = smov 256   ;;  %s6375_s28 = smov 16  }
  0x1e   : > { %5395 = dma.hbm_to_vmem [thread:$0]  (!%p6451_p11), %s7505_s1, 65536, %s132_s22, [#allocation6], %s6374_s27, %s6374_s27, %s6375_s28  }
  0x1f   : > { %s6259_s4 = scalar_lea.vmem %s146_s25, 64  ;;  %p6267_p2 = scmp.lt.s32.totalorder %s146_s25, %s146_s25 }
  0x20   : > { %p6260_p1 = scmp.ne.s32.totalorder %s146_s25, %s6259_s4  ;;  %p6268_p6 = scmp.lt.s32.totalorder %s6259_s4, %s6259_s4 }
  0x22   : > { %p6262_p13 = pnand %p6260_p1, %p6224_p12  ;;  %p6269_p5 = por %p6268_p6, %p6267_p2 }
  0x24   : > { %p6263_p0 = pneg %p6262_p13 }
  0x26   : > { %p6270_p10 = pnand %p6269_p5, %p6263_p0 }
  0x28   : > { %6273 = shalt.err (!%p6270_p10)
}
  0x29   : > { %5398 = dma.hbm_to_vmem [thread:$0]  (!%p6451_p11), %s7506_s2, 64, %s146_s25, [#allocation6]  }
  0x2a   : > { %s6474_s7 = sadd.s32 1, %s6370_s15   ;;  %s27_s8 = sadd.s32 1, %s6366_s14 }
  0x2b   : > { %s24_s9 = ssub.s32 %s6370_s15, %s6474_s7  ;;  %p34_p1 = scmp.ne.s32.totalorder %s6366_s14, %s6362_s13 }
  0x2c   : > { %p25_p2 = scmp.eq.s32.totalorder %s24_s9, 0  ;;  %p35_p6 = scmp.eq.s32.totalorder %s6370_s15, 0 }
  0x2d   : > { %p7548_p12 = scmp.eq.s32.totalorder %s6423_s16, 1  ;;  %p5409_p7 = scmp.lt.s32.totalorder %s6370_s15, 2 }
  0x2e   : > { %s6490_s11 = scalar_select %p25_p2, %s6366_s14, %s27_s8  }
  0x2f   : > { %p6484_p3 = por %p7548_p12, %p34_p1  ;;  %p36_p9 = por %p35_p6, %p34_p1 }
  0x30   : > { %s156_s17 = sand.u32 1, %s6366_s14   ;;  %s5377_s22 = sshll.u32 %s6370_s15, 14 }
  0x31   : > { %s7549_s10 = scalar_select %p6484_p3, 1, 0 }
  0x32   : > { %s4849_s21 = sshll.u32 %s156_s17, 10  ;;  %s6497_s25 = scalar_lea.hbm %s7504_s0, %s5377_s22 }
  0x33   : > { %s160_s26 = scalar_lea.vmem [#allocation2], %s4849_s21  ;;  %p6501_p11 = pnand %p5409_p7, %p36_p9 }
  0x34   : > { %s168_s27 = sshll.u32 %s160_s26, 4  ;;  %s6505_s29 = scalar_lea.sflag [#allocation3], %s156_s17  ;;  %s6499_s27 = int_to_ptr.vmem [resolvable:$true] %s168_s27 }
  0x35   : > { %s6274_s30 = scalar_lea.hbm %s6497_s25, 16384  ;;  %p6276_p0 = pneg %p6501_p11 }
  0x36   : > { %p6275_p13 = scmp.ne.s32.totalorder %s6497_s25, %s6274_s30  ;;  %s6279_s6 = scalar_lea.hbm %s7504_s0, 32768 }
  0x37   : > { %p6280_p1 = scmp.lt.s32.totalorder %s6497_s25, %s7504_s0  ;;  %p6281_p2 = scmp.lt.s32.totalorder %s6279_s6, %s6274_s30 }
  0x38   : > { %p6277_p5 = pnand %p6276_p0, %p6275_p13 }
  0x39   : > { %p6282_p6 = por %p6281_p2, %p6280_p1 }
  0x3a   : > { %p6278_p10 = pneg %p6277_p5 }
  0x3c   : > { %p6283_p12 = pnand %p6282_p6, %p6278_p10 }
  0x3e   : > { %6286 = shalt.err (!%p6283_p12)
}
  0x3f   : > { %s6287_s17 = scalar_lea.vmem %s6499_s27, 16384  ;;  %s6376_s21 = smov [#allocation2]  }
  0x40   : > { %p6288_p7 = scmp.ne.s32.totalorder %s6499_s27, %s6287_s17  ;;  %s6292_s22 = sshll.u32 %s6376_s21, 4  ;;  %s6293_s22 = int_to_ptr.vmem [resolvable:$false] %s6292_s22 }
  0x41   : > { %s6294_s23 = scalar_lea.vmem %s6293_s22, 32768  ;;  %p6295_p5 = scmp.lt.s32.totalorder %s6499_s27, %s6293_s22 }
  0x42   : > { %p6290_p9 = pnand %p6288_p7, %p6276_p0  ;;  %p6296_p3 = scmp.lt.s32.totalorder %s6294_s23, %s6287_s17 }
  0x44   : > { %p6291_p13 = pneg %p6290_p9  ;;  %p6297_p4 = por %p6296_p3, %p6295_p5 }
  0x46   : > { %p6298_p8 = pnand %p6297_p4, %p6291_p13 }
  0x48   : > { %6301 = shalt.err (!%p6298_p8)
}
  0x49   : > { %s6377_s24 = smov 2048   ;;  %s6378_s26 = smov 128  }
  0x4a   : > { %5402 = dma.hbm_to_vmem [thread:$0]  (!%p6501_p11), %s6497_s25, 16384, %s6499_s27, %s6505_s29, %s6377_s24, %s6377_s24, %s6378_s26  }
  0x4b   : > { %p7551_p0 = scmp.ne.s32.totalorder %s7546_s20, 0 }
  0x4d   : > { %180 = sbr.rel (%p7551_p0) target bundleno = 845 (0x34d), region = 32 }
  0x52   : > { %s6529_s30 = sand.u32 1, %s6362_s13   ;;  %p7552_p4 = scmp.ne.s32.totalorder %s7544_s18, 0 }
  0x53   : > { %s4854_s4 = sshll.u32 %s6529_s30, 10  ;;  %s183_s5 = scalar_lea.sflag [#allocation3], %s6529_s30 }
  0x54   : > { %s6533_s6 = scalar_lea.vmem [#allocation2], %s4854_s4 }
  0x55   : > { %6345 = dma.done.wait (%p7552_p4), %s183_s5, 16384  }
  0x56   : > { %6347 = vsyncadd (%p7552_p4), %s183_s5, 4294950912  ;;  %p7553_p8 = scmp.eq.s32.totalorder %s6423_s16, 0 }
  0x58   : > { %6349 = dma.done.wait (%p7553_p8), [#allocation6], 65600   ;;  %p7554_p3 = pmov %p7553_p8 }
  0x59   : > { %v5453_v0 = vld [vmem:[#allocation5 + $0xe4] ss:$16 sps:$4 sm:$0xff]   ;;  %v5457_v2 = vld [vmem:[#allocation5 + $0xe0] ss:$16 sps:$4 sm:$0xff]   ;;  %v220_v46 = vld [vmem:[%s6533_s6 + $0x8] sm:$0xff]  ;;  %s4857_s18 = sshll.u32 %s6529_s30, 8 }
  0x5a   : > { %6351 = vsyncadd (%p7554_p3), [#allocation6], 4294901696  ;;  %v5455_v1 = vld [vmem:[#allocation5 + $0x2e4] ss:$16 sps:$4 sm:$0xff]   ;;  %3505 = vmatprep.subr.bf16.mxu0 %v5453_v0  ;;  %v5458_v3 = vld [vmem:[#allocation5 + $0x2e0] ss:$16 sps:$4 sm:$0xff]  }
  0x5b   : > { %3578 = vmatprep.subr.bf16.mxu1 %v5455_v1  ;;  %v5459_v4 = vld [vmem:[#allocation5 + $0xc4] ss:$16 sps:$4 sm:$0xff]   ;;  %3506 = vmatpush1.bf16.msra.mxu0 %v5457_v2  ;;  %v5463_v6 = vld [vmem:[#allocation5 + $0xc0] ss:$16 sps:$4 sm:$0xff]   ;;  %v236_v47 = vld [vmem:[%s6533_s6 + $0x88] sm:$0xff]  ;;  %s7143_s20 = scalar_lea.vmem [#allocation8], %s4857_s18 }
  0x5c   : > { %3579 = vmatpush1.bf16.msra.mxu1 %v5458_v3  ;;  %v5461_v5 = vld [vmem:[#allocation5 + $0x2c4] ss:$16 sps:$4 sm:$0xff]   ;;  %3507 = vmatprep.subr.bf16.mxu0 %v5459_v4  ;;  %v5464_v7 = vld [vmem:[#allocation5 + $0x2c0] ss:$16 sps:$4 sm:$0xff]   ;;  %v222_v48 = vld [vmem:[%s6533_s6 + $0x18] sm:$0xff]  ;;  %v6547_v53 = vpack.c.bf16 %v236_v47, %v220_v46  ;;  %s5379_s25 = sshll.u32 %s6423_s16, 12 }
  0x5d   : > { %3580 = vmatprep.subr.bf16.mxu1 %v5461_v5  ;;  %v5465_v8 = vld [vmem:[#allocation5 + $0xa4] ss:$16 sps:$4 sm:$0xff]   ;;  %v5469_v10 = vld [vmem:[#allocation5 + $0xa0] ss:$16 sps:$4 sm:$0xff]   ;;  %v238_v49 = vld [vmem:[%s6533_s6 + $0x98] sm:$0xff]  ;;  %s4752_s27 = sshll.u32 %s7143_s20, 4  ;;  %s7457_s8 = scalar_lea.hbm %s7507_s3, %s5379_s25  ;;  %s7459_s27 = int_to_ptr.vmem [resolvable:$true] %s4752_s27 }
  0x5e   : > { %v5467_v9 = vld [vmem:[#allocation5 + $0x2a4] ss:$16 sps:$4 sm:$0xff]   ;;  %v5470_v11 = vld [vmem:[#allocation5 + $0x2a0] ss:$16 sps:$4 sm:$0xff]   ;;  %v6549_v54 = vpack.c.bf16 %v238_v49, %v222_v48  ;;  %3537 = vmatprep.mubr.bf16.mxu0 %v6547_v53  ;;  %v286_v47 = vld [vmem:[%s6533_s6 + $0x218] sm:$0xff]  ;;  %s4738_s9 = scalar_lea.sflag [#allocation4], %s6529_s30 }
  0x5f   : > { %3508 = vmatpush1.bf16.msra.mxu0 %v5463_v6  ;;  %v5471_v12 = vld [vmem:[#allocation5 + $0x84] ss:$16 sps:$4 sm:$0xff]   ;;  %v5475_v14 = vld [vmem:[#allocation5 + $0x80] ss:$16 sps:$4 sm:$0xff]   ;;  %v302_v49 = vld [vmem:[%s6533_s6 + $0x298] sm:$0xff]  ;;  %s6302_s16 = scalar_lea.vmem %s7459_s27, 4096 }
  0x60   : > { %3581 = vmatpush1.bf16.msra.mxu1 %v5464_v7  ;;  %3509 = vmatprep.subr.bf16.mxu0 %v5465_v8  ;;  %v5473_v13 = vld [vmem:[#allocation5 + $0x284] ss:$16 sps:$4 sm:$0xff]   ;;  %v5476_v15 = vld [vmem:[#allocation5 + $0x280] ss:$16 sps:$4 sm:$0xff]   ;;  %p6303_p11 = scmp.ne.s32.totalorder %s7459_s27, %s6302_s16  ;;  %p7725_p10 = scmp.ne.s32.totalorder %s7549_s10, 0 }
  0x61   : > { %3582 = vmatprep.subr.bf16.mxu1 %v5467_v9  ;;  %v5477_v16 = vld [vmem:[#allocation5 + $0x64] ss:$16 sps:$4 sm:$0xff]   ;;  %v5481_v18 = vld [vmem:[#allocation5 + $0x60] ss:$16 sps:$4 sm:$0xff]   ;;  %3610 = vmatprep.mubr.bf16.mxu1 %v6549_v54  ;;  %s6379_s17 = smov [#allocation8]  }
  0x62   : > { %v5479_v17 = vld [vmem:[#allocation5 + $0x264] ss:$16 sps:$4 sm:$0xff]   ;;  %v5482_v19 = vld [vmem:[#allocation5 + $0x260] ss:$16 sps:$4 sm:$0xff]   ;;  %p6304_p1 = pnand %p6303_p11, %p7725_p10  ;;  %s6306_s21 = sshll.u32 %s6379_s17, 4  ;;  %s6307_s21 = int_to_ptr.vmem [resolvable:$false] %s6306_s21 }
  0x63   : > { %3510 = vmatpush1.bf16.msra.mxu0 %v5469_v10  ;;  %v5483_v20 = vld [vmem:[#allocation5 + $0x44] ss:$16 sps:$4 sm:$0xff]   ;;  %v5487_v22 = vld [vmem:[#allocation5 + $0x40] ss:$16 sps:$4 sm:$0xff]   ;;  %s6308_s22 = scalar_lea.vmem %s6307_s21, 8192  ;;  %p6309_p6 = scmp.lt.s32.totalorder %s7459_s27, %s6307_s21 }
  0x64   : > { %3583 = vmatpush1.bf16.msra.mxu1 %v5470_v11  ;;  %3511 = vmatprep.subr.bf16.mxu0 %v5471_v12  ;;  %v5485_v21 = vld [vmem:[#allocation5 + $0x244] ss:$16 sps:$4 sm:$0xff]   ;;  %v5488_v23 = vld [vmem:[#allocation5 + $0x240] ss:$16 sps:$4 sm:$0xff]   ;;  %p6305_p2 = pneg %p6304_p1  ;;  %p6310_p12 = scmp.lt.s32.totalorder %s6308_s22, %s6302_s16 }
  0x65   : > { %3584 = vmatprep.subr.bf16.mxu1 %v5473_v13  ;;  %v5489_v24 = vld [vmem:[#allocation5 + $0x24] ss:$16 sps:$4 sm:$0xff]   ;;  %v5493_v26 = vld [vmem:[#allocation5 + $0x20] ss:$16 sps:$4 sm:$0xff]  }
  0x66   : > { %v5491_v25 = vld [vmem:[#allocation5 + $0x224] ss:$16 sps:$4 sm:$0xff]   ;;  %v5494_v27 = vld [vmem:[#allocation5 + $0x220] ss:$16 sps:$4 sm:$0xff]   ;;  %p6311_p7 = por %p6310_p12, %p6309_p6 }
  0x67   : > { %3512 = vmatpush1.bf16.msra.mxu0 %v5475_v14  ;;  %v5495_v28 = vld [vmem:[#allocation5 + $0x4] ss:$16 sps:$4 sm:$0xff]   ;;  %v5499_v30 = vld [vmem:[#allocation5] ss:$16 sps:$4 sm:$0xff]  }
  0x68   : > { %3585 = vmatpush1.bf16.msra.mxu1 %v5476_v15  ;;  %3513 = vmatprep.subr.bf16.mxu0 %v5477_v16  ;;  %v5497_v29 = vld [vmem:[#allocation5 + $0x204] ss:$16 sps:$4 sm:$0xff]   ;;  %v5500_v31 = vld [vmem:[#allocation5 + $0x200] ss:$16 sps:$4 sm:$0xff]   ;;  %p6312_p9 = pnand %p6311_p7, %p6305_p2 }
  0x69   : > { %3586 = vmatprep.subr.bf16.mxu1 %v5479_v17  ;;  %v5501_v32 = vld [vmem:[#allocation5 + $0x1e4] ss:$16 sps:$4 sm:$0xff]   ;;  %v5505_v34 = vld [vmem:[#allocation5 + $0x1e0] ss:$16 sps:$4 sm:$0xff]  }
  0x6a   : > { %v5503_v33 = vld [vmem:[#allocation5 + $0x3e4] ss:$16 sps:$4 sm:$0xff]   ;;  %v5506_v35 = vld [vmem:[#allocation5 + $0x3e0] ss:$16 sps:$4 sm:$0xff]  }
  0x6b   : > { %3514 = vmatpush1.bf16.msra.mxu0 %v5481_v18  ;;  %v5507_v36 = vld [vmem:[#allocation5 + $0x1c4] ss:$16 sps:$4 sm:$0xff]   ;;  %v5511_v38 = vld [vmem:[#allocation5 + $0x1c0] ss:$16 sps:$4 sm:$0xff]  }
  0x6c   : > { %3587 = vmatpush1.bf16.msra.mxu1 %v5482_v19  ;;  %3515 = vmatprep.subr.bf16.mxu0 %v5483_v20  ;;  %v5509_v37 = vld [vmem:[#allocation5 + $0x3c4] ss:$16 sps:$4 sm:$0xff]   ;;  %v5512_v39 = vld [vmem:[#allocation5 + $0x3c0] ss:$16 sps:$4 sm:$0xff]  }
  0x6d   : > { %3588 = vmatprep.subr.bf16.mxu1 %v5485_v21  ;;  %v5513_v40 = vld [vmem:[#allocation5 + $0x1a4] ss:$16 sps:$4 sm:$0xff]   ;;  %v5517_v42 = vld [vmem:[#allocation5 + $0x1a0] ss:$16 sps:$4 sm:$0xff]  }
  0x6e   : > { %v5515_v41 = vld [vmem:[#allocation5 + $0x3a4] ss:$16 sps:$4 sm:$0xff]   ;;  %v5518_v43 = vld [vmem:[#allocation5 + $0x3a0] ss:$16 sps:$4 sm:$0xff]  }
  0x6f   : > { %3516 = vmatpush1.bf16.msra.mxu0 %v5487_v22  ;;  %v5519_v44 = vld [vmem:[#allocation5 + $0x184] ss:$16 sps:$4 sm:$0xff]   ;;  %v5523_v50 = vld [vmem:[#allocation5 + $0x180] ss:$16 sps:$4 sm:$0xff]   ;;  %v252_v22 = vld [vmem:[%s6533_s6 + $0x108] sm:$0xff] }
  0x70   : > { %3589 = vmatpush1.bf16.msra.mxu1 %v5488_v23  ;;  %3517 = vmatprep.subr.bf16.mxu0 %v5489_v24  ;;  %v5521_v45 = vld [vmem:[#allocation5 + $0x384] ss:$16 sps:$4 sm:$0xff]   ;;  %v5524_v51 = vld [vmem:[#allocation5 + $0x380] ss:$16 sps:$4 sm:$0xff]   ;;  %v268_v23 = vld [vmem:[%s6533_s6 + $0x188] sm:$0xff] }
  0x71   : > { %3590 = vmatprep.subr.bf16.mxu1 %v5491_v25  ;;  %v5525_v52 = vld [vmem:[#allocation5 + $0x164] ss:$16 sps:$4 sm:$0xff]   ;;  %v5529_v56 = vld [vmem:[#allocation5 + $0x160] ss:$16 sps:$4 sm:$0xff]   ;;  %v6565_v24 = vpack.c.bf16 %v268_v23, %v252_v22 }
  0x72   : > { %v5527_v55 = vld [vmem:[#allocation5 + $0x364] ss:$16 sps:$4 sm:$0xff]   ;;  %v5530_v57 = vld [vmem:[#allocation5 + $0x360] ss:$16 sps:$4 sm:$0xff]  }
  0x73   : > { %3518 = vmatpush1.bf16.msra.mxu0 %v5493_v26  ;;  %v5531_v58 = vld [vmem:[#allocation5 + $0x144] ss:$16 sps:$4 sm:$0xff]   ;;  %v5535_v60 = vld [vmem:[#allocation5 + $0x140] ss:$16 sps:$4 sm:$0xff]  }
  0x74   : > { %3591 = vmatpush1.bf16.msra.mxu1 %v5494_v27  ;;  %3519 = vmatprep.subr.bf16.mxu0 %v5495_v28  ;;  %v5533_v59 = vld [vmem:[#allocation5 + $0x344] ss:$16 sps:$4 sm:$0xff]   ;;  %v5536_v61 = vld [vmem:[#allocation5 + $0x340] ss:$16 sps:$4 sm:$0xff]   ;;  %v254_v27 = vld [vmem:[%s6533_s6 + $0x118] sm:$0xff] }
  0x75   : > { %3592 = vmatprep.subr.bf16.mxu1 %v5497_v29  ;;  %v5537_v62 = vld [vmem:[#allocation5 + $0x124] ss:$16 sps:$4 sm:$0xff]   ;;  %v5541_v0 = vld [vmem:[#allocation5 + $0x120] ss:$16 sps:$4 sm:$0xff]   ;;  %v270_v29 = vld [vmem:[%s6533_s6 + $0x198] sm:$0xff] }
  0x76   : > { %v5539_v63 = vld [vmem:[#allocation5 + $0x324] ss:$16 sps:$4 sm:$0xff]   ;;  %v5542_v1 = vld [vmem:[#allocation5 + $0x320] ss:$16 sps:$4 sm:$0xff]  }
  0x77   : > { %3520 = vmatpush1.bf16.msra.mxu0 %v5499_v30  ;;  %v5543_v2 = vld [vmem:[#allocation5 + $0x104] ss:$16 sps:$4 sm:$0xff]   ;;  %v5547_v4 = vld [vmem:[#allocation5 + $0x100] ss:$16 sps:$4 sm:$0xff]  }
  0x78   : > { %3593 = vmatpush1.bf16.msra.mxu1 %v5500_v31  ;;  %3521 = vmatprep.subr.bf16.mxu0 %v5501_v32  ;;  %v5545_v3 = vld [vmem:[#allocation5 + $0x304] ss:$16 sps:$4 sm:$0xff]   ;;  %v5548_v5 = vld [vmem:[#allocation5 + $0x300] ss:$16 sps:$4 sm:$0xff]   ;;  %v6573_v32 = vpack.c.bf16 %v270_v29, %v254_v27  ;;  %v226_v27 = vld [vmem:[%s6533_s6 + $0x38] sm:$0xff] }
  0x79   : > { %3594 = vmatprep.subr.bf16.mxu1 %v5503_v33  ;;  %v219_v6 = vld [vmem:[%s6533_s6] sm:$0xff]  ;;  %v221_v8 = vld [vmem:[%s6533_s6 + $0x10] sm:$0xff] }
  0x7a   : > { %v235_v7 = vld [vmem:[%s6533_s6 + $0x80] sm:$0xff]  ;;  %v237_v9 = vld [vmem:[%s6533_s6 + $0x90] sm:$0xff] }
  0x7b   : > { %3522 = vmatpush2.bf16.msra.mxu0 %v5505_v34  ;;  %v5551_v10 = vld [vmem:[#allocation5 + $0x4e4] ss:$16 sps:$4 sm:$0xff]   ;;  %v6557_v12 = vpack.c.bf16 %v235_v7, %v219_v6  ;;  %v6559_v13 = vpack.c.bf16 %v237_v9, %v221_v8  ;;  %v5549_v14 = vld [vmem:[#allocation5 + $0x4e0] ss:$16 sps:$4 sm:$0xff]   ;;  %v334_v7 = vld [vmem:[%s6533_s6 + $0x398] sm:$0xff] }
  0x7c   : > { %3595 = vmatpush2.bf16.msra.mxu1 %v5506_v35  ;;  %3523 = vmatprep.subr.bf16.mxu0 %v5507_v36  ;;  %v5554_v11 = vld [vmem:[#allocation5 + $0x6e4] ss:$16 sps:$4 sm:$0xff]   ;;  %v5552_v15 = vld [vmem:[#allocation5 + $0x6e0] ss:$16 sps:$4 sm:$0xff]  }
  0x7d   : > { %3596 = vmatprep.subr.bf16.mxu1 %v5509_v37  ;;  %v5557_v16 = vld [vmem:[#allocation5 + $0x4c4] ss:$16 sps:$4 sm:$0xff]   ;;  %v5555_v18 = vld [vmem:[#allocation5 + $0x4c0] ss:$16 sps:$4 sm:$0xff]  }
  0x7e   : > { %v5560_v17 = vld [vmem:[#allocation5 + $0x6c4] ss:$16 sps:$4 sm:$0xff]   ;;  %v5558_v19 = vld [vmem:[#allocation5 + $0x6c0] ss:$16 sps:$4 sm:$0xff]  }
  0x7f   : > { %3524 = vmatpush2.bf16.msra.mxu0 %v5511_v38  ;;  %v5563_v20 = vld [vmem:[#allocation5 + $0x4a4] ss:$16 sps:$4 sm:$0xff]   ;;  %v5561_v30 = vld [vmem:[#allocation5 + $0x4a0] ss:$16 sps:$4 sm:$0xff]  }
  0x80   : > { %3597 = vmatpush2.bf16.msra.mxu1 %v5512_v39  ;;  %3525 = vmatprep.subr.bf16.mxu0 %v5513_v40  ;;  %v5566_v21 = vld [vmem:[#allocation5 + $0x6a4] ss:$16 sps:$4 sm:$0xff]   ;;  %v5564_v31 = vld [vmem:[#allocation5 + $0x6a0] ss:$16 sps:$4 sm:$0xff]  }
  0x81   : > { %3598 = vmatprep.subr.bf16.mxu1 %v5515_v41  ;;  %v251_v25 = vld [vmem:[%s6533_s6 + $0x100] sm:$0xff]  ;;  %v253_v35 = vld [vmem:[%s6533_s6 + $0x110] sm:$0xff] }
  0x82   : > { %v267_v26 = vld [vmem:[%s6533_s6 + $0x180] sm:$0xff]  ;;  %v269_v36 = vld [vmem:[%s6533_s6 + $0x190] sm:$0xff] }
  0x83   : > { %3526 = vmatpush2.bf16.msra.mxu0 %v5517_v42  ;;  %v6570_v28 = vpack.c.bf16 %v267_v26, %v251_v25  ;;  %v5569_v33 = vld [vmem:[#allocation5 + $0x484] ss:$16 sps:$4 sm:$0xff]   ;;  %v5567_v37 = vld [vmem:[#allocation5 + $0x480] ss:$16 sps:$4 sm:$0xff]   ;;  %v6580_v39 = vpack.c.bf16 %v269_v36, %v253_v35  ;;  %v284_v42 = vld [vmem:[%s6533_s6 + $0x208] sm:$0xff] }
  0x84   : > { %3599 = vmatpush2.bf16.msra.mxu1 %v5518_v43  ;;  %3527 = vmatprep.subr.bf16.mxu0 %v5519_v44  ;;  %v5572_v34 = vld [vmem:[#allocation5 + $0x684] ss:$16 sps:$4 sm:$0xff]   ;;  %v5570_v38 = vld [vmem:[#allocation5 + $0x680] ss:$16 sps:$4 sm:$0xff]   ;;  %v300_v43 = vld [vmem:[%s6533_s6 + $0x288] sm:$0xff] }
  0x85   : > { %3600 = vmatprep.subr.bf16.mxu1 %v5521_v45  ;;  %v5575_v40 = vld [vmem:[#allocation5 + $0x464] ss:$16 sps:$4 sm:$0xff]   ;;  %v6585_v44 = vpack.c.bf16 %v300_v43, %v284_v42  ;;  %v5585_v8 = vld [vmem:[#allocation5 + $0x420] ss:$16 sps:$4 sm:$0xff]   ;;  %v224_v25 = vld [vmem:[%s6533_s6 + $0x28] sm:$0xff] }
  0x86   : > { %v5578_v41 = vld [vmem:[#allocation5 + $0x664] ss:$16 sps:$4 sm:$0xff]   ;;  %v5588_v9 = vld [vmem:[#allocation5 + $0x620] ss:$16 sps:$4 sm:$0xff]   ;;  %v240_v26 = vld [vmem:[%s6533_s6 + $0xa8] sm:$0xff] }
  0x87   : > { %3528 = vmatpush2.bf16.msra.mxu0 %v5523_v50  ;;  %v283_v45 = vld [vmem:[%s6533_s6 + $0x200] sm:$0xff] }
  0x88   : > { %3601 = vmatpush2.bf16.msra.mxu1 %v5524_v51  ;;  %3529 = vmatprep.subr.bf16.mxu0 %v5525_v52  ;;  %v299_v46 = vld [vmem:[%s6533_s6 + $0x280] sm:$0xff]  ;;  %v6593_v52 = vpack.c.bf16 %v302_v49, %v286_v47 }
  0x89   : > { %3602 = vmatprep.subr.bf16.mxu1 %v5527_v55  ;;  %v6590_v48 = vpack.c.bf16 %v299_v46, %v283_v45  ;;  %v5573_v50 = vld [vmem:[#allocation5 + $0x460] ss:$16 sps:$4 sm:$0xff]   ;;  %v5581_v55 = vld [vmem:[#allocation5 + $0x444] ss:$16 sps:$4 sm:$0xff]  }
  0x8a   : > { %v5576_v51 = vld [vmem:[#allocation5 + $0x660] ss:$16 sps:$4 sm:$0xff]   ;;  %v5605_v29 = vld [vmem:[#allocation5 + $0x5c4] ss:$16 sps:$4 sm:$0xff]  }
  0x8b   : > { %3530 = vmatpush2.bf16.msra.mxu0 %v5529_v56  ;;  %v5584_v56 = vld [vmem:[#allocation5 + $0x644] ss:$16 sps:$4 sm:$0xff]   ;;  %v5597_v22 = vld [vmem:[#allocation5 + $0x5e0] ss:$16 sps:$4 sm:$0xff]  }
  0x8c   : > { %3603 = vmatpush2.bf16.msra.mxu1 %v5530_v57  ;;  %3531 = vmatprep.subr.bf16.mxu0 %v5531_v58  ;;  %v285_v57 = vld [vmem:[%s6533_s6 + $0x210] sm:$0xff] }
  0x8d   : > { %3604 = vmatprep.subr.bf16.mxu1 %v5533_v59  ;;  %v301_v58 = vld [vmem:[%s6533_s6 + $0x290] sm:$0xff] }
  0x8e   : > { %v5579_v59 = vld [vmem:[#allocation5 + $0x440] ss:$16 sps:$4 sm:$0xff]   ;;  %v5617_v42 = vld [vmem:[#allocation5 + $0x584] ss:$16 sps:$4 sm:$0xff]  }
  0x8f   : > { %3532 = vmatpush2.bf16.msra.mxu0 %v5535_v60  ;;  %v5582_v60 = vld [vmem:[#allocation5 + $0x640] ss:$16 sps:$4 sm:$0xff]   ;;  %v5620_v43 = vld [vmem:[#allocation5 + $0x784] ss:$16 sps:$4 sm:$0xff]  }
  0x90   : > { %3605 = vmatpush2.bf16.msra.mxu1 %v5536_v61  ;;  %3533 = vmatprep.subr.bf16.mxu0 %v5537_v62  ;;  %v6600_v61 = vpack.c.bf16 %v301_v58, %v285_v57  ;;  %v5587_v62 = vld [vmem:[#allocation5 + $0x424] ss:$16 sps:$4 sm:$0xff]   ;;  %v5600_v23 = vld [vmem:[#allocation5 + $0x7e0] ss:$16 sps:$4 sm:$0xff]  }
  0x91   : > { %3606 = vmatprep.subr.bf16.mxu1 %v5539_v63  ;;  %v5590_v63 = vld [vmem:[#allocation5 + $0x624] ss:$16 sps:$4 sm:$0xff]   ;;  %v5603_v35 = vld [vmem:[#allocation5 + $0x5c0] ss:$16 sps:$4 sm:$0xff]  }
  0x92   : > { %v5606_v36 = vld [vmem:[#allocation5 + $0x7c0] ss:$16 sps:$4 sm:$0xff]   ;;  %v5623_v47 = vld [vmem:[#allocation5 + $0x564] ss:$16 sps:$4 sm:$0xff]  }
  0x93   : > { %3534 = vmatpush2.bf16.msra.mxu0 %v5541_v0  ;;  %v316_v0 = vld [vmem:[%s6533_s6 + $0x308] sm:$0xff]  ;;  %v5615_v45 = vld [vmem:[#allocation5 + $0x580] ss:$16 sps:$4 sm:$0xff]   ;;  %v5626_v49 = vld [vmem:[#allocation5 + $0x764] ss:$16 sps:$4 sm:$0xff]  }
  0x94   : > { %3607 = vmatpush2.bf16.msra.mxu1 %v5542_v1  ;;  %3535 = vmatprep.subr.bf16.mxu0 %v5543_v2  ;;  %v332_v1 = vld [vmem:[%s6533_s6 + $0x388] sm:$0xff]  ;;  %v5618_v46 = vld [vmem:[#allocation5 + $0x780] ss:$16 sps:$4 sm:$0xff]  }
  0x95   : > { %3608 = vmatprep.subr.bf16.mxu1 %v5545_v3  ;;  %v6605_v2 = vpack.c.bf16 %v332_v1, %v316_v0  ;;  %v315_v3 = vld [vmem:[%s6533_s6 + $0x300] sm:$0xff] }
  0x96   : > { %v5627_v57 = vld [vmem:[#allocation5 + $0x540] ss:$16 sps:$4 sm:$0xff]   ;;  %v5641_v0 = vld [vmem:[#allocation5 + $0x504] ss:$16 sps:$4 sm:$0xff]  }
  0x97   : > { %3536 = vmatpush2.bf16.msra.mxu0 %v5547_v4  ;;  %v331_v4 = vld [vmem:[%s6533_s6 + $0x380] sm:$0xff] }
  0x98   : > { %3609 = vmatpush2.bf16.msra.mxu1 %v5548_v5  ;;  %3651 = vmatprep.subr.bf16.mxu0 %v5551_v10  ;;  %v318_v5 = vld [vmem:[%s6533_s6 + $0x318] sm:$0xff]  ;;  %v6610_v6 = vpack.c.bf16 %v331_v4, %v315_v3  ;;  %v5630_v58 = vld [vmem:[#allocation5 + $0x740] ss:$16 sps:$4 sm:$0xff]   ;;  %v5644_v1 = vld [vmem:[#allocation5 + $0x704] ss:$16 sps:$4 sm:$0xff]  }
  0x99   : > { %3724 = vmatprep.subr.bf16.mxu1 %v5554_v11  ;;  %v6613_v10 = vpack.c.bf16 %v334_v7, %v318_v5  ;;  %v5593_v11 = vld [vmem:[#allocation5 + $0x404] ss:$16 sps:$4 sm:$0xff]   ;;  %v5639_v3 = vld [vmem:[#allocation5 + $0x500] ss:$16 sps:$4 sm:$0xff]  }
  0x9a   : > { %3538 = vmatmul.mubr.bf16.vlgmr.msra.gmra.mxu0 %v6557_v12  ;;  %v5642_v4 = vld [vmem:[#allocation5 + $0x700] ss:$16 sps:$4 sm:$0xff]  }
  0x9b   : > { %3611 = vmatmul.mubr.bf16.vlgmr.msra.gmra.mxu1 %v6559_v13  ;;  %3652 = vmatpush1.bf16.msra.mxu0 %v5549_v14  ;;  %v5596_v14 = vld [vmem:[#allocation5 + $0x604] ss:$16 sps:$4 sm:$0xff]  }
  0x9c   : > { %3725 = vmatpush1.bf16.msra.mxu1 %v5552_v15  ;;  %3653 = vmatprep.subr.bf16.mxu0 %v5557_v16  ;;  %v317_v15 = vld [vmem:[%s6533_s6 + $0x310] sm:$0xff]  ;;  %v223_v5 = vld [vmem:[%s6533_s6 + $0x20] sm:$0xff] }
  0x9d   : > { %3726 = vmatprep.subr.bf16.mxu1 %v5560_v17  ;;  %3547 = vmatprep.mubr.bf16.mxu0 %v6565_v24  ;;  %v333_v16 = vld [vmem:[%s6533_s6 + $0x390] sm:$0xff]  ;;  %v239_v7 = vld [vmem:[%s6533_s6 + $0xa0] sm:$0xff] }
  0x9e   : > { %3620 = vmatprep.mubr.bf16.mxu1 %v6573_v32  ;;  %v5591_v17 = vld [vmem:[#allocation5 + $0x400] ss:$16 sps:$4 sm:$0xff]  }
  0x9f   : > { %3654 = vmatpush1.bf16.msra.mxu0 %v5555_v18  ;;  %v5594_v18 = vld [vmem:[#allocation5 + $0x600] ss:$16 sps:$4 sm:$0xff]  }
  0xa0   : > { %3727 = vmatpush1.bf16.msra.mxu1 %v5558_v19  ;;  %3655 = vmatprep.subr.bf16.mxu0 %v5563_v20  ;;  %v6620_v19 = vpack.c.bf16 %v333_v16, %v317_v15  ;;  %v5599_v20 = vld [vmem:[#allocation5 + $0x5e4] ss:$16 sps:$4 sm:$0xff]   ;;  %v5645_v15 = vld [vmem:[#allocation5 + $0x8e0] ss:$16 sps:$4 sm:$0xff]  }
  0xa1   : > { %3728 = vmatprep.subr.bf16.mxu1 %v5566_v21  ;;  %v5602_v21 = vld [vmem:[#allocation5 + $0x7e4] ss:$16 sps:$4 sm:$0xff]   ;;  %v5648_v16 = vld [vmem:[#allocation5 + $0xae0] ss:$16 sps:$4 sm:$0xff]  }
  0xa2   : > { %3548 = vmatmul.mubr.bf16.gmra.mxu0 %v6570_v28 }
  0xa3   : > { %3656 = vmatpush1.bf16.msra.mxu0 %v5561_v30  ;;  %3621 = vmatmul.mubr.bf16.gmra.mxu1 %v6580_v39  ;;  %v5608_v30 = vld [vmem:[#allocation5 + $0x7c4] ss:$16 sps:$4 sm:$0xff]  }
  0xa4   : > { %3729 = vmatpush1.bf16.msra.mxu1 %v5564_v31  ;;  %3657 = vmatprep.subr.bf16.mxu0 %v5569_v33  ;;  %v6626_v31 = vpack.c.bf16 %v240_v26, %v224_v25  ;;  %v242_v33 = vld [vmem:[%s6533_s6 + $0xb8] sm:$0xff]  ;;  %v5653_v25 = vld [vmem:[#allocation5 + $0x8c4] ss:$16 sps:$4 sm:$0xff]  }
  0xa5   : > { %3730 = vmatprep.subr.bf16.mxu1 %v5572_v34  ;;  %3557 = vmatprep.mubr.bf16.mxu0 %v6585_v44  ;;  %v6629_v34 = vpack.c.bf16 %v242_v33, %v226_v27  ;;  %v5656_v26 = vld [vmem:[#allocation5 + $0xac4] ss:$16 sps:$4 sm:$0xff]   ;;  %v5651_v27 = vld [vmem:[#allocation5 + $0x8c0] ss:$16 sps:$4 sm:$0xff]  }
  0xa6   : > { %3630 = vmatprep.mubr.bf16.mxu1 %v6593_v52  ;;  %v255_v33 = vld [vmem:[%s6533_s6 + $0x120] sm:$0xff] }
  0xa7   : > { %3658 = vmatpush1.bf16.msra.mxu0 %v5567_v37  ;;  %v5611_v37 = vld [vmem:[#allocation5 + $0x5a4] ss:$16 sps:$4 sm:$0xff]  }
  0xa8   : > { %3731 = vmatpush1.bf16.msra.mxu1 %v5570_v38  ;;  %3659 = vmatprep.subr.bf16.mxu0 %v5575_v40  ;;  %v5614_v38 = vld [vmem:[#allocation5 + $0x7a4] ss:$16 sps:$4 sm:$0xff]   ;;  %v5609_v40 = vld [vmem:[#allocation5 + $0x5a0] ss:$16 sps:$4 sm:$0xff]  }
  0xa9   : > { %3732 = vmatprep.subr.bf16.mxu1 %v5578_v41  ;;  %v5612_v41 = vld [vmem:[#allocation5 + $0x7a0] ss:$16 sps:$4 sm:$0xff]  }
  0xaa   : > { %3558 = vmatmul.mubr.bf16.gmra.mxu0 %v6590_v48 }
  0xab   : > { %3660 = vmatpush1.bf16.msra.mxu0 %v5573_v50  ;;  %3631 = vmatmul.mubr.bf16.gmra.mxu1 %v6600_v61  ;;  %v5621_v50 = vld [vmem:[#allocation5 + $0x560] ss:$16 sps:$4 sm:$0xff]  }
  0xac   : > { %3733 = vmatpush1.bf16.msra.mxu1 %v5576_v51  ;;  %3661 = vmatprep.subr.bf16.mxu0 %v5581_v55  ;;  %v5624_v51 = vld [vmem:[#allocation5 + $0x760] ss:$16 sps:$4 sm:$0xff]   ;;  %v5629_v55 = vld [vmem:[#allocation5 + $0x544] ss:$16 sps:$4 sm:$0xff]  }
  0xad   : > { %3734 = vmatprep.subr.bf16.mxu1 %v5584_v56  ;;  %3567 = vmatprep.mubr.bf16.mxu0 %v6605_v2  ;;  %v5632_v56 = vld [vmem:[#allocation5 + $0x744] ss:$16 sps:$4 sm:$0xff]  }
  0xae   : > { %3640 = vmatprep.mubr.bf16.mxu1 %v6613_v10 }
  0xaf   : > { %3662 = vmatpush1.bf16.msra.mxu0 %v5579_v59  ;;  %v5635_v59 = vld [vmem:[#allocation5 + $0x524] ss:$16 sps:$4 sm:$0xff]  }
  0xb0   : > { %3735 = vmatpush1.bf16.msra.mxu1 %v5582_v60  ;;  %3663 = vmatprep.subr.bf16.mxu0 %v5587_v62  ;;  %v5638_v60 = vld [vmem:[#allocation5 + $0x724] ss:$16 sps:$4 sm:$0xff]   ;;  %v5633_v62 = vld [vmem:[#allocation5 + $0x520] ss:$16 sps:$4 sm:$0xff]  }
  0xb1   : > { %3736 = vmatprep.subr.bf16.mxu1 %v5590_v63  ;;  %v5636_v63 = vld [vmem:[#allocation5 + $0x720] ss:$16 sps:$4 sm:$0xff]  }
  0xb2   : > { %3568 = vmatmul.mubr.bf16.gmra.mxu0 %v6610_v6 }
  0xb3   : > { %3664 = vmatpush1.bf16.msra.mxu0 %v5585_v8  ;;  %3641 = vmatmul.mubr.bf16.gmra.mxu1 %v6620_v19  ;;  %v225_v8 = vld [vmem:[%s6533_s6 + $0x30] sm:$0xff] }
  0xb4   : > { %3737 = vmatpush1.bf16.msra.mxu1 %v5588_v9  ;;  %3665 = vmatprep.subr.bf16.mxu0 %v5593_v11  ;;  %v241_v9 = vld [vmem:[%s6533_s6 + $0xb0] sm:$0xff] }
  0xb5   : > { %3738 = vmatprep.subr.bf16.mxu1 %v5596_v14  ;;  %3683 = vmatprep.mubr.bf16.mxu0 %v6626_v31  ;;  %v5647_v11 = vld [vmem:[#allocation5 + $0x8e4] ss:$16 sps:$4 sm:$0xff]  }
  0xb6   : > { %3756 = vmatprep.mubr.bf16.mxu1 %v6629_v34  ;;  %v5650_v14 = vld [vmem:[#allocation5 + $0xae4] ss:$16 sps:$4 sm:$0xff]  }
  0xb7   : > { %3666 = vmatpush1.bf16.msra.mxu0 %v5591_v17  ;;  %v256_v17 = vld [vmem:[%s6533_s6 + $0x128] sm:$0xff] }
  0xb8   : > { %3739 = vmatpush1.bf16.msra.mxu1 %v5594_v18  ;;  %3667 = vmatprep.subr.bf16.mxu0 %v5599_v20  ;;  %v272_v18 = vld [vmem:[%s6533_s6 + $0x1a8] sm:$0xff]  ;;  %v6639_v20 = vpack.c.bf16 %v239_v7, %v223_v5  ;;  %v5669_v5 = vld [vmem:[#allocation5 + $0x860] ss:$16 sps:$4 sm:$0xff]  }
  0xb9   : > { %3740 = vmatprep.subr.bf16.mxu1 %v5602_v21  ;;  %v6641_v21 = vpack.c.bf16 %v241_v9, %v225_v8  ;;  %v5672_v7 = vld [vmem:[#allocation5 + $0xa60] ss:$16 sps:$4 sm:$0xff]   ;;  %v320_v8 = vld [vmem:[%s6533_s6 + $0x328] sm:$0xff] }
  0xba   : > { %v336_v9 = vld [vmem:[%s6533_s6 + $0x3a8] sm:$0xff] }
  0xbb   : > { %3668 = vmatpush2.bf16.msra.mxu0 %v5597_v22  ;;  %v258_v22 = vld [vmem:[%s6533_s6 + $0x138] sm:$0xff] }
  0xbc   : > { %3741 = vmatpush2.bf16.msra.mxu1 %v5600_v23  ;;  %3669 = vmatprep.subr.bf16.mxu0 %v5605_v29  ;;  %v274_v23 = vld [vmem:[%s6533_s6 + $0x1b8] sm:$0xff]  ;;  %v5654_v29 = vld [vmem:[#allocation5 + $0xac0] ss:$16 sps:$4 sm:$0xff]  }
  0xbd   : > { %3742 = vmatprep.subr.bf16.mxu1 %v5608_v30  ;;  %v6645_v30 = vpack.c.bf16 %v272_v18, %v256_v17  ;;  %v5677_v17 = vld [vmem:[#allocation5 + $0x844] ss:$16 sps:$4 sm:$0xff]  }
  0xbe   : > { %v5680_v18 = vld [vmem:[#allocation5 + $0xa44] ss:$16 sps:$4 sm:$0xff]  }
  0xbf   : > { %3670 = vmatpush2.bf16.msra.mxu0 %v5603_v35  ;;  %v271_v35 = vld [vmem:[%s6533_s6 + $0x1a0] sm:$0xff] }
  0xc0   : > { %3743 = vmatpush2.bf16.msra.mxu1 %v5606_v36  ;;  %3671 = vmatprep.subr.bf16.mxu0 %v5611_v37  ;;  %v6649_v36 = vpack.c.bf16 %v274_v23, %v258_v22  ;;  %v5659_v37 = vld [vmem:[#allocation5 + $0x8a4] ss:$16 sps:$4 sm:$0xff]   ;;  %v5675_v22 = vld [vmem:[#allocation5 + $0x840] ss:$16 sps:$4 sm:$0xff]  }
  0xc1   : > { %3744 = vmatprep.subr.bf16.mxu1 %v5614_v38  ;;  %v257_v38 = vld [vmem:[%s6533_s6 + $0x130] sm:$0xff] }
  0xc2   : > { %v5678_v23 = vld [vmem:[#allocation5 + $0xa40] ss:$16 sps:$4 sm:$0xff]  }
  0xc3   : > { %3672 = vmatpush2.bf16.msra.mxu0 %v5609_v40  ;;  %v273_v40 = vld [vmem:[%s6533_s6 + $0x1b0] sm:$0xff] }
  0xc4   : > { %3745 = vmatpush2.bf16.msra.mxu1 %v5612_v41  ;;  %3673 = vmatprep.subr.bf16.mxu0 %v5617_v42  ;;  %v5662_v41 = vld [vmem:[#allocation5 + $0xaa4] ss:$16 sps:$4 sm:$0xff]   ;;  %v5657_v42 = vld [vmem:[#allocation5 + $0x8a0] ss:$16 sps:$4 sm:$0xff]  }
  0xc5   : > { %3746 = vmatprep.subr.bf16.mxu1 %v5620_v43  ;;  %v5660_v43 = vld [vmem:[#allocation5 + $0xaa0] ss:$16 sps:$4 sm:$0xff]  }
  0xc7   : > { %3674 = vmatpush2.bf16.msra.mxu0 %v5615_v45  ;;  %v288_v45 = vld [vmem:[%s6533_s6 + $0x228] sm:$0xff] }
  0xc8   : > { %3747 = vmatpush2.bf16.msra.mxu1 %v5618_v46  ;;  %3675 = vmatprep.subr.bf16.mxu0 %v5623_v47  ;;  %v304_v46 = vld [vmem:[%s6533_s6 + $0x2a8] sm:$0xff]  ;;  %v6659_v47 = vpack.c.bf16 %v271_v35, %v255_v33  ;;  %v321_v33 = vld [vmem:[%s6533_s6 + $0x330] sm:$0xff] }
  0xc9   : > { %3748 = vmatprep.subr.bf16.mxu1 %v5626_v49  ;;  %v6661_v49 = vpack.c.bf16 %v273_v40, %v257_v38  ;;  %v337_v35 = vld [vmem:[%s6533_s6 + $0x3b0] sm:$0xff] }
  0xca   : > { %v5686_v38 = vld [vmem:[#allocation5 + $0xa24] ss:$16 sps:$4 sm:$0xff]   ;;  %v5681_v40 = vld [vmem:[#allocation5 + $0x820] ss:$16 sps:$4 sm:$0xff]  }
  0xcb   : > { %3676 = vmatpush2.bf16.msra.mxu0 %v5621_v50  ;;  %v290_v50 = vld [vmem:[%s6533_s6 + $0x238] sm:$0xff] }
  0xcc   : > { %3749 = vmatpush2.bf16.msra.mxu1 %v5624_v51  ;;  %3677 = vmatprep.subr.bf16.mxu0 %v5629_v55  ;;  %v306_v51 = vld [vmem:[%s6533_s6 + $0x2b8] sm:$0xff]  ;;  %v5665_v55 = vld [vmem:[#allocation5 + $0x884] ss:$16 sps:$4 sm:$0xff]  }
  0xcd   : > { %3750 = vmatprep.subr.bf16.mxu1 %v5632_v56  ;;  %v5668_v56 = vld [vmem:[#allocation5 + $0xa84] ss:$16 sps:$4 sm:$0xff]  }
  0xcf   : > { %3678 = vmatpush2.bf16.msra.mxu0 %v5627_v57  ;;  %v5663_v57 = vld [vmem:[#allocation5 + $0x880] ss:$16 sps:$4 sm:$0xff]  }
  0xd0   : > { %3751 = vmatpush2.bf16.msra.mxu1 %v5630_v58  ;;  %3679 = vmatprep.subr.bf16.mxu0 %v5635_v59  ;;  %v5666_v58 = vld [vmem:[#allocation5 + $0xa80] ss:$16 sps:$4 sm:$0xff]   ;;  %v6665_v59 = vpack.c.bf16 %v304_v46, %v288_v45  ;;  %v6700_v45 = vpack.c.bf16 %v337_v35, %v321_v33  ;;  %v244_v46 = vld [vmem:[%s6533_s6 + $0xc8] sm:$0xff]  ;;  %v5719_v33 = vld [vmem:[#allocation5 + $0x964] ss:$16 sps:$4 sm:$0xff]  }
  0xd1   : > { %3752 = vmatprep.subr.bf16.mxu1 %v5638_v60  ;;  %v287_v60 = vld [vmem:[%s6533_s6 + $0x220] sm:$0xff] }
  0xd2   : > { %v5722_v35 = vld [vmem:[#allocation5 + $0xb64] ss:$16 sps:$4 sm:$0xff]  }
  0xd3   : > { %3680 = vmatpush2.bf16.msra.mxu0 %v5633_v62  ;;  %v303_v62 = vld [vmem:[%s6533_s6 + $0x2a0] sm:$0xff] }
  0xd4   : > { %3753 = vmatpush2.bf16.msra.mxu1 %v5636_v63  ;;  %3681 = vmatprep.subr.bf16.mxu0 %v5641_v0  ;;  %v6669_v63 = vpack.c.bf16 %v306_v51, %v290_v50  ;;  %v5671_v0 = vld [vmem:[#allocation5 + $0x864] ss:$16 sps:$4 sm:$0xff]   ;;  %v230_v50 = vld [vmem:[%s6533_s6 + $0x58] sm:$0xff] }
  0xd5   : > { %3754 = vmatprep.subr.bf16.mxu1 %v5644_v1  ;;  %v289_v1 = vld [vmem:[%s6533_s6 + $0x230] sm:$0xff]  ;;  %v246_v51 = vld [vmem:[%s6533_s6 + $0xd8] sm:$0xff] }
  0xd7   : > { %3682 = vmatpush2.bf16.msra.mxu0 %v5639_v3  ;;  %v305_v3 = vld [vmem:[%s6533_s6 + $0x2b0] sm:$0xff] }
  0xd8   : > { %3755 = vmatpush2.bf16.msra.mxu1 %v5642_v4  ;;  %3797 = vmatprep.subr.bf16.mxu0 %v5647_v11  ;;  %v5674_v4 = vld [vmem:[#allocation5 + $0xa64] ss:$16 sps:$4 sm:$0xff]   ;;  %v6679_v11 = vpack.c.bf16 %v303_v62, %v287_v60  ;;  %v5687_v60 = vld [vmem:[#allocation5 + $0x800] ss:$16 sps:$4 sm:$0xff]  }
  0xd9   : > { %3870 = vmatprep.subr.bf16.mxu1 %v5650_v14  ;;  %v6681_v14 = vpack.c.bf16 %v305_v3, %v289_v1  ;;  %v5690_v62 = vld [vmem:[#allocation5 + $0xa00] ss:$16 sps:$4 sm:$0xff]   ;;  %v5698_v1 = vld [vmem:[#allocation5 + $0xbe4] ss:$16 sps:$4 sm:$0xff]  }
  0xda   : > { %3684 = vmatmul.mubr.bf16.vlgmr.msra.gmra.mxu0 %v6639_v20  ;;  %v5693_v3 = vld [vmem:[#allocation5 + $0x9e0] ss:$16 sps:$4 sm:$0xff]  }
  0xdb   : > { %3757 = vmatmul.mubr.bf16.vlgmr.msra.gmra.mxu1 %v6641_v21  ;;  %3798 = vmatpush1.bf16.msra.mxu0 %v5645_v15  ;;  %v322_v15 = vld [vmem:[%s6533_s6 + $0x338] sm:$0xff] }
  0xdc   : > { %3871 = vmatpush1.bf16.msra.mxu1 %v5648_v16  ;;  %3799 = vmatprep.subr.bf16.mxu0 %v5653_v25  ;;  %v338_v16 = vld [vmem:[%s6533_s6 + $0x3b8] sm:$0xff]  ;;  %v6685_v25 = vpack.c.bf16 %v336_v9, %v320_v8  ;;  %v5699_v8 = vld [vmem:[#allocation5 + $0x9c0] ss:$16 sps:$4 sm:$0xff]  }
  0xdd   : > { %3872 = vmatprep.subr.bf16.mxu1 %v5656_v26  ;;  %3693 = vmatprep.mubr.bf16.mxu0 %v6645_v30  ;;  %v319_v26 = vld [vmem:[%s6533_s6 + $0x320] sm:$0xff] }
  0xde   : > { %3766 = vmatprep.mubr.bf16.mxu1 %v6649_v36  ;;  %v5702_v9 = vld [vmem:[#allocation5 + $0xbc0] ss:$16 sps:$4 sm:$0xff]  }
  0xdf   : > { %3800 = vmatpush1.bf16.msra.mxu0 %v5651_v27  ;;  %v6688_v27 = vpack.c.bf16 %v338_v16, %v322_v15  ;;  %v5707_v15 = vld [vmem:[#allocation5 + $0x9a4] ss:$16 sps:$4 sm:$0xff]  }
  0xe0   : > { %3873 = vmatpush1.bf16.msra.mxu1 %v5654_v29  ;;  %3801 = vmatprep.subr.bf16.mxu0 %v5659_v37  ;;  %v335_v29 = vld [vmem:[%s6533_s6 + $0x3a0] sm:$0xff] }
  0xe1   : > { %3874 = vmatprep.subr.bf16.mxu1 %v5662_v41  ;;  %v5683_v37 = vld [vmem:[#allocation5 + $0x824] ss:$16 sps:$4 sm:$0xff]   ;;  %v5684_v41 = vld [vmem:[#allocation5 + $0xa20] ss:$16 sps:$4 sm:$0xff]  }
  0xe2   : > { %3694 = vmatmul.mubr.bf16.gmra.mxu0 %v6659_v47  ;;  %v5710_v16 = vld [vmem:[#allocation5 + $0xba4] ss:$16 sps:$4 sm:$0xff]  }
  0xe3   : > { %3767 = vmatmul.mubr.bf16.gmra.mxu1 %v6661_v49  ;;  %3802 = vmatpush1.bf16.msra.mxu0 %v5657_v42  ;;  %v228_v42 = vld [vmem:[%s6533_s6 + $0x48] sm:$0xff] }
  0xe4   : > { %3875 = vmatpush1.bf16.msra.mxu1 %v5660_v43  ;;  %3803 = vmatprep.subr.bf16.mxu0 %v5665_v55  ;;  %v6698_v43 = vpack.c.bf16 %v335_v29, %v319_v26  ;;  %v5689_v55 = vld [vmem:[#allocation5 + $0x804] ss:$16 sps:$4 sm:$0xff]   ;;  %v5711_v26 = vld [vmem:[#allocation5 + $0x980] ss:$16 sps:$4 sm:$0xff]  }
  0xe5   : > { %3876 = vmatprep.subr.bf16.mxu1 %v5668_v56  ;;  %3703 = vmatprep.mubr.bf16.mxu0 %v6665_v59  ;;  %v5692_v56 = vld [vmem:[#allocation5 + $0xa04] ss:$16 sps:$4 sm:$0xff]   ;;  %v5714_v29 = vld [vmem:[#allocation5 + $0xb80] ss:$16 sps:$4 sm:$0xff]  }
  0xe6   : > { %3776 = vmatprep.mubr.bf16.mxu1 %v6669_v63 }
  0xe7   : > { %3804 = vmatpush1.bf16.msra.mxu0 %v5663_v57  ;;  %v6705_v57 = vpack.c.bf16 %v244_v46, %v228_v42  ;;  %v5723_v42 = vld [vmem:[#allocation5 + $0x940] ss:$16 sps:$4 sm:$0xff]  }
  0xe8   : > { %3877 = vmatpush1.bf16.msra.mxu1 %v5666_v58  ;;  %3805 = vmatprep.subr.bf16.mxu0 %v5671_v0  ;;  %v6707_v58 = vpack.c.bf16 %v246_v51, %v230_v50  ;;  %v5695_v0 = vld [vmem:[#allocation5 + $0x9e4] ss:$16 sps:$4 sm:$0xff]   ;;  %v5726_v46 = vld [vmem:[#allocation5 + $0xb40] ss:$16 sps:$4 sm:$0xff]  }
  0xe9   : > { %3878 = vmatprep.subr.bf16.mxu1 %v5674_v4  ;;  %v5696_v4 = vld [vmem:[#allocation5 + $0xbe0] ss:$16 sps:$4 sm:$0xff]   ;;  %v5731_v50 = vld [vmem:[#allocation5 + $0x924] ss:$16 sps:$4 sm:$0xff]  }
  0xea   : > { %3704 = vmatmul.mubr.bf16.gmra.mxu0 %v6679_v11  ;;  %v5734_v51 = vld [vmem:[#allocation5 + $0xb24] ss:$16 sps:$4 sm:$0xff]  }
  0xeb   : > { %3777 = vmatmul.mubr.bf16.gmra.mxu1 %v6681_v14  ;;  %3806 = vmatpush1.bf16.msra.mxu0 %v5669_v5  ;;  %v5701_v5 = vld [vmem:[#allocation5 + $0x9c4] ss:$16 sps:$4 sm:$0xff]  }
  0xec   : > { %3879 = vmatpush1.bf16.msra.mxu1 %v5672_v7  ;;  %3807 = vmatprep.subr.bf16.mxu0 %v5677_v17  ;;  %v5704_v7 = vld [vmem:[#allocation5 + $0xbc4] ss:$16 sps:$4 sm:$0xff]   ;;  %v5705_v17 = vld [vmem:[#allocation5 + $0x9a0] ss:$16 sps:$4 sm:$0xff]  }
  0xed   : > { %3880 = vmatprep.subr.bf16.mxu1 %v5680_v18  ;;  %3713 = vmatprep.mubr.bf16.mxu0 %v6685_v25  ;;  %v5708_v18 = vld [vmem:[#allocation5 + $0xba0] ss:$16 sps:$4 sm:$0xff]  }
  0xee   : > { %3786 = vmatprep.mubr.bf16.mxu1 %v6688_v27 }
  0xef   : > { %3808 = vmatpush1.bf16.msra.mxu0 %v5675_v22  ;;  %v5713_v22 = vld [vmem:[#allocation5 + $0x984] ss:$16 sps:$4 sm:$0xff]  }
  0xf0   : > { %3881 = vmatpush1.bf16.msra.mxu1 %v5678_v23  ;;  %3809 = vmatprep.subr.bf16.mxu0 %v5683_v37  ;;  %v5716_v23 = vld [vmem:[#allocation5 + $0xb84] ss:$16 sps:$4 sm:$0xff]   ;;  %v5717_v37 = vld [vmem:[#allocation5 + $0x960] ss:$16 sps:$4 sm:$0xff]  }
  0xf1   : > { %3882 = vmatprep.subr.bf16.mxu1 %v5686_v38  ;;  %v5720_v38 = vld [vmem:[#allocation5 + $0xb60] ss:$16 sps:$4 sm:$0xff]  }
  0xf2   : > { %3714 = vmatmul.mubr.bf16.gmra.mxu0 %v6698_v43 }
  0xf3   : > { %3787 = vmatmul.mubr.bf16.gmra.mxu1 %v6700_v45  ;;  %3810 = vmatpush1.bf16.msra.mxu0 %v5681_v40  ;;  %v5725_v40 = vld [vmem:[#allocation5 + $0x944] ss:$16 sps:$4 sm:$0xff]  }
  0xf4   : > { %3883 = vmatpush1.bf16.msra.mxu1 %v5684_v41  ;;  %3811 = vmatprep.subr.bf16.mxu0 %v5689_v55  ;;  %v5728_v41 = vld [vmem:[#allocation5 + $0xb44] ss:$16 sps:$4 sm:$0xff]   ;;  %v5729_v55 = vld [vmem:[#allocation5 + $0x920] ss:$16 sps:$4 sm:$0xff]  }
  0xf5   : > { %3884 = vmatprep.subr.bf16.mxu1 %v5692_v56  ;;  %3829 = vmatprep.mubr.bf16.mxu0 %v6705_v57  ;;  %v5732_v56 = vld [vmem:[#allocation5 + $0xb20] ss:$16 sps:$4 sm:$0xff]  }
  0xf6   : > { %3902 = vmatprep.mubr.bf16.mxu1 %v6707_v58 }
  0xf7   : > { %3812 = vmatpush1.bf16.msra.mxu0 %v5687_v60  ;;  %v5737_v60 = vld [vmem:[#allocation5 + $0x904] ss:$16 sps:$4 sm:$0xff]  }
  0xf8   : > { %3885 = vmatpush1.bf16.msra.mxu1 %v5690_v62  ;;  %3813 = vmatprep.subr.bf16.mxu0 %v5695_v0  ;;  %v5740_v62 = vld [vmem:[#allocation5 + $0xb04] ss:$16 sps:$4 sm:$0xff]   ;;  %v5735_v0 = vld [vmem:[#allocation5 + $0x900] ss:$16 sps:$4 sm:$0xff]  }
  0xf9   : > { %3886 = vmatprep.subr.bf16.mxu1 %v5698_v1  ;;  %v5738_v1 = vld [vmem:[#allocation5 + $0xb00] ss:$16 sps:$4 sm:$0xff]  }
  0xfb   : > { %3814 = vmatpush2.bf16.msra.mxu0 %v5693_v3  ;;  %v227_v3 = vld [vmem:[%s6533_s6 + $0x40] sm:$0xff] }
  0xfc   : > { %3887 = vmatpush2.bf16.msra.mxu1 %v5696_v4  ;;  %3815 = vmatprep.subr.bf16.mxu0 %v5701_v5  ;;  %v243_v4 = vld [vmem:[%s6533_s6 + $0xc0] sm:$0xff]  ;;  %v229_v5 = vld [vmem:[%s6533_s6 + $0x50] sm:$0xff] }
  0xfd   : > { %3888 = vmatprep.subr.bf16.mxu1 %v5704_v7  ;;  %v245_v7 = vld [vmem:[%s6533_s6 + $0xd0] sm:$0xff] }
  0xff   : > { %3816 = vmatpush2.bf16.msra.mxu0 %v5699_v8  ;;  %v5743_v8 = vld [vmem:[#allocation5 + $0xce4] ss:$16 sps:$4 sm:$0xff]  }
 0x100   : > { %3889 = vmatpush2.bf16.msra.mxu1 %v5702_v9  ;;  %3817 = vmatprep.subr.bf16.mxu0 %v5707_v15  ;;  %v5746_v9 = vld [vmem:[#allocation5 + $0xee4] ss:$16 sps:$4 sm:$0xff]   ;;  %v5741_v15 = vld [vmem:[#allocation5 + $0xce0] ss:$16 sps:$4 sm:$0xff]  }
 0x101   : > { %3890 = vmatprep.subr.bf16.mxu1 %v5710_v16  ;;  %v5744_v16 = vld [vmem:[#allocation5 + $0xee0] ss:$16 sps:$4 sm:$0xff]  }
 0x103   : > { %3818 = vmatpush2.bf16.msra.mxu0 %v5705_v17  ;;  %v260_v17 = vld [vmem:[%s6533_s6 + $0x148] sm:$0xff] }
 0x104   : > { %3891 = vmatpush2.bf16.msra.mxu1 %v5708_v18  ;;  %3819 = vmatprep.subr.bf16.mxu0 %v5713_v22  ;;  %v276_v18 = vld [vmem:[%s6533_s6 + $0x1c8] sm:$0xff]  ;;  %v6719_v22 = vpack.c.bf16 %v243_v4, %v227_v3 }
 0x105   : > { %3892 = vmatprep.subr.bf16.mxu1 %v5716_v23  ;;  %v6721_v23 = vpack.c.bf16 %v245_v7, %v229_v5  ;;  %v294_v5 = vld [vmem:[%s6533_s6 + $0x258] sm:$0xff] }
 0x106   : > { %7555 = vst [vmem:[#allocation12_spill] sm:$0xff] %v6719_v22  ;;  %v310_v7 = vld [vmem:[%s6533_s6 + $0x2d8] sm:$0xff] }
 0x107   : > { %3820 = vmatpush2.bf16.msra.mxu0 %v5711_v26  ;;  %7556 = vst [vmem:[#allocation13_spill] sm:$0xff] %v6721_v23  ;;  %v262_v26 = vld [vmem:[%s6533_s6 + $0x158] sm:$0xff] }
 0x108   : > { %3893 = vmatpush2.bf16.msra.mxu1 %v5714_v29  ;;  %3821 = vmatprep.subr.bf16.mxu0 %v5719_v33  ;;  %v278_v29 = vld [vmem:[%s6533_s6 + $0x1d8] sm:$0xff]  ;;  %v5749_v33 = vld [vmem:[#allocation5 + $0xcc4] ss:$16 sps:$4 sm:$0xff]  }
 0x109   : > { %3894 = vmatprep.subr.bf16.mxu1 %v5722_v35  ;;  %v5752_v35 = vld [vmem:[#allocation5 + $0xec4] ss:$16 sps:$4 sm:$0xff]  }
 0x10b   : > { %3822 = vmatpush2.bf16.msra.mxu0 %v5717_v37  ;;  %v5747_v37 = vld [vmem:[#allocation5 + $0xcc0] ss:$16 sps:$4 sm:$0xff]  }
 0x10c   : > { %3895 = vmatpush2.bf16.msra.mxu1 %v5720_v38  ;;  %3823 = vmatprep.subr.bf16.mxu0 %v5725_v40  ;;  %v5750_v38 = vld [vmem:[#allocation5 + $0xec0] ss:$16 sps:$4 sm:$0xff]   ;;  %v6725_v40 = vpack.c.bf16 %v276_v18, %v260_v17  ;;  %v6747_v17 = vpack.c.bf16 %v310_v7, %v294_v5 }
 0x10d   : > { %3896 = vmatprep.subr.bf16.mxu1 %v5728_v41  ;;  %v259_v41 = vld [vmem:[%s6533_s6 + $0x140] sm:$0xff] }
 0x10e   : > { %7557 = vst [vmem:[#allocation14_spill] sm:$0xff] %v6725_v40  ;;  %7562 = vst [vmem:[#allocation19_spill] sm:$0xff] %v6747_v17  ;;  %v5762_v18 = vld [vmem:[#allocation5 + $0xe80] ss:$16 sps:$4 sm:$0xff]  }
 0x10f   : > { %3824 = vmatpush2.bf16.msra.mxu0 %v5723_v42  ;;  %v275_v42 = vld [vmem:[%s6533_s6 + $0x1c0] sm:$0xff] }
 0x110   : > { %3897 = vmatpush2.bf16.msra.mxu1 %v5726_v46  ;;  %3825 = vmatprep.subr.bf16.mxu0 %v5731_v50  ;;  %v6729_v46 = vpack.c.bf16 %v278_v29, %v262_v26  ;;  %v5755_v50 = vld [vmem:[#allocation5 + $0xca4] ss:$16 sps:$4 sm:$0xff]   ;;  %v6739_v3 = vpack.c.bf16 %v275_v42, %v259_v41  ;;  %v324_v41 = vld [vmem:[%s6533_s6 + $0x348] sm:$0xff]  ;;  %v5765_v42 = vld [vmem:[#allocation5 + $0xc60] ss:$16 sps:$4 sm:$0xff]  }
 0x111   : > { %3898 = vmatprep.subr.bf16.mxu1 %v5734_v51  ;;  %v261_v51 = vld [vmem:[%s6533_s6 + $0x150] sm:$0xff]  ;;  %v291_v26 = vld [vmem:[%s6533_s6 + $0x240] sm:$0xff] }
 0x112   : > { %7558 = vst [vmem:[#allocation15_spill] sm:$0xff] %v6729_v46  ;;  %7559 = vst [vmem:[#allocation16_spill] sm:$0xff] %v6739_v3  ;;  %v307_v29 = vld [vmem:[%s6533_s6 + $0x2c0] sm:$0xff] }
 0x113   : > { %3826 = vmatpush2.bf16.msra.mxu0 %v5729_v55  ;;  %v277_v55 = vld [vmem:[%s6533_s6 + $0x1d0] sm:$0xff] }
 0x114   : > { %3899 = vmatpush2.bf16.msra.mxu1 %v5732_v56  ;;  %3827 = vmatprep.subr.bf16.mxu0 %v5737_v60  ;;  %v5758_v56 = vld [vmem:[#allocation5 + $0xea4] ss:$16 sps:$4 sm:$0xff]   ;;  %v5753_v60 = vld [vmem:[#allocation5 + $0xca0] ss:$16 sps:$4 sm:$0xff]   ;;  %v6741_v4 = vpack.c.bf16 %v277_v55, %v261_v51  ;;  %v326_v51 = vld [vmem:[%s6533_s6 + $0x358] sm:$0xff]  ;;  %v6760_v55 = vpack.c.bf16 %v307_v29, %v291_v26 }
 0x115   : > { %3900 = vmatprep.subr.bf16.mxu1 %v5740_v62  ;;  %v5756_v62 = vld [vmem:[#allocation5 + $0xea0] ss:$16 sps:$4 sm:$0xff]  }
 0x116   : > { %7560 = vst [vmem:[#allocation17_spill] sm:$0xff] %v6741_v4  ;;  %7563 = vst [vmem:[#allocation20_spill] sm:$0xff] %v6760_v55  ;;  %v5771_v5 = vld [vmem:[#allocation5 + $0xc40] ss:$16 sps:$4 sm:$0xff]  }
 0x117   : > { %3828 = vmatpush2.bf16.msra.mxu0 %v5735_v0  ;;  %v292_v0 = vld [vmem:[%s6533_s6 + $0x248] sm:$0xff]  ;;  %v5774_v7 = vld [vmem:[#allocation5 + $0xe40] ss:$16 sps:$4 sm:$0xff]  }
 0x118   : > { %3901 = vmatpush2.bf16.msra.mxu1 %v5738_v1  ;;  %3943 = vmatprep.subr.bf16.mxu0 %v5743_v8  ;;  %v308_v1 = vld [vmem:[%s6533_s6 + $0x2c8] sm:$0xff]  ;;  %v5761_v8 = vld [vmem:[#allocation5 + $0xc84] ss:$16 sps:$4 sm:$0xff]  }
 0x119   : > { %4016 = vmatprep.subr.bf16.mxu1 %v5746_v9  ;;  %v5764_v9 = vld [vmem:[#allocation5 + $0xe84] ss:$16 sps:$4 sm:$0xff]  }
 0x11a   : > { %3830 = vmatmul.mubr.bf16.vlgmr.msra.gmra.mxu0 %v6719_v22  ;;  %v323_v26 = vld [vmem:[%s6533_s6 + $0x340] sm:$0xff]  ;;  %v341_v29 = vld [vmem:[%s6533_s6 + $0x3d0] sm:$0xff] }
 0x11b   : > { %3903 = vmatmul.mubr.bf16.vlgmr.msra.gmra.mxu1 %v6721_v23  ;;  %3944 = vmatpush1.bf16.msra.mxu0 %v5741_v15  ;;  %v5759_v15 = vld [vmem:[#allocation5 + $0xc80] ss:$16 sps:$4 sm:$0xff]  }
 0x11c   : > { %4017 = vmatpush1.bf16.msra.mxu1 %v5744_v16  ;;  %3945 = vmatprep.subr.bf16.mxu0 %v5749_v33  ;;  %v6745_v16 = vpack.c.bf16 %v308_v1, %v292_v0  ;;  %v5767_v33 = vld [vmem:[#allocation5 + $0xc64] ss:$16 sps:$4 sm:$0xff]  }
 0x11d   : > { %4018 = vmatprep.subr.bf16.mxu1 %v5752_v35  ;;  %3839 = vmatprep.mubr.bf16.mxu0 %v6725_v40  ;;  %v293_v35 = vld [vmem:[%s6533_s6 + $0x250] sm:$0xff]  ;;  %v330_v40 = vld [vmem:[%s6533_s6 + $0x378] sm:$0xff] }
 0x11e   : > { %3912 = vmatprep.mubr.bf16.mxu1 %v6729_v46  ;;  %7561 = vst [vmem:[#allocation18_spill] sm:$0xff] %v6745_v16  ;;  %v5773_v0 = vld [vmem:[#allocation5 + $0xc44] ss:$16 sps:$4 sm:$0xff]  }
 0x11f   : > { %3946 = vmatpush1.bf16.msra.mxu0 %v5747_v37  ;;  %v309_v37 = vld [vmem:[%s6533_s6 + $0x2d0] sm:$0xff] }
 0x120   : > { %4019 = vmatpush1.bf16.msra.mxu1 %v5750_v38  ;;  %3947 = vmatprep.subr.bf16.mxu0 %v5755_v50  ;;  %v5770_v38 = vld [vmem:[#allocation5 + $0xe64] ss:$16 sps:$4 sm:$0xff]   ;;  %v340_v50 = vld [vmem:[%s6533_s6 + $0x3c8] sm:$0xff] }
 0x121   : > { %4020 = vmatprep.subr.bf16.mxu1 %v5758_v56  ;;  %v6762_v56 = vpack.c.bf16 %v309_v37, %v293_v35  ;;  %v5776_v1 = vld [vmem:[#allocation5 + $0xe44] ss:$16 sps:$4 sm:$0xff]   ;;  %v5777_v37 = vld [vmem:[#allocation5 + $0xc20] ss:$16 sps:$4 sm:$0xff]  }
 0x122   : > { %3840 = vmatmul.mubr.bf16.gmra.mxu0 %v6739_v3  ;;  %v5782_v35 = vld [vmem:[#allocation5 + $0xe24] ss:$16 sps:$4 sm:$0xff]  }
 0x123   : > { %3913 = vmatmul.mubr.bf16.gmra.mxu1 %v6741_v4  ;;  %3948 = vmatpush1.bf16.msra.mxu0 %v5753_v60  ;;  %7564 = vst [vmem:[#allocation21_spill] sm:$0xff] %v6762_v56  ;;  %v342_v60 = vld [vmem:[%s6533_s6 + $0x3d8] sm:$0xff] }
 0x124   : > { %4021 = vmatpush1.bf16.msra.mxu1 %v5756_v62  ;;  %3949 = vmatprep.subr.bf16.mxu0 %v5761_v8  ;;  %v5768_v62 = vld [vmem:[#allocation5 + $0xe60] ss:$16 sps:$4 sm:$0xff]   ;;  %v6765_v8 = vpack.c.bf16 %v340_v50, %v324_v41 }
 0x125   : > { %4022 = vmatprep.subr.bf16.mxu1 %v5764_v9  ;;  %3849 = vmatprep.mubr.bf16.mxu0 %v6745_v16  ;;  %v6767_v9 = vpack.c.bf16 %v342_v60, %v326_v51  ;;  %v248_v51 = vld [vmem:[%s6533_s6 + $0xe8] sm:$0xff]  ;;  %v234_v60 = vld [vmem:[%s6533_s6 + $0x78] sm:$0xff] }
 0x126   : > { %3922 = vmatprep.mubr.bf16.mxu1 %v6747_v17  ;;  %7565 = vst [vmem:[#allocation22_spill] sm:$0xff] %v6765_v8  ;;  %v5848_v17 = vld [vmem:[#allocation5 + $0x2cc] ss:$16 sps:$4 sm:$0xff]   ;;  %v5843_v16 = vld [vmem:[#allocation5 + $0xc8] ss:$16 sps:$4 sm:$0xff]  }
 0x127   : > { %3950 = vmatpush1.bf16.msra.mxu0 %v5759_v15  ;;  %7566 = vst [vmem:[#allocation23_spill] sm:$0xff] %v6767_v9  ;;  %v339_v15 = vld [vmem:[%s6533_s6 + $0x3c0] sm:$0xff] }
 0x128   : > { %4023 = vmatpush1.bf16.msra.mxu1 %v5762_v18  ;;  %3951 = vmatprep.subr.bf16.mxu0 %v5767_v33  ;;  %v325_v18 = vld [vmem:[%s6533_s6 + $0x350] sm:$0xff]  ;;  %v6778_v41 = vpack.c.bf16 %v339_v15, %v323_v26 }
 0x129   : > { %4024 = vmatprep.subr.bf16.mxu1 %v5770_v38  ;;  %v5779_v33 = vld [vmem:[#allocation5 + $0xc24] ss:$16 sps:$4 sm:$0xff]   ;;  %v232_v38 = vld [vmem:[%s6533_s6 + $0x68] sm:$0xff]  ;;  %v6780_v50 = vpack.c.bf16 %v341_v29, %v325_v18  ;;  %v5783_v26 = vld [vmem:[#allocation5 + $0xc00] ss:$16 sps:$4 sm:$0xff]  }
 0x12a   : > { %3850 = vmatmul.mubr.bf16.gmra.mxu0 %v6760_v55  ;;  %7567 = vst [vmem:[#allocation24_spill] sm:$0xff] %v6778_v41  ;;  %v5786_v15 = vld [vmem:[#allocation5 + $0xe00] ss:$16 sps:$4 sm:$0xff]   ;;  %v5797_v29 = vld [vmem:[#allocation5 + $0xdc4] ss:$16 sps:$4 sm:$0xff]  }
 0x12b   : > { %3923 = vmatmul.mubr.bf16.gmra.mxu1 %v6762_v56  ;;  %3952 = vmatpush1.bf16.msra.mxu0 %v5765_v42  ;;  %7568 = vst [vmem:[#allocation25_spill] sm:$0xff] %v6780_v50  ;;  %v250_v56 = vld [vmem:[%s6533_s6 + $0xf8] sm:$0xff]  ;;  %v5780_v42 = vld [vmem:[#allocation5 + $0xe20] ss:$16 sps:$4 sm:$0xff]  }
 0x12c   : > { %4025 = vmatpush1.bf16.msra.mxu1 %v5768_v62  ;;  %3953 = vmatprep.subr.bf16.mxu0 %v5773_v0  ;;  %v5785_v62 = vld [vmem:[#allocation5 + $0xc04] ss:$16 sps:$4 sm:$0xff]   ;;  %v5789_v18 = vld [vmem:[#allocation5 + $0xde0] ss:$16 sps:$4 sm:$0xff]  }
 0x12d   : > { %4026 = vmatprep.subr.bf16.mxu1 %v5776_v1  ;;  %3859 = vmatprep.mubr.bf16.mxu0 %v6765_v8  ;;  %v5788_v0 = vld [vmem:[#allocation5 + $0xe04] ss:$16 sps:$4 sm:$0xff]   ;;  %v6785_v1 = vpack.c.bf16 %v248_v51, %v232_v38  ;;  %v6787_v8 = vpack.c.bf16 %v250_v56, %v234_v60  ;;  %v5792_v56 = vld [vmem:[#allocation5 + $0xfe0] ss:$16 sps:$4 sm:$0xff]  }
 0x12e   : > { %3932 = vmatprep.mubr.bf16.mxu1 %v6767_v9  ;;  %v5803_v38 = vld [vmem:[#allocation5 + $0xda4] ss:$16 sps:$4 sm:$0xff]   ;;  %v5801_v60 = vld [vmem:[#allocation5 + $0xda0] ss:$16 sps:$4 sm:$0xff]  }
 0x12f   : > { %3954 = vmatpush1.bf16.msra.mxu0 %v5771_v5  ;;  %7569 = vst [vmem:[#allocation26_spill] sm:$0xff] %v6785_v1  ;;  %7570 = vst [vmem:[#allocation27_spill] sm:$0xff] %v6787_v8  ;;  %v5791_v5 = vld [vmem:[#allocation5 + $0xde4] ss:$16 sps:$4 sm:$0xff]  }
 0x130   : > { %4027 = vmatpush1.bf16.msra.mxu1 %v5774_v7  ;;  %3955 = vmatprep.subr.bf16.mxu0 %v5779_v33  ;;  %v5794_v7 = vld [vmem:[#allocation5 + $0xfe4] ss:$16 sps:$4 sm:$0xff]  }
 0x131   : > { %4028 = vmatprep.subr.bf16.mxu1 %v5782_v35  ;;  %v5800_v33 = vld [vmem:[#allocation5 + $0xfc4] ss:$16 sps:$4 sm:$0xff]   ;;  %v5795_v35 = vld [vmem:[#allocation5 + $0xdc0] ss:$16 sps:$4 sm:$0xff]  }
 0x132   : > { %3860 = vmatmul.mubr.bf16.gmra.mxu0 %v6778_v41  ;;  %v5806_v51 = vld [vmem:[#allocation5 + $0xfa4] ss:$16 sps:$4 sm:$0xff]   ;;  %v266_v41 = vld [vmem:[%s6533_s6 + $0x178] sm:$0xff] }
 0x133   : > { %3933 = vmatmul.mubr.bf16.gmra.mxu1 %v6780_v50  ;;  %3956 = vmatpush1.bf16.msra.mxu0 %v5777_v37  ;;  %v5798_v37 = vld [vmem:[#allocation5 + $0xfc0] ss:$16 sps:$4 sm:$0xff]   ;;  %v280_v50 = vld [vmem:[%s6533_s6 + $0x1e8] sm:$0xff] }
 0x134   : > { %4029 = vmatpush1.bf16.msra.mxu1 %v5780_v42  ;;  %3957 = vmatprep.subr.bf16.mxu0 %v5785_v62  ;;  %v5804_v42 = vld [vmem:[#allocation5 + $0xfa0] ss:$16 sps:$4 sm:$0xff]   ;;  %v5809_v62 = vld [vmem:[#allocation5 + $0xd84] ss:$16 sps:$4 sm:$0xff]  }
 0x135   : > { %4030 = vmatprep.subr.bf16.mxu1 %v5788_v0  ;;  %3975 = vmatprep.mubr.bf16.mxu0 %v6785_v1  ;;  %v5812_v0 = vld [vmem:[#allocation5 + $0xf84] ss:$16 sps:$4 sm:$0xff]  }
 0x136   : > { %4048 = vmatprep.mubr.bf16.mxu1 %v6787_v8  ;;  %v249_v8 = vld [vmem:[%s6533_s6 + $0xf0] sm:$0xff] }
 0x137   : > { %3958 = vmatpush1.bf16.msra.mxu0 %v5783_v26  ;;  %v5807_v26 = vld [vmem:[#allocation5 + $0xd80] ss:$16 sps:$4 sm:$0xff]  }
 0x138   : > { %4031 = vmatpush1.bf16.msra.mxu1 %v5786_v15  ;;  %3959 = vmatprep.subr.bf16.mxu0 %v5791_v5  ;;  %v5810_v15 = vld [vmem:[#allocation5 + $0xf80] ss:$16 sps:$4 sm:$0xff]   ;;  %v5815_v5 = vld [vmem:[#allocation5 + $0xd64] ss:$16 sps:$4 sm:$0xff]  }
 0x139   : > { %4032 = vmatprep.subr.bf16.mxu1 %v5794_v7  ;;  %v5818_v7 = vld [vmem:[#allocation5 + $0xf64] ss:$16 sps:$4 sm:$0xff]  }
 0x13b   : > { %3960 = vmatpush2.bf16.msra.mxu0 %v5789_v18  ;;  %v5813_v18 = vld [vmem:[#allocation5 + $0xd60] ss:$16 sps:$4 sm:$0xff]  }
 0x13c   : > { %4033 = vmatpush2.bf16.msra.mxu1 %v5792_v56  ;;  %3961 = vmatprep.subr.bf16.mxu0 %v5797_v29  ;;  %v5816_v56 = vld [vmem:[#allocation5 + $0xf60] ss:$16 sps:$4 sm:$0xff]   ;;  %v5821_v29 = vld [vmem:[#allocation5 + $0xd44] ss:$16 sps:$4 sm:$0xff]  }
 0x13d   : > { %4034 = vmatprep.subr.bf16.mxu1 %v5800_v33  ;;  %v5824_v33 = vld [vmem:[#allocation5 + $0xf44] ss:$16 sps:$4 sm:$0xff]  }
 0x13f   : > { %3962 = vmatpush2.bf16.msra.mxu0 %v5795_v35  ;;  %v5819_v35 = vld [vmem:[#allocation5 + $0xd40] ss:$16 sps:$4 sm:$0xff]  }
 0x140   : > { %4035 = vmatpush2.bf16.msra.mxu1 %v5798_v37  ;;  %3963 = vmatprep.subr.bf16.mxu0 %v5803_v38  ;;  %v5822_v37 = vld [vmem:[#allocation5 + $0xf40] ss:$16 sps:$4 sm:$0xff]   ;;  %v925_v38 = vlaneseq }
 0x141   : > { %4036 = vmatprep.subr.bf16.mxu1 %v5806_v51  ;;  %v5827_v51 = vld [vmem:[#allocation5 + $0xd24] ss:$16 sps:$4 sm:$0xff]  }
 0x143   : > { %3964 = vmatpush2.bf16.msra.mxu0 %v5801_v60  ;;  %v5830_v60 = vld [vmem:[#allocation5 + $0xf24] ss:$16 sps:$4 sm:$0xff]  }
 0x144   : > { %4037 = vmatpush2.bf16.msra.mxu1 %v5804_v42  ;;  %3965 = vmatprep.subr.bf16.mxu0 %v5809_v62  ;;  %v5825_v42 = vld [vmem:[#allocation5 + $0xd20] ss:$16 sps:$4 sm:$0xff]  }
 0x145   : > { %4038 = vmatprep.subr.bf16.mxu1 %v5812_v0  ;;  %v5828_v62 = vld [vmem:[#allocation5 + $0xf20] ss:$16 sps:$4 sm:$0xff]   ;;  %v6793_v0 = vshrl.u32 %v925_v38, 7  ;;  %v5842_v38 = vld [vmem:[#allocation5 + $0x2ec] ss:$16 sps:$4 sm:$0xff]  }
 0x147   : > { %3966 = vmatpush2.bf16.msra.mxu0 %v5807_v26  ;;  %7571 = vst [vmem:[#allocation28_spill] sm:$0xff] %v6793_v0  ;;  %v5833_v26 = vld [vmem:[#allocation5 + $0xd04] ss:$16 sps:$4 sm:$0xff]   ;;  %v931_v1 = vsub.s32 1, %v6793_v0 }
 0x148   : > { %4039 = vmatpush2.bf16.msra.mxu1 %v5810_v15  ;;  %3967 = vmatprep.subr.bf16.mxu0 %v5815_v5  ;;  %v5836_v15 = vld [vmem:[#allocation5 + $0xf04] ss:$16 sps:$4 sm:$0xff]   ;;  %v5831_v5 = vld [vmem:[#allocation5 + $0xd00] ss:$16 sps:$4 sm:$0xff]  }
 0x149   : > { %4040 = vmatprep.subr.bf16.mxu1 %v5818_v7  ;;  %v5834_v7 = vld [vmem:[#allocation5 + $0xf00] ss:$16 sps:$4 sm:$0xff]  }
 0x14b   : > { %3968 = vmatpush2.bf16.msra.mxu0 %v5813_v18  ;;  %v231_v18 = vld [vmem:[%s6533_s6 + $0x60] sm:$0xff] }
 0x14c   : > { %4041 = vmatpush2.bf16.msra.mxu1 %v5816_v56  ;;  %3969 = vmatprep.subr.bf16.mxu0 %v5821_v29  ;;  %v247_v56 = vld [vmem:[%s6533_s6 + $0xe0] sm:$0xff]  ;;  %v233_v29 = vld [vmem:[%s6533_s6 + $0x70] sm:$0xff] }
 0x14d   : > { %4042 = vmatprep.subr.bf16.mxu1 %v5824_v33  ;;  %v923_v33 = vld [vmem:[#allocation7] sm:$0xf]  ;;  %v6804_v9 = vpack.c.bf16 %v247_v56, %v231_v18  ;;  %v6806_v55 = vpack.c.bf16 %v249_v8, %v233_v29  ;;  %v5846_v18 = vld [vmem:[#allocation5 + $0x2c8] ss:$16 sps:$4 sm:$0xff]  }
 0x14e   : > { %v263_v8 = vld [vmem:[%s6533_s6 + $0x160] sm:$0xff] }
 0x14f   : > { %3970 = vmatpush2.bf16.msra.mxu0 %v5819_v35  ;;  %v927_v35 = vsub.s32 0, %v6793_v0  ;;  %7572 = vst [vmem:[#allocation29_spill] sm:$0xff] %v6804_v9  ;;  %7573 = vst [vmem:[#allocation30_spill] sm:$0xff] %v6806_v55  ;;  %v6811_v0 = vrot.slane %v923_v33, %v931_v1  ;;  %v279_v29 = vld [vmem:[%s6533_s6 + $0x1e0] sm:$0xff] }
 0x150   : > { %4043 = vmatpush2.bf16.msra.mxu1 %v5822_v37  ;;  %3971 = vmatprep.subr.bf16.mxu0 %v5827_v51  ;;  %v5839_v37 = vld [vmem:[#allocation5 + $0xec] ss:$16 sps:$4 sm:$0xff]   ;;  %v6832_v3 = vpack.c.bf16 %v279_v29, %v263_v8 }
 0x151   : > { %4044 = vmatprep.subr.bf16.mxu1 %v5830_v60  ;;  %v264_v51 = vld [vmem:[%s6533_s6 + $0x168] sm:$0xff] }
 0x152   : > { %v5837_v60 = vld [vmem:[#allocation5 + $0xe8] ss:$16 sps:$4 sm:$0xff]   ;;  %v6813_v56 = vpack.c.bf16 %v280_v50, %v264_v51  ;;  %v281_v50 = vld [vmem:[%s6533_s6 + $0x1f0] sm:$0xff]  ;;  %7576 = vst [vmem:[#allocation33_spill] sm:$0xff] %v6832_v3  ;;  %v5857_v8 = vld [vmem:[#allocation5 + $0x8c] ss:$16 sps:$4 sm:$0xff]  }
 0x153   : > { %3972 = vmatpush2.bf16.msra.mxu0 %v5825_v42  ;;  %v282_v42 = vld [vmem:[%s6533_s6 + $0x1f8] sm:$0xff]  ;;  %v296_v51 = vld [vmem:[%s6533_s6 + $0x268] sm:$0xff] }
 0x154   : > { %4045 = vmatpush2.bf16.msra.mxu1 %v5828_v62  ;;  %3973 = vmatprep.subr.bf16.mxu0 %v5833_v26  ;;  %v6809_v62 = vrot.slane %v923_v33, %v927_v35  ;;  %v5840_v26 = vld [vmem:[#allocation5 + $0x2e8] ss:$16 sps:$4 sm:$0xff]   ;;  %7574 = vst [vmem:[#allocation31_spill] sm:$0xff] %v6813_v56  ;;  %v6817_v4 = vpack.c.bf16 %v282_v42, %v266_v41  ;;  %v5851_v35 = vld [vmem:[#allocation5 + $0xac] ss:$16 sps:$4 sm:$0xff]  }
 0x155   : > { %4046 = vmatprep.subr.bf16.mxu1 %v5836_v15  ;;  %v5845_v15 = vld [vmem:[#allocation5 + $0xcc] ss:$16 sps:$4 sm:$0xff]  }
 0x156   : > { %7575 = vst [vmem:[#allocation32_spill] sm:$0xff] %v6817_v4  ;;  %v5860_v29 = vld [vmem:[#allocation5 + $0x28c] ss:$16 sps:$4 sm:$0xff]  }
 0x157   : > { %3974 = vmatpush2.bf16.msra.mxu0 %v5831_v5 }
 0x158   : > { %4047 = vmatpush2.bf16.msra.mxu1 %v5834_v7  ;;  %4089 = vmatprep.subr.bf16.mxu0 %v5839_v37  ;;  %v265_v37 = vld [vmem:[%s6533_s6 + $0x170] sm:$0xff] }
 0x159   : > { %4162 = vmatprep.subr.bf16.mxu1 %v5842_v38  ;;  %v5854_v38 = vld [vmem:[#allocation5 + $0x2ac] ss:$16 sps:$4 sm:$0xff]   ;;  %v6834_v46 = vpack.c.bf16 %v281_v50, %v265_v37  ;;  %v5855_v50 = vld [vmem:[#allocation5 + $0x88] ss:$16 sps:$4 sm:$0xff]  }
 0x15a   : > { %v3539_v5 = vpop.f32.mrf.mxu0  ;;  %3976 = vmatmul.mubr.bf16.vlgmr.msra.gmra.mxu0 %v6804_v9  ;;  %v5849_v9 = vld [vmem:[#allocation5 + $0xa8] ss:$16 sps:$4 sm:$0xff]  }
 0x15b   : > { %v3612_v7 = vpop.f32.mrf.mxu1  ;;  %4049 = vmatmul.mubr.bf16.vlgmr.msra.gmra.mxu1 %v6806_v55  ;;  %v3540_v1 = vadd.f32 %v3539_v5, %v6809_v62  ;;  %4090 = vmatpush1.bf16.msra.mxu0 %v5837_v60  ;;  %v312_v5 = vld [vmem:[%s6533_s6 + $0x2e8] sm:$0xff]  ;;  %v298_v60 = vld [vmem:[%s6533_s6 + $0x278] sm:$0xff]  ;;  %7577 = vst [vmem:[#allocation34_spill] sm:$0xff] %v6834_v46 }
 0x15c   : > { %4163 = vmatpush1.bf16.msra.mxu1 %v5840_v26  ;;  %v3541_v33 = vpop.f32.mrf.mxu0  ;;  %4091 = vmatprep.subr.bf16.mxu0 %v5845_v15  ;;  %v314_v15 = vld [vmem:[%s6533_s6 + $0x2f8] sm:$0xff] }
 0x15d   : > { %v3614_v41 = vpop.f32.mrf.mxu1  ;;  %4164 = vmatprep.subr.bf16.mxu1 %v5848_v17  ;;  %v6825_v42 = vadd.f32 %v3612_v7, %v3540_v1  ;;  %v3542_v55 = vadd.f32 %v3541_v33, %v6811_v0  ;;  %3985 = vmatprep.mubr.bf16.mxu0 %v6813_v56  ;;  %v5852_v33 = vld [vmem:[#allocation5 + $0x2a8] ss:$16 sps:$4 sm:$0xff]   ;;  %v295_v56 = vld [vmem:[%s6533_s6 + $0x260] sm:$0xff] }
 0x15e   : > { %4058 = vmatprep.mubr.bf16.mxu1 %v6817_v4  ;;  %v3543_v26 = vpop.f32.mrf.mxu0 }
 0x15f   : > { %v6837_v17 = vadd.f32 %v3614_v41, %v3542_v55  ;;  %v3544_v7 = vadd.f32 %v3543_v26, %v6809_v62  ;;  %v3616_v1 = vpop.f32.mrf.mxu1  ;;  %4092 = vmatpush1.bf16.msra.mxu0 %v5843_v16  ;;  %v5858_v55 = vld [vmem:[#allocation5 + $0x288] ss:$16 sps:$4 sm:$0xff]   ;;  %v6844_v41 = vpack.c.bf16 %v312_v5, %v296_v51  ;;  %v311_v26 = vld [vmem:[%s6533_s6 + $0x2e0] sm:$0xff]  ;;  %v6848_v16 = vpack.c.bf16 %v314_v15, %v298_v60  ;;  %v313_v51 = vld [vmem:[%s6533_s6 + $0x2f0] sm:$0xff] }
 0x160   : > { %4165 = vmatpush1.bf16.msra.mxu1 %v5846_v18  ;;  %v6840_v4 = vpop.f32.mrf.mxu0  ;;  %4093 = vmatprep.subr.bf16.mxu0 %v5851_v35  ;;  %v5863_v18 = vld [vmem:[#allocation5 + $0x6c] ss:$16 sps:$4 sm:$0xff]   ;;  %v297_v35 = vld [vmem:[%s6533_s6 + $0x270] sm:$0xff] }
 0x161   : > { %4166 = vmatprep.subr.bf16.mxu1 %v5854_v38  ;;  %v6842_v37 = vadd.f32 %v3616_v1, %v3544_v7  ;;  %7579 = vst [vmem:[#allocation36_spill] sm:$0xff] %v6844_v41  ;;  %7580 = vst [vmem:[#allocation37_spill] sm:$0xff] %v6848_v16  ;;  %v6853_v7 = vpop.f32.mrf.mxu1  ;;  %v5866_v60 = vld [vmem:[#allocation5 + $0x26c] ss:$16 sps:$4 sm:$0xff]   ;;  %v6865_v22 = vpack.c.bf16 %v313_v51, %v297_v35  ;;  %v5867_v51 = vld [vmem:[#allocation5 + $0x48] ss:$16 sps:$4 sm:$0xff]  }
 0x162   : > { %3986 = vmatmul.mubr.bf16.gmra.mxu0 %v6832_v3  ;;  %v3549_v38 = vpop.f32.mrf.mxu0  ;;  %v328_v15 = vld [vmem:[%s6533_s6 + $0x368] sm:$0xff] }
 0x163   : > { %7578 = vst [vmem:[#allocation35_spill] sm:$0xff] %v6842_v37  ;;  %4059 = vmatmul.mubr.bf16.gmra.mxu1 %v6834_v46  ;;  %4094 = vmatpush1.bf16.msra.mxu0 %v5849_v9  ;;  %v3550_v5 = vadd.f32 %v3549_v38, %v6809_v62  ;;  %v5861_v46 = vld [vmem:[#allocation5 + $0x68] ss:$16 sps:$4 sm:$0xff]   ;;  %v3622_v9 = vpop.f32.mrf.mxu1  ;;  %7582 = vst [vmem:[#allocation39_spill] sm:$0xff] %v6865_v22 }
 0x164   : > { %4167 = vmatpush1.bf16.msra.mxu1 %v5852_v33  ;;  %4095 = vmatprep.subr.bf16.mxu0 %v5857_v8  ;;  %v3551_v1 = vpop.f32.mrf.mxu0  ;;  %v344_v3 = vld [vmem:[%s6533_s6 + $0x3e8] sm:$0xff]  ;;  %v6863_v33 = vpack.c.bf16 %v311_v26, %v295_v56  ;;  %v346_v38 = vld [vmem:[%s6533_s6 + $0x3f8] sm:$0xff] }
 0x165   : > { %4168 = vmatprep.subr.bf16.mxu1 %v5860_v29  ;;  %3995 = vmatprep.mubr.bf16.mxu0 %v6844_v41  ;;  %v3552_v23 = vadd.f32 %v3551_v1, %v6811_v0  ;;  %v6868_v8 = vadd.f32 %v3622_v9, %v3550_v5  ;;  %v5864_v41 = vld [vmem:[#allocation5 + $0x268] ss:$16 sps:$4 sm:$0xff]   ;;  %v3624_v37 = vpop.f32.mrf.mxu1  ;;  %v5869_v1 = vld [vmem:[#allocation5 + $0x4c] ss:$16 sps:$4 sm:$0xff]   ;;  %v6875_v9 = vpack.c.bf16 %v344_v3, %v328_v15 }
 0x166   : > { %4068 = vmatprep.mubr.bf16.mxu1 %v6848_v16  ;;  %7581 = vst [vmem:[#allocation38_spill] sm:$0xff] %v6863_v33  ;;  %v3553_v29 = vpop.f32.mrf.mxu0  ;;  %v5872_v56 = vld [vmem:[#allocation5 + $0x24c] ss:$16 sps:$4 sm:$0xff]   ;;  %v5870_v5 = vld [vmem:[#allocation5 + $0x248] ss:$16 sps:$4 sm:$0xff]  }
 0x167   : > { %7583 = vst [vmem:[#allocation40_spill] sm:$0xff] %v6868_v8  ;;  %4096 = vmatpush1.bf16.msra.mxu0 %v5855_v50  ;;  %v3554_v16 = vadd.f32 %v3553_v29, %v6809_v62  ;;  %v6871_v26 = vadd.f32 %v3624_v37, %v3552_v23  ;;  %7585 = vst [vmem:[#allocation42_spill] sm:$0xff] %v6875_v9  ;;  %v327_v50 = vld [vmem:[%s6533_s6 + $0x360] sm:$0xff]  ;;  %v6879_v8 = vpack.c.bf16 %v346_v38, %v330_v40  ;;  %v3626_v29 = vpop.f32.mrf.mxu1  ;;  %v345_v37 = vld [vmem:[%s6533_s6 + $0x3f0] sm:$0xff] }
 0x168   : > { %4169 = vmatpush1.bf16.msra.mxu1 %v5858_v55  ;;  %4097 = vmatprep.subr.bf16.mxu0 %v5863_v18  ;;  %v6873_v35 = vpop.f32.mrf.mxu0  ;;  %v343_v55 = vld [vmem:[%s6533_s6 + $0x3e0] sm:$0xff]  ;;  %v329_v18 = vld [vmem:[%s6533_s6 + $0x370] sm:$0xff]  ;;  %v5875_v40 = vld [vmem:[#allocation5 + $0x2c] ss:$16 sps:$4 sm:$0xff]  }
 0x169   : > { %4170 = vmatprep.subr.bf16.mxu1 %v5866_v60  ;;  %7584 = vst [vmem:[#allocation41_spill] sm:$0xff] %v6871_v26  ;;  %7586 = vst [vmem:[#allocation43_spill] sm:$0xff] %v6879_v8  ;;  %v6884_v60 = vadd.f32 %v3626_v29, %v3554_v16  ;;  %v6888_v3 = vpop.f32.mrf.mxu1  ;;  %v5878_v15 = vld [vmem:[#allocation5 + $0x22c] ss:$16 sps:$4 sm:$0xff]  }
 0x16a   : > { %3996 = vmatmul.mubr.bf16.gmra.mxu0 %v6863_v33  ;;  %v3559_v23 = vpop.f32.mrf.mxu0 }
 0x16b   : > { %4069 = vmatmul.mubr.bf16.gmra.mxu1 %v6865_v22  ;;  %7587 = vst [vmem:[#allocation44_spill] sm:$0xff] %v6884_v60  ;;  %4098 = vmatpush1.bf16.msra.mxu0 %v5861_v46  ;;  %v3560_v26 = vadd.f32 %v3559_v23, %v6809_v62  ;;  %v3632_v29 = vpop.f32.mrf.mxu1  ;;  %v6893_v22 = vpack.c.bf16 %v343_v55, %v327_v50  ;;  %v5873_v46 = vld [vmem:[#allocation5 + $0x28] ss:$16 sps:$4 sm:$0xff]  }
 0x16c   : > { %4171 = vmatpush1.bf16.msra.mxu1 %v5864_v41  ;;  %4099 = vmatprep.subr.bf16.mxu0 %v5869_v1  ;;  %v3561_v38 = vpop.f32.mrf.mxu0  ;;  %v6895_v41 = vpack.c.bf16 %v345_v37, %v329_v18  ;;  %v5876_v1 = vld [vmem:[#allocation5 + $0x228] ss:$16 sps:$4 sm:$0xff]  }
 0x16d   : > { %4172 = vmatprep.subr.bf16.mxu1 %v5872_v56  ;;  %4005 = vmatprep.mubr.bf16.mxu0 %v6875_v9  ;;  %v3562_v16 = vadd.f32 %v3561_v38, %v6811_v0  ;;  %7588 = vst [vmem:[#allocation45_spill] sm:$0xff] %v6893_v22  ;;  %v6897_v23 = vadd.f32 %v3632_v29, %v3560_v26  ;;  %v3634_v60 = vpop.f32.mrf.mxu1  ;;  %v5884_v9 = vld [vmem:[#allocation5 + $0x20c] ss:$16 sps:$4 sm:$0xff]   ;;  %v5879_v26 = vld [vmem:[#allocation5 + $0x8] ss:$16 sps:$4 sm:$0xff]  }
 0x16e   : > { %4078 = vmatprep.mubr.bf16.mxu1 %v6879_v8  ;;  %7589 = vst [vmem:[#allocation46_spill] sm:$0xff] %v6895_v41  ;;  %v3563_v33 = vpop.f32.mrf.mxu0  ;;  %v5881_v8 = vld [vmem:[#allocation5 + $0xc] ss:$16 sps:$4 sm:$0xff]  }
 0x16f   : > { %4100 = vmatpush1.bf16.msra.mxu0 %v5867_v51  ;;  %v3564_v56 = vadd.f32 %v3563_v33, %v6809_v62  ;;  %v6900_v38 = vadd.f32 %v3634_v60, %v3562_v16  ;;  %v3636_v55 = vpop.f32.mrf.mxu1  ;;  %v5882_v33 = vld [vmem:[#allocation5 + $0x208] ss:$16 sps:$4 sm:$0xff]   ;;  %v5887_v60 = vld [vmem:[#allocation5 + $0x1ec] ss:$16 sps:$4 sm:$0xff]  }
 0x170   : > { %4173 = vmatpush1.bf16.msra.mxu1 %v5870_v5  ;;  %4101 = vmatprep.subr.bf16.mxu0 %v5875_v40  ;;  %v6902_v50 = vpop.f32.mrf.mxu0  ;;  %v5890_v40 = vld [vmem:[#allocation5 + $0x3ec] ss:$16 sps:$4 sm:$0xff]  }
 0x171   : > { %4174 = vmatprep.subr.bf16.mxu1 %v5878_v15  ;;  %v6906_v51 = vadd.f32 %v3636_v55, %v3564_v56  ;;  %v6909_v37 = vpop.f32.mrf.mxu1  ;;  %v5885_v56 = vld [vmem:[#allocation5 + $0x1e8] ss:$16 sps:$4 sm:$0xff]  }
 0x172   : > { %4006 = vmatmul.mubr.bf16.gmra.mxu0 %v6893_v22  ;;  %v3569_v5 = vpop.f32.mrf.mxu0  ;;  %v5888_v55 = vld [vmem:[#allocation5 + $0x3e8] ss:$16 sps:$4 sm:$0xff]  }
 0x173   : > { %4079 = vmatmul.mubr.bf16.gmra.mxu1 %v6895_v41  ;;  %7590 = vst [vmem:[#allocation47_spill] sm:$0xff] %v6906_v51  ;;  %4102 = vmatpush1.bf16.msra.mxu0 %v5873_v46  ;;  %v3570_v18 = vadd.f32 %v3569_v5, %v6809_v62  ;;  %v3642_v29 = vpop.f32.mrf.mxu1  ;;  %v5893_v5 = vld [vmem:[#allocation5 + $0x1cc] ss:$16 sps:$4 sm:$0xff]  }
 0x174   : > { %4175 = vmatpush1.bf16.msra.mxu1 %v5876_v1  ;;  %4103 = vmatprep.subr.bf16.mxu0 %v5881_v8  ;;  %v3571_v15 = vpop.f32.mrf.mxu0  ;;  %v5896_v41 = vld [vmem:[#allocation5 + $0x3cc] ss:$16 sps:$4 sm:$0xff]  }
 0x175   : > { %4176 = vmatprep.subr.bf16.mxu1 %v5884_v9  ;;  %v3572_v16 = vadd.f32 %v3571_v15, %v6811_v0  ;;  %4121 = vmatprep.mubr.bf16.mxu0 %v6547_v53  ;;  %v6914_v46 = vadd.f32 %v3642_v29, %v3570_v18  ;;  %v3644_v9 = vpop.f32.mrf.mxu1  ;;  %v5891_v53 = vld [vmem:[#allocation5 + $0x1c8] ss:$16 sps:$4 sm:$0xff]   ;;  %v5911_v29 = vld [vmem:[#allocation5 + $0x16c] ss:$16 sps:$4 sm:$0xff]  }
 0x176   : > { %4194 = vmatprep.mubr.bf16.mxu1 %v6549_v54  ;;  %v3573_v1 = vpop.f32.mrf.mxu0  ;;  %v5894_v54 = vld [vmem:[#allocation5 + $0x3c8] ss:$16 sps:$4 sm:$0xff]  }
 0x177   : > { %7591 = vst [vmem:[#allocation48_spill] sm:$0xff] %v6914_v46  ;;  %4104 = vmatpush1.bf16.msra.mxu0 %v5879_v26  ;;  %v3574_v8 = vadd.f32 %v3573_v1, %v6809_v62  ;;  %v6917_v15 = vadd.f32 %v3644_v9, %v3572_v16  ;;  %v3646_v22 = vpop.f32.mrf.mxu1  ;;  %v5899_v26 = vld [vmem:[#allocation5 + $0x1ac] ss:$16 sps:$4 sm:$0xff]   ;;  %v5897_v18 = vld [vmem:[#allocation5 + $0x1a8] ss:$16 sps:$4 sm:$0xff]  }
 0x178   : > { %4177 = vmatpush1.bf16.msra.mxu1 %v5882_v33  ;;  %4105 = vmatprep.subr.bf16.mxu0 %v5887_v60  ;;  %v5902_v33 = vld [vmem:[#allocation5 + $0x3ac] ss:$16 sps:$4 sm:$0xff]   ;;  %v5900_v62 = vld [vmem:[#allocation5 + $0x3a8] ss:$16 sps:$4 sm:$0xff]  }
 0x179   : > { %4178 = vmatprep.subr.bf16.mxu1 %v5890_v40  ;;  %7592 = vst [vmem:[#allocation49_spill] sm:$0xff] %v6917_v15  ;;  %v6919_v51 = vadd.f32 %v3646_v22, %v3574_v8  ;;  %v5905_v60 = vld [vmem:[#allocation5 + $0x18c] ss:$16 sps:$4 sm:$0xff]   ;;  %v5903_v16 = vld [vmem:[#allocation5 + $0x188] ss:$16 sps:$4 sm:$0xff]  }
 0x17a   : > { %v5908_v40 = vld [vmem:[#allocation5 + $0x38c] ss:$16 sps:$4 sm:$0xff]   ;;  %v5906_v22 = vld [vmem:[#allocation5 + $0x388] ss:$16 sps:$4 sm:$0xff]  }
 0x17b   : > { %7593 = vst [vmem:[#allocation50_spill] sm:$0xff] %v6919_v51  ;;  %4106 = vmatpush2.bf16.msra.mxu0 %v5885_v56  ;;  %v5914_v56 = vld [vmem:[#allocation5 + $0x36c] ss:$16 sps:$4 sm:$0xff]   ;;  %v5909_v1 = vld [vmem:[#allocation5 + $0x168] ss:$16 sps:$4 sm:$0xff]  }
 0x17c   : > { %4179 = vmatpush2.bf16.msra.mxu1 %v5888_v55  ;;  %4107 = vmatprep.subr.bf16.mxu0 %v5893_v5  ;;  %v5917_v55 = vld [vmem:[#allocation5 + $0x14c] ss:$16 sps:$4 sm:$0xff]   ;;  %v5915_v9 = vld [vmem:[#allocation5 + $0x148] ss:$16 sps:$4 sm:$0xff]  }
 0x17d   : > { %4180 = vmatprep.subr.bf16.mxu1 %v5896_v41  ;;  %v5912_v41 = vld [vmem:[#allocation5 + $0x368] ss:$16 sps:$4 sm:$0xff]   ;;  %v5920_v8 = vld [vmem:[#allocation5 + $0x34c] ss:$16 sps:$4 sm:$0xff]  }
 0x17e   : > { %v5918_v5 = vld [vmem:[#allocation5 + $0x348] ss:$16 sps:$4 sm:$0xff]   ;;  %v6013_v51 = vld [vmem:[#allocation5 + $0x54c] ss:$16 sps:$4 sm:$0xff]  }
 0x17f   : > { %4108 = vmatpush2.bf16.msra.mxu0 %v5891_v53  ;;  %v5923_v53 = vld [vmem:[#allocation5 + $0x12c] ss:$16 sps:$4 sm:$0xff]   ;;  %v6011_v15 = vld [vmem:[#allocation5 + $0x548] ss:$16 sps:$4 sm:$0xff]  }
 0x180   : > { %4181 = vmatpush2.bf16.msra.mxu1 %v5894_v54  ;;  %4109 = vmatprep.subr.bf16.mxu0 %v5899_v26  ;;  %v5926_v54 = vld [vmem:[#allocation5 + $0x32c] ss:$16 sps:$4 sm:$0xff]   ;;  %v5921_v26 = vld [vmem:[#allocation5 + $0x128] ss:$16 sps:$4 sm:$0xff]  }
 0x181   : > { %4182 = vmatprep.subr.bf16.mxu1 %v5902_v33  ;;  %v5924_v33 = vld [vmem:[#allocation5 + $0x328] ss:$16 sps:$4 sm:$0xff]   ;;  %v6019_v46 = vld [vmem:[#allocation5 + $0x52c] ss:$16 sps:$4 sm:$0xff]  }
 0x183   : > { %4110 = vmatpush2.bf16.msra.mxu0 %v5897_v18  ;;  %v5929_v18 = vld [vmem:[#allocation5 + $0x10c] ss:$16 sps:$4 sm:$0xff]  }
 0x184   : > { %4183 = vmatpush2.bf16.msra.mxu1 %v5900_v62  ;;  %4111 = vmatprep.subr.bf16.mxu0 %v5905_v60  ;;  %v5932_v62 = vld [vmem:[#allocation5 + $0x30c] ss:$16 sps:$4 sm:$0xff]   ;;  %v5927_v60 = vld [vmem:[#allocation5 + $0x108] ss:$16 sps:$4 sm:$0xff]  }
 0x185   : > { %4184 = vmatprep.subr.bf16.mxu1 %v5908_v40  ;;  %v5930_v40 = vld [vmem:[#allocation5 + $0x308] ss:$16 sps:$4 sm:$0xff]  }
 0x187   : > { %4112 = vmatpush2.bf16.msra.mxu0 %v5903_v16  ;;  %v5935_v16 = vld [vmem:[#allocation5 + $0x4ec] ss:$16 sps:$4 sm:$0xff]  }
 0x188   : > { %4185 = vmatpush2.bf16.msra.mxu1 %v5906_v22  ;;  %4113 = vmatprep.subr.bf16.mxu0 %v5911_v29  ;;  %v5938_v22 = vld [vmem:[#allocation5 + $0x6ec] ss:$16 sps:$4 sm:$0xff]   ;;  %v5933_v29 = vld [vmem:[#allocation5 + $0x4e8] ss:$16 sps:$4 sm:$0xff]  }
 0x189   : > { %4186 = vmatprep.subr.bf16.mxu1 %v5914_v56  ;;  %v5936_v56 = vld [vmem:[#allocation5 + $0x6e8] ss:$16 sps:$4 sm:$0xff]  }
 0x18b   : > { %4114 = vmatpush2.bf16.msra.mxu0 %v5909_v1  ;;  %v5941_v1 = vld [vmem:[#allocation5 + $0x4cc] ss:$16 sps:$4 sm:$0xff]  }
 0x18c   : > { %4187 = vmatpush2.bf16.msra.mxu1 %v5912_v41  ;;  %4115 = vmatprep.subr.bf16.mxu0 %v5917_v55  ;;  %v5944_v41 = vld [vmem:[#allocation5 + $0x6cc] ss:$16 sps:$4 sm:$0xff]   ;;  %v5939_v55 = vld [vmem:[#allocation5 + $0x4c8] ss:$16 sps:$4 sm:$0xff]  }
 0x18d   : > { %4188 = vmatprep.subr.bf16.mxu1 %v5920_v8  ;;  %v5942_v8 = vld [vmem:[#allocation5 + $0x6c8] ss:$16 sps:$4 sm:$0xff]  }
 0x18f   : > { %4116 = vmatpush2.bf16.msra.mxu0 %v5915_v9  ;;  %v6923_v9 = vpop.f32.mrf.mxu0 }
 0x190   : > { %4189 = vmatpush2.bf16.msra.mxu1 %v5918_v5  ;;  %4117 = vmatprep.subr.bf16.mxu0 %v5923_v53  ;;  %v5947_v5 = vld [vmem:[#allocation5 + $0x4ac] ss:$16 sps:$4 sm:$0xff]  }
 0x191   : > { %4190 = vmatprep.subr.bf16.mxu1 %v5926_v54  ;;  %v5950_v53 = vld [vmem:[#allocation5 + $0x6ac] ss:$16 sps:$4 sm:$0xff]  }
 0x193   : > { %4118 = vmatpush2.bf16.msra.mxu0 %v5921_v26  ;;  %v5945_v26 = vld [vmem:[#allocation5 + $0x4a8] ss:$16 sps:$4 sm:$0xff]  }
 0x194   : > { %4191 = vmatpush2.bf16.msra.mxu1 %v5924_v33  ;;  %4119 = vmatprep.subr.bf16.mxu0 %v5929_v18  ;;  %v5953_v33 = vld [vmem:[#allocation5 + $0x48c] ss:$16 sps:$4 sm:$0xff]  }
 0x195   : > { %4192 = vmatprep.subr.bf16.mxu1 %v5932_v62  ;;  %v5956_v18 = vld [vmem:[#allocation5 + $0x68c] ss:$16 sps:$4 sm:$0xff]  }
 0x197   : > { %4120 = vmatpush2.bf16.msra.mxu0 %v5927_v60 }
 0x198   : > { %4193 = vmatpush2.bf16.msra.mxu1 %v5930_v40  ;;  %4235 = vmatprep.subr.bf16.mxu0 %v5935_v16  ;;  %v5951_v40 = vld [vmem:[#allocation5 + $0x488] ss:$16 sps:$4 sm:$0xff]   ;;  %v5962_v16 = vld [vmem:[#allocation5 + $0x66c] ss:$16 sps:$4 sm:$0xff]  }
 0x199   : > { %4308 = vmatprep.subr.bf16.mxu1 %v5938_v22 }
 0x19a   : > { %4122 = vmatmul.mubr.bf16.vlgmr.msra.gmra.mxu0 %v6557_v12  ;;  %v6927_v54 = vpop.f32.mrf.mxu0  ;;  %v5948_v12 = vld [vmem:[#allocation5 + $0x6a8] ss:$16 sps:$4 sm:$0xff]  }
 0x19b   : > { %4195 = vmatmul.mubr.bf16.vlgmr.msra.gmra.mxu1 %v6559_v13  ;;  %4236 = vmatpush1.bf16.msra.mxu0 %v5933_v29  ;;  %v6929_v13 = vpop.f32.mrf.mxu1 }
 0x19c   : > { %4309 = vmatpush1.bf16.msra.mxu1 %v5936_v56  ;;  %4237 = vmatprep.subr.bf16.mxu0 %v5941_v1  ;;  %7594 = vst [vmem:[#allocation51_spill] sm:$0xff] %v6929_v13  ;;  %v6933_v60 = vpop.f32.mrf.mxu0  ;;  %v5957_v56 = vld [vmem:[#allocation5 + $0x468] ss:$16 sps:$4 sm:$0xff]   ;;  %v5968_v1 = vld [vmem:[#allocation5 + $0x64c] ss:$16 sps:$4 sm:$0xff]  }
 0x19d   : > { %4310 = vmatprep.subr.bf16.mxu1 %v5944_v41  ;;  %4131 = vmatprep.mubr.bf16.mxu0 %v6565_v24  ;;  %v6931_v62 = vpop.f32.mrf.mxu1  ;;  %v5954_v24 = vld [vmem:[#allocation5 + $0x688] ss:$16 sps:$4 sm:$0xff]  }
 0x19e   : > { %4204 = vmatprep.mubr.bf16.mxu1 %v6573_v32  ;;  %v5959_v32 = vld [vmem:[#allocation5 + $0x46c] ss:$16 sps:$4 sm:$0xff]   ;;  %v6941_v29 = vpop.f32.mrf.mxu0  ;;  %v6017_v13 = vld [vmem:[#allocation5 + $0x528] ss:$16 sps:$4 sm:$0xff]  }
 0x19f   : > { %4238 = vmatpush1.bf16.msra.mxu0 %v5939_v55  ;;  %v6939_v22 = vpop.f32.mrf.mxu1 }
 0x1a0   : > { %4311 = vmatpush1.bf16.msra.mxu1 %v5942_v8  ;;  %4239 = vmatprep.subr.bf16.mxu0 %v5947_v5  ;;  %v6945_v55 = vpop.f32.mrf.mxu0  ;;  %v5963_v8 = vld [vmem:[#allocation5 + $0x448] ss:$16 sps:$4 sm:$0xff]   ;;  %v5974_v5 = vld [vmem:[#allocation5 + $0x62c] ss:$16 sps:$4 sm:$0xff]  }
 0x1a1   : > { %4312 = vmatprep.subr.bf16.mxu1 %v5950_v53  ;;  %v6943_v41 = vpop.f32.mrf.mxu1 }
 0x1a2   : > { %4132 = vmatmul.mubr.bf16.gmra.mxu0 %v6570_v28  ;;  %v5960_v28 = vld [vmem:[#allocation5 + $0x668] ss:$16 sps:$4 sm:$0xff]  }
 0x1a3   : > { %4205 = vmatmul.mubr.bf16.gmra.mxu1 %v6580_v39  ;;  %4240 = vmatpush1.bf16.msra.mxu0 %v5945_v26  ;;  %v5965_v39 = vld [vmem:[#allocation5 + $0x44c] ss:$16 sps:$4 sm:$0xff]   ;;  %v6951_v53 = vpop.f32.mrf.mxu1  ;;  %v6953_v26 = vpop.f32.mrf.mxu0 }
 0x1a4   : > { %4313 = vmatpush1.bf16.msra.mxu1 %v5948_v12  ;;  %4241 = vmatprep.subr.bf16.mxu0 %v5953_v33  ;;  %v5969_v12 = vld [vmem:[#allocation5 + $0x428] ss:$16 sps:$4 sm:$0xff]   ;;  %v5977_v33 = vld [vmem:[#allocation5 + $0x40c] ss:$16 sps:$4 sm:$0xff]  }
 0x1a5   : > { %4314 = vmatprep.subr.bf16.mxu1 %v5956_v18  ;;  %4141 = vmatprep.mubr.bf16.mxu0 %v6585_v44  ;;  %v5966_v44 = vld [vmem:[#allocation5 + $0x648] ss:$16 sps:$4 sm:$0xff]   ;;  %v5980_v18 = vld [vmem:[#allocation5 + $0x60c] ss:$16 sps:$4 sm:$0xff]  }
 0x1a6   : > { %4214 = vmatprep.mubr.bf16.mxu1 %v6593_v52  ;;  %v5971_v52 = vld [vmem:[#allocation5 + $0x42c] ss:$16 sps:$4 sm:$0xff]  }
 0x1a7   : > { %4242 = vmatpush1.bf16.msra.mxu0 %v5951_v40  ;;  %v6957_v40 = vpop.f32.mrf.mxu0 }
 0x1a8   : > { %4315 = vmatpush1.bf16.msra.mxu1 %v5954_v24  ;;  %4243 = vmatprep.subr.bf16.mxu0 %v5959_v32  ;;  %v5975_v24 = vld [vmem:[#allocation5 + $0x408] ss:$16 sps:$4 sm:$0xff]   ;;  %v5983_v32 = vld [vmem:[#allocation5 + $0x5ec] ss:$16 sps:$4 sm:$0xff]  }
 0x1a9   : > { %4316 = vmatprep.subr.bf16.mxu1 %v5962_v16  ;;  %v5986_v16 = vld [vmem:[#allocation5 + $0x7ec] ss:$16 sps:$4 sm:$0xff]  }
 0x1aa   : > { %4142 = vmatmul.mubr.bf16.gmra.mxu0 %v6590_v48  ;;  %v5972_v48 = vld [vmem:[#allocation5 + $0x628] ss:$16 sps:$4 sm:$0xff]  }
 0x1ab   : > { %4215 = vmatmul.mubr.bf16.gmra.mxu1 %v6600_v61  ;;  %4244 = vmatpush1.bf16.msra.mxu0 %v5957_v56  ;;  %v6955_v61 = vpop.f32.mrf.mxu1  ;;  %v6965_v56 = vpop.f32.mrf.mxu0 }
 0x1ac   : > { %4317 = vmatpush1.bf16.msra.mxu1 %v5960_v28  ;;  %4245 = vmatprep.subr.bf16.mxu0 %v5965_v39  ;;  %v5981_v28 = vld [vmem:[#allocation5 + $0x5e8] ss:$16 sps:$4 sm:$0xff]   ;;  %v5989_v39 = vld [vmem:[#allocation5 + $0x5cc] ss:$16 sps:$4 sm:$0xff]  }
 0x1ad   : > { %4318 = vmatprep.subr.bf16.mxu1 %v5968_v1  ;;  %4151 = vmatprep.mubr.bf16.mxu0 %v6605_v2  ;;  %v5978_v2 = vld [vmem:[#allocation5 + $0x608] ss:$16 sps:$4 sm:$0xff]   ;;  %v5992_v1 = vld [vmem:[#allocation5 + $0x7cc] ss:$16 sps:$4 sm:$0xff]  }
 0x1ae   : > { %4224 = vmatprep.mubr.bf16.mxu1 %v6613_v10  ;;  %v6961_v10 = vpop.f32.mrf.mxu1 }
 0x1af   : > { %4246 = vmatpush1.bf16.msra.mxu0 %v5963_v8  ;;  %v6969_v8 = vpop.f32.mrf.mxu0 }
 0x1b0   : > { %4319 = vmatpush1.bf16.msra.mxu1 %v5966_v44  ;;  %4247 = vmatprep.subr.bf16.mxu0 %v5971_v52  ;;  %v5987_v44 = vld [vmem:[#allocation5 + $0x5c8] ss:$16 sps:$4 sm:$0xff]  }
 0x1b1   : > { %4320 = vmatprep.subr.bf16.mxu1 %v5974_v5  ;;  %v5998_v5 = vld [vmem:[#allocation5 + $0x7ac] ss:$16 sps:$4 sm:$0xff]  }
 0x1b2   : > { %4152 = vmatmul.mubr.bf16.gmra.mxu0 %v6610_v6  ;;  %v5984_v6 = vld [vmem:[#allocation5 + $0x7e8] ss:$16 sps:$4 sm:$0xff]  }
 0x1b3   : > { %4225 = vmatmul.mubr.bf16.gmra.mxu1 %v6620_v19  ;;  %4248 = vmatpush1.bf16.msra.mxu0 %v5969_v12  ;;  %v6967_v19 = vpop.f32.mrf.mxu1  ;;  %v6973_v12 = vpop.f32.mrf.mxu0 }
 0x1b4   : > { %4321 = vmatpush1.bf16.msra.mxu1 %v5972_v48  ;;  %4249 = vmatprep.subr.bf16.mxu0 %v5977_v33  ;;  %v5993_v48 = vld [vmem:[#allocation5 + $0x5a8] ss:$16 sps:$4 sm:$0xff]  }
 0x1b5   : > { %4322 = vmatprep.subr.bf16.mxu1 %v5980_v18  ;;  %4267 = vmatprep.mubr.bf16.mxu0 %v6626_v31  ;;  %v5990_v31 = vld [vmem:[#allocation5 + $0x7c8] ss:$16 sps:$4 sm:$0xff]   ;;  %v6971_v52 = vpop.f32.mrf.mxu1 }
 0x1b6   : > { %4340 = vmatprep.mubr.bf16.mxu1 %v6629_v34  ;;  %v5995_v34 = vld [vmem:[#allocation5 + $0x5ac] ss:$16 sps:$4 sm:$0xff]   ;;  %v5996_v33 = vld [vmem:[#allocation5 + $0x7a8] ss:$16 sps:$4 sm:$0xff]  }
 0x1b7   : > { %4250 = vmatpush1.bf16.msra.mxu0 %v5975_v24  ;;  %v6975_v18 = vpop.f32.mrf.mxu1  ;;  %v6001_v24 = vld [vmem:[#allocation5 + $0x58c] ss:$16 sps:$4 sm:$0xff]  }
 0x1b8   : > { %4323 = vmatpush1.bf16.msra.mxu1 %v5978_v2  ;;  %4251 = vmatprep.subr.bf16.mxu0 %v5983_v32  ;;  %v6004_v2 = vld [vmem:[#allocation5 + $0x78c] ss:$16 sps:$4 sm:$0xff]   ;;  %v6977_v32 = vpop.f32.mrf.mxu0 }
 0x1b9   : > { %4324 = vmatprep.subr.bf16.mxu1 %v5986_v16  ;;  %v5999_v16 = vld [vmem:[#allocation5 + $0x588] ss:$16 sps:$4 sm:$0xff]  }
 0x1bb   : > { %4252 = vmatpush2.bf16.msra.mxu0 %v5981_v28  ;;  %v6002_v28 = vld [vmem:[#allocation5 + $0x788] ss:$16 sps:$4 sm:$0xff]  }
 0x1bc   : > { %4325 = vmatpush2.bf16.msra.mxu1 %v5984_v6  ;;  %4253 = vmatprep.subr.bf16.mxu0 %v5989_v39  ;;  %v6979_v6 = vpop.f32.mrf.mxu1  ;;  %v6007_v39 = vld [vmem:[#allocation5 + $0x56c] ss:$16 sps:$4 sm:$0xff]  }
 0x1bd   : > { %4326 = vmatprep.subr.bf16.mxu1 %v5992_v1  ;;  %v6010_v1 = vld [vmem:[#allocation5 + $0x76c] ss:$16 sps:$4 sm:$0xff]  }
 0x1bf   : > { %4254 = vmatpush2.bf16.msra.mxu0 %v5987_v44  ;;  %v6981_v44 = vpop.f32.mrf.mxu0 }
 0x1c0   : > { %4327 = vmatpush2.bf16.msra.mxu1 %v5990_v31  ;;  %4255 = vmatprep.subr.bf16.mxu0 %v5995_v34  ;;  %v6005_v31 = vld [vmem:[#allocation5 + $0x568] ss:$16 sps:$4 sm:$0xff]  }
 0x1c1   : > { %4328 = vmatprep.subr.bf16.mxu1 %v5998_v5  ;;  %v6008_v34 = vld [vmem:[#allocation5 + $0x768] ss:$16 sps:$4 sm:$0xff]   ;;  %v6983_v5 = vpop.f32.mrf.mxu1 }
 0x1c2   : > { %7595 = vst [vmem:[#allocation52_spill] sm:$0xff] %v6983_v5  ;;  %v6025_v5 = vld [vmem:[#allocation5 + $0x50c] ss:$16 sps:$4 sm:$0xff]  }
 0x1c3   : > { %4256 = vmatpush2.bf16.msra.mxu0 %v5993_v48  ;;  %v6016_v48 = vld [vmem:[#allocation5 + $0x74c] ss:$16 sps:$4 sm:$0xff]  }
 0x1c4   : > { %4329 = vmatpush2.bf16.msra.mxu1 %v5996_v33  ;;  %4257 = vmatprep.subr.bf16.mxu0 %v6001_v24  ;;  %v6985_v33 = vpop.f32.mrf.mxu0  ;;  %v6014_v24 = vld [vmem:[#allocation5 + $0x748] ss:$16 sps:$4 sm:$0xff]  }
 0x1c5   : > { %4330 = vmatprep.subr.bf16.mxu1 %v6004_v2  ;;  %7596 = vst [vmem:[#allocation53_spill] sm:$0xff] %v6985_v33  ;;  %v6987_v2 = vpop.f32.mrf.mxu1  ;;  %v6023_v33 = vld [vmem:[#allocation5 + $0x508] ss:$16 sps:$4 sm:$0xff]  }
 0x1c6   : > { %7597 = vst [vmem:[#allocation54_spill] sm:$0xff] %v6987_v2  ;;  %v6031_v2 = vld [vmem:[#allocation5 + $0x8ec] ss:$16 sps:$4 sm:$0xff]  }
 0x1c7   : > { %4258 = vmatpush2.bf16.msra.mxu0 %v5999_v16  ;;  %v6022_v16 = vld [vmem:[#allocation5 + $0x72c] ss:$16 sps:$4 sm:$0xff]  }
 0x1c8   : > { %4331 = vmatpush2.bf16.msra.mxu1 %v6002_v28  ;;  %4259 = vmatprep.subr.bf16.mxu0 %v6007_v39  ;;  %v6989_v28 = vpop.f32.mrf.mxu0  ;;  %v6020_v39 = vld [vmem:[#allocation5 + $0x728] ss:$16 sps:$4 sm:$0xff]  }
 0x1c9   : > { %4332 = vmatprep.subr.bf16.mxu1 %v6010_v1  ;;  %v6991_v1 = vpop.f32.mrf.mxu1 }
 0x1ca   : > { %7598 = vst [vmem:[#allocation55_spill] sm:$0xff] %v6991_v1 }
 0x1cb   : > { %4260 = vmatpush2.bf16.msra.mxu0 %v6005_v31  ;;  %v6028_v31 = vld [vmem:[#allocation5 + $0x70c] ss:$16 sps:$4 sm:$0xff]  }
 0x1cc   : > { %4333 = vmatpush2.bf16.msra.mxu1 %v6008_v34  ;;  %4261 = vmatprep.subr.bf16.mxu0 %v6013_v51  ;;  %v6993_v34 = vpop.f32.mrf.mxu0  ;;  %v6026_v51 = vld [vmem:[#allocation5 + $0x708] ss:$16 sps:$4 sm:$0xff]  }
 0x1cd   : > { %4334 = vmatprep.subr.bf16.mxu1 %v6016_v48  ;;  %7599 = vst [vmem:[#allocation56_spill] sm:$0xff] %v6993_v34  ;;  %v6995_v48 = vpop.f32.mrf.mxu1  ;;  %v6037_v34 = vld [vmem:[#allocation5 + $0x8cc] ss:$16 sps:$4 sm:$0xff]  }
 0x1ce   : > { %7600 = vst [vmem:[#allocation57_spill] sm:$0xff] %v6995_v48 }
 0x1cf   : > { %4262 = vmatpush2.bf16.msra.mxu0 %v6011_v15  ;;  %v6034_v15 = vld [vmem:[#allocation5 + $0xaec] ss:$16 sps:$4 sm:$0xff]   ;;  %v6999_v1 = vpop.f32.mrf.mxu1 }
 0x1d0   : > { %4335 = vmatpush2.bf16.msra.mxu1 %v6014_v24  ;;  %4263 = vmatprep.subr.bf16.mxu0 %v6019_v46  ;;  %v6997_v24 = vpop.f32.mrf.mxu0  ;;  %v6029_v46 = vld [vmem:[#allocation5 + $0x8e8] ss:$16 sps:$4 sm:$0xff]   ;;  %7602 = vst [vmem:[#allocation59_spill] sm:$0xff] %v6999_v1 }
 0x1d1   : > { %4336 = vmatprep.subr.bf16.mxu1 %v6022_v16  ;;  %7601 = vst [vmem:[#allocation58_spill] sm:$0xff] %v6997_v24  ;;  %v6032_v16 = vld [vmem:[#allocation5 + $0xae8] ss:$16 sps:$4 sm:$0xff]  }
 0x1d2   : > { %v6092_v24 = vld [vmem:[#allocation5 + $0xba8] ss:$16 sps:$4 sm:$0xff]  }
 0x1d3   : > { %4264 = vmatpush2.bf16.msra.mxu0 %v6017_v13  ;;  %v6040_v13 = vld [vmem:[#allocation5 + $0xacc] ss:$16 sps:$4 sm:$0xff]  }
 0x1d4   : > { %4337 = vmatpush2.bf16.msra.mxu1 %v6020_v39  ;;  %4265 = vmatprep.subr.bf16.mxu0 %v6025_v5  ;;  %v7001_v39 = vpop.f32.mrf.mxu0  ;;  %v6035_v5 = vld [vmem:[#allocation5 + $0x8c8] ss:$16 sps:$4 sm:$0xff]  }
 0x1d5   : > { %4338 = vmatprep.subr.bf16.mxu1 %v6028_v31  ;;  %7603 = vst [vmem:[#allocation60_spill] sm:$0xff] %v7001_v39  ;;  %v6038_v31 = vld [vmem:[#allocation5 + $0xac8] ss:$16 sps:$4 sm:$0xff]   ;;  %v6076_v39 = vld [vmem:[#allocation5 + $0xa0c] ss:$16 sps:$4 sm:$0xff]  }
 0x1d7   : > { %4266 = vmatpush2.bf16.msra.mxu0 %v6023_v33  ;;  %v7005_v33 = vpop.f32.mrf.mxu1 }
 0x1d8   : > { %4339 = vmatpush2.bf16.msra.mxu1 %v6026_v51  ;;  %4381 = vmatprep.subr.bf16.mxu0 %v6031_v2  ;;  %7604 = vst [vmem:[#allocation61_spill] sm:$0xff] %v7005_v33  ;;  %v6043_v2 = vld [vmem:[#allocation5 + $0x8ac] ss:$16 sps:$4 sm:$0xff]  }
 0x1d9   : > { %4454 = vmatprep.subr.bf16.mxu1 %v6034_v15  ;;  %v6046_v15 = vld [vmem:[#allocation5 + $0xaac] ss:$16 sps:$4 sm:$0xff]  }
 0x1da   : > { %4268 = vmatmul.mubr.bf16.vlgmr.msra.gmra.mxu0 %v6639_v20  ;;  %v7007_v51 = vpop.f32.mrf.mxu0  ;;  %v6041_v20 = vld [vmem:[#allocation5 + $0x8a8] ss:$16 sps:$4 sm:$0xff]   ;;  %v6052_v33 = vld [vmem:[#allocation5 + $0xa8c] ss:$16 sps:$4 sm:$0xff]  }
 0x1db   : > { %4341 = vmatmul.mubr.bf16.vlgmr.msra.gmra.mxu1 %v6641_v21  ;;  %4382 = vmatpush1.bf16.msra.mxu0 %v6029_v46  ;;  %v7011_v1 = vpop.f32.mrf.mxu1  ;;  %v6044_v21 = vld [vmem:[#allocation5 + $0xaa8] ss:$16 sps:$4 sm:$0xff]  }
 0x1dc   : > { %4455 = vmatpush1.bf16.msra.mxu1 %v6032_v16  ;;  %4383 = vmatprep.subr.bf16.mxu0 %v6037_v34  ;;  %v7013_v46 = vpop.f32.mrf.mxu0  ;;  %v6049_v16 = vld [vmem:[#allocation5 + $0x88c] ss:$16 sps:$4 sm:$0xff]  }
 0x1dd   : > { %4456 = vmatprep.subr.bf16.mxu1 %v6040_v13  ;;  %4277 = vmatprep.mubr.bf16.mxu0 %v6645_v30  ;;  %v7015_v34 = vpop.f32.mrf.mxu1  ;;  %v6047_v30 = vld [vmem:[#allocation5 + $0x888] ss:$16 sps:$4 sm:$0xff]  }
 0x1de   : > { %4350 = vmatprep.mubr.bf16.mxu1 %v6649_v36  ;;  %v6050_v36 = vld [vmem:[#allocation5 + $0xa88] ss:$16 sps:$4 sm:$0xff]   ;;  %v7019_v13 = vpop.f32.mrf.mxu0 }
 0x1df   : > { %4384 = vmatpush1.bf16.msra.mxu0 %v6035_v5  ;;  %v6055_v5 = vld [vmem:[#allocation5 + $0x86c] ss:$16 sps:$4 sm:$0xff]  }
 0x1e0   : > { %4457 = vmatpush1.bf16.msra.mxu1 %v6038_v31  ;;  %4385 = vmatprep.subr.bf16.mxu0 %v6043_v2  ;;  %v6058_v31 = vld [vmem:[#allocation5 + $0xa6c] ss:$16 sps:$4 sm:$0xff]   ;;  %v7023_v2 = vpop.f32.mrf.mxu1 }
 0x1e1   : > { %4458 = vmatprep.subr.bf16.mxu1 %v6046_v15  ;;  %v7025_v15 = vpop.f32.mrf.mxu0 }
 0x1e2   : > { %4278 = vmatmul.mubr.bf16.gmra.mxu0 %v6659_v47  ;;  %v6053_v47 = vld [vmem:[#allocation5 + $0x868] ss:$16 sps:$4 sm:$0xff]  }
 0x1e3   : > { %4351 = vmatmul.mubr.bf16.gmra.mxu1 %v6661_v49  ;;  %4386 = vmatpush1.bf16.msra.mxu0 %v6041_v20  ;;  %v6056_v49 = vld [vmem:[#allocation5 + $0xa68] ss:$16 sps:$4 sm:$0xff]   ;;  %v6061_v20 = vld [vmem:[#allocation5 + $0x84c] ss:$16 sps:$4 sm:$0xff]  }
 0x1e4   : > { %4459 = vmatpush1.bf16.msra.mxu1 %v6044_v21  ;;  %4387 = vmatprep.subr.bf16.mxu0 %v6049_v16  ;;  %v6064_v21 = vld [vmem:[#allocation5 + $0xa4c] ss:$16 sps:$4 sm:$0xff]   ;;  %v7027_v16 = vpop.f32.mrf.mxu1 }
 0x1e5   : > { %4460 = vmatprep.subr.bf16.mxu1 %v6052_v33  ;;  %4287 = vmatprep.mubr.bf16.mxu0 %v6665_v59  ;;  %v6059_v59 = vld [vmem:[#allocation5 + $0x848] ss:$16 sps:$4 sm:$0xff]   ;;  %v7031_v33 = vpop.f32.mrf.mxu0 }
 0x1e6   : > { %4360 = vmatprep.mubr.bf16.mxu1 %v6669_v63  ;;  %v6062_v63 = vld [vmem:[#allocation5 + $0xa48] ss:$16 sps:$4 sm:$0xff]  }
 0x1e7   : > { %4388 = vmatpush1.bf16.msra.mxu0 %v6047_v30  ;;  %v7033_v30 = vpop.f32.mrf.mxu1 }
 0x1e8   : > { %4461 = vmatpush1.bf16.msra.mxu1 %v6050_v36  ;;  %4389 = vmatprep.subr.bf16.mxu0 %v6055_v5  ;;  %v6067_v36 = vld [vmem:[#allocation5 + $0x82c] ss:$16 sps:$4 sm:$0xff]  }
 0x1e9   : > { %4462 = vmatprep.subr.bf16.mxu1 %v6058_v31  ;;  %v6070_v5 = vld [vmem:[#allocation5 + $0xa2c] ss:$16 sps:$4 sm:$0xff]   ;;  %v7037_v31 = vpop.f32.mrf.mxu0 }
 0x1ea   : > { %4288 = vmatmul.mubr.bf16.gmra.mxu0 %v6679_v11  ;;  %v6065_v11 = vld [vmem:[#allocation5 + $0x828] ss:$16 sps:$4 sm:$0xff]  }
 0x1eb   : > { %4361 = vmatmul.mubr.bf16.gmra.mxu1 %v6681_v14  ;;  %4390 = vmatpush1.bf16.msra.mxu0 %v6053_v47  ;;  %v6068_v14 = vld [vmem:[#allocation5 + $0xa28] ss:$16 sps:$4 sm:$0xff]   ;;  %v7039_v47 = vpop.f32.mrf.mxu1 }
 0x1ec   : > { %4463 = vmatpush1.bf16.msra.mxu1 %v6056_v49  ;;  %4391 = vmatprep.subr.bf16.mxu0 %v6061_v20  ;;  %v6073_v49 = vld [vmem:[#allocation5 + $0x80c] ss:$16 sps:$4 sm:$0xff]   ;;  %v7043_v20 = vpop.f32.mrf.mxu0 }
 0x1ed   : > { %4464 = vmatprep.subr.bf16.mxu1 %v6064_v21  ;;  %4297 = vmatprep.mubr.bf16.mxu0 %v6685_v25  ;;  %v6071_v25 = vld [vmem:[#allocation5 + $0x808] ss:$16 sps:$4 sm:$0xff]   ;;  %v7045_v21 = vpop.f32.mrf.mxu1 }
 0x1ee   : > { %4370 = vmatprep.mubr.bf16.mxu1 %v6688_v27  ;;  %v6074_v27 = vld [vmem:[#allocation5 + $0xa08] ss:$16 sps:$4 sm:$0xff]  }
 0x1ef   : > { %4392 = vmatpush1.bf16.msra.mxu0 %v6059_v59  ;;  %v6079_v59 = vld [vmem:[#allocation5 + $0x9ec] ss:$16 sps:$4 sm:$0xff]  }
 0x1f0   : > { %4465 = vmatpush1.bf16.msra.mxu1 %v6062_v63  ;;  %4393 = vmatprep.subr.bf16.mxu0 %v6067_v36  ;;  %v6082_v63 = vld [vmem:[#allocation5 + $0xbec] ss:$16 sps:$4 sm:$0xff]   ;;  %v7049_v36 = vpop.f32.mrf.mxu0 }
 0x1f1   : > { %4466 = vmatprep.subr.bf16.mxu1 %v6070_v5  ;;  %v7051_v5 = vpop.f32.mrf.mxu1 }
 0x1f2   : > { %4298 = vmatmul.mubr.bf16.gmra.mxu0 %v6698_v43  ;;  %v6077_v43 = vld [vmem:[#allocation5 + $0x9e8] ss:$16 sps:$4 sm:$0xff]   ;;  %7605 = vst [vmem:[#allocation62_spill] sm:$0xff] %v7051_v5  ;;  %v7053_v48 = vpop.f32.mrf.mxu0 }
 0x1f3   : > { %4371 = vmatmul.mubr.bf16.gmra.mxu1 %v6700_v45  ;;  %4394 = vmatpush1.bf16.msra.mxu0 %v6065_v11  ;;  %v6080_v45 = vld [vmem:[#allocation5 + $0xbe8] ss:$16 sps:$4 sm:$0xff]   ;;  %v6085_v11 = vld [vmem:[#allocation5 + $0x9cc] ss:$16 sps:$4 sm:$0xff]  }
 0x1f4   : > { %4467 = vmatpush1.bf16.msra.mxu1 %v6068_v14  ;;  %4395 = vmatprep.subr.bf16.mxu0 %v6073_v49  ;;  %v6088_v14 = vld [vmem:[#allocation5 + $0xbcc] ss:$16 sps:$4 sm:$0xff]   ;;  %v6086_v49 = vld [vmem:[#allocation5 + $0xbc8] ss:$16 sps:$4 sm:$0xff]  }
 0x1f5   : > { %4468 = vmatprep.subr.bf16.mxu1 %v6076_v39  ;;  %4413 = vmatprep.mubr.bf16.mxu0 %v6705_v57  ;;  %v6083_v39 = vld [vmem:[#allocation5 + $0x9c8] ss:$16 sps:$4 sm:$0xff]   ;;  %v7055_v57 = vpop.f32.mrf.mxu1 }
 0x1f6   : > { %4486 = vmatprep.mubr.bf16.mxu1 %v6707_v58  ;;  %7606 = vst [vmem:[#allocation63_spill] sm:$0xff] %v7055_v57  ;;  %v6091_v58 = vld [vmem:[#allocation5 + $0x9ac] ss:$16 sps:$4 sm:$0xff]   ;;  %v6095_v5 = vld [vmem:[#allocation5 + $0x988] ss:$16 sps:$4 sm:$0xff]  }
 0x1f7   : > { %4396 = vmatpush1.bf16.msra.mxu0 %v6071_v25  ;;  %v6094_v25 = vld [vmem:[#allocation5 + $0xbac] ss:$16 sps:$4 sm:$0xff]   ;;  %v6098_v57 = vld [vmem:[#allocation5 + $0xb88] ss:$16 sps:$4 sm:$0xff]  }
 0x1f8   : > { %4469 = vmatpush1.bf16.msra.mxu1 %v6074_v27  ;;  %4397 = vmatprep.subr.bf16.mxu0 %v6079_v59  ;;  %v6089_v27 = vld [vmem:[#allocation5 + $0x9a8] ss:$16 sps:$4 sm:$0xff]   ;;  %v7057_v59 = vpop.f32.mrf.mxu0 }
 0x1f9   : > { %4470 = vmatprep.subr.bf16.mxu1 %v6082_v63  ;;  %7607 = vst [vmem:[#allocation64_spill] sm:$0xff] %v7057_v59  ;;  %v7059_v63 = vpop.f32.mrf.mxu1  ;;  %v6101_v59 = vld [vmem:[#allocation5 + $0x968] ss:$16 sps:$4 sm:$0xff]  }
 0x1fa   : > { %7608 = vst [vmem:[#allocation65_spill] sm:$0xff] %v7059_v63  ;;  %v6104_v63 = vld [vmem:[#allocation5 + $0xb68] ss:$16 sps:$4 sm:$0xff]  }
 0x1fb   : > { %4398 = vmatpush2.bf16.msra.mxu0 %v6077_v43  ;;  %v6097_v43 = vld [vmem:[#allocation5 + $0x98c] ss:$16 sps:$4 sm:$0xff]  }
 0x1fc   : > { %4471 = vmatpush2.bf16.msra.mxu1 %v6080_v45  ;;  %4399 = vmatprep.subr.bf16.mxu0 %v6085_v11  ;;  %v6100_v45 = vld [vmem:[#allocation5 + $0xb8c] ss:$16 sps:$4 sm:$0xff]   ;;  %v7061_v11 = vpop.f32.mrf.mxu0 }
 0x1fd   : > { %4472 = vmatprep.subr.bf16.mxu1 %v6088_v14  ;;  %7609 = vst [vmem:[#allocation66_spill] sm:$0xff] %v7061_v11  ;;  %v7063_v14 = vpop.f32.mrf.mxu1  ;;  %v6107_v11 = vld [vmem:[#allocation5 + $0x948] ss:$16 sps:$4 sm:$0xff]  }
 0x1fe   : > { %7610 = vst [vmem:[#allocation67_spill] sm:$0xff] %v7063_v14  ;;  %v6110_v14 = vld [vmem:[#allocation5 + $0xb48] ss:$16 sps:$4 sm:$0xff]  }
 0x1ff   : > { %4400 = vmatpush2.bf16.msra.mxu0 %v6083_v39  ;;  %v6103_v39 = vld [vmem:[#allocation5 + $0x96c] ss:$16 sps:$4 sm:$0xff]  }
 0x200   : > { %4473 = vmatpush2.bf16.msra.mxu1 %v6086_v49  ;;  %4401 = vmatprep.subr.bf16.mxu0 %v6091_v58  ;;  %v6106_v49 = vld [vmem:[#allocation5 + $0xb6c] ss:$16 sps:$4 sm:$0xff]   ;;  %v7065_v58 = vpop.f32.mrf.mxu0 }
 0x201   : > { %4474 = vmatprep.subr.bf16.mxu1 %v6094_v25  ;;  %7611 = vst [vmem:[#allocation68_spill] sm:$0xff] %v7065_v58  ;;  %v7067_v25 = vpop.f32.mrf.mxu1  ;;  %v3546_v58 = vadd.f32 %v6840_v4, %v6811_v0 }
 0x202   : > { %7612 = vst [vmem:[#allocation69_spill] sm:$0xff] %v7067_v25 }
 0x203   : > { %4402 = vmatpush2.bf16.msra.mxu0 %v6089_v27  ;;  %v6112_v27 = vld [vmem:[#allocation5 + $0xb4c] ss:$16 sps:$4 sm:$0xff]   ;;  %v3619_v4 = vadd.f32 %v6853_v7, %v3546_v58  ;;  %v7618_v58 = vld [vmem:[#allocation40_spill] sm:$0xff] }
 0x204   : > { %4475 = vmatpush2.bf16.msra.mxu1 %v6092_v24  ;;  %4403 = vmatprep.subr.bf16.mxu0 %v6097_v43  ;;  %v6109_v24 = vld [vmem:[#allocation5 + $0x94c] ss:$16 sps:$4 sm:$0xff]   ;;  %v7069_v43 = vpop.f32.mrf.mxu0 }
 0x205   : > { %4476 = vmatprep.subr.bf16.mxu1 %v6100_v45  ;;  %7613 = vst [vmem:[#allocation70_spill] sm:$0xff] %v7069_v43  ;;  %v7071_v45 = vpop.f32.mrf.mxu1 }
 0x206   : > { %7614 = vst [vmem:[#allocation71_spill] sm:$0xff] %v7071_v45  ;;  %v3688_v45 = vadd.f32 %v6933_v60, %v6837_v17  ;;  %v3556_v17 = vadd.f32 %v6873_v35, %v6811_v0  ;;  %v6128_v35 = vld [vmem:[#allocation5 + $0xee8] ss:$16 sps:$4 sm:$0xff]  }
 0x207   : > { %4404 = vmatpush2.bf16.msra.mxu0 %v6095_v5  ;;  %v6115_v5 = vld [vmem:[#allocation5 + $0x92c] ss:$16 sps:$4 sm:$0xff]   ;;  %v7079_v25 = vpop.f32.mrf.mxu1 }
 0x208   : > { %4477 = vmatpush2.bf16.msra.mxu1 %v6098_v57  ;;  %4405 = vmatprep.subr.bf16.mxu0 %v6103_v39  ;;  %v6118_v57 = vld [vmem:[#allocation5 + $0xb2c] ss:$16 sps:$4 sm:$0xff]   ;;  %v3686_v39 = vadd.f32 %v6927_v54, %v6825_v42  ;;  %7616 = vst [vmem:[#allocation73_spill] sm:$0xff] %v7079_v25  ;;  %v3761_v7 = vadd.f32 %v6939_v22, %v3688_v45 }
 0x209   : > { %4478 = vmatprep.subr.bf16.mxu1 %v6106_v49  ;;  %v7077_v49 = vpop.f32.mrf.mxu0  ;;  %v7617_v42 = vld [vmem:[#allocation35_spill] sm:$0xff] }
 0x20a   : > { %7615 = vst [vmem:[#allocation72_spill] sm:$0xff] %v7077_v49  ;;  %v3759_v43 = vadd.f32 %v6931_v62, %v3686_v39  ;;  %v3690_v54 = vadd.f32 %v6941_v29, %v7617_v42  ;;  %v6130_v25 = vld [vmem:[#allocation5 + $0xeec] ss:$16 sps:$4 sm:$0xff]   ;;  %v3692_v62 = vadd.f32 %v6945_v55, %v3619_v4  ;;  %v3566_v29 = vadd.f32 %v6902_v50, %v6811_v0  ;;  %v7620_v42 = vld [vmem:[#allocation44_spill] sm:$0xff] }
 0x20b   : > { %4406 = vmatpush2.bf16.msra.mxu0 %v6101_v59  ;;  %v6113_v59 = vld [vmem:[#allocation5 + $0x928] ss:$16 sps:$4 sm:$0xff]   ;;  %v7087_v49 = vpop.f32.mrf.mxu0  ;;  %v3696_v39 = vadd.f32 %v6953_v26, %v7618_v58  ;;  %v6133_v50 = vld [vmem:[#allocation5 + $0xccc] ss:$16 sps:$4 sm:$0xff]  }
 0x20c   : > { %4479 = vmatpush2.bf16.msra.mxu1 %v6104_v63  ;;  %4407 = vmatprep.subr.bf16.mxu0 %v6109_v24  ;;  %v6116_v63 = vld [vmem:[#allocation5 + $0xb28] ss:$16 sps:$4 sm:$0xff]   ;;  %v6121_v24 = vld [vmem:[#allocation5 + $0x90c] ss:$16 sps:$4 sm:$0xff]   ;;  %v3832_v60 = vadd.f32 %v7007_v51, %v3759_v43  ;;  %v7113_v4 = vadd.f32 %v6909_v37, %v3566_v29 }
 0x20d   : > { %4480 = vmatprep.subr.bf16.mxu1 %v6112_v27  ;;  %v6124_v27 = vld [vmem:[#allocation5 + $0xb0c] ss:$16 sps:$4 sm:$0xff]   ;;  %v7104_v55 = vpop.f32.mrf.mxu0  ;;  %v6131_v37 = vld [vmem:[#allocation5 + $0xcc8] ss:$16 sps:$4 sm:$0xff]  }
 0x20e   : > { %v6136_v26 = vld [vmem:[#allocation5 + $0xecc] ss:$16 sps:$4 sm:$0xff]   ;;  %v3905_v43 = vadd.f32 %v7011_v1, %v3832_v60 }
 0x20f   : > { %4408 = vmatpush2.bf16.msra.mxu0 %v6107_v11  ;;  %v6119_v11 = vld [vmem:[#allocation5 + $0x908] ss:$16 sps:$4 sm:$0xff]   ;;  %v6139_v60 = vld [vmem:[#allocation5 + $0xcac] ss:$16 sps:$4 sm:$0xff]  }
 0x210   : > { %4481 = vmatpush2.bf16.msra.mxu1 %v6110_v14  ;;  %4409 = vmatprep.subr.bf16.mxu0 %v6115_v5  ;;  %v6122_v14 = vld [vmem:[#allocation5 + $0xb08] ss:$16 sps:$4 sm:$0xff]   ;;  %v7089_v5 = vpop.f32.mrf.mxu1 }
 0x211   : > { %4482 = vmatprep.subr.bf16.mxu1 %v6118_v57  ;;  %v6127_v57 = vld [vmem:[#allocation5 + $0xcec] ss:$16 sps:$4 sm:$0xff]  }
 0x212   : > { %v7106_v51 = vpop.f32.mrf.mxu1 }
 0x213   : > { %4410 = vmatpush2.bf16.msra.mxu0 %v6113_v59  ;;  %v3763_v59 = vadd.f32 %v6943_v41, %v3690_v54  ;;  %v3629_v41 = vadd.f32 %v6888_v3, %v3556_v17  ;;  %v3700_v54 = vadd.f32 %v6965_v56, %v7620_v42 }
 0x214   : > { %4483 = vmatpush2.bf16.msra.mxu1 %v6116_v63  ;;  %4411 = vmatprep.subr.bf16.mxu0 %v6121_v24  ;;  %v3834_v63 = vadd.f32 %v7013_v46, %v3761_v7  ;;  %v6125_v24 = vld [vmem:[#allocation5 + $0xce8] ss:$16 sps:$4 sm:$0xff]   ;;  %v3765_v46 = vadd.f32 %v6951_v53, %v3692_v62 }
 0x215   : > { %4484 = vmatprep.subr.bf16.mxu1 %v6124_v27  ;;  %v7619_v27 = vld [vmem:[#allocation41_spill] sm:$0xff]  ;;  %v3836_v45 = vadd.f32 %v7019_v13, %v3763_v59  ;;  %v6134_v13 = vld [vmem:[#allocation5 + $0xec8] ss:$16 sps:$4 sm:$0xff]   ;;  %v3702_v56 = vadd.f32 %v6969_v8, %v3629_v41  ;;  %v7624_v59 = vld [vmem:[#allocation15_spill] sm:$0xff]  ;;  %v3773_v8 = vadd.f32 %v6967_v19, %v3700_v54 }
 0x216   : > { %v3698_v22 = vadd.f32 %v6957_v40, %v7619_v27  ;;  %v3769_v40 = vadd.f32 %v6955_v61, %v3696_v39  ;;  %v3907_v3 = vadd.f32 %v7015_v34, %v3834_v63  ;;  %v3838_v53 = vadd.f32 %v7025_v15, %v3765_v46  ;;  %v6142_v34 = vld [vmem:[#allocation5 + $0xeac] ss:$16 sps:$4 sm:$0xff]   ;;  %v7623_v39 = vld [vmem:[#allocation14_spill] sm:$0xff]  ;;  %v7626_v54 = vld [vmem:[#allocation16_spill] sm:$0xff] }
 0x217   : > { %4412 = vmatpush2.bf16.msra.mxu0 %v6119_v11  ;;  %v3909_v15 = vadd.f32 %v7023_v2, %v3836_v45  ;;  %v6140_v41 = vld [vmem:[#allocation5 + $0xea8] ss:$16 sps:$4 sm:$0xff]   ;;  %v3846_v46 = vadd.f32 %v7043_v20, %v3773_v8 }
 0x218   : > { %4485 = vmatpush2.bf16.msra.mxu1 %v6122_v14  ;;  %4527 = vmatprep.subr.bf16.mxu0 %v6127_v57  ;;  %v7621_v14 = vld [vmem:[#allocation12_spill] sm:$0xff]  ;;  %v7622_v57 = vld [vmem:[#allocation13_spill] sm:$0xff]  ;;  %v3771_v61 = vadd.f32 %v6961_v10, %v3698_v22  ;;  %v3842_v17 = vadd.f32 %v7031_v33, %v3769_v40  ;;  %v3576_v10 = vadd.f32 %v6923_v9, %v6811_v0 }
 0x219   : > { %4600 = vmatprep.subr.bf16.mxu1 %v6130_v25  ;;  %v3706_v33 = vadd.f32 %v6973_v12, %v6897_v23  ;;  %v3911_v2 = vadd.f32 %v7027_v16, %v3838_v53  ;;  %v3775_v0 = vadd.f32 %v6971_v52, %v3702_v56  ;;  %v3708_v9 = vadd.f32 %v6977_v32, %v6900_v38  ;;  %v6145_v16 = vld [vmem:[#allocation5 + $0xc8c] ss:$16 sps:$4 sm:$0xff]   ;;  %v6146_v53 = vld [vmem:[#allocation5 + $0xe88] ss:$16 sps:$4 sm:$0xff]  }
 0x21a   : > { %v3977_v25 = vpop.f32.mrf.mxu0  ;;  %4414 = vmatmul.mubr.bf16.vlgmr.msra.gmra.mxu0 %v7621_v14  ;;  %v3844_v63 = vadd.f32 %v7037_v31, %v3771_v61  ;;  %v3915_v23 = vadd.f32 %v7033_v30, %v3842_v17  ;;  %v6148_v31 = vld [vmem:[#allocation5 + $0xe8c] ss:$16 sps:$4 sm:$0xff]   ;;  %v3919_v17 = vadd.f32 %v7045_v21, %v3846_v46  ;;  %v7635_v21 = vld [vmem:[#allocation62_spill] sm:$0xff] }
 0x21b   : > { %v4050_v11 = vpop.f32.mrf.mxu1  ;;  %4487 = vmatmul.mubr.bf16.vlgmr.msra.gmra.mxu1 %v7622_v57  ;;  %v3978_v1 = vadd.f32 %v3977_v25, %v3905_v43  ;;  %4528 = vmatpush1.bf16.msra.mxu0 %v6125_v24  ;;  %v3779_v38 = vadd.f32 %v6975_v18, %v3706_v33  ;;  %v7625_v32 = vld [vmem:[#allocation47_spill] sm:$0xff]  ;;  %v7627_v25 = vld [vmem:[#allocation17_spill] sm:$0xff]  ;;  %v6143_v18 = vld [vmem:[#allocation5 + $0xc88] ss:$16 sps:$4 sm:$0xff]  }
 0x21c   : > { %4601 = vmatpush1.bf16.msra.mxu1 %v6128_v35  ;;  %v3979_v7 = vpop.f32.mrf.mxu0  ;;  %4529 = vmatprep.subr.bf16.mxu0 %v6133_v50  ;;  %v3710_v30 = vadd.f32 %v6981_v44, %v7625_v32  ;;  %v3917_v40 = vadd.f32 %v7039_v47, %v3844_v63  ;;  %v3781_v44 = vadd.f32 %v6979_v6, %v3708_v9  ;;  %v7628_v47 = vld [vmem:[#allocation53_spill] sm:$0xff]  ;;  %v7630_v6 = vld [vmem:[#allocation19_spill] sm:$0xff]  ;;  %v7640_v46 = vld [vmem:[#allocation66_spill] sm:$0xff] }
 0x21d   : > { %v4052_v62 = vpop.f32.mrf.mxu1  ;;  %4602 = vmatprep.subr.bf16.mxu1 %v6136_v26  ;;  %v4051_v29 = vadd.f32 %v4050_v11, %v3978_v1  ;;  %v3980_v58 = vadd.f32 %v3979_v7, %v3907_v3  ;;  %4423 = vmatprep.mubr.bf16.mxu0 %v7623_v39  ;;  %v6137_v26 = vld [vmem:[#allocation5 + $0xca8] ss:$16 sps:$4 sm:$0xff]   ;;  %v3848_v11 = vadd.f32 %v7049_v36, %v3775_v0  ;;  %v6151_v36 = vld [vmem:[#allocation5 + $0xc6c] ss:$16 sps:$4 sm:$0xff]  }
 0x21e   : > { %4496 = vmatprep.mubr.bf16.mxu1 %v7624_v59  ;;  %v3981_v24 = vpop.f32.mrf.mxu0  ;;  %v3712_v1 = vadd.f32 %v7628_v47, %v7113_v4  ;;  %v6154_v56 = vld [vmem:[#allocation5 + $0xe6c] ss:$16 sps:$4 sm:$0xff]   ;;  %v7634_v59 = vld [vmem:[#allocation64_spill] sm:$0xff] }
 0x21f   : > { %v4054_v35 = vpop.f32.mrf.mxu1  ;;  %v4673_v27 = vmax.f32 %v4051_v29, 0.0  ;;  %v4053_v22 = vadd.f32 %v4052_v62, %v3980_v58  ;;  %v3982_v50 = vadd.f32 %v3981_v24, %v3909_v15  ;;  %4530 = vmatpush1.bf16.msra.mxu0 %v6131_v37  ;;  %v3852_v37 = vadd.f32 %v7053_v48, %v3779_v38  ;;  %v7631_v4 = vld [vmem:[#allocation51_spill] sm:$0xff]  ;;  %v7632_v48 = vld [vmem:[#allocation52_spill] sm:$0xff] }
 0x220   : > { %4603 = vmatpush1.bf16.msra.mxu1 %v6134_v13  ;;  %v3983_v19 = vpop.f32.mrf.mxu0  ;;  %4531 = vmatprep.subr.bf16.mxu0 %v6139_v60  ;;  %v3649_v15 = vadd.f32 %v7631_v4, %v3576_v10  ;;  %v3783_v29 = vadd.f32 %v7632_v48, %v3710_v30  ;;  %v7633_v58 = vld [vmem:[#allocation48_spill] sm:$0xff]  ;;  %v3854_v8 = vadd.f32 %v7634_v59, %v3781_v44  ;;  %v7639_v9 = vld [vmem:[#allocation63_spill] sm:$0xff] }
 0x221   : > { %v4056_v12 = vpop.f32.mrf.mxu1  ;;  %4604 = vmatprep.subr.bf16.mxu1 %v6142_v34  ;;  %4705 = vst [vmem:[%s7143_s20] sm:$0xff] %v4673_v27  ;;  %v4674_v52 = vmax.f32 %v4053_v22, 0.0  ;;  %v4055_v43 = vadd.f32 %v4054_v35, %v3982_v50  ;;  %v3984_v45 = vadd.f32 %v3983_v19, %v3911_v2  ;;  %v7629_v34 = vld [vmem:[#allocation18_spill] sm:$0xff]  ;;  %v3716_v39 = vadd.f32 %v6989_v28, %v7633_v58  ;;  %v7638_v0 = vld [vmem:[#allocation56_spill] sm:$0xff]  ;;  %v7641_v32 = vld [vmem:[#allocation55_spill] sm:$0xff] }
 0x222   : > { %v3987_v42 = vpop.f32.mrf.mxu0  ;;  %4424 = vmatmul.mubr.bf16.gmra.mxu0 %v7626_v54  ;;  %v3921_v24 = vadd.f32 %v7635_v21, %v3848_v11  ;;  %v6149_v22 = vld [vmem:[#allocation5 + $0xc68] ss:$16 sps:$4 sm:$0xff]   ;;  %v6166_v4 = vld [vmem:[#allocation5 + $0xe2c] ss:$16 sps:$4 sm:$0xff]  }
 0x223   : > { %v4060_v20 = vpop.f32.mrf.mxu1  ;;  %4497 = vmatmul.mubr.bf16.gmra.mxu1 %v7627_v25  ;;  %4706 = vst [vmem:[%s7143_s20 + $0x8] sm:$0xff] %v4674_v52  ;;  %v4677_v14 = vmax.f32 %v4055_v43, 0.0  ;;  %v4057_v57 = vadd.f32 %v4056_v12, %v3984_v45  ;;  %v3988_v3 = vadd.f32 %v3987_v42, %v3915_v23  ;;  %4532 = vmatpush1.bf16.msra.mxu0 %v6137_v26  ;;  %v6152_v10 = vld [vmem:[#allocation5 + $0xe68] ss:$16 sps:$4 sm:$0xff]   ;;  %v7651_v48 = vld [vmem:[#allocation67_spill] sm:$0xff] }
 0x224   : > { %4605 = vmatpush1.bf16.msra.mxu1 %v6140_v41  ;;  %v3989_v13 = vpop.f32.mrf.mxu0  ;;  %4533 = vmatprep.subr.bf16.mxu0 %v6145_v16  ;;  %v7636_v50 = vld [vmem:[#allocation54_spill] sm:$0xff]  ;;  %v7637_v41 = vld [vmem:[#allocation49_spill] sm:$0xff]  ;;  %v3925_v23 = vadd.f32 %v7639_v9, %v3852_v37  ;;  %v3856_v52 = vadd.f32 %v7640_v46, %v3783_v29  ;;  %v3789_v30 = vadd.f32 %v7641_v32, %v3716_v39  ;;  %v7655_v21 = vld [vmem:[#allocation72_spill] sm:$0xff] }
 0x225   : > { %v4062_v61 = vpop.f32.mrf.mxu1  ;;  %4606 = vmatprep.subr.bf16.mxu1 %v6148_v31  ;;  %4709 = vst [vmem:[%s7143_s20 + $0x20] sm:$0xff] %v4677_v14  ;;  %v4678_v7 = vmax.f32 %v4057_v57, 0.0  ;;  %v3990_v62 = vadd.f32 %v3989_v13, %v3917_v40  ;;  %v4061_v60 = vadd.f32 %v4060_v20, %v3988_v3  ;;  %4433 = vmatprep.mubr.bf16.mxu0 %v7629_v34  ;;  %v6157_v16 = vld [vmem:[#allocation5 + $0xc4c] ss:$16 sps:$4 sm:$0xff]   ;;  %v7642_v40 = vld [vmem:[#allocation50_spill] sm:$0xff]  ;;  %v7645_v14 = vld [vmem:[#allocation20_spill] sm:$0xff] }
 0x226   : > { %4506 = vmatprep.mubr.bf16.mxu1 %v7630_v6  ;;  %v3991_v33 = vpop.f32.mrf.mxu0  ;;  %v3785_v26 = vadd.f32 %v7636_v50, %v3712_v1  ;;  %v3718_v28 = vadd.f32 %v7638_v0, %v7637_v41  ;;  %v6160_v31 = vld [vmem:[#allocation5 + $0xe4c] ss:$16 sps:$4 sm:$0xff]   ;;  %v7643_v42 = vld [vmem:[#allocation58_spill] sm:$0xff]  ;;  %v3929_v29 = vadd.f32 %v7651_v48, %v3856_v52 }
 0x227   : > { %v4064_v63 = vpop.f32.mrf.mxu1  ;;  %4710 = vst [vmem:[%s7143_s20 + $0x28] sm:$0xff] %v4678_v7  ;;  %v4681_v35 = vmax.f32 %v4061_v60, 0.0  ;;  %v3992_v2 = vadd.f32 %v3991_v33, %v3919_v17  ;;  %v4063_v27 = vadd.f32 %v4062_v61, %v3990_v62  ;;  %4534 = vmatpush1.bf16.msra.mxu0 %v6143_v18  ;;  %v3720_v54 = vadd.f32 %v7643_v42, %v7642_v40  ;;  %v7644_v20 = vld [vmem:[#allocation65_spill] sm:$0xff]  ;;  %v7647_v18 = vld [vmem:[#allocation68_spill] sm:$0xff]  ;;  %v7650_v7 = vld [vmem:[#allocation70_spill] sm:$0xff] }
 0x228   : > { %4607 = vmatpush1.bf16.msra.mxu1 %v6146_v53  ;;  %v3993_v19 = vpop.f32.mrf.mxu0  ;;  %4535 = vmatprep.subr.bf16.mxu0 %v6151_v36  ;;  %v3927_v25 = vadd.f32 %v7644_v20, %v3854_v8  ;;  %v7646_v3 = vld [vmem:[#allocation21_spill] sm:$0xff]  ;;  %v3858_v53 = vadd.f32 %v7647_v18, %v3785_v26  ;;  %v6155_v37 = vld [vmem:[#allocation5 + $0xc48] ss:$16 sps:$4 sm:$0xff]   ;;  %v3862_v62 = vadd.f32 %v7650_v7, %v3789_v30  ;;  %v7653_v33 = vld [vmem:[#allocation23_spill] sm:$0xff] }
 0x229   : > { %v4066_v12 = vpop.f32.mrf.mxu1  ;;  %4608 = vmatprep.subr.bf16.mxu1 %v6154_v56  ;;  %4713 = vst [vmem:[%s7143_s20 + $0x40] sm:$0xff] %v4681_v35  ;;  %v4682_v43 = vmax.f32 %v4063_v27, 0.0  ;;  %v3994_v45 = vadd.f32 %v3993_v19, %v3921_v24  ;;  %v4065_v38 = vadd.f32 %v4064_v63, %v3992_v2  ;;  %v6158_v13 = vld [vmem:[#allocation5 + $0xe48] ss:$16 sps:$4 sm:$0xff]   ;;  %v7648_v61 = vld [vmem:[#allocation57_spill] sm:$0xff] }
 0x22a   : > { %v3997_v11 = vpop.f32.mrf.mxu0  ;;  %4434 = vmatmul.mubr.bf16.gmra.mxu0 %v7645_v14  ;;  %v3791_v36 = vadd.f32 %v7648_v61, %v3718_v28  ;;  %v7649_v56 = vld [vmem:[#allocation60_spill] sm:$0xff]  ;;  %v6163_v6 = vld [vmem:[#allocation5 + $0xc2c] ss:$16 sps:$4 sm:$0xff]   ;;  %v7652_v8 = vld [vmem:[#allocation22_spill] sm:$0xff] }
 0x22b   : > { %v4070_v57 = vpop.f32.mrf.mxu1  ;;  %4507 = vmatmul.mubr.bf16.gmra.mxu1 %v7646_v3  ;;  %4714 = vst [vmem:[%s7143_s20 + $0x48] sm:$0xff] %v4682_v43  ;;  %v4685_v44 = vmax.f32 %v4065_v38, 0.0  ;;  %v3998_v47 = vadd.f32 %v3997_v11, %v3925_v23  ;;  %v4067_v1 = vadd.f32 %v4066_v12, %v3994_v45  ;;  %4536 = vmatpush1.bf16.msra.mxu0 %v6149_v22  ;;  %v7656_v27 = vld [vmem:[#allocation69_spill] sm:$0xff]  ;;  %v6161_v41 = vld [vmem:[#allocation5 + $0xc28] ss:$16 sps:$4 sm:$0xff]   ;;  %v7658_v23 = vld [vmem:[#allocation71_spill] sm:$0xff] }
 0x22c   : > { %4609 = vmatpush1.bf16.msra.mxu1 %v6152_v10  ;;  %v3722_v17 = vadd.f32 %v7649_v56, %v3649_v15  ;;  %v3999_v60 = vpop.f32.mrf.mxu0  ;;  %4537 = vmatprep.subr.bf16.mxu0 %v6157_v16  ;;  %v7654_v15 = vld [vmem:[#allocation59_spill] sm:$0xff]  ;;  %v3864_v24 = vadd.f32 %v7655_v21, %v3791_v36  ;;  %v3931_v22 = vadd.f32 %v7656_v27, %v3858_v53  ;;  %v6164_v0 = vld [vmem:[#allocation5 + $0xe28] ss:$16 sps:$4 sm:$0xff]   ;;  %v7657_v28 = vld [vmem:[#allocation61_spill] sm:$0xff] }
 0x22d   : > { %v4072_v34 = vpop.f32.mrf.mxu1  ;;  %4610 = vmatprep.subr.bf16.mxu1 %v6160_v31  ;;  %4717 = vst [vmem:[%s7143_s20 + $0x60] sm:$0xff] %v4685_v44  ;;  %v4686_v58 = vmax.f32 %v4067_v1, 0.0  ;;  %v4000_v39 = vadd.f32 %v3999_v60, %v3927_v25  ;;  %v4071_v59 = vadd.f32 %v4070_v57, %v3998_v47  ;;  %4443 = vmatprep.mubr.bf16.mxu0 %v7652_v8  ;;  %v6169_v31 = vld [vmem:[#allocation5 + $0xc0c] ss:$16 sps:$4 sm:$0xff]   ;;  %v7660_v42 = vld [vmem:[#allocation24_spill] sm:$0xff]  ;;  %v7662_v61 = vld [vmem:[#allocation26_spill] sm:$0xff] }
 0x22e   : > { %4516 = vmatprep.mubr.bf16.mxu1 %v7653_v33  ;;  %v3793_v63 = vadd.f32 %v7654_v15, %v3720_v54  ;;  %v4001_v35 = vpop.f32.mrf.mxu0  ;;  %v3795_v9 = vadd.f32 %v7657_v28, %v3722_v17  ;;  %v3935_v19 = vadd.f32 %v7658_v23, %v3862_v62  ;;  %v6172_v46 = vld [vmem:[#allocation5 + $0xe0c] ss:$16 sps:$4 sm:$0xff]   ;;  %v6170_v3 = vld [vmem:[#allocation5 + $0xe08] ss:$16 sps:$4 sm:$0xff]  }
 0x22f   : > { %v4074_v2 = vpop.f32.mrf.mxu1  ;;  %4718 = vst [vmem:[%s7143_s20 + $0x68] sm:$0xff] %v4686_v58  ;;  %v4689_v10 = vmax.f32 %v4071_v59, 0.0  ;;  %v4002_v50 = vadd.f32 %v4001_v35, %v3929_v29  ;;  %v4073_v26 = vadd.f32 %v4072_v34, %v4000_v39  ;;  %4538 = vmatpush1.bf16.msra.mxu0 %v6155_v37  ;;  %v7659_v32 = vld [vmem:[#allocation73_spill] sm:$0xff]  ;;  %v7663_v36 = vld [vmem:[#allocation27_spill] sm:$0xff]  ;;  %v6179_v15 = vld [vmem:[#allocation5 + $0xdc8] ss:$16 sps:$4 sm:$0xff]  }
 0x230   : > { %4611 = vmatpush1.bf16.msra.mxu1 %v6158_v13  ;;  %v4003_v12 = vpop.f32.mrf.mxu0  ;;  %4539 = vmatprep.subr.bf16.mxu0 %v6163_v6  ;;  %v3866_v52 = vadd.f32 %v7087_v49, %v3793_v63  ;;  %v3937_v30 = vadd.f32 %v7659_v32, %v3864_v24  ;;  %v7661_v20 = vld [vmem:[#allocation25_spill] sm:$0xff]  ;;  %v3868_v25 = vadd.f32 %v7104_v55, %v3795_v9  ;;  %v6167_v49 = vld [vmem:[#allocation5 + $0xc08] ss:$16 sps:$4 sm:$0xff]  }
 0x231   : > { %v4076_v16 = vpop.f32.mrf.mxu1  ;;  %4612 = vmatprep.subr.bf16.mxu1 %v6166_v4  ;;  %4721 = vst [vmem:[%s7143_s20 + $0x80] sm:$0xff] %v4689_v10  ;;  %v4690_v43 = vmax.f32 %v4073_v26, 0.0  ;;  %v4004_v45 = vadd.f32 %v4003_v12, %v3931_v22  ;;  %v4075_v38 = vadd.f32 %v4074_v2, %v4002_v50  ;;  %v6175_v44 = vld [vmem:[#allocation5 + $0xdec] ss:$16 sps:$4 sm:$0xff]   ;;  %v6176_v6 = vld [vmem:[#allocation5 + $0xfe8] ss:$16 sps:$4 sm:$0xff]  }
 0x232   : > { %v4007_v40 = vpop.f32.mrf.mxu0  ;;  %4444 = vmatmul.mubr.bf16.gmra.mxu0 %v7660_v42  ;;  %v6178_v47 = vld [vmem:[#allocation5 + $0xfec] ss:$16 sps:$4 sm:$0xff]   ;;  %v3939_v1 = vadd.f32 %v7089_v5, %v3866_v52  ;;  %v3941_v7 = vadd.f32 %v7106_v51, %v3868_v25  ;;  %v6173_v5 = vld [vmem:[#allocation5 + $0xde8] ss:$16 sps:$4 sm:$0xff]  }
 0x233   : > { %v4080_v54 = vpop.f32.mrf.mxu1  ;;  %4517 = vmatmul.mubr.bf16.gmra.mxu1 %v7661_v20  ;;  %4722 = vst [vmem:[%s7143_s20 + $0x88] sm:$0xff] %v4690_v43  ;;  %v4693_v11 = vmax.f32 %v4075_v38, 0.0  ;;  %v4008_v14 = vadd.f32 %v4007_v40, %v3935_v19  ;;  %v4077_v57 = vadd.f32 %v4076_v16, %v4004_v45  ;;  %4540 = vmatpush1.bf16.msra.mxu0 %v6161_v41  ;;  %v6181_v29 = vld [vmem:[#allocation5 + $0xdcc] ss:$16 sps:$4 sm:$0xff]   ;;  %v6182_v63 = vld [vmem:[#allocation5 + $0xfc8] ss:$16 sps:$4 sm:$0xff]  }
 0x234   : > { %4613 = vmatpush1.bf16.msra.mxu1 %v6164_v0  ;;  %v4009_v18 = vpop.f32.mrf.mxu0  ;;  %4541 = vmatprep.subr.bf16.mxu0 %v6169_v31  ;;  %v6184_v58 = vld [vmem:[#allocation5 + $0xfcc] ss:$16 sps:$4 sm:$0xff]   ;;  %v6185_v2 = vld [vmem:[#allocation5 + $0xda8] ss:$16 sps:$4 sm:$0xff]   ;;  %v6221_v20 = vld [vmem:[#allocation7] sm:$0xf] }
 0x235   : > { %v4082_v53 = vpop.f32.mrf.mxu1  ;;  %4614 = vmatprep.subr.bf16.mxu1 %v6172_v46  ;;  %4725 = vst [vmem:[%s7143_s20 + $0xa0] sm:$0xff] %v4693_v11  ;;  %v4694_v55 = vmax.f32 %v4077_v57, 0.0  ;;  %v4010_v37 = vadd.f32 %v4009_v18, %v3937_v30  ;;  %v4081_v13 = vadd.f32 %v4080_v54, %v4008_v14  ;;  %4559 = vmatprep.mubr.bf16.mxu0 %v7662_v61  ;;  %v6187_v21 = vld [vmem:[#allocation5 + $0xdac] ss:$16 sps:$4 sm:$0xff]   ;;  %v6188_v27 = vld [vmem:[#allocation5 + $0xfa8] ss:$16 sps:$4 sm:$0xff]  }
 0x236   : > { %4632 = vmatprep.mubr.bf16.mxu1 %v7663_v36  ;;  %v4011_v56 = vpop.f32.mrf.mxu0  ;;  %v6190_v24 = vld [vmem:[#allocation5 + $0xfac] ss:$16 sps:$4 sm:$0xff]   ;;  %v6191_v50 = vld [vmem:[#allocation5 + $0xd88] ss:$16 sps:$4 sm:$0xff]  }
 0x237   : > { %v4084_v17 = vpop.f32.mrf.mxu1  ;;  %4726 = vst [vmem:[%s7143_s20 + $0xa8] sm:$0xff] %v4694_v55  ;;  %v4697_v62 = vmax.f32 %v4081_v13, 0.0  ;;  %v4012_v60 = vadd.f32 %v4011_v56, %v3939_v1  ;;  %v4083_v34 = vadd.f32 %v4082_v53, %v4010_v37  ;;  %4542 = vmatpush1.bf16.msra.mxu0 %v6167_v49  ;;  %v6193_v22 = vld [vmem:[#allocation5 + $0xd8c] ss:$16 sps:$4 sm:$0xff]   ;;  %v6194_v26 = vld [vmem:[#allocation5 + $0xf88] ss:$16 sps:$4 sm:$0xff]  }
 0x238   : > { %4615 = vmatpush1.bf16.msra.mxu1 %v6170_v3  ;;  %v4013_v4 = vpop.f32.mrf.mxu0  ;;  %4543 = vmatprep.subr.bf16.mxu0 %v6175_v44  ;;  %v6196_v10 = vld [vmem:[#allocation5 + $0xf8c] ss:$16 sps:$4 sm:$0xff]   ;;  %v6197_v28 = vld [vmem:[#allocation5 + $0xd68] ss:$16 sps:$4 sm:$0xff]  }
 0x239   : > { %v4086_v48 = vpop.f32.mrf.mxu1  ;;  %4616 = vmatprep.subr.bf16.mxu1 %v6178_v47  ;;  %4729 = vst [vmem:[%s7143_s20 + $0xc0] sm:$0xff] %v4697_v62  ;;  %v4698_v39 = vmax.f32 %v4083_v34, 0.0  ;;  %v4014_v51 = vadd.f32 %v4013_v4, %v3941_v7  ;;  %v4085_v59 = vadd.f32 %v4084_v17, %v4012_v60  ;;  %v6199_v41 = vld [vmem:[#allocation5 + $0xd6c] ss:$16 sps:$4 sm:$0xff]   ;;  %v6200_v9 = vld [vmem:[#allocation5 + $0xf68] ss:$16 sps:$4 sm:$0xff]  }
 0x23a   : > { %v6202_v0 = vld [vmem:[#allocation5 + $0xf6c] ss:$16 sps:$4 sm:$0xff]   ;;  %v6203_v12 = vld [vmem:[#allocation5 + $0xd48] ss:$16 sps:$4 sm:$0xff]  }
 0x23b   : > { %4730 = vst [vmem:[%s7143_s20 + $0xc8] sm:$0xff] %v4698_v39  ;;  %v4701_v8 = vmax.f32 %v4085_v59, 0.0  ;;  %v4087_v33 = vadd.f32 %v4086_v48, %v4014_v51  ;;  %4544 = vmatpush2.bf16.msra.mxu0 %v6173_v5  ;;  %v6205_v23 = vld [vmem:[#allocation5 + $0xd4c] ss:$16 sps:$4 sm:$0xff]   ;;  %v6206_v16 = vld [vmem:[#allocation5 + $0xf48] ss:$16 sps:$4 sm:$0xff]  }
 0x23c   : > { %4617 = vmatpush2.bf16.msra.mxu1 %v6176_v6  ;;  %4545 = vmatprep.subr.bf16.mxu0 %v6181_v29  ;;  %v6208_v19 = vld [vmem:[#allocation5 + $0xf4c] ss:$16 sps:$4 sm:$0xff]   ;;  %v6209_v52 = vld [vmem:[#allocation5 + $0xd28] ss:$16 sps:$4 sm:$0xff]  }
 0x23d   : > { %4618 = vmatprep.subr.bf16.mxu1 %v6184_v58  ;;  %4733 = vst [vmem:[%s7143_s20 + $0xe0] sm:$0xff] %v4701_v8  ;;  %v4702_v35 = vmax.f32 %v4087_v33, 0.0  ;;  %v6211_v31 = vld [vmem:[#allocation5 + $0xd2c] ss:$16 sps:$4 sm:$0xff]   ;;  %v6212_v43 = vld [vmem:[#allocation5 + $0xf28] ss:$16 sps:$4 sm:$0xff]  }
 0x23e   : > { %v6214_v46 = vld [vmem:[#allocation5 + $0xf2c] ss:$16 sps:$4 sm:$0xff]   ;;  %v6215_v32 = vld [vmem:[#allocation5 + $0xd08] ss:$16 sps:$4 sm:$0xff]  }
 0x23f   : > { %4734 = vst [vmem:[%s7143_s20 + $0xe8] sm:$0xff] %v4702_v35  ;;  %4546 = vmatpush2.bf16.msra.mxu0 %v6179_v15  ;;  %v6217_v45 = vld [vmem:[#allocation5 + $0xd0c] ss:$16 sps:$4 sm:$0xff]   ;;  %v6218_v30 = vld [vmem:[#allocation5 + $0xf08] ss:$16 sps:$4 sm:$0xff]  }
 0x240   : > { %4619 = vmatpush2.bf16.msra.mxu1 %v6182_v63  ;;  %4547 = vmatprep.subr.bf16.mxu0 %v6187_v21  ;;  %v6220_v38 = vld [vmem:[#allocation5 + $0xf0c] ss:$16 sps:$4 sm:$0xff]   ;;  %v7664_v40 = vld [vmem:[#allocation28_spill] sm:$0xff]  ;;  %v7666_v3 = vld [vmem:[#allocation30_spill] sm:$0xff] }
 0x241   : > { %4620 = vmatprep.subr.bf16.mxu1 %v6190_v24  ;;  %v935_v42 = vsub.s32 2, %v7664_v40  ;;  %v939_v54 = vsub.s32 3, %v7664_v40  ;;  %v7665_v49 = vld [vmem:[#allocation29_spill] sm:$0xff]  ;;  %v7667_v53 = vld [vmem:[#allocation31_spill] sm:$0xff]  ;;  %v7668_v44 = vld [vmem:[#allocation32_spill] sm:$0xff] }
 0x242   : > { %v7669_v34 = vld [vmem:[#allocation33_spill] sm:$0xff]  ;;  %v7670_v5 = vld [vmem:[#allocation34_spill] sm:$0xff]  ;;  %v7671_v29 = vld [vmem:[#allocation36_spill] sm:$0xff] }
 0x243   : > { %4548 = vmatpush2.bf16.msra.mxu0 %v6185_v2  ;;  %v7215_v25 = vrot.slane %v6221_v20, %v935_v42  ;;  %v7217_v11 = vrot.slane %v6221_v20, %v939_v54  ;;  %v7672_v58 = vld [vmem:[#allocation37_spill] sm:$0xff]  ;;  %v7678_v54 = vld [vmem:[#allocation46_spill] sm:$0xff] }
 0x244   : > { %4621 = vmatpush2.bf16.msra.mxu1 %v6188_v27  ;;  %4549 = vmatprep.subr.bf16.mxu0 %v6193_v22  ;;  %v7677_v42 = vld [vmem:[#allocation45_spill] sm:$0xff] }
 0x245   : > { %4622 = vmatprep.subr.bf16.mxu1 %v6196_v10  ;;  %v7673_v10 = vld [vmem:[#allocation38_spill] sm:$0xff] }
 0x247   : > { %4550 = vmatpush2.bf16.msra.mxu0 %v6191_v50  ;;  %v7674_v50 = vld [vmem:[#allocation39_spill] sm:$0xff] }
 0x248   : > { %4623 = vmatpush2.bf16.msra.mxu1 %v6194_v26  ;;  %4551 = vmatprep.subr.bf16.mxu0 %v6199_v41 }
 0x249   : > { %4624 = vmatprep.subr.bf16.mxu1 %v6202_v0  ;;  %v7675_v0 = vld [vmem:[#allocation42_spill] sm:$0xff] }
 0x24b   : > { %4552 = vmatpush2.bf16.msra.mxu0 %v6197_v28  ;;  %v7676_v28 = vld [vmem:[#allocation43_spill] sm:$0xff] }
 0x24c   : > { %4625 = vmatpush2.bf16.msra.mxu1 %v6200_v9  ;;  %4553 = vmatprep.subr.bf16.mxu0 %v6205_v23 }
 0x24d   : > { %4626 = vmatprep.subr.bf16.mxu1 %v6208_v19 }
 0x24f   : > { %4554 = vmatpush2.bf16.msra.mxu0 %v6203_v12 }
 0x250   : > { %4627 = vmatpush2.bf16.msra.mxu1 %v6206_v16  ;;  %4555 = vmatprep.subr.bf16.mxu0 %v6211_v31 }
 0x251   : > { %4628 = vmatprep.subr.bf16.mxu1 %v6214_v46 }
 0x253   : > { %4556 = vmatpush2.bf16.msra.mxu0 %v6209_v52 }
 0x254   : > { %4629 = vmatpush2.bf16.msra.mxu1 %v6212_v43  ;;  %4557 = vmatprep.subr.bf16.mxu0 %v6217_v45 }
 0x255   : > { %4630 = vmatprep.subr.bf16.mxu1 %v6220_v38 }
 0x257   : > { %4558 = vmatpush2.bf16.msra.mxu0 %v6215_v32 }
 0x258   : > { %4631 = vmatpush2.bf16.msra.mxu1 %v6218_v30 }
 0x25a   : > { %v4123_v14 = vpop.f32.mrf.mxu0  ;;  %4560 = vmatmul.mubr.bf16.vlgmr.msra.gmra.mxu0 %v7665_v49 }
 0x25b   : > { %v4196_v57 = vpop.f32.mrf.mxu1  ;;  %4633 = vmatmul.mubr.bf16.vlgmr.msra.gmra.mxu1 %v7666_v3  ;;  %v4124_v18 = vadd.f32 %v4123_v14, %v7215_v25  ;;  %4569 = vmatprep.mubr.bf16.mxu0 %v7667_v53 }
 0x25c   : > { %4642 = vmatprep.mubr.bf16.mxu1 %v7668_v44  ;;  %v4125_v47 = vpop.f32.mrf.mxu0 }
 0x25d   : > { %v4198_v1 = vpop.f32.mrf.mxu1  ;;  %v7224_v55 = vadd.f32 %v4196_v57, %v4124_v18  ;;  %v4126_v37 = vadd.f32 %v4125_v47, %v7217_v11 }
 0x25e   : > { %v4127_v13 = vpop.f32.mrf.mxu0 }
 0x25f   : > { %v4200_v61 = vpop.f32.mrf.mxu1  ;;  %v7227_v36 = vadd.f32 %v4198_v1, %v4126_v37  ;;  %v4128_v56 = vadd.f32 %v4127_v13, %v7215_v25 }
 0x260   : > { %v4129_v17 = vpop.f32.mrf.mxu0 }
 0x261   : > { %v4202_v7 = vpop.f32.mrf.mxu1  ;;  %v7230_v62 = vadd.f32 %v4200_v61, %v4128_v56  ;;  %v4130_v60 = vadd.f32 %v4129_v17, %v7217_v11 }
 0x262   : > { %4570 = vmatmul.mubr.bf16.gmra.mxu0 %v7669_v34  ;;  %v4133_v6 = vpop.f32.mrf.mxu0 }
 0x263   : > { %4643 = vmatmul.mubr.bf16.gmra.mxu1 %v7670_v5  ;;  %v4206_v4 = vpop.f32.mrf.mxu1  ;;  %v7235_v48 = vadd.f32 %v4202_v7, %v4130_v60  ;;  %4579 = vmatprep.mubr.bf16.mxu0 %v7671_v29  ;;  %v4134_v39 = vadd.f32 %v4133_v6, %v7215_v25 }
 0x264   : > { %4652 = vmatprep.mubr.bf16.mxu1 %v7672_v58  ;;  %v4135_v51 = vpop.f32.mrf.mxu0 }
 0x265   : > { %v4208_v59 = vpop.f32.mrf.mxu1  ;;  %v4136_v8 = vadd.f32 %v4135_v51, %v7217_v11  ;;  %v7241_v33 = vadd.f32 %v4206_v4, %v4134_v39 }
 0x266   : > { %v4137_v15 = vpop.f32.mrf.mxu0 }
 0x267   : > { %v4210_v63 = vpop.f32.mrf.mxu1  ;;  %v4138_v21 = vadd.f32 %v4137_v15, %v7215_v25  ;;  %v7244_v24 = vadd.f32 %v4208_v59, %v4136_v8 }
 0x268   : > { %v4139_v35 = vpop.f32.mrf.mxu0 }
 0x269   : > { %v4212_v2 = vpop.f32.mrf.mxu1  ;;  %v4140_v27 = vadd.f32 %v4139_v35, %v7217_v11  ;;  %v7247_v22 = vadd.f32 %v4210_v63, %v4138_v21 }
 0x26a   : > { %4580 = vmatmul.mubr.bf16.gmra.mxu0 %v7673_v10  ;;  %v4143_v26 = vpop.f32.mrf.mxu0 }
 0x26b   : > { %4653 = vmatmul.mubr.bf16.gmra.mxu1 %v7674_v50  ;;  %v4216_v41 = vpop.f32.mrf.mxu1  ;;  %4589 = vmatprep.mubr.bf16.mxu0 %v7675_v0  ;;  %v4144_v9 = vadd.f32 %v4143_v26, %v7215_v25  ;;  %v7254_v23 = vadd.f32 %v4212_v2, %v4140_v27 }
 0x26c   : > { %4662 = vmatprep.mubr.bf16.mxu1 %v7676_v28  ;;  %v4145_v19 = vpop.f32.mrf.mxu0 }
 0x26d   : > { %v4218_v12 = vpop.f32.mrf.mxu1  ;;  %v4146_v16 = vadd.f32 %v4145_v19, %v7217_v11  ;;  %v7257_v31 = vadd.f32 %v4216_v41, %v4144_v9 }
 0x26e   : > { %v4147_v46 = vpop.f32.mrf.mxu0 }
 0x26f   : > { %v4220_v52 = vpop.f32.mrf.mxu1  ;;  %v4148_v43 = vadd.f32 %v4147_v46, %v7215_v25  ;;  %v7260_v45 = vadd.f32 %v4218_v12, %v4146_v16 }
 0x270   : > { %v4149_v38 = vpop.f32.mrf.mxu0 }
 0x271   : > { %v4222_v32 = vpop.f32.mrf.mxu1  ;;  %v4150_v30 = vadd.f32 %v4149_v38, %v7217_v11  ;;  %v7263_v40 = vadd.f32 %v4220_v52, %v4148_v43 }
 0x272   : > { %4590 = vmatmul.mubr.bf16.gmra.mxu0 %v7677_v42  ;;  %v4153_v20 = vpop.f32.mrf.mxu0 }
 0x273   : > { %4663 = vmatmul.mubr.bf16.gmra.mxu1 %v7678_v54  ;;  %v4226_v14 = vpop.f32.mrf.mxu1  ;;  %v4154_v57 = vadd.f32 %v4153_v20, %v7215_v25  ;;  %v7268_v49 = vadd.f32 %v4222_v32, %v4150_v30 }
 0x274   : > { %v4155_v3 = vpop.f32.mrf.mxu0 }
 0x275   : > { %v4228_v18 = vpop.f32.mrf.mxu1  ;;  %v4156_v53 = vadd.f32 %v4155_v3, %v7217_v11  ;;  %v7271_v44 = vadd.f32 %v4226_v14, %v4154_v57 }
 0x276   : > { %v4157_v47 = vpop.f32.mrf.mxu0 }
 0x277   : > { %v4230_v1 = vpop.f32.mrf.mxu1  ;;  %v4158_v37 = vadd.f32 %v4157_v47, %v7215_v25  ;;  %v7274_v13 = vadd.f32 %v4228_v18, %v4156_v53 }
 0x278   : > { %v4159_v61 = vpop.f32.mrf.mxu0 }
 0x279   : > { %7679 = vst [vmem:[#allocation35_spill] sm:$0xff] %v7274_v13  ;;  %v4232_v56 = vpop.f32.mrf.mxu1  ;;  %v4160_v17 = vadd.f32 %v4159_v61, %v7217_v11  ;;  %v7277_v7 = vadd.f32 %v4230_v1, %v4158_v37 }
 0x27b   : > { %7680 = vst [vmem:[#allocation40_spill] sm:$0xff] %v7277_v7  ;;  %v7279_v60 = vadd.f32 %v4232_v56, %v4160_v17 }
 0x27d   : > { %7681 = vst [vmem:[#allocation41_spill] sm:$0xff] %v7279_v60 }
 0x29a   : > { %v4269_v34 = vpop.f32.mrf.mxu0 }
 0x29b   : > { %v4342_v5 = vpop.f32.mrf.mxu1 }
 0x29c   : > { %v4271_v6 = vpop.f32.mrf.mxu0 }
 0x29d   : > { %v7281_v4 = vpop.f32.mrf.mxu1 }
 0x29e   : > { %v4273_v29 = vpop.f32.mrf.mxu0 }
 0x29f   : > { %v7283_v58 = vpop.f32.mrf.mxu1 }
 0x2a0   : > { %v4275_v39 = vpop.f32.mrf.mxu0 }
 0x2a1   : > { %v7285_v25 = vpop.f32.mrf.mxu1 }
 0x2a2   : > { %v4279_v51 = vpop.f32.mrf.mxu0 }
 0x2a3   : > { %v7287_v59 = vpop.f32.mrf.mxu1 }
 0x2a4   : > { %v4281_v8 = vpop.f32.mrf.mxu0 }
 0x2a5   : > { %v7289_v11 = vpop.f32.mrf.mxu1 }
 0x2a6   : > { %v7291_v15 = vpop.f32.mrf.mxu0 }
 0x2a7   : > { %v7293_v63 = vpop.f32.mrf.mxu1 }
 0x2a8   : > { %v7295_v21 = vpop.f32.mrf.mxu0 }
 0x2a9   : > { %v7297_v35 = vpop.f32.mrf.mxu1 }
 0x2aa   : > { %v7299_v2 = vpop.f32.mrf.mxu0 }
 0x2ab   : > { %v7301_v27 = vpop.f32.mrf.mxu1 }
 0x2ac   : > { %v7303_v10 = vpop.f32.mrf.mxu0 }
 0x2ad   : > { %v7305_v50 = vpop.f32.mrf.mxu1 }
 0x2ae   : > { %v7307_v26 = vpop.f32.mrf.mxu0 }
 0x2af   : > { %v7309_v41 = vpop.f32.mrf.mxu1 }
 0x2b0   : > { %v7311_v0 = vpop.f32.mrf.mxu0 }
 0x2b1   : > { %v7313_v28 = vpop.f32.mrf.mxu1 }
 0x2b2   : > { %7682 = vst [vmem:[#allocation44_spill] sm:$0xff] %v7313_v28  ;;  %v7315_v9 = vpop.f32.mrf.mxu0  ;;  %v4270_v28 = vadd.f32 %v4269_v34, %v7224_v55  ;;  %v4280_v55 = vadd.f32 %v4279_v51, %v7241_v33 }
 0x2b3   : > { %v7317_v19 = vpop.f32.mrf.mxu1 }
 0x2b4   : > { %7683 = vst [vmem:[#allocation12_spill] sm:$0xff] %v7317_v19  ;;  %v7319_v12 = vpop.f32.mrf.mxu0 }
 0x2b5   : > { %7684 = vst [vmem:[#allocation13_spill] sm:$0xff] %v7319_v12  ;;  %v7321_v16 = vpop.f32.mrf.mxu1 }
 0x2b6   : > { %7685 = vst [vmem:[#allocation14_spill] sm:$0xff] %v7321_v16  ;;  %v7323_v46 = vpop.f32.mrf.mxu0 }
 0x2b7   : > { %7686 = vst [vmem:[#allocation15_spill] sm:$0xff] %v7323_v46  ;;  %v7325_v52 = vpop.f32.mrf.mxu1 }
 0x2b8   : > { %7687 = vst [vmem:[#allocation47_spill] sm:$0xff] %v7325_v52  ;;  %v7327_v43 = vpop.f32.mrf.mxu0 }
 0x2b9   : > { %7688 = vst [vmem:[#allocation16_spill] sm:$0xff] %v7327_v43  ;;  %v7329_v38 = vpop.f32.mrf.mxu1 }
 0x2ba   : > { %7689 = vst [vmem:[#allocation17_spill] sm:$0xff] %v7329_v38 }
 0x2da   : > { %v4415_v32 = vpop.f32.mrf.mxu0 }
 0x2db   : > { %v4488_v30 = vpop.f32.mrf.mxu1 }
 0x2dc   : > { %v4417_v42 = vpop.f32.mrf.mxu0 }
 0x2dd   : > { %v4490_v54 = vpop.f32.mrf.mxu1 }
 0x2de   : > { %v4419_v20 = vpop.f32.mrf.mxu0 }
 0x2df   : > { %v4492_v14 = vpop.f32.mrf.mxu1 }
 0x2e0   : > { %v4421_v57 = vpop.f32.mrf.mxu0 }
 0x2e1   : > { %v4494_v3 = vpop.f32.mrf.mxu1 }
 0x2e2   : > { %v4425_v18 = vpop.f32.mrf.mxu0 }
 0x2e3   : > { %v7331_v53 = vpop.f32.mrf.mxu1 }
 0x2e4   : > { %v4427_v47 = vpop.f32.mrf.mxu0 }
 0x2e5   : > { %v7333_v1 = vpop.f32.mrf.mxu1 }
 0x2e6   : > { %v7335_v37 = vpop.f32.mrf.mxu0 }
 0x2e7   : > { %v7337_v61 = vpop.f32.mrf.mxu1 }
 0x2e8   : > { %v7339_v56 = vpop.f32.mrf.mxu0 }
 0x2e9   : > { %v7341_v17 = vpop.f32.mrf.mxu1 }
 0x2ea   : > { %7690 = vst [vmem:[#allocation53_spill] sm:$0xff] %v7341_v17  ;;  %v7343_v38 = vpop.f32.mrf.mxu0 }
 0x2eb   : > { %v7345_v52 = vpop.f32.mrf.mxu1 }
 0x2ec   : > { %7691 = vst [vmem:[#allocation18_spill] sm:$0xff] %v7345_v52  ;;  %v7347_v43 = vpop.f32.mrf.mxu0 }
 0x2ed   : > { %7692 = vst [vmem:[#allocation19_spill] sm:$0xff] %v7347_v43  ;;  %v7349_v60 = vpop.f32.mrf.mxu1  ;;  %v4343_v43 = vadd.f32 %v4342_v5, %v4270_v28 }
 0x2ee   : > { %7693 = vst [vmem:[#allocation51_spill] sm:$0xff] %v7349_v60  ;;  %v7351_v16 = vpop.f32.mrf.mxu0  ;;  %v4272_v60 = vadd.f32 %v4271_v6, %v7227_v36 }
 0x2ef   : > { %7694 = vst [vmem:[#allocation52_spill] sm:$0xff] %v7351_v16  ;;  %v7353_v46 = vpop.f32.mrf.mxu1  ;;  %v4274_v16 = vadd.f32 %v4273_v29, %v7230_v62 }
 0x2f0   : > { %7695 = vst [vmem:[#allocation48_spill] sm:$0xff] %v7353_v46  ;;  %v7355_v7 = vpop.f32.mrf.mxu0 }
 0x2f1   : > { %7696 = vst [vmem:[#allocation64_spill] sm:$0xff] %v7355_v7  ;;  %v7357_v19 = vpop.f32.mrf.mxu1  ;;  %v4347_v34 = vadd.f32 %v7283_v58, %v4274_v16 }
 0x2f2   : > { %7697 = vst [vmem:[#allocation62_spill] sm:$0xff] %v7357_v19  ;;  %v7359_v12 = vpop.f32.mrf.mxu0  ;;  %v4345_v19 = vadd.f32 %v7281_v4, %v4272_v60  ;;  %v4353_v60 = vadd.f32 %v7287_v59, %v4280_v55 }
 0x2f3   : > { %7698 = vst [vmem:[#allocation54_spill] sm:$0xff] %v7359_v12  ;;  %v7361_v13 = vpop.f32.mrf.mxu1  ;;  %v4276_v12 = vadd.f32 %v4275_v39, %v7235_v48  ;;  %v4420_v29 = vadd.f32 %v4419_v20, %v4347_v34  ;;  %v4284_v48 = vadd.f32 %v7291_v15, %v7247_v22  ;;  %v4290_v22 = vadd.f32 %v7299_v2, %v7257_v31 }
 0x2f4   : > { %7699 = vst [vmem:[#allocation49_spill] sm:$0xff] %v7361_v13  ;;  %v7364_v17 = vpop.f32.mrf.mxu0  ;;  %v4416_v13 = vadd.f32 %v4415_v32, %v4343_v43  ;;  %v4426_v28 = vadd.f32 %v4425_v18, %v4353_v60  ;;  %v7702_v60 = vld [vmem:[#allocation19_spill] sm:$0xff] }
 0x2f5   : > { %7700 = vst [vmem:[#allocation56_spill] sm:$0xff] %v7364_v17  ;;  %v7366_v52 = vpop.f32.mrf.mxu1  ;;  %v4418_v17 = vadd.f32 %v4417_v42, %v4345_v19  ;;  %v4349_v62 = vadd.f32 %v7285_v25, %v4276_v12  ;;  %v4357_v59 = vadd.f32 %v7293_v63, %v4284_v48 }
 0x2f6   : > { %7701 = vst [vmem:[#allocation63_spill] sm:$0xff] %v7366_v52  ;;  %v7370_v46 = vpop.f32.mrf.mxu0  ;;  %v4282_v52 = vadd.f32 %v4281_v8, %v7244_v24  ;;  %v4489_v6 = vadd.f32 %v4488_v30, %v4416_v13  ;;  %v4286_v8 = vadd.f32 %v7295_v21, %v7254_v23  ;;  %v4493_v13 = vadd.f32 %v4492_v14, %v4420_v29 }
 0x2f7   : > { %v7372_v7 = vpop.f32.mrf.mxu1  ;;  %v4491_v39 = vadd.f32 %v4490_v54, %v4418_v17  ;;  %v4422_v58 = vadd.f32 %v4421_v57, %v4349_v62  ;;  %v4292_v21 = vadd.f32 %v7303_v10, %v7260_v45  ;;  %v4499_v54 = vadd.f32 %v7331_v53, %v4426_v28  ;;  %v7707_v28 = vld [vmem:[#allocation18_spill] sm:$0xff] }
 0x2f8   : > { %v7379_v36 = vpop.f32.mrf.mxu0  ;;  %v4355_v24 = vadd.f32 %v7289_v11, %v4282_v52  ;;  %v4359_v23 = vadd.f32 %v7297_v35, %v4286_v8  ;;  %v4430_v14 = vadd.f32 %v7335_v37, %v4357_v59  ;;  %v4294_v35 = vadd.f32 %v7307_v26, %v7263_v40  ;;  %v7706_v8 = vld [vmem:[#allocation13_spill] sm:$0xff] }
 0x2f9   : > { %v7381_v5 = vpop.f32.mrf.mxu1  ;;  %v4495_v30 = vadd.f32 %v4494_v3, %v4422_v58  ;;  %v4363_v3 = vadd.f32 %v7301_v27, %v4290_v22  ;;  %v4365_v55 = vadd.f32 %v7305_v50, %v4292_v21  ;;  %v4296_v27 = vadd.f32 %v7311_v0, %v7268_v49  ;;  %v7703_v0 = vld [vmem:[#allocation53_spill] sm:$0xff]  ;;  %v7704_v58 = vld [vmem:[#allocation44_spill] sm:$0xff] }
 0x2fa   : > { %v4428_v15 = vadd.f32 %v4427_v47, %v4355_v24  ;;  %v4432_v10 = vadd.f32 %v7339_v56, %v4359_v23  ;;  %v4503_v26 = vadd.f32 %v7337_v61, %v4430_v14  ;;  %v4367_v29 = vadd.f32 %v7309_v41, %v4294_v35  ;;  %v7705_v24 = vld [vmem:[#allocation35_spill] sm:$0xff]  ;;  %v7709_v22 = vld [vmem:[#allocation12_spill] sm:$0xff] }
 0x2fb   : > { %v4436_v34 = vadd.f32 %v7343_v38, %v4363_v3  ;;  %v4300_v50 = vadd.f32 %v7315_v9, %v7271_v44  ;;  %v4438_v48 = vadd.f32 %v7702_v60, %v4365_v55  ;;  %v4302_v41 = vadd.f32 %v7706_v8, %v7705_v24  ;;  %v7708_v9 = vld [vmem:[#allocation52_spill] sm:$0xff] }
 0x2fc   : > { %v4501_v18 = vadd.f32 %v7333_v1, %v4428_v15  ;;  %v4505_v38 = vadd.f32 %v7703_v0, %v4432_v10  ;;  %v7713_v21 = vld [vmem:[#allocation64_spill] sm:$0xff]  ;;  %v7723_v0 = vld [vmem:[#allocation49_spill] sm:$0xff] }
 0x2fd   : > { %v4373_v15 = vadd.f32 %v7709_v22, %v4300_v50  ;;  %v7716_v3 = vld [vmem:[#allocation16_spill] sm:$0xff]  ;;  %v7724_v8 = vld [vmem:[#allocation63_spill] sm:$0xff] }
 0x31a   : > { %v4561_v4 = vpop.f32.mrf.mxu0 }
 0x31b   : > { %v4634_v33 = vpop.f32.mrf.mxu1  ;;  %v4562_v51 = vadd.f32 %v4561_v4, %v4489_v6 }
 0x31c   : > { %v4563_v19 = vpop.f32.mrf.mxu0 }
 0x31d   : > { %v4636_v25 = vpop.f32.mrf.mxu1  ;;  %v4635_v12 = vadd.f32 %v4634_v33, %v4562_v51  ;;  %v4564_v16 = vadd.f32 %v4563_v19, %v4491_v39  ;;  %v4369_v51 = vadd.f32 %v7704_v58, %v4296_v27  ;;  %v4509_v19 = vadd.f32 %v7707_v28, %v4436_v34  ;;  %v7719_v34 = vld [vmem:[#allocation47_spill] sm:$0xff] }
 0x31e   : > { %v4565_v43 = vpop.f32.mrf.mxu0 }
 0x31f   : > { %v4638_v32 = vpop.f32.mrf.mxu1  ;;  %v4675_v11 = vmax.f32 %v4635_v12, 0.0  ;;  %v4637_v52 = vadd.f32 %v4636_v25, %v4564_v16  ;;  %v4566_v42 = vadd.f32 %v4565_v43, %v4493_v13  ;;  %v4440_v13 = vadd.f32 %v7708_v9, %v4367_v29  ;;  %v7710_v43 = vld [vmem:[#allocation40_spill] sm:$0xff] }
 0x320   : > { %v4567_v20 = vpop.f32.mrf.mxu0 }
 0x321   : > { %v4640_v63 = vpop.f32.mrf.mxu1  ;;  %4707 = vst [vmem:[%s7143_s20 + $0x10] sm:$0xff] %v4675_v11  ;;  %v4676_v31 = vmax.f32 %v4637_v52, 0.0  ;;  %v4639_v2 = vadd.f32 %v4638_v32, %v4566_v42  ;;  %v4568_v57 = vadd.f32 %v4567_v20, %v4495_v30  ;;  %v7711_v32 = vld [vmem:[#allocation15_spill] sm:$0xff] }
 0x322   : > { %v4571_v47 = vpop.f32.mrf.mxu0  ;;  %v4304_v30 = vadd.f32 %v7711_v32, %v7710_v43  ;;  %v7712_v11 = vld [vmem:[#allocation51_spill] sm:$0xff] }
 0x323   : > { %v4644_v45 = vpop.f32.mrf.mxu1  ;;  %4708 = vst [vmem:[%s7143_s20 + $0x18] sm:$0xff] %v4676_v31  ;;  %v4679_v53 = vmax.f32 %v4639_v2, 0.0  ;;  %v4641_v17 = vadd.f32 %v4640_v63, %v4568_v57  ;;  %v4572_v37 = vadd.f32 %v4571_v47, %v4499_v54  ;;  %v4511_v52 = vadd.f32 %v7712_v11, %v4438_v48  ;;  %v7714_v31 = vld [vmem:[#allocation14_spill] sm:$0xff]  ;;  %v7715_v57 = vld [vmem:[#allocation41_spill] sm:$0xff] }
 0x324   : > { %v4573_v62 = vpop.f32.mrf.mxu0  ;;  %v4442_v54 = vadd.f32 %v7713_v21, %v4369_v51  ;;  %v4375_v2 = vadd.f32 %v7714_v31, %v4302_v41  ;;  %v4306_v35 = vadd.f32 %v7716_v3, %v7715_v57 }
 0x325   : > { %v4646_v40 = vpop.f32.mrf.mxu1  ;;  %4711 = vst [vmem:[%s7143_s20 + $0x30] sm:$0xff] %v4679_v53  ;;  %v4680_v1 = vmax.f32 %v4641_v17, 0.0  ;;  %v4645_v6 = vadd.f32 %v4644_v45, %v4572_v37  ;;  %v4574_v56 = vadd.f32 %v4573_v62, %v4501_v18  ;;  %v7717_v18 = vld [vmem:[#allocation54_spill] sm:$0xff]  ;;  %v7718_v53 = vld [vmem:[#allocation48_spill] sm:$0xff]  ;;  %v4377_v62 = vadd.f32 %v7719_v34, %v4304_v30 }
 0x326   : > { %v4575_v4 = vpop.f32.mrf.mxu0  ;;  %v4446_v47 = vadd.f32 %v7717_v18, %v4373_v15  ;;  %v4513_v17 = vadd.f32 %v7718_v53, %v4440_v13 }
 0x327   : > { %v4648_v49 = vpop.f32.mrf.mxu1  ;;  %4712 = vst [vmem:[%s7143_s20 + $0x38] sm:$0xff] %v4680_v1  ;;  %v4683_v33 = vmax.f32 %v4645_v6, 0.0  ;;  %v4647_v39 = vadd.f32 %v4646_v40, %v4574_v56  ;;  %v4576_v61 = vadd.f32 %v4575_v4, %v4503_v26  ;;  %v7720_v40 = vld [vmem:[#allocation56_spill] sm:$0xff]  ;;  %v7721_v56 = vld [vmem:[#allocation62_spill] sm:$0xff]  ;;  %v7722_v4 = vld [vmem:[#allocation17_spill] sm:$0xff] }
 0x328   : > { %v4577_v25 = vpop.f32.mrf.mxu0  ;;  %v4448_v26 = vadd.f32 %v7720_v40, %v4375_v2  ;;  %v4515_v29 = vadd.f32 %v7721_v56, %v4442_v54 }
 0x329   : > { %v4650_v44 = vpop.f32.mrf.mxu1  ;;  %4715 = vst [vmem:[%s7143_s20 + $0x50] sm:$0xff] %v4683_v33  ;;  %v4684_v12 = vmax.f32 %v4647_v39, 0.0  ;;  %v4649_v16 = vadd.f32 %v4648_v49, %v4576_v61  ;;  %v4578_v59 = vadd.f32 %v4577_v25, %v4505_v38  ;;  %v4379_v49 = vadd.f32 %v7722_v4, %v4306_v35 }
 0x32a   : > { %v4581_v42 = vpop.f32.mrf.mxu0  ;;  %v4519_v38 = vadd.f32 %v7723_v0, %v4446_v47  ;;  %v4450_v61 = vadd.f32 %v7370_v46, %v4377_v62  ;;  %v4521_v41 = vadd.f32 %v7724_v8, %v4448_v26 }
 0x32b   : > { %v4654_v23 = vpop.f32.mrf.mxu1  ;;  %4716 = vst [vmem:[%s7143_s20 + $0x58] sm:$0xff] %v4684_v12  ;;  %v4687_v20 = vmax.f32 %v4649_v16, 0.0  ;;  %v4651_v63 = vadd.f32 %v4650_v44, %v4578_v59  ;;  %v4582_v14 = vadd.f32 %v4581_v42, %v4509_v19  ;;  %v4452_v25 = vadd.f32 %v7379_v36, %v4379_v49 }
 0x32c   : > { %v4583_v45 = vpop.f32.mrf.mxu0  ;;  %v4523_v46 = vadd.f32 %v7372_v7, %v4450_v61 }
 0x32d   : > { %v4656_v10 = vpop.f32.mrf.mxu1  ;;  %4719 = vst [vmem:[%s7143_s20 + $0x70] sm:$0xff] %v4687_v20  ;;  %v4688_v37 = vmax.f32 %v4651_v63, 0.0  ;;  %v4655_v55 = vadd.f32 %v4654_v23, %v4582_v14  ;;  %v4584_v27 = vadd.f32 %v4583_v45, %v4511_v52  ;;  %v4525_v36 = vadd.f32 %v7381_v5, %v4452_v25 }
 0x32e   : > { %v4585_v1 = vpop.f32.mrf.mxu0 }
 0x32f   : > { %v4658_v6 = vpop.f32.mrf.mxu1  ;;  %4720 = vst [vmem:[%s7143_s20 + $0x78] sm:$0xff] %v4688_v37  ;;  %v4691_v50 = vmax.f32 %v4655_v55, 0.0  ;;  %v4657_v60 = vadd.f32 %v4656_v10, %v4584_v27  ;;  %v4586_v48 = vadd.f32 %v4585_v1, %v4513_v17 }
 0x330   : > { %v4587_v33 = vpop.f32.mrf.mxu0 }
 0x331   : > { %v4660_v39 = vpop.f32.mrf.mxu1  ;;  %4723 = vst [vmem:[%s7143_s20 + $0x90] sm:$0xff] %v4691_v50  ;;  %v4692_v58 = vmax.f32 %v4657_v60, 0.0  ;;  %v4659_v51 = vadd.f32 %v4658_v6, %v4586_v48  ;;  %v4588_v24 = vadd.f32 %v4587_v33, %v4515_v29 }
 0x332   : > { %v4591_v28 = vpop.f32.mrf.mxu0 }
 0x333   : > { %v4664_v19 = vpop.f32.mrf.mxu1  ;;  %4724 = vst [vmem:[%s7143_s20 + $0x98] sm:$0xff] %v4692_v58  ;;  %v4695_v44 = vmax.f32 %v4659_v51, 0.0  ;;  %v4661_v9 = vadd.f32 %v4660_v39, %v4588_v24  ;;  %v4592_v13 = vadd.f32 %v4591_v28, %v4519_v38 }
 0x334   : > { %v4593_v12 = vpop.f32.mrf.mxu0 }
 0x335   : > { %v4666_v16 = vpop.f32.mrf.mxu1  ;;  %4727 = vst [vmem:[%s7143_s20 + $0xb0] sm:$0xff] %v4695_v44  ;;  %v4696_v59 = vmax.f32 %v4661_v9, 0.0  ;;  %v4665_v22 = vadd.f32 %v4664_v19, %v4592_v13  ;;  %v4594_v15 = vadd.f32 %v4593_v12, %v4521_v41 }
 0x336   : > { %v4595_v43 = vpop.f32.mrf.mxu0 }
 0x337   : > { %v4668_v32 = vpop.f32.mrf.mxu1  ;;  %4728 = vst [vmem:[%s7143_s20 + $0xb8] sm:$0xff] %v4696_v59  ;;  %v4699_v30 = vmax.f32 %v4665_v22, 0.0  ;;  %v4667_v11 = vadd.f32 %v4666_v16, %v4594_v15  ;;  %v4596_v52 = vadd.f32 %v4595_v43, %v4523_v46 }
 0x338   : > { %v4597_v42 = vpop.f32.mrf.mxu0 }
 0x339   : > { %4731 = vst [vmem:[%s7143_s20 + $0xd0] sm:$0xff] %v4699_v30  ;;  %v4700_v7 = vmax.f32 %v4667_v11, 0.0  ;;  %v4669_v23 = vadd.f32 %v4668_v32, %v4596_v52  ;;  %v4598_v21 = vadd.f32 %v4597_v42, %v4525_v36  ;;  %v4670_v54 = vpop.f32.mrf.mxu1 }
 0x33b   : > { %4732 = vst [vmem:[%s7143_s20 + $0xd8] sm:$0xff] %v4700_v7  ;;  %v4703_v20 = vmax.f32 %v4669_v23, 0.0  ;;  %v4671_v63 = vadd.f32 %v4670_v54, %v4598_v21 }
 0x33d   : > { %4735 = vst [vmem:[%s7143_s20 + $0xf0] sm:$0xff] %v4703_v20  ;;  %v4704_v5 = vmax.f32 %v4671_v63, 0.0 }
 0x33f   : > { %4736 = vst [vmem:[%s7143_s20 + $0xf8] sm:$0xff] %v4704_v5 }
 0x340   : > { %6315 = shalt.err (!%p6312_p9)
}
 0x341   : > { %s6316_s23 = scalar_lea.hbm %s7457_s8, 4096  ;;  %s6320_s4 = scalar_lea.hbm %s7507_s3, 8192 }
 0x342   : > { %p6317_p13 = scmp.ne.s32.totalorder %s7457_s8, %s6316_s23  ;;  %p6321_p4 = scmp.lt.s32.totalorder %s7457_s8, %s7507_s3 }
 0x343   : > { %p6322_p8 = scmp.lt.s32.totalorder %s6320_s4, %s6316_s23 }
 0x344   : > { %p6318_p5 = pnand %p6317_p13, %p7725_p10 }
 0x345   : > { %p6323_p3 = por %p6322_p8, %p6321_p4 }
 0x346   : > { %p6319_p0 = pneg %p6318_p5 }
 0x348   : > { %p6324_p11 = pnand %p6323_p3, %p6319_p0 }
 0x34a   : > { %6327 = shalt.err (!%p6324_p11)
}
 0x34b   : > { %s6380_s18 = smov 512   ;;  %s6381_s20 = smov 32  }
 0x34c   : > { %5390 = dma.vmem_to_hbm [thread:$0]  (%p7725_p10), %s7459_s27, 4096, %s7457_s8, %s4738_s9, %s6380_s18, %s6380_s18, %s6381_s20  }
 0x34d PF: > { %s4767_s25 = sand.u32 1, %s6358_s12   ;;  %p7726_p1 = scmp.ne.s32.totalorder %s7545_s19, 0 }
 0x34e   : > { %p7727_p2 = scmp.ge.s32.totalorder %s6370_s15, 2  ;;  %s4768_s28 = scalar_lea.sflag [#allocation4], %s4767_s25 }
 0x350   : > { %p5404_p6 = pnand %p7727_p2, %p7726_p1 }
 0x352   : > { %p5405_p12 = pneg %p5404_p6 }
 0x354   : > { %6353 = dma.done.wait (%p5405_p12), %s4768_s28, 4096  }
 0x355   : > { %6355 = vsyncadd (%p5405_p12), %s4768_s28, 4294963200  ;;  %p17_p7 = scmp.ge.s32.totalorder %s6474_s7, 4   ;;  %s7728_s12 = smov %s6362_s13 }
 0x356   : > { %s7729_s13 = smov %s6366_s14  ;;  %s7730_s14 = smov %s6490_s11 }
 0x357   : > { %s7731_s15 = smov %s6474_s7  ;;  %19 = sbr.rel (!%p17_p7) target bundleno = 6 (0x6), region = 85 }
 0x35c   :  { %4773 = vsyncpa [#allocation3], 1 }
 0x35d   :  { %4775 = vsyncpa [#allocation3 + $0x1], 1 }
 0x35e   :  { %4776 = vsyncpa [#allocation6], 1 }
 0x35f   :  { %4777 = vsyncpa [#allocation4], 1 }
 0x360   :  { %4779 = vsyncpa [#allocation4 + $0x1], 1 }

// kernel: tpu_custom_call.1
= control target key start
LH: loop header
LB: loop body
LE: loop exit
PB: predicated region body
PF: predicated region fallthrough
CT: control target
= control target key end

     0   :  { %8 = vsyncpa [#allocation3], 0  ;;  %s7504_s0 = inlined_call_operand.hbm [shape: f32[128,2048], index: 0, kind: input, shape index: {}]   ;;  %s7505_s1 = inlined_call_operand.hbm [shape: bf16[2048,512], index: 1, kind: input, shape index: {}]   ;;  %s7506_s2 = inlined_call_operand.hbm [shape: f32[1,512], index: 2, kind: input, shape index: {}]   ;;  %s7507_s3 = inlined_call_operand.hbm [shape: f32[128,512], index: 3, kind: output, shape index: {}]  }
   0x1   :  { %10 = vsyncpa [#allocation3 + $0x1], 0 }
   0x2   :  { %11 = vsyncpa [#allocation6], 0 }
   0x3   :  { %12 = vsyncpa [#allocation4], 0 }
   0x4   :  { %14 = vsyncpa [#allocation4 + $0x1], 0  ;;  %s6402_s12 = smov 0   ;;  %s6404_s13 = smov 0  }
   0x5   :  { %s6406_s14 = smov 0   ;;  %s6408_s15 = smov 0  }
   0x6 LB: > { %s6423_s16 = sadd.s32 4294967295, %s6370_s15   ;;  %s4844_s17 = sadd.s32 4294967294, %s6370_s15   ;;  %s6370_s15 = sphi %s6408_s15, %s7731_s15   ;;  %s6366_s14 = sphi %s6406_s14, %s7730_s14   ;;  %s6362_s13 = sphi %s6404_s13, %s7729_s13   ;;  %s6358_s12 = sphi %s6402_s12, %s7728_s12  }
   0x7   : > { %p40_p0 = scmp.ne.s32.totalorder %s6362_s13, %s6358_s12  ;;  %p7508_p1 = scmp.eq.s32.totalorder %s6423_s16, 0 }
   0x8   : > { %p112_p3 = scmp.eq.s32.totalorder %s4844_s17, 1  ;;  %p4845_p5 = scmp.ge.s32.totalorder %s6370_s15, 1 }
   0x9   : > { %p6432_p4 = por %p7508_p1, %p40_p0  ;;  %p119_p7 = scmp.lt.s32.totalorder %s6370_s15, 3 }
   0xa   : > { %p6437_p6 = por %p112_p3, %p40_p0  ;;  %s6372_s21 = smov [#allocation5]  }
   0xb   : > { %s7544_s18 = scalar_select %p6432_p4, 1, 0 }
   0xc   : > { %s7545_s19 = scalar_select %p6437_p6, 1, 0 }
   0xd   : > { %p6442_p8 = pnand %p4845_p5, %p119_p7  ;;  %s131_s22 = sshll.u32 %s6372_s21, 4  ;;  %s132_s22 = int_to_ptr.vmem [resolvable:$true] %s131_s22 }
   0xe   : > { %s6373_s24 = smov [#allocation7]   ;;  %s6233_s26 = scalar_lea.vmem %s132_s22, 65536 }
   0xf   : > { %s7546_s20 = scalar_select %p6442_p8, 1, 0 }
  0x10   : > { %p5392_p9 = pneg %p6442_p8  ;;  %s145_s25 = sshll.u32 %s6373_s24, 4  ;;  %s146_s25 = int_to_ptr.vmem [resolvable:$true] %s145_s25 }
  0x11   : > { %p6234_p13 = scmp.ne.s32.totalorder %s132_s22, %s6233_s26  ;;  %p6241_p5 = scmp.lt.s32.totalorder %s132_s22, %s132_s22 }
  0x12   : > { %p6451_p11 = pnand %p5392_p9, %p7508_p1  ;;  %p6242_p7 = scmp.lt.s32.totalorder %s6233_s26, %s6233_s26 }
  0x14   : > { %p6224_p12 = pneg %p6451_p11  ;;  %p6243_p10 = por %p6242_p7, %p6241_p5 }
  0x16   : > { %p6236_p0 = pnand %p6234_p13, %p6224_p12 }
  0x18   : > { %p6237_p3 = pneg %p6236_p0 }
  0x1a   : > { %p6244_p9 = pnand %p6243_p10, %p6237_p3 }
  0x1c   : > { %6247 = shalt.err (!%p6244_p9)
}
  0x1d   : > { %s6374_s27 = smov 256   ;;  %s6375_s28 = smov 16  }
  0x1e   : > { %5395 = dma.hbm_to_vmem [thread:$0]  (!%p6451_p11), %s7505_s1, 65536, %s132_s22, [#allocation6], %s6374_s27, %s6374_s27, %s6375_s28  }
  0x1f   : > { %s6259_s4 = scalar_lea.vmem %s146_s25, 64  ;;  %p6267_p2 = scmp.lt.s32.totalorder %s146_s25, %s146_s25 }
  0x20   : > { %p6260_p1 = scmp.ne.s32.totalorder %s146_s25, %s6259_s4  ;;  %p6268_p6 = scmp.lt.s32.totalorder %s6259_s4, %s6259_s4 }
  0x22   : > { %p6262_p13 = pnand %p6260_p1, %p6224_p12  ;;  %p6269_p5 = por %p6268_p6, %p6267_p2 }
  0x24   : > { %p6263_p0 = pneg %p6262_p13 }
  0x26   : > { %p6270_p10 = pnand %p6269_p5, %p6263_p0 }
  0x28   : > { %6273 = shalt.err (!%p6270_p10)
}
  0x29   : > { %5398 = dma.hbm_to_vmem [thread:$0]  (!%p6451_p11), %s7506_s2, 64, %s146_s25, [#allocation6]  }
  0x2a   : > { %s6474_s7 = sadd.s32 1, %s6370_s15   ;;  %s27_s8 = sadd.s32 1, %s6366_s14 }
  0x2b   : > { %s24_s9 = ssub.s32 %s6370_s15, %s6474_s7  ;;  %p34_p1 = scmp.ne.s32.totalorder %s6366_s14, %s6362_s13 }
  0x2c   : > { %p25_p2 = scmp.eq.s32.totalorder %s24_s9, 0  ;;  %p35_p6 = scmp.eq.s32.totalorder %s6370_s15, 0 }
  0x2d   : > { %p7548_p12 = scmp.eq.s32.totalorder %s6423_s16, 1  ;;  %p5409_p7 = scmp.lt.s32.totalorder %s6370_s15, 2 }
  0x2e   : > { %s6490_s11 = scalar_select %p25_p2, %s6366_s14, %s27_s8  }
  0x2f   : > { %p6484_p3 = por %p7548_p12, %p34_p1  ;;  %p36_p9 = por %p35_p6, %p34_p1 }
  0x30   : > { %s156_s17 = sand.u32 1, %s6366_s14   ;;  %s5377_s22 = sshll.u32 %s6370_s15, 14 }
  0x31   : > { %s7549_s10 = scalar_select %p6484_p3, 1, 0 }
  0x32   : > { %s4849_s21 = sshll.u32 %s156_s17, 10  ;;  %s6497_s25 = scalar_lea.hbm %s7504_s0, %s5377_s22 }
  0x33   : > { %s160_s26 = scalar_lea.vmem [#allocation2], %s4849_s21  ;;  %p6501_p11 = pnand %p5409_p7, %p36_p9 }
  0x34   : > { %s168_s27 = sshll.u32 %s160_s26, 4  ;;  %s6505_s29 = scalar_lea.sflag [#allocation3], %s156_s17  ;;  %s6499_s27 = int_to_ptr.vmem [resolvable:$true] %s168_s27 }
  0x35   : > { %s6274_s30 = scalar_lea.hbm %s6497_s25, 16384  ;;  %p6276_p0 = pneg %p6501_p11 }
  0x36   : > { %p6275_p13 = scmp.ne.s32.totalorder %s6497_s25, %s6274_s30  ;;  %s6279_s6 = scalar_lea.hbm %s7504_s0, 32768 }
  0x37   : > { %p6280_p1 = scmp.lt.s32.totalorder %s6497_s25, %s7504_s0  ;;  %p6281_p2 = scmp.lt.s32.totalorder %s6279_s6, %s6274_s30 }
  0x38   : > { %p6277_p5 = pnand %p6276_p0, %p6275_p13 }
  0x39   : > { %p6282_p6 = por %p6281_p2, %p6280_p1 }
  0x3a   : > { %p6278_p10 = pneg %p6277_p5 }
  0x3c   : > { %p6283_p12 = pnand %p6282_p6, %p6278_p10 }
  0x3e   : > { %6286 = shalt.err (!%p6283_p12)
}
  0x3f   : > { %s6287_s17 = scalar_lea.vmem %s6499_s27, 16384  ;;  %s6376_s21 = smov [#allocation2]  }
  0x40   : > { %p6288_p7 = scmp.ne.s32.totalorder %s6499_s27, %s6287_s17  ;;  %s6292_s22 = sshll.u32 %s6376_s21, 4  ;;  %s6293_s22 = int_to_ptr.vmem [resolvable:$false] %s6292_s22 }
  0x41   : > { %s6294_s23 = scalar_lea.vmem %s6293_s22, 32768  ;;  %p6295_p5 = scmp.lt.s32.totalorder %s6499_s27, %s6293_s22 }
  0x42   : > { %p6290_p9 = pnand %p6288_p7, %p6276_p0  ;;  %p6296_p3 = scmp.lt.s32.totalorder %s6294_s23, %s6287_s17 }
  0x44   : > { %p6291_p13 = pneg %p6290_p9  ;;  %p6297_p4 = por %p6296_p3, %p6295_p5 }
  0x46   : > { %p6298_p8 = pnand %p6297_p4, %p6291_p13 }
  0x48   : > { %6301 = shalt.err (!%p6298_p8)
}
  0x49   : > { %s6377_s24 = smov 2048   ;;  %s6378_s26 = smov 128  }
  0x4a   : > { %5402 = dma.hbm_to_vmem [thread:$0]  (!%p6501_p11), %s6497_s25, 16384, %s6499_s27, %s6505_s29, %s6377_s24, %s6377_s24, %s6378_s26  }
  0x4b   : > { %p7551_p0 = scmp.ne.s32.totalorder %s7546_s20, 0 }
  0x4d   : > { %180 = sbr.rel (%p7551_p0) target bundleno = 845 (0x34d), region = 32 }
  0x52   : > { %s6529_s30 = sand.u32 1, %s6362_s13   ;;  %p7552_p4 = scmp.ne.s32.totalorder %s7544_s18, 0 }
  0x53   : > { %s4854_s4 = sshll.u32 %s6529_s30, 10  ;;  %s183_s5 = scalar_lea.sflag [#allocation3], %s6529_s30 }
  0x54   : > { %s6533_s6 = scalar_lea.vmem [#allocation2], %s4854_s4 }
  0x55   : > { %6345 = dma.done.wait (%p7552_p4), %s183_s5, 16384  }
  0x56   : > { %6347 = vsyncadd (%p7552_p4), %s183_s5, 4294950912  ;;  %p7553_p8 = scmp.eq.s32.totalorder %s6423_s16, 0 }
  0x58   : > { %6349 = dma.done.wait (%p7553_p8), [#allocation6], 65600   ;;  %p7554_p3 = pmov %p7553_p8 }
  0x59   : > { %v5453_v0 = vld [vmem:[#allocation5 + $0xe4] ss:$16 sps:$4 sm:$0xff]   ;;  %v5457_v2 = vld [vmem:[#allocation5 + $0xe0] ss:$16 sps:$4 sm:$0xff]   ;;  %v220_v46 = vld [vmem:[%s6533_s6 + $0x8] sm:$0xff]  ;;  %s4857_s18 = sshll.u32 %s6529_s30, 8 }
  0x5a   : > { %6351 = vsyncadd (%p7554_p3), [#allocation6], 4294901696  ;;  %v5455_v1 = vld [vmem:[#allocation5 + $0x2e4] ss:$16 sps:$4 sm:$0xff]   ;;  %3505 = vmatprep.subr.bf16.mxu0 %v5453_v0  ;;  %v5458_v3 = vld [vmem:[#allocation5 + $0x2e0] ss:$16 sps:$4 sm:$0xff]  }
  0x5b   : > { %3578 = vmatprep.subr.bf16.mxu1 %v5455_v1  ;;  %v5459_v4 = vld [vmem:[#allocation5 + $0xc4] ss:$16 sps:$4 sm:$0xff]   ;;  %3506 = vmatpush1.bf16.msra.mxu0 %v5457_v2  ;;  %v5463_v6 = vld [vmem:[#allocation5 + $0xc0] ss:$16 sps:$4 sm:$0xff]   ;;  %v236_v47 = vld [vmem:[%s6533_s6 + $0x88] sm:$0xff]  ;;  %s7143_s20 = scalar_lea.vmem [#allocation8], %s4857_s18 }
  0x5c   : > { %3579 = vmatpush1.bf16.msra.mxu1 %v5458_v3  ;;  %v5461_v5 = vld [vmem:[#allocation5 + $0x2c4] ss:$16 sps:$4 sm:$0xff]   ;;  %3507 = vmatprep.subr.bf16.mxu0 %v5459_v4  ;;  %v5464_v7 = vld [vmem:[#allocation5 + $0x2c0] ss:$16 sps:$4 sm:$0xff]   ;;  %v222_v48 = vld [vmem:[%s6533_s6 + $0x18] sm:$0xff]  ;;  %v6547_v53 = vpack.c.bf16 %v236_v47, %v220_v46  ;;  %s5379_s25 = sshll.u32 %s6423_s16, 12 }
  0x5d   : > { %3580 = vmatprep.subr.bf16.mxu1 %v5461_v5  ;;  %v5465_v8 = vld [vmem:[#allocation5 + $0xa4] ss:$16 sps:$4 sm:$0xff]   ;;  %v5469_v10 = vld [vmem:[#allocation5 + $0xa0] ss:$16 sps:$4 sm:$0xff]   ;;  %v238_v49 = vld [vmem:[%s6533_s6 + $0x98] sm:$0xff]  ;;  %s4752_s27 = sshll.u32 %s7143_s20, 4  ;;  %s7457_s8 = scalar_lea.hbm %s7507_s3, %s5379_s25  ;;  %s7459_s27 = int_to_ptr.vmem [resolvable:$true] %s4752_s27 }
  0x5e   : > { %v5467_v9 = vld [vmem:[#allocation5 + $0x2a4] ss:$16 sps:$4 sm:$0xff]   ;;  %v5470_v11 = vld [vmem:[#allocation5 + $0x2a0] ss:$16 sps:$4 sm:$0xff]   ;;  %v6549_v54 = vpack.c.bf16 %v238_v49, %v222_v48  ;;  %3537 = vmatprep.mubr.bf16.mxu0 %v6547_v53  ;;  %v286_v47 = vld [vmem:[%s6533_s6 + $0x218] sm:$0xff]  ;;  %s4738_s9 = scalar_lea.sflag [#allocation4], %s6529_s30 }
  0x5f   : > { %3508 = vmatpush1.bf16.msra.mxu0 %v5463_v6  ;;  %v5471_v12 = vld [vmem:[#allocation5 + $0x84] ss:$16 sps:$4 sm:$0xff]   ;;  %v5475_v14 = vld [vmem:[#allocation5 + $0x80] ss:$16 sps:$4 sm:$0xff]   ;;  %v302_v49 = vld [vmem:[%s6533_s6 + $0x298] sm:$0xff]  ;;  %s6302_s16 = scalar_lea.vmem %s7459_s27, 4096 }
  0x60   : > { %3581 = vmatpush1.bf16.msra.mxu1 %v5464_v7  ;;  %3509 = vmatprep.subr.bf16.mxu0 %v5465_v8  ;;  %v5473_v13 = vld [vmem:[#allocation5 + $0x284] ss:$16 sps:$4 sm:$0xff]   ;;  %v5476_v15 = vld [vmem:[#allocation5 + $0x280] ss:$16 sps:$4 sm:$0xff]   ;;  %p6303_p11 = scmp.ne.s32.totalorder %s7459_s27, %s6302_s16  ;;  %p7725_p10 = scmp.ne.s32.totalorder %s7549_s10, 0 }
  0x61   : > { %3582 = vmatprep.subr.bf16.mxu1 %v5467_v9  ;;  %v5477_v16 = vld [vmem:[#allocation5 + $0x64] ss:$16 sps:$4 sm:$0xff]   ;;  %v5481_v18 = vld [vmem:[#allocation5 + $0x60] ss:$16 sps:$4 sm:$0xff]   ;;  %3610 = vmatprep.mubr.bf16.mxu1 %v6549_v54  ;;  %s6379_s17 = smov [#allocation8]  }
  0x62   : > { %v5479_v17 = vld [vmem:[#allocation5 + $0x264] ss:$16 sps:$4 sm:$0xff]   ;;  %v5482_v19 = vld [vmem:[#allocation5 + $0x260] ss:$16 sps:$4 sm:$0xff]   ;;  %p6304_p1 = pnand %p6303_p11, %p7725_p10  ;;  %s6306_s21 = sshll.u32 %s6379_s17, 4  ;;  %s6307_s21 = int_to_ptr.vmem [resolvable:$false] %s6306_s21 }
  0x63   : > { %3510 = vmatpush1.bf16.msra.mxu0 %v5469_v10  ;;  %v5483_v20 = vld [vmem:[#allocation5 + $0x44] ss:$16 sps:$4 sm:$0xff]   ;;  %v5487_v22 = vld [vmem:[#allocation5 + $0x40] ss:$16 sps:$4 sm:$0xff]   ;;  %s6308_s22 = scalar_lea.vmem %s6307_s21, 8192  ;;  %p6309_p6 = scmp.lt.s32.totalorder %s7459_s27, %s6307_s21 }
  0x64   : > { %3583 = vmatpush1.bf16.msra.mxu1 %v5470_v11  ;;  %3511 = vmatprep.subr.bf16.mxu0 %v5471_v12  ;;  %v5485_v21 = vld [vmem:[#allocation5 + $0x244] ss:$16 sps:$4 sm:$0xff]   ;;  %v5488_v23 = vld [vmem:[#allocation5 + $0x240] ss:$16 sps:$4 sm:$0xff]   ;;  %p6305_p2 = pneg %p6304_p1  ;;  %p6310_p12 = scmp.lt.s32.totalorder %s6308_s22, %s6302_s16 }
  0x65   : > { %3584 = vmatprep.subr.bf16.mxu1 %v5473_v13  ;;  %v5489_v24 = vld [vmem:[#allocation5 + $0x24] ss:$16 sps:$4 sm:$0xff]   ;;  %v5493_v26 = vld [vmem:[#allocation5 + $0x20] ss:$16 sps:$4 sm:$0xff]  }
  0x66   : > { %v5491_v25 = vld [vmem:[#allocation5 + $0x224] ss:$16 sps:$4 sm:$0xff]   ;;  %v5494_v27 = vld [vmem:[#allocation5 + $0x220] ss:$16 sps:$4 sm:$0xff]   ;;  %p6311_p7 = por %p6310_p12, %p6309_p6 }
  0x67   : > { %3512 = vmatpush1.bf16.msra.mxu0 %v5475_v14  ;;  %v5495_v28 = vld [vmem:[#allocation5 + $0x4] ss:$16 sps:$4 sm:$0xff]   ;;  %v5499_v30 = vld [vmem:[#allocation5] ss:$16 sps:$4 sm:$0xff]  }
  0x68   : > { %3585 = vmatpush1.bf16.msra.mxu1 %v5476_v15  ;;  %3513 = vmatprep.subr.bf16.mxu0 %v5477_v16  ;;  %v5497_v29 = vld [vmem:[#allocation5 + $0x204] ss:$16 sps:$4 sm:$0xff]   ;;  %v5500_v31 = vld [vmem:[#allocation5 + $0x200] ss:$16 sps:$4 sm:$0xff]   ;;  %p6312_p9 = pnand %p6311_p7, %p6305_p2 }
  0x69   : > { %3586 = vmatprep.subr.bf16.mxu1 %v5479_v17  ;;  %v5501_v32 = vld [vmem:[#allocation5 + $0x1e4] ss:$16 sps:$4 sm:$0xff]   ;;  %v5505_v34 = vld [vmem:[#allocation5 + $0x1e0] ss:$16 sps:$4 sm:$0xff]  }
  0x6a   : > { %v5503_v33 = vld [vmem:[#allocation5 + $0x3e4] ss:$16 sps:$4 sm:$0xff]   ;;  %v5506_v35 = vld [vmem:[#allocation5 + $0x3e0] ss:$16 sps:$4 sm:$0xff]  }
  0x6b   : > { %3514 = vmatpush1.bf16.msra.mxu0 %v5481_v18  ;;  %v5507_v36 = vld [vmem:[#allocation5 + $0x1c4] ss:$16 sps:$4 sm:$0xff]   ;;  %v5511_v38 = vld [vmem:[#allocation5 + $0x1c0] ss:$16 sps:$4 sm:$0xff]  }
  0x6c   : > { %3587 = vmatpush1.bf16.msra.mxu1 %v5482_v19  ;;  %3515 = vmatprep.subr.bf16.mxu0 %v5483_v20  ;;  %v5509_v37 = vld [vmem:[#allocation5 + $0x3c4] ss:$16 sps:$4 sm:$0xff]   ;;  %v5512_v39 = vld [vmem:[#allocation5 + $0x3c0] ss:$16 sps:$4 sm:$0xff]  }
  0x6d   : > { %3588 = vmatprep.subr.bf16.mxu1 %v5485_v21  ;;  %v5513_v40 = vld [vmem:[#allocation5 + $0x1a4] ss:$16 sps:$4 sm:$0xff]   ;;  %v5517_v42 = vld [vmem:[#allocation5 + $0x1a0] ss:$16 sps:$4 sm:$0xff]  }
  0x6e   : > { %v5515_v41 = vld [vmem:[#allocation5 + $0x3a4] ss:$16 sps:$4 sm:$0xff]   ;;  %v5518_v43 = vld [vmem:[#allocation5 + $0x3a0] ss:$16 sps:$4 sm:$0xff]  }
  0x6f   : > { %3516 = vmatpush1.bf16.msra.mxu0 %v5487_v22  ;;  %v5519_v44 = vld [vmem:[#allocation5 + $0x184] ss:$16 sps:$4 sm:$0xff]   ;;  %v5523_v50 = vld [vmem:[#allocation5 + $0x180] ss:$16 sps:$4 sm:$0xff]   ;;  %v252_v22 = vld [vmem:[%s6533_s6 + $0x108] sm:$0xff] }
  0x70   : > { %3589 = vmatpush1.bf16.msra.mxu1 %v5488_v23  ;;  %3517 = vmatprep.subr.bf16.mxu0 %v5489_v24  ;;  %v5521_v45 = vld [vmem:[#allocation5 + $0x384] ss:$16 sps:$4 sm:$0xff]   ;;  %v5524_v51 = vld [vmem:[#allocation5 + $0x380] ss:$16 sps:$4 sm:$0xff]   ;;  %v268_v23 = vld [vmem:[%s6533_s6 + $0x188] sm:$0xff] }
  0x71   : > { %3590 = vmatprep.subr.bf16.mxu1 %v5491_v25  ;;  %v5525_v52 = vld [vmem:[#allocation5 + $0x164] ss:$16 sps:$4 sm:$0xff]   ;;  %v5529_v56 = vld [vmem:[#allocation5 + $0x160] ss:$16 sps:$4 sm:$0xff]   ;;  %v6565_v24 = vpack.c.bf16 %v268_v23, %v252_v22 }
  0x72   : > { %v5527_v55 = vld [vmem:[#allocation5 + $0x364] ss:$16 sps:$4 sm:$0xff]   ;;  %v5530_v57 = vld [vmem:[#allocation5 + $0x360] ss:$16 sps:$4 sm:$0xff]  }
  0x73   : > { %3518 = vmatpush1.bf16.msra.mxu0 %v5493_v26  ;;  %v5531_v58 = vld [vmem:[#allocation5 + $0x144] ss:$16 sps:$4 sm:$0xff]   ;;  %v5535_v60 = vld [vmem:[#allocation5 + $0x140] ss:$16 sps:$4 sm:$0xff]  }
  0x74   : > { %3591 = vmatpush1.bf16.msra.mxu1 %v5494_v27  ;;  %3519 = vmatprep.subr.bf16.mxu0 %v5495_v28  ;;  %v5533_v59 = vld [vmem:[#allocation5 + $0x344] ss:$16 sps:$4 sm:$0xff]   ;;  %v5536_v61 = vld [vmem:[#allocation5 + $0x340] ss:$16 sps:$4 sm:$0xff]   ;;  %v254_v27 = vld [vmem:[%s6533_s6 + $0x118] sm:$0xff] }
  0x75   : > { %3592 = vmatprep.subr.bf16.mxu1 %v5497_v29  ;;  %v5537_v62 = vld [vmem:[#allocation5 + $0x124] ss:$16 sps:$4 sm:$0xff]   ;;  %v5541_v0 = vld [vmem:[#allocation5 + $0x120] ss:$16 sps:$4 sm:$0xff]   ;;  %v270_v29 = vld [vmem:[%s6533_s6 + $0x198] sm:$0xff] }
  0x76   : > { %v5539_v63 = vld [vmem:[#allocation5 + $0x324] ss:$16 sps:$4 sm:$0xff]   ;;  %v5542_v1 = vld [vmem:[#allocation5 + $0x320] ss:$16 sps:$4 sm:$0xff]  }
  0x77   : > { %3520 = vmatpush1.bf16.msra.mxu0 %v5499_v30  ;;  %v5543_v2 = vld [vmem:[#allocation5 + $0x104] ss:$16 sps:$4 sm:$0xff]   ;;  %v5547_v4 = vld [vmem:[#allocation5 + $0x100] ss:$16 sps:$4 sm:$0xff]  }
  0x78   : > { %3593 = vmatpush1.bf16.msra.mxu1 %v5500_v31  ;;  %3521 = vmatprep.subr.bf16.mxu0 %v5501_v32  ;;  %v5545_v3 = vld [vmem:[#allocation5 + $0x304] ss:$16 sps:$4 sm:$0xff]   ;;  %v5548_v5 = vld [vmem:[#allocation5 + $0x300] ss:$16 sps:$4 sm:$0xff]   ;;  %v6573_v32 = vpack.c.bf16 %v270_v29, %v254_v27  ;;  %v226_v27 = vld [vmem:[%s6533_s6 + $0x38] sm:$0xff] }
  0x79   : > { %3594 = vmatprep.subr.bf16.mxu1 %v5503_v33  ;;  %v219_v6 = vld [vmem:[%s6533_s6] sm:$0xff]  ;;  %v221_v8 = vld [vmem:[%s6533_s6 + $0x10] sm:$0xff] }
  0x7a   : > { %v235_v7 = vld [vmem:[%s6533_s6 + $0x80] sm:$0xff]  ;;  %v237_v9 = vld [vmem:[%s6533_s6 + $0x90] sm:$0xff] }
  0x7b   : > { %3522 = vmatpush2.bf16.msra.mxu0 %v5505_v34  ;;  %v5551_v10 = vld [vmem:[#allocation5 + $0x4e4] ss:$16 sps:$4 sm:$0xff]   ;;  %v6557_v12 = vpack.c.bf16 %v235_v7, %v219_v6  ;;  %v6559_v13 = vpack.c.bf16 %v237_v9, %v221_v8  ;;  %v5549_v14 = vld [vmem:[#allocation5 + $0x4e0] ss:$16 sps:$4 sm:$0xff]   ;;  %v334_v7 = vld [vmem:[%s6533_s6 + $0x398] sm:$0xff] }
  0x7c   : > { %3595 = vmatpush2.bf16.msra.mxu1 %v5506_v35  ;;  %3523 = vmatprep.subr.bf16.mxu0 %v5507_v36  ;;  %v5554_v11 = vld [vmem:[#allocation5 + $0x6e4] ss:$16 sps:$4 sm:$0xff]   ;;  %v5552_v15 = vld [vmem:[#allocation5 + $0x6e0] ss:$16 sps:$4 sm:$0xff]  }
  0x7d   : > { %3596 = vmatprep.subr.bf16.mxu1 %v5509_v37  ;;  %v5557_v16 = vld [vmem:[#allocation5 + $0x4c4] ss:$16 sps:$4 sm:$0xff]   ;;  %v5555_v18 = vld [vmem:[#allocation5 + $0x4c0] ss:$16 sps:$4 sm:$0xff]  }
  0x7e   : > { %v5560_v17 = vld [vmem:[#allocation5 + $0x6c4] ss:$16 sps:$4 sm:$0xff]   ;;  %v5558_v19 = vld [vmem:[#allocation5 + $0x6c0] ss:$16 sps:$4 sm:$0xff]  }
  0x7f   : > { %3524 = vmatpush2.bf16.msra.mxu0 %v5511_v38  ;;  %v5563_v20 = vld [vmem:[#allocation5 + $0x4a4] ss:$16 sps:$4 sm:$0xff]   ;;  %v5561_v30 = vld [vmem:[#allocation5 + $0x4a0] ss:$16 sps:$4 sm:$0xff]  }
  0x80   : > { %3597 = vmatpush2.bf16.msra.mxu1 %v5512_v39  ;;  %3525 = vmatprep.subr.bf16.mxu0 %v5513_v40  ;;  %v5566_v21 = vld [vmem:[#allocation5 + $0x6a4] ss:$16 sps:$4 sm:$0xff]   ;;  %v5564_v31 = vld [vmem:[#allocation5 + $0x6a0] ss:$16 sps:$4 sm:$0xff]  }
  0x81   : > { %3598 = vmatprep.subr.bf16.mxu1 %v5515_v41  ;;  %v251_v25 = vld [vmem:[%s6533_s6 + $0x100] sm:$0xff]  ;;  %v253_v35 = vld [vmem:[%s6533_s6 + $0x110] sm:$0xff] }
  0x82   : > { %v267_v26 = vld [vmem:[%s6533_s6 + $0x180] sm:$0xff]  ;;  %v269_v36 = vld [vmem:[%s6533_s6 + $0x190] sm:$0xff] }
  0x83   : > { %3526 = vmatpush2.bf16.msra.mxu0 %v5517_v42  ;;  %v6570_v28 = vpack.c.bf16 %v267_v26, %v251_v25  ;;  %v5569_v33 = vld [vmem:[#allocation5 + $0x484] ss:$16 sps:$4 sm:$0xff]   ;;  %v5567_v37 = vld [vmem:[#allocation5 + $0x480] ss:$16 sps:$4 sm:$0xff]   ;;  %v6580_v39 = vpack.c.bf16 %v269_v36, %v253_v35  ;;  %v284_v42 = vld [vmem:[%s6533_s6 + $0x208] sm:$0xff] }
  0x84   : > { %3599 = vmatpush2.bf16.msra.mxu1 %v5518_v43  ;;  %3527 = vmatprep.subr.bf16.mxu0 %v5519_v44  ;;  %v5572_v34 = vld [vmem:[#allocation5 + $0x684] ss:$16 sps:$4 sm:$0xff]   ;;  %v5570_v38 = vld [vmem:[#allocation5 + $0x680] ss:$16 sps:$4 sm:$0xff]   ;;  %v300_v43 = vld [vmem:[%s6533_s6 + $0x288] sm:$0xff] }
  0x85   : > { %3600 = vmatprep.subr.bf16.mxu1 %v5521_v45  ;;  %v5575_v40 = vld [vmem:[#allocation5 + $0x464] ss:$16 sps:$4 sm:$0xff]   ;;  %v6585_v44 = vpack.c.bf16 %v300_v43, %v284_v42  ;;  %v5585_v8 = vld [vmem:[#allocation5 + $0x420] ss:$16 sps:$4 sm:$0xff]   ;;  %v224_v25 = vld [vmem:[%s6533_s6 + $0x28] sm:$0xff] }
  0x86   : > { %v5578_v41 = vld [vmem:[#allocation5 + $0x664] ss:$16 sps:$4 sm:$0xff]   ;;  %v5588_v9 = vld [vmem:[#allocation5 + $0x620] ss:$16 sps:$4 sm:$0xff]   ;;  %v240_v26 = vld [vmem:[%s6533_s6 + $0xa8] sm:$0xff] }
  0x87   : > { %3528 = vmatpush2.bf16.msra.mxu0 %v5523_v50  ;;  %v283_v45 = vld [vmem:[%s6533_s6 + $0x200] sm:$0xff] }
  0x88   : > { %3601 = vmatpush2.bf16.msra.mxu1 %v5524_v51  ;;  %3529 = vmatprep.subr.bf16.mxu0 %v5525_v52  ;;  %v299_v46 = vld [vmem:[%s6533_s6 + $0x280] sm:$0xff]  ;;  %v6593_v52 = vpack.c.bf16 %v302_v49, %v286_v47 }
  0x89   : > { %3602 = vmatprep.subr.bf16.mxu1 %v5527_v55  ;;  %v6590_v48 = vpack.c.bf16 %v299_v46, %v283_v45  ;;  %v5573_v50 = vld [vmem:[#allocation5 + $0x460] ss:$16 sps:$4 sm:$0xff]   ;;  %v5581_v55 = vld [vmem:[#allocation5 + $0x444] ss:$16 sps:$4 sm:$0xff]  }
  0x8a   : > { %v5576_v51 = vld [vmem:[#allocation5 + $0x660] ss:$16 sps:$4 sm:$0xff]   ;;  %v5605_v29 = vld [vmem:[#allocation5 + $0x5c4] ss:$16 sps:$4 sm:$0xff]  }
  0x8b   : > { %3530 = vmatpush2.bf16.msra.mxu0 %v5529_v56  ;;  %v5584_v56 = vld [vmem:[#allocation5 + $0x644] ss:$16 sps:$4 sm:$0xff]   ;;  %v5597_v22 = vld [vmem:[#allocation5 + $0x5e0] ss:$16 sps:$4 sm:$0xff]  }
  0x8c   : > { %3603 = vmatpush2.bf16.msra.mxu1 %v5530_v57  ;;  %3531 = vmatprep.subr.bf16.mxu0 %v5531_v58  ;;  %v285_v57 = vld [vmem:[%s6533_s6 + $0x210] sm:$0xff] }
  0x8d   : > { %3604 = vmatprep.subr.bf16.mxu1 %v5533_v59  ;;  %v301_v58 = vld [vmem:[%s6533_s6 + $0x290] sm:$0xff] }
  0x8e   : > { %v5579_v59 = vld [vmem:[#allocation5 + $0x440] ss:$16 sps:$4 sm:$0xff]   ;;  %v5617_v42 = vld [vmem:[#allocation5 + $0x584] ss:$16 sps:$4 sm:$0xff]  }
  0x8f   : > { %3532 = vmatpush2.bf16.msra.mxu0 %v5535_v60  ;;  %v5582_v60 = vld [vmem:[#allocation5 + $0x640] ss:$16 sps:$4 sm:$0xff]   ;;  %v5620_v43 = vld [vmem:[#allocation5 + $0x784] ss:$16 sps:$4 sm:$0xff]  }
  0x90   : > { %3605 = vmatpush2.bf16.msra.mxu1 %v5536_v61  ;;  %3533 = vmatprep.subr.bf16.mxu0 %v5537_v62  ;;  %v6600_v61 = vpack.c.bf16 %v301_v58, %v285_v57  ;;  %v5587_v62 = vld [vmem:[#allocation5 + $0x424] ss:$16 sps:$4 sm:$0xff]   ;;  %v5600_v23 = vld [vmem:[#allocation5 + $0x7e0] ss:$16 sps:$4 sm:$0xff]  }
  0x91   : > { %3606 = vmatprep.subr.bf16.mxu1 %v5539_v63  ;;  %v5590_v63 = vld [vmem:[#allocation5 + $0x624] ss:$16 sps:$4 sm:$0xff]   ;;  %v5603_v35 = vld [vmem:[#allocation5 + $0x5c0] ss:$16 sps:$4 sm:$0xff]  }
  0x92   : > { %v5606_v36 = vld [vmem:[#allocation5 + $0x7c0] ss:$16 sps:$4 sm:$0xff]   ;;  %v5623_v47 = vld [vmem:[#allocation5 + $0x564] ss:$16 sps:$4 sm:$0xff]  }
  0x93   : > { %3534 = vmatpush2.bf16.msra.mxu0 %v5541_v0  ;;  %v316_v0 = vld [vmem:[%s6533_s6 + $0x308] sm:$0xff]  ;;  %v5615_v45 = vld [vmem:[#allocation5 + $0x580] ss:$16 sps:$4 sm:$0xff]   ;;  %v5626_v49 = vld [vmem:[#allocation5 + $0x764] ss:$16 sps:$4 sm:$0xff]  }
  0x94   : > { %3607 = vmatpush2.bf16.msra.mxu1 %v5542_v1  ;;  %3535 = vmatprep.subr.bf16.mxu0 %v5543_v2  ;;  %v332_v1 = vld [vmem:[%s6533_s6 + $0x388] sm:$0xff]  ;;  %v5618_v46 = vld [vmem:[#allocation5 + $0x780] ss:$16 sps:$4 sm:$0xff]  }
  0x95   : > { %3608 = vmatprep.subr.bf16.mxu1 %v5545_v3  ;;  %v6605_v2 = vpack.c.bf16 %v332_v1, %v316_v0  ;;  %v315_v3 = vld [vmem:[%s6533_s6 + $0x300] sm:$0xff] }
  0x96   : > { %v5627_v57 = vld [vmem:[#allocation5 + $0x540] ss:$16 sps:$4 sm:$0xff]   ;;  %v5641_v0 = vld [vmem:[#allocation5 + $0x504] ss:$16 sps:$4 sm:$0xff]  }
  0x97   : > { %3536 = vmatpush2.bf16.msra.mxu0 %v5547_v4  ;;  %v331_v4 = vld [vmem:[%s6533_s6 + $0x380] sm:$0xff] }
  0x98   : > { %3609 = vmatpush2.bf16.msra.mxu1 %v5548_v5  ;;  %3651 = vmatprep.subr.bf16.mxu0 %v5551_v10  ;;  %v318_v5 = vld [vmem:[%s6533_s6 + $0x318] sm:$0xff]  ;;  %v6610_v6 = vpack.c.bf16 %v331_v4, %v315_v3  ;;  %v5630_v58 = vld [vmem:[#allocation5 + $0x740] ss:$16 sps:$4 sm:$0xff]   ;;  %v5644_v1 = vld [vmem:[#allocation5 + $0x704] ss:$16 sps:$4 sm:$0xff]  }
  0x99   : > { %3724 = vmatprep.subr.bf16.mxu1 %v5554_v11  ;;  %v6613_v10 = vpack.c.bf16 %v334_v7, %v318_v5  ;;  %v5593_v11 = vld [vmem:[#allocation5 + $0x404] ss:$16 sps:$4 sm:$0xff]   ;;  %v5639_v3 = vld [vmem:[#allocation5 + $0x500] ss:$16 sps:$4 sm:$0xff]  }
  0x9a   : > { %3538 = vmatmul.mubr.bf16.vlgmr.msra.gmra.mxu0 %v6557_v12  ;;  %v5642_v4 = vld [vmem:[#allocation5 + $0x700] ss:$16 sps:$4 sm:$0xff]  }
  0x9b   : > { %3611 = vmatmul.mubr.bf16.vlgmr.msra.gmra.mxu1 %v6559_v13  ;;  %3652 = vmatpush1.bf16.msra.mxu0 %v5549_v14  ;;  %v5596_v14 = vld [vmem:[#allocation5 + $0x604] ss:$16 sps:$4 sm:$0xff]  }
  0x9c   : > { %3725 = vmatpush1.bf16.msra.mxu1 %v5552_v15  ;;  %3653 = vmatprep.subr.bf16.mxu0 %v5557_v16  ;;  %v317_v15 = vld [vmem:[%s6533_s6 + $0x310] sm:$0xff]  ;;  %v223_v5 = vld [vmem:[%s6533_s6 + $0x20] sm:$0xff] }
  0x9d   : > { %3726 = vmatprep.subr.bf16.mxu1 %v5560_v17  ;;  %3547 = vmatprep.mubr.bf16.mxu0 %v6565_v24  ;;  %v333_v16 = vld [vmem:[%s6533_s6 + $0x390] sm:$0xff]  ;;  %v239_v7 = vld [vmem:[%s6533_s6 + $0xa0] sm:$0xff] }
  0x9e   : > { %3620 = vmatprep.mubr.bf16.mxu1 %v6573_v32  ;;  %v5591_v17 = vld [vmem:[#allocation5 + $0x400] ss:$16 sps:$4 sm:$0xff]  }
  0x9f   : > { %3654 = vmatpush1.bf16.msra.mxu0 %v5555_v18  ;;  %v5594_v18 = vld [vmem:[#allocation5 + $0x600] ss:$16 sps:$4 sm:$0xff]  }
  0xa0   : > { %3727 = vmatpush1.bf16.msra.mxu1 %v5558_v19  ;;  %3655 = vmatprep.subr.bf16.mxu0 %v5563_v20  ;;  %v6620_v19 = vpack.c.bf16 %v333_v16, %v317_v15  ;;  %v5599_v20 = vld [vmem:[#allocation5 + $0x5e4] ss:$16 sps:$4 sm:$0xff]   ;;  %v5645_v15 = vld [vmem:[#allocation5 + $0x8e0] ss:$16 sps:$4 sm:$0xff]  }
  0xa1   : > { %3728 = vmatprep.subr.bf16.mxu1 %v5566_v21  ;;  %v5602_v21 = vld [vmem:[#allocation5 + $0x7e4] ss:$16 sps:$4 sm:$0xff]   ;;  %v5648_v16 = vld [vmem:[#allocation5 + $0xae0] ss:$16 sps:$4 sm:$0xff]  }
  0xa2   : > { %3548 = vmatmul.mubr.bf16.gmra.mxu0 %v6570_v28 }
  0xa3   : > { %3656 = vmatpush1.bf16.msra.mxu0 %v5561_v30  ;;  %3621 = vmatmul.mubr.bf16.gmra.mxu1 %v6580_v39  ;;  %v5608_v30 = vld [vmem:[#allocation5 + $0x7c4] ss:$16 sps:$4 sm:$0xff]  }
  0xa4   : > { %3729 = vmatpush1.bf16.msra.mxu1 %v5564_v31  ;;  %3657 = vmatprep.subr.bf16.mxu0 %v5569_v33  ;;  %v6626_v31 = vpack.c.bf16 %v240_v26, %v224_v25  ;;  %v242_v33 = vld [vmem:[%s6533_s6 + $0xb8] sm:$0xff]  ;;  %v5653_v25 = vld [vmem:[#allocation5 + $0x8c4] ss:$16 sps:$4 sm:$0xff]  }
  0xa5   : > { %3730 = vmatprep.subr.bf16.mxu1 %v5572_v34  ;;  %3557 = vmatprep.mubr.bf16.mxu0 %v6585_v44  ;;  %v6629_v34 = vpack.c.bf16 %v242_v33, %v226_v27  ;;  %v5656_v26 = vld [vmem:[#allocation5 + $0xac4] ss:$16 sps:$4 sm:$0xff]   ;;  %v5651_v27 = vld [vmem:[#allocation5 + $0x8c0] ss:$16 sps:$4 sm:$0xff]  }
  0xa6   : > { %3630 = vmatprep.mubr.bf16.mxu1 %v6593_v52  ;;  %v255_v33 = vld [vmem:[%s6533_s6 + $0x120] sm:$0xff] }
  0xa7   : > { %3658 = vmatpush1.bf16.msra.mxu0 %v5567_v37  ;;  %v5611_v37 = vld [vmem:[#allocation5 + $0x5a4] ss:$16 sps:$4 sm:$0xff]  }
  0xa8   : > { %3731 = vmatpush1.bf16.msra.mxu1 %v5570_v38  ;;  %3659 = vmatprep.subr.bf16.mxu0 %v5575_v40  ;;  %v5614_v38 = vld [vmem:[#allocation5 + $0x7a4] ss:$16 sps:$4 sm:$0xff]   ;;  %v5609_v40 = vld [vmem:[#allocation5 + $0x5a0] ss:$16 sps:$4 sm:$0xff]  }
  0xa9   : > { %3732 = vmatprep.subr.bf16.mxu1 %v5578_v41  ;;  %v5612_v41 = vld [vmem:[#allocation5 + $0x7a0] ss:$16 sps:$4 sm:$0xff]  }
  0xaa   : > { %3558 = vmatmul.mubr.bf16.gmra.mxu0 %v6590_v48 }
  0xab   : > { %3660 = vmatpush1.bf16.msra.mxu0 %v5573_v50  ;;  %3631 = vmatmul.mubr.bf16.gmra.mxu1 %v6600_v61  ;;  %v5621_v50 = vld [vmem:[#allocation5 + $0x560] ss:$16 sps:$4 sm:$0xff]  }
  0xac   : > { %3733 = vmatpush1.bf16.msra.mxu1 %v5576_v51  ;;  %3661 = vmatprep.subr.bf16.mxu0 %v5581_v55  ;;  %v5624_v51 = vld [vmem:[#allocation5 + $0x760] ss:$16 sps:$4 sm:$0xff]   ;;  %v5629_v55 = vld [vmem:[#allocation5 + $0x544] ss:$16 sps:$4 sm:$0xff]  }
  0xad   : > { %3734 = vmatprep.subr.bf16.mxu1 %v5584_v56  ;;  %3567 = vmatprep.mubr.bf16.mxu0 %v6605_v2  ;;  %v5632_v56 = vld [vmem:[#allocation5 + $0x744] ss:$16 sps:$4 sm:$0xff]  }
  0xae   : > { %3640 = vmatprep.mubr.bf16.mxu1 %v6613_v10 }
  0xaf   : > { %3662 = vmatpush1.bf16.msra.mxu0 %v5579_v59  ;;  %v5635_v59 = vld [vmem:[#allocation5 + $0x524] ss:$16 sps:$4 sm:$0xff]  }
  0xb0   : > { %3735 = vmatpush1.bf16.msra.mxu1 %v5582_v60  ;;  %3663 = vmatprep.subr.bf16.mxu0 %v5587_v62  ;;  %v5638_v60 = vld [vmem:[#allocation5 + $0x724] ss:$16 sps:$4 sm:$0xff]   ;;  %v5633_v62 = vld [vmem:[#allocation5 + $0x520] ss:$16 sps:$4 sm:$0xff]  }
  0xb1   : > { %3736 = vmatprep.subr.bf16.mxu1 %v5590_v63  ;;  %v5636_v63 = vld [vmem:[#allocation5 + $0x720] ss:$16 sps:$4 sm:$0xff]  }
  0xb2   : > { %3568 = vmatmul.mubr.bf16.gmra.mxu0 %v6610_v6 }
  0xb3   : > { %3664 = vmatpush1.bf16.msra.mxu0 %v5585_v8  ;;  %3641 = vmatmul.mubr.bf16.gmra.mxu1 %v6620_v19  ;;  %v225_v8 = vld [vmem:[%s6533_s6 + $0x30] sm:$0xff] }
  0xb4   : > { %3737 = vmatpush1.bf16.msra.mxu1 %v5588_v9  ;;  %3665 = vmatprep.subr.bf16.mxu0 %v5593_v11  ;;  %v241_v9 = vld [vmem:[%s6533_s6 + $0xb0] sm:$0xff] }
  0xb5   : > { %3738 = vmatprep.subr.bf16.mxu1 %v5596_v14  ;;  %3683 = vmatprep.mubr.bf16.mxu0 %v6626_v31  ;;  %v5647_v11 = vld [vmem:[#allocation5 + $0x8e4] ss:$16 sps:$4 sm:$0xff]  }
  0xb6   : > { %3756 = vmatprep.mubr.bf16.mxu1 %v6629_v34  ;;  %v5650_v14 = vld [vmem:[#allocation5 + $0xae4] ss:$16 sps:$4 sm:$0xff]  }
  0xb7   : > { %3666 = vmatpush1.bf16.msra.mxu0 %v5591_v17  ;;  %v256_v17 = vld [vmem:[%s6533_s6 + $0x128] sm:$0xff] }
  0xb8   : > { %3739 = vmatpush1.bf16.msra.mxu1 %v5594_v18  ;;  %3667 = vmatprep.subr.bf16.mxu0 %v5599_v20  ;;  %v272_v18 = vld [vmem:[%s6533_s6 + $0x1a8] sm:$0xff]  ;;  %v6639_v20 = vpack.c.bf16 %v239_v7, %v223_v5  ;;  %v5669_v5 = vld [vmem:[#allocation5 + $0x860] ss:$16 sps:$4 sm:$0xff]  }
  0xb9   : > { %3740 = vmatprep.subr.bf16.mxu1 %v5602_v21  ;;  %v6641_v21 = vpack.c.bf16 %v241_v9, %v225_v8  ;;  %v5672_v7 = vld [vmem:[#allocation5 + $0xa60] ss:$16 sps:$4 sm:$0xff]   ;;  %v320_v8 = vld [vmem:[%s6533_s6 + $0x328] sm:$0xff] }
  0xba   : > { %v336_v9 = vld [vmem:[%s6533_s6 + $0x3a8] sm:$0xff] }
  0xbb   : > { %3668 = vmatpush2.bf16.msra.mxu0 %v5597_v22  ;;  %v258_v22 = vld [vmem:[%s6533_s6 + $0x138] sm:$0xff] }
  0xbc   : > { %3741 = vmatpush2.bf16.msra.mxu1 %v5600_v23  ;;  %3669 = vmatprep.subr.bf16.mxu0 %v5605_v29  ;;  %v274_v23 = vld [vmem:[%s6533_s6 + $0x1b8] sm:$0xff]  ;;  %v5654_v29 = vld [vmem:[#allocation5 + $0xac0] ss:$16 sps:$4 sm:$0xff]  }
  0xbd   : > { %3742 = vmatprep.subr.bf16.mxu1 %v5608_v30  ;;  %v6645_v30 = vpack.c.bf16 %v272_v18, %v256_v17  ;;  %v5677_v17 = vld [vmem:[#allocation5 + $0x844] ss:$16 sps:$4 sm:$0xff]  }
  0xbe   : > { %v5680_v18 = vld [vmem:[#allocation5 + $0xa44] ss:$16 sps:$4 sm:$0xff]  }
  0xbf   : > { %3670 = vmatpush2.bf16.msra.mxu0 %v5603_v35  ;;  %v271_v35 = vld [vmem:[%s6533_s6 + $0x1a0] sm:$0xff] }
  0xc0   : > { %3743 = vmatpush2.bf16.msra.mxu1 %v5606_v36  ;;  %3671 = vmatprep.subr.bf16.mxu0 %v5611_v37  ;;  %v6649_v36 = vpack.c.bf16 %v274_v23, %v258_v22  ;;  %v5659_v37 = vld [vmem:[#allocation5 + $0x8a4] ss:$16 sps:$4 sm:$0xff]   ;;  %v5675_v22 = vld [vmem:[#allocation5 + $0x840] ss:$16 sps:$4 sm:$0xff]  }
  0xc1   : > { %3744 = vmatprep.subr.bf16.mxu1 %v5614_v38  ;;  %v257_v38 = vld [vmem:[%s6533_s6 + $0x130] sm:$0xff] }
  0xc2   : > { %v5678_v23 = vld [vmem:[#allocation5 + $0xa40] ss:$16 sps:$4 sm:$0xff]  }
  0xc3   : > { %3672 = vmatpush2.bf16.msra.mxu0 %v5609_v40  ;;  %v273_v40 = vld [vmem:[%s6533_s6 + $0x1b0] sm:$0xff] }
  0xc4   : > { %3745 = vmatpush2.bf16.msra.mxu1 %v5612_v41  ;;  %3673 = vmatprep.subr.bf16.mxu0 %v5617_v42  ;;  %v5662_v41 = vld [vmem:[#allocation5 + $0xaa4] ss:$16 sps:$4 sm:$0xff]   ;;  %v5657_v42 = vld [vmem:[#allocation5 + $0x8a0] ss:$16 sps:$4 sm:$0xff]  }
  0xc5   : > { %3746 = vmatprep.subr.bf16.mxu1 %v5620_v43  ;;  %v5660_v43 = vld [vmem:[#allocation5 + $0xaa0] ss:$16 sps:$4 sm:$0xff]  }
  0xc7   : > { %3674 = vmatpush2.bf16.msra.mxu0 %v5615_v45  ;;  %v288_v45 = vld [vmem:[%s6533_s6 + $0x228] sm:$0xff] }
  0xc8   : > { %3747 = vmatpush2.bf16.msra.mxu1 %v5618_v46  ;;  %3675 = vmatprep.subr.bf16.mxu0 %v5623_v47  ;;  %v304_v46 = vld [vmem:[%s6533_s6 + $0x2a8] sm:$0xff]  ;;  %v6659_v47 = vpack.c.bf16 %v271_v35, %v255_v33  ;;  %v321_v33 = vld [vmem:[%s6533_s6 + $0x330] sm:$0xff] }
  0xc9   : > { %3748 = vmatprep.subr.bf16.mxu1 %v5626_v49  ;;  %v6661_v49 = vpack.c.bf16 %v273_v40, %v257_v38  ;;  %v337_v35 = vld [vmem:[%s6533_s6 + $0x3b0] sm:$0xff] }
  0xca   : > { %v5686_v38 = vld [vmem:[#allocation5 + $0xa24] ss:$16 sps:$4 sm:$0xff]   ;;  %v5681_v40 = vld [vmem:[#allocation5 + $0x820] ss:$16 sps:$4 sm:$0xff]  }
  0xcb   : > { %3676 = vmatpush2.bf16.msra.mxu0 %v5621_v50  ;;  %v290_v50 = vld [vmem:[%s6533_s6 + $0x238] sm:$0xff] }
  0xcc   : > { %3749 = vmatpush2.bf16.msra.mxu1 %v5624_v51  ;;  %3677 = vmatprep.subr.bf16.mxu0 %v5629_v55  ;;  %v306_v51 = vld [vmem:[%s6533_s6 + $0x2b8] sm:$0xff]  ;;  %v5665_v55 = vld [vmem:[#allocation5 + $0x884] ss:$16 sps:$4 sm:$0xff]  }
  0xcd   : > { %3750 = vmatprep.subr.bf16.mxu1 %v5632_v56  ;;  %v5668_v56 = vld [vmem:[#allocation5 + $0xa84] ss:$16 sps:$4 sm:$0xff]  }
  0xcf   : > { %3678 = vmatpush2.bf16.msra.mxu0 %v5627_v57  ;;  %v5663_v57 = vld [vmem:[#allocation5 + $0x880] ss:$16 sps:$4 sm:$0xff]  }
  0xd0   : > { %3751 = vmatpush2.bf16.msra.mxu1 %v5630_v58  ;;  %3679 = vmatprep.subr.bf16.mxu0 %v5635_v59  ;;  %v5666_v58 = vld [vmem:[#allocation5 + $0xa80] ss:$16 sps:$4 sm:$0xff]   ;;  %v6665_v59 = vpack.c.bf16 %v304_v46, %v288_v45  ;;  %v6700_v45 = vpack.c.bf16 %v337_v35, %v321_v33  ;;  %v244_v46 = vld [vmem:[%s6533_s6 + $0xc8] sm:$0xff]  ;;  %v5719_v33 = vld [vmem:[#allocation5 + $0x964] ss:$16 sps:$4 sm:$0xff]  }
  0xd1   : > { %3752 = vmatprep.subr.bf16.mxu1 %v5638_v60  ;;  %v287_v60 = vld [vmem:[%s6533_s6 + $0x220] sm:$0xff] }
  0xd2   : > { %v5722_v35 = vld [vmem:[#allocation5 + $0xb64] ss:$16 sps:$4 sm:$0xff]  }
  0xd3   : > { %3680 = vmatpush2.bf16.msra.mxu0 %v5633_v62  ;;  %v303_v62 = vld [vmem:[%s6533_s6 + $0x2a0] sm:$0xff] }
  0xd4   : > { %3753 = vmatpush2.bf16.msra.mxu1 %v5636_v63  ;;  %3681 = vmatprep.subr.bf16.mxu0 %v5641_v0  ;;  %v6669_v63 = vpack.c.bf16 %v306_v51, %v290_v50  ;;  %v5671_v0 = vld [vmem:[#allocation5 + $0x864] ss:$16 sps:$4 sm:$0xff]   ;;  %v230_v50 = vld [vmem:[%s6533_s6 + $0x58] sm:$0xff] }
  0xd5   : > { %3754 = vmatprep.subr.bf16.mxu1 %v5644_v1  ;;  %v289_v1 = vld [vmem:[%s6533_s6 + $0x230] sm:$0xff]  ;;  %v246_v51 = vld [vmem:[%s6533_s6 + $0xd8] sm:$0xff] }
  0xd7   : > { %3682 = vmatpush2.bf16.msra.mxu0 %v5639_v3  ;;  %v305_v3 = vld [vmem:[%s6533_s6 + $0x2b0] sm:$0xff] }
  0xd8   : > { %3755 = vmatpush2.bf16.msra.mxu1 %v5642_v4  ;;  %3797 = vmatprep.subr.bf16.mxu0 %v5647_v11  ;;  %v5674_v4 = vld [vmem:[#allocation5 + $0xa64] ss:$16 sps:$4 sm:$0xff]   ;;  %v6679_v11 = vpack.c.bf16 %v303_v62, %v287_v60  ;;  %v5687_v60 = vld [vmem:[#allocation5 + $0x800] ss:$16 sps:$4 sm:$0xff]  }
  0xd9   : > { %3870 = vmatprep.subr.bf16.mxu1 %v5650_v14  ;;  %v6681_v14 = vpack.c.bf16 %v305_v3, %v289_v1  ;;  %v5690_v62 = vld [vmem:[#allocation5 + $0xa00] ss:$16 sps:$4 sm:$0xff]   ;;  %v5698_v1 = vld [vmem:[#allocation5 + $0xbe4] ss:$16 sps:$4 sm:$0xff]  }
  0xda   : > { %3684 = vmatmul.mubr.bf16.vlgmr.msra.gmra.mxu0 %v6639_v20  ;;  %v5693_v3 = vld [vmem:[#allocation5 + $0x9e0] ss:$16 sps:$4 sm:$0xff]  }
  0xdb   : > { %3757 = vmatmul.mubr.bf16.vlgmr.msra.gmra.mxu1 %v6641_v21  ;;  %3798 = vmatpush1.bf16.msra.mxu0 %v5645_v15  ;;  %v322_v15 = vld [vmem:[%s6533_s6 + $0x338] sm:$0xff] }
  0xdc   : > { %3871 = vmatpush1.bf16.msra.mxu1 %v5648_v16  ;;  %3799 = vmatprep.subr.bf16.mxu0 %v5653_v25  ;;  %v338_v16 = vld [vmem:[%s6533_s6 + $0x3b8] sm:$0xff]  ;;  %v6685_v25 = vpack.c.bf16 %v336_v9, %v320_v8  ;;  %v5699_v8 = vld [vmem:[#allocation5 + $0x9c0] ss:$16 sps:$4 sm:$0xff]  }
  0xdd   : > { %3872 = vmatprep.subr.bf16.mxu1 %v5656_v26  ;;  %3693 = vmatprep.mubr.bf16.mxu0 %v6645_v30  ;;  %v319_v26 = vld [vmem:[%s6533_s6 + $0x320] sm:$0xff] }
  0xde   : > { %3766 = vmatprep.mubr.bf16.mxu1 %v6649_v36  ;;  %v5702_v9 = vld [vmem:[#allocation5 + $0xbc0] ss:$16 sps:$4 sm:$0xff]  }
  0xdf   : > { %3800 = vmatpush1.bf16.msra.mxu0 %v5651_v27  ;;  %v6688_v27 = vpack.c.bf16 %v338_v16, %v322_v15  ;;  %v5707_v15 = vld [vmem:[#allocation5 + $0x9a4] ss:$16 sps:$4 sm:$0xff]  }
  0xe0   : > { %3873 = vmatpush1.bf16.msra.mxu1 %v5654_v29  ;;  %3801 = vmatprep.subr.bf16.mxu0 %v5659_v37  ;;  %v335_v29 = vld [vmem:[%s6533_s6 + $0x3a0] sm:$0xff] }
  0xe1   : > { %3874 = vmatprep.subr.bf16.mxu1 %v5662_v41  ;;  %v5683_v37 = vld [vmem:[#allocation5 + $0x824] ss:$16 sps:$4 sm:$0xff]   ;;  %v5684_v41 = vld [vmem:[#allocation5 + $0xa20] ss:$16 sps:$4 sm:$0xff]  }
  0xe2   : > { %3694 = vmatmul.mubr.bf16.gmra.mxu0 %v6659_v47  ;;  %v5710_v16 = vld [vmem:[#allocation5 + $0xba4] ss:$16 sps:$4 sm:$0xff]  }
  0xe3   : > { %3767 = vmatmul.mubr.bf16.gmra.mxu1 %v6661_v49  ;;  %3802 = vmatpush1.bf16.msra.mxu0 %v5657_v42  ;;  %v228_v42 = vld [vmem:[%s6533_s6 + $0x48] sm:$0xff] }
  0xe4   : > { %3875 = vmatpush1.bf16.msra.mxu1 %v5660_v43  ;;  %3803 = vmatprep.subr.bf16.mxu0 %v5665_v55  ;;  %v6698_v43 = vpack.c.bf16 %v335_v29, %v319_v26  ;;  %v5689_v55 = vld [vmem:[#allocation5 + $0x804] ss:$16 sps:$4 sm:$0xff]   ;;  %v5711_v26 = vld [vmem:[#allocation5 + $0x980] ss:$16 sps:$4 sm:$0xff]  }
  0xe5   : > { %3876 = vmatprep.subr.bf16.mxu1 %v5668_v56  ;;  %3703 = vmatprep.mubr.bf16.mxu0 %v6665_v59  ;;  %v5692_v56 = vld [vmem:[#allocation5 + $0xa04] ss:$16 sps:$4 sm:$0xff]   ;;  %v5714_v29 = vld [vmem:[#allocation5 + $0xb80] ss:$16 sps:$4 sm:$0xff]  }
  0xe6   : > { %3776 = vmatprep.mubr.bf16.mxu1 %v6669_v63 }
  0xe7   : > { %3804 = vmatpush1.bf16.msra.mxu0 %v5663_v57  ;;  %v6705_v57 = vpack.c.bf16 %v244_v46, %v228_v42  ;;  %v5723_v42 = vld [vmem:[#allocation5 + $0x940] ss:$16 sps:$4 sm:$0xff]  }
  0xe8   : > { %3877 = vmatpush1.bf16.msra.mxu1 %v5666_v58  ;;  %3805 = vmatprep.subr.bf16.mxu0 %v5671_v0  ;;  %v6707_v58 = vpack.c.bf16 %v246_v51, %v230_v50  ;;  %v5695_v0 = vld [vmem:[#allocation5 + $0x9e4] ss:$16 sps:$4 sm:$0xff]   ;;  %v5726_v46 = vld [vmem:[#allocation5 + $0xb40] ss:$16 sps:$4 sm:$0xff]  }
  0xe9   : > { %3878 = vmatprep.subr.bf16.mxu1 %v5674_v4  ;;  %v5696_v4 = vld [vmem:[#allocation5 + $0xbe0] ss:$16 sps:$4 sm:$0xff]   ;;  %v5731_v50 = vld [vmem:[#allocation5 + $0x924] ss:$16 sps:$4 sm:$0xff]  }
  0xea   : > { %3704 = vmatmul.mubr.bf16.gmra.mxu0 %v6679_v11  ;;  %v5734_v51 = vld [vmem:[#allocation5 + $0xb24] ss:$16 sps:$4 sm:$0xff]  }
  0xeb   : > { %3777 = vmatmul.mubr.bf16.gmra.mxu1 %v6681_v14  ;;  %3806 = vmatpush1.bf16.msra.mxu0 %v5669_v5  ;;  %v5701_v5 = vld [vmem:[#allocation5 + $0x9c4] ss:$16 sps:$4 sm:$0xff]  }
  0xec   : > { %3879 = vmatpush1.bf16.msra.mxu1 %v5672_v7  ;;  %3807 = vmatprep.subr.bf16.mxu0 %v5677_v17  ;;  %v5704_v7 = vld [vmem:[#allocation5 + $0xbc4] ss:$16 sps:$4 sm:$0xff]   ;;  %v5705_v17 = vld [vmem:[#allocation5 + $0x9a0] ss:$16 sps:$4 sm:$0xff]  }
  0xed   : > { %3880 = vmatprep.subr.bf16.mxu1 %v5680_v18  ;;  %3713 = vmatprep.mubr.bf16.mxu0 %v6685_v25  ;;  %v5708_v18 = vld [vmem:[#allocation5 + $0xba0] ss:$16 sps:$4 sm:$0xff]  }
  0xee   : > { %3786 = vmatprep.mubr.bf16.mxu1 %v6688_v27 }
  0xef   : > { %3808 = vmatpush1.bf16.msra.mxu0 %v5675_v22  ;;  %v5713_v22 = vld [vmem:[#allocation5 + $0x984] ss:$16 sps:$4 sm:$0xff]  }
  0xf0   : > { %3881 = vmatpush1.bf16.msra.mxu1 %v5678_v23  ;;  %3809 = vmatprep.subr.bf16.mxu0 %v5683_v37  ;;  %v5716_v23 = vld [vmem:[#allocation5 + $0xb84] ss:$16 sps:$4 sm:$0xff]   ;;  %v5717_v37 = vld [vmem:[#allocation5 + $0x960] ss:$16 sps:$4 sm:$0xff]  }
  0xf1   : > { %3882 = vmatprep.subr.bf16.mxu1 %v5686_v38  ;;  %v5720_v38 = vld [vmem:[#allocation5 + $0xb60] ss:$16 sps:$4 sm:$0xff]  }
  0xf2   : > { %3714 = vmatmul.mubr.bf16.gmra.mxu0 %v6698_v43 }
  0xf3   : > { %3787 = vmatmul.mubr.bf16.gmra.mxu1 %v6700_v45  ;;  %3810 = vmatpush1.bf16.msra.mxu0 %v5681_v40  ;;  %v5725_v40 = vld [vmem:[#allocation5 + $0x944] ss:$16 sps:$4 sm:$0xff]  }
  0xf4   : > { %3883 = vmatpush1.bf16.msra.mxu1 %v5684_v41  ;;  %3811 = vmatprep.subr.bf16.mxu0 %v5689_v55  ;;  %v5728_v41 = vld [vmem:[#allocation5 + $0xb44] ss:$16 sps:$4 sm:$0xff]   ;;  %v5729_v55 = vld [vmem:[#allocation5 + $0x920] ss:$16 sps:$4 sm:$0xff]  }
  0xf5   : > { %3884 = vmatprep.subr.bf16.mxu1 %v5692_v56  ;;  %3829 = vmatprep.mubr.bf16.mxu0 %v6705_v57  ;;  %v5732_v56 = vld [vmem:[#allocation5 + $0xb20] ss:$16 sps:$4 sm:$0xff]  }
  0xf6   : > { %3902 = vmatprep.mubr.bf16.mxu1 %v6707_v58 }
  0xf7   : > { %3812 = vmatpush1.bf16.msra.mxu0 %v5687_v60  ;;  %v5737_v60 = vld [vmem:[#allocation5 + $0x904] ss:$16 sps:$4 sm:$0xff]  }
  0xf8   : > { %3885 = vmatpush1.bf16.msra.mxu1 %v5690_v62  ;;  %3813 = vmatprep.subr.bf16.mxu0 %v5695_v0  ;;  %v5740_v62 = vld [vmem:[#allocation5 + $0xb04] ss:$16 sps:$4 sm:$0xff]   ;;  %v5735_v0 = vld [vmem:[#allocation5 + $0x900] ss:$16 sps:$4 sm:$0xff]  }
  0xf9   : > { %3886 = vmatprep.subr.bf16.mxu1 %v5698_v1  ;;  %v5738_v1 = vld [vmem:[#allocation5 + $0xb00] ss:$16 sps:$4 sm:$0xff]  }
  0xfb   : > { %3814 = vmatpush2.bf16.msra.mxu0 %v5693_v3  ;;  %v227_v3 = vld [vmem:[%s6533_s6 + $0x40] sm:$0xff] }
  0xfc   : > { %3887 = vmatpush2.bf16.msra.mxu1 %v5696_v4  ;;  %3815 = vmatprep.subr.bf16.mxu0 %v5701_v5  ;;  %v243_v4 = vld [vmem:[%s6533_s6 + $0xc0] sm:$0xff]  ;;  %v229_v5 = vld [vmem:[%s6533_s6 + $0x50] sm:$0xff] }
  0xfd   : > { %3888 = vmatprep.subr.bf16.mxu1 %v5704_v7  ;;  %v245_v7 = vld [vmem:[%s6533_s6 + $0xd0] sm:$0xff] }
  0xff   : > { %3816 = vmatpush2.bf16.msra.mxu0 %v5699_v8  ;;  %v5743_v8 = vld [vmem:[#allocation5 + $0xce4] ss:$16 sps:$4 sm:$0xff]  }
 0x100   : > { %3889 = vmatpush2.bf16.msra.mxu1 %v5702_v9  ;;  %3817 = vmatprep.subr.bf16.mxu0 %v5707_v15  ;;  %v5746_v9 = vld [vmem:[#allocation5 + $0xee4] ss:$16 sps:$4 sm:$0xff]   ;;  %v5741_v15 = vld [vmem:[#allocation5 + $0xce0] ss:$16 sps:$4 sm:$0xff]  }
 0x101   : > { %3890 = vmatprep.subr.bf16.mxu1 %v5710_v16  ;;  %v5744_v16 = vld [vmem:[#allocation5 + $0xee0] ss:$16 sps:$4 sm:$0xff]  }
 0x103   : > { %3818 = vmatpush2.bf16.msra.mxu0 %v5705_v17  ;;  %v260_v17 = vld [vmem:[%s6533_s6 + $0x148] sm:$0xff] }
 0x104   : > { %3891 = vmatpush2.bf16.msra.mxu1 %v5708_v18  ;;  %3819 = vmatprep.subr.bf16.mxu0 %v5713_v22  ;;  %v276_v18 = vld [vmem:[%s6533_s6 + $0x1c8] sm:$0xff]  ;;  %v6719_v22 = vpack.c.bf16 %v243_v4, %v227_v3 }
 0x105   : > { %3892 = vmatprep.subr.bf16.mxu1 %v5716_v23  ;;  %v6721_v23 = vpack.c.bf16 %v245_v7, %v229_v5  ;;  %v294_v5 = vld [vmem:[%s6533_s6 + $0x258] sm:$0xff] }
 0x106   : > { %7555 = vst [vmem:[#allocation12_spill] sm:$0xff] %v6719_v22  ;;  %v310_v7 = vld [vmem:[%s6533_s6 + $0x2d8] sm:$0xff] }
 0x107   : > { %3820 = vmatpush2.bf16.msra.mxu0 %v5711_v26  ;;  %7556 = vst [vmem:[#allocation13_spill] sm:$0xff] %v6721_v23  ;;  %v262_v26 = vld [vmem:[%s6533_s6 + $0x158] sm:$0xff] }
 0x108   : > { %3893 = vmatpush2.bf16.msra.mxu1 %v5714_v29  ;;  %3821 = vmatprep.subr.bf16.mxu0 %v5719_v33  ;;  %v278_v29 = vld [vmem:[%s6533_s6 + $0x1d8] sm:$0xff]  ;;  %v5749_v33 = vld [vmem:[#allocation5 + $0xcc4] ss:$16 sps:$4 sm:$0xff]  }
 0x109   : > { %3894 = vmatprep.subr.bf16.mxu1 %v5722_v35  ;;  %v5752_v35 = vld [vmem:[#allocation5 + $0xec4] ss:$16 sps:$4 sm:$0xff]  }
 0x10b   : > { %3822 = vmatpush2.bf16.msra.mxu0 %v5717_v37  ;;  %v5747_v37 = vld [vmem:[#allocation5 + $0xcc0] ss:$16 sps:$4 sm:$0xff]  }
 0x10c   : > { %3895 = vmatpush2.bf16.msra.mxu1 %v5720_v38  ;;  %3823 = vmatprep.subr.bf16.mxu0 %v5725_v40  ;;  %v5750_v38 = vld [vmem:[#allocation5 + $0xec0] ss:$16 sps:$4 sm:$0xff]   ;;  %v6725_v40 = vpack.c.bf16 %v276_v18, %v260_v17  ;;  %v6747_v17 = vpack.c.bf16 %v310_v7, %v294_v5 }
 0x10d   : > { %3896 = vmatprep.subr.bf16.mxu1 %v5728_v41  ;;  %v259_v41 = vld [vmem:[%s6533_s6 + $0x140] sm:$0xff] }
 0x10e   : > { %7557 = vst [vmem:[#allocation14_spill] sm:$0xff] %v6725_v40  ;;  %7562 = vst [vmem:[#allocation19_spill] sm:$0xff] %v6747_v17  ;;  %v5762_v18 = vld [vmem:[#allocation5 + $0xe80] ss:$16 sps:$4 sm:$0xff]  }
 0x10f   : > { %3824 = vmatpush2.bf16.msra.mxu0 %v5723_v42  ;;  %v275_v42 = vld [vmem:[%s6533_s6 + $0x1c0] sm:$0xff] }
 0x110   : > { %3897 = vmatpush2.bf16.msra.mxu1 %v5726_v46  ;;  %3825 = vmatprep.subr.bf16.mxu0 %v5731_v50  ;;  %v6729_v46 = vpack.c.bf16 %v278_v29, %v262_v26  ;;  %v5755_v50 = vld [vmem:[#allocation5 + $0xca4] ss:$16 sps:$4 sm:$0xff]   ;;  %v6739_v3 = vpack.c.bf16 %v275_v42, %v259_v41  ;;  %v324_v41 = vld [vmem:[%s6533_s6 + $0x348] sm:$0xff]  ;;  %v5765_v42 = vld [vmem:[#allocation5 + $0xc60] ss:$16 sps:$4 sm:$0xff]  }
 0x111   : > { %3898 = vmatprep.subr.bf16.mxu1 %v5734_v51  ;;  %v261_v51 = vld [vmem:[%s6533_s6 + $0x150] sm:$0xff]  ;;  %v291_v26 = vld [vmem:[%s6533_s6 + $0x240] sm:$0xff] }
 0x112   : > { %7558 = vst [vmem:[#allocation15_spill] sm:$0xff] %v6729_v46  ;;  %7559 = vst [vmem:[#allocation16_spill] sm:$0xff] %v6739_v3  ;;  %v307_v29 = vld [vmem:[%s6533_s6 + $0x2c0] sm:$0xff] }
 0x113   : > { %3826 = vmatpush2.bf16.msra.mxu0 %v5729_v55  ;;  %v277_v55 = vld [vmem:[%s6533_s6 + $0x1d0] sm:$0xff] }
 0x114   : > { %3899 = vmatpush2.bf16.msra.mxu1 %v5732_v56  ;;  %3827 = vmatprep.subr.bf16.mxu0 %v5737_v60  ;;  %v5758_v56 = vld [vmem:[#allocation5 + $0xea4] ss:$16 sps:$4 sm:$0xff]   ;;  %v5753_v60 = vld [vmem:[#allocation5 + $0xca0] ss:$16 sps:$4 sm:$0xff]   ;;  %v6741_v4 = vpack.c.bf16 %v277_v55, %v261_v51  ;;  %v326_v51 = vld [vmem:[%s6533_s6 + $0x358] sm:$0xff]  ;;  %v6760_v55 = vpack.c.bf16 %v307_v29, %v291_v26 }
 0x115   : > { %3900 = vmatprep.subr.bf16.mxu1 %v5740_v62  ;;  %v5756_v62 = vld [vmem:[#allocation5 + $0xea0] ss:$16 sps:$4 sm:$0xff]  }
 0x116   : > { %7560 = vst [vmem:[#allocation17_spill] sm:$0xff] %v6741_v4  ;;  %7563 = vst [vmem:[#allocation20_spill] sm:$0xff] %v6760_v55  ;;  %v5771_v5 = vld [vmem:[#allocation5 + $0xc40] ss:$16 sps:$4 sm:$0xff]  }
 0x117   : > { %3828 = vmatpush2.bf16.msra.mxu0 %v5735_v0  ;;  %v292_v0 = vld [vmem:[%s6533_s6 + $0x248] sm:$0xff]  ;;  %v5774_v7 = vld [vmem:[#allocation5 + $0xe40] ss:$16 sps:$4 sm:$0xff]  }
 0x118   : > { %3901 = vmatpush2.bf16.msra.mxu1 %v5738_v1  ;;  %3943 = vmatprep.subr.bf16.mxu0 %v5743_v8  ;;  %v308_v1 = vld [vmem:[%s6533_s6 + $0x2c8] sm:$0xff]  ;;  %v5761_v8 = vld [vmem:[#allocation5 + $0xc84] ss:$16 sps:$4 sm:$0xff]  }
 0x119   : > { %4016 = vmatprep.subr.bf16.mxu1 %v5746_v9  ;;  %v5764_v9 = vld [vmem:[#allocation5 + $0xe84] ss:$16 sps:$4 sm:$0xff]  }
 0x11a   : > { %3830 = vmatmul.mubr.bf16.vlgmr.msra.gmra.mxu0 %v6719_v22  ;;  %v323_v26 = vld [vmem:[%s6533_s6 + $0x340] sm:$0xff]  ;;  %v341_v29 = vld [vmem:[%s6533_s6 + $0x3d0] sm:$0xff] }
 0x11b   : > { %3903 = vmatmul.mubr.bf16.vlgmr.msra.gmra.mxu1 %v6721_v23  ;;  %3944 = vmatpush1.bf16.msra.mxu0 %v5741_v15  ;;  %v5759_v15 = vld [vmem:[#allocation5 + $0xc80] ss:$16 sps:$4 sm:$0xff]  }
 0x11c   : > { %4017 = vmatpush1.bf16.msra.mxu1 %v5744_v16  ;;  %3945 = vmatprep.subr.bf16.mxu0 %v5749_v33  ;;  %v6745_v16 = vpack.c.bf16 %v308_v1, %v292_v0  ;;  %v5767_v33 = vld [vmem:[#allocation5 + $0xc64] ss:$16 sps:$4 sm:$0xff]  }
 0x11d   : > { %4018 = vmatprep.subr.bf16.mxu1 %v5752_v35  ;;  %3839 = vmatprep.mubr.bf16.mxu0 %v6725_v40  ;;  %v293_v35 = vld [vmem:[%s6533_s6 + $0x250] sm:$0xff]  ;;  %v330_v40 = vld [vmem:[%s6533_s6 + $0x378] sm:$0xff] }
 0x11e   : > { %3912 = vmatprep.mubr.bf16.mxu1 %v6729_v46  ;;  %7561 = vst [vmem:[#allocation18_spill] sm:$0xff] %v6745_v16  ;;  %v5773_v0 = vld [vmem:[#allocation5 + $0xc44] ss:$16 sps:$4 sm:$0xff]  }
 0x11f   : > { %3946 = vmatpush1.bf16.msra.mxu0 %v5747_v37  ;;  %v309_v37 = vld [vmem:[%s6533_s6 + $0x2d0] sm:$0xff] }
 0x120   : > { %4019 = vmatpush1.bf16.msra.mxu1 %v5750_v38  ;;  %3947 = vmatprep.subr.bf16.mxu0 %v5755_v50  ;;  %v5770_v38 = vld [vmem:[#allocation5 + $0xe64] ss:$16 sps:$4 sm:$0xff]   ;;  %v340_v50 = vld [vmem:[%s6533_s6 + $0x3c8] sm:$0xff] }
 0x121   : > { %4020 = vmatprep.subr.bf16.mxu1 %v5758_v56  ;;  %v6762_v56 = vpack.c.bf16 %v309_v37, %v293_v35  ;;  %v5776_v1 = vld [vmem:[#allocation5 + $0xe44] ss:$16 sps:$4 sm:$0xff]   ;;  %v5777_v37 = vld [vmem:[#allocation5 + $0xc20] ss:$16 sps:$4 sm:$0xff]  }
 0x122   : > { %3840 = vmatmul.mubr.bf16.gmra.mxu0 %v6739_v3  ;;  %v5782_v35 = vld [vmem:[#allocation5 + $0xe24] ss:$16 sps:$4 sm:$0xff]  }
 0x123   : > { %3913 = vmatmul.mubr.bf16.gmra.mxu1 %v6741_v4  ;;  %3948 = vmatpush1.bf16.msra.mxu0 %v5753_v60  ;;  %7564 = vst [vmem:[#allocation21_spill] sm:$0xff] %v6762_v56  ;;  %v342_v60 = vld [vmem:[%s6533_s6 + $0x3d8] sm:$0xff] }
 0x124   : > { %4021 = vmatpush1.bf16.msra.mxu1 %v5756_v62  ;;  %3949 = vmatprep.subr.bf16.mxu0 %v5761_v8  ;;  %v5768_v62 = vld [vmem:[#allocation5 + $0xe60] ss:$16 sps:$4 sm:$0xff]   ;;  %v6765_v8 = vpack.c.bf16 %v340_v50, %v324_v41 }
 0x125   : > { %4022 = vmatprep.subr.bf16.mxu1 %v5764_v9  ;;  %3849 = vmatprep.mubr.bf16.mxu0 %v6745_v16  ;;  %v6767_v9 = vpack.c.bf16 %v342_v60, %v326_v51  ;;  %v248_v51 = vld [vmem:[%s6533_s6 + $0xe8] sm:$0xff]  ;;  %v234_v60 = vld [vmem:[%s6533_s6 + $0x78] sm:$0xff] }
 0x126   : > { %3922 = vmatprep.mubr.bf16.mxu1 %v6747_v17  ;;  %7565 = vst [vmem:[#allocation22_spill] sm:$0xff] %v6765_v8  ;;  %v5848_v17 = vld [vmem:[#allocation5 + $0x2cc] ss:$16 sps:$4 sm:$0xff]   ;;  %v5843_v16 = vld [vmem:[#allocation5 + $0xc8] ss:$16 sps:$4 sm:$0xff]  }
 0x127   : > { %3950 = vmatpush1.bf16.msra.mxu0 %v5759_v15  ;;  %7566 = vst [vmem:[#allocation23_spill] sm:$0xff] %v6767_v9  ;;  %v339_v15 = vld [vmem:[%s6533_s6 + $0x3c0] sm:$0xff] }
 0x128   : > { %4023 = vmatpush1.bf16.msra.mxu1 %v5762_v18  ;;  %3951 = vmatprep.subr.bf16.mxu0 %v5767_v33  ;;  %v325_v18 = vld [vmem:[%s6533_s6 + $0x350] sm:$0xff]  ;;  %v6778_v41 = vpack.c.bf16 %v339_v15, %v323_v26 }
 0x129   : > { %4024 = vmatprep.subr.bf16.mxu1 %v5770_v38  ;;  %v5779_v33 = vld [vmem:[#allocation5 + $0xc24] ss:$16 sps:$4 sm:$0xff]   ;;  %v232_v38 = vld [vmem:[%s6533_s6 + $0x68] sm:$0xff]  ;;  %v6780_v50 = vpack.c.bf16 %v341_v29, %v325_v18  ;;  %v5783_v26 = vld [vmem:[#allocation5 + $0xc00] ss:$16 sps:$4 sm:$0xff]  }
 0x12a   : > { %3850 = vmatmul.mubr.bf16.gmra.mxu0 %v6760_v55  ;;  %7567 = vst [vmem:[#allocation24_spill] sm:$0xff] %v6778_v41  ;;  %v5786_v15 = vld [vmem:[#allocation5 + $0xe00] ss:$16 sps:$4 sm:$0xff]   ;;  %v5797_v29 = vld [vmem:[#allocation5 + $0xdc4] ss:$16 sps:$4 sm:$0xff]  }
 0x12b   : > { %3923 = vmatmul.mubr.bf16.gmra.mxu1 %v6762_v56  ;;  %3952 = vmatpush1.bf16.msra.mxu0 %v5765_v42  ;;  %7568 = vst [vmem:[#allocation25_spill] sm:$0xff] %v6780_v50  ;;  %v250_v56 = vld [vmem:[%s6533_s6 + $0xf8] sm:$0xff]  ;;  %v5780_v42 = vld [vmem:[#allocation5 + $0xe20] ss:$16 sps:$4 sm:$0xff]  }
 0x12c   : > { %4025 = vmatpush1.bf16.msra.mxu1 %v5768_v62  ;;  %3953 = vmatprep.subr.bf16.mxu0 %v5773_v0  ;;  %v5785_v62 = vld [vmem:[#allocation5 + $0xc04] ss:$16 sps:$4 sm:$0xff]   ;;  %v5789_v18 = vld [vmem:[#allocation5 + $0xde0] ss:$16 sps:$4 sm:$0xff]  }
 0x12d   : > { %4026 = vmatprep.subr.bf16.mxu1 %v5776_v1  ;;  %3859 = vmatprep.mubr.bf16.mxu0 %v6765_v8  ;;  %v5788_v0 = vld [vmem:[#allocation5 + $0xe04] ss:$16 sps:$4 sm:$0xff]   ;;  %v6785_v1 = vpack.c.bf16 %v248_v51, %v232_v38  ;;  %v6787_v8 = vpack.c.bf16 %v250_v56, %v234_v60  ;;  %v5792_v56 = vld [vmem:[#allocation5 + $0xfe0] ss:$16 sps:$4 sm:$0xff]  }
 0x12e   : > { %3932 = vmatprep.mubr.bf16.mxu1 %v6767_v9  ;;  %v5803_v38 = vld [vmem:[#allocation5 + $0xda4] ss:$16 sps:$4 sm:$0xff]   ;;  %v5801_v60 = vld [vmem:[#allocation5 + $0xda0] ss:$16 sps:$4 sm:$0xff]  }
 0x12f   : > { %3954 = vmatpush1.bf16.msra.mxu0 %v5771_v5  ;;  %7569 = vst [vmem:[#allocation26_spill] sm:$0xff] %v6785_v1  ;;  %7570 = vst [vmem:[#allocation27_spill] sm:$0xff] %v6787_v8  ;;  %v5791_v5 = vld [vmem:[#allocation5 + $0xde4] ss:$16 sps:$4 sm:$0xff]  }
 0x130   : > { %4027 = vmatpush1.bf16.msra.mxu1 %v5774_v7  ;;  %3955 = vmatprep.subr.bf16.mxu0 %v5779_v33  ;;  %v5794_v7 = vld [vmem:[#allocation5 + $0xfe4] ss:$16 sps:$4 sm:$0xff]  }
 0x131   : > { %4028 = vmatprep.subr.bf16.mxu1 %v5782_v35  ;;  %v5800_v33 = vld [vmem:[#allocation5 + $0xfc4] ss:$16 sps:$4 sm:$0xff]   ;;  %v5795_v35 = vld [vmem:[#allocation5 + $0xdc0] ss:$16 sps:$4 sm:$0xff]  }
 0x132   : > { %3860 = vmatmul.mubr.bf16.gmra.mxu0 %v6778_v41  ;;  %v5806_v51 = vld [vmem:[#allocation5 + $0xfa4] ss:$16 sps:$4 sm:$0xff]   ;;  %v266_v41 = vld [vmem:[%s6533_s6 + $0x178] sm:$0xff] }
 0x133   : > { %3933 = vmatmul.mubr.bf16.gmra.mxu1 %v6780_v50  ;;  %3956 = vmatpush1.bf16.msra.mxu0 %v5777_v37  ;;  %v5798_v37 = vld [vmem:[#allocation5 + $0xfc0] ss:$16 sps:$4 sm:$0xff]   ;;  %v280_v50 = vld [vmem:[%s6533_s6 + $0x1e8] sm:$0xff] }
 0x134   : > { %4029 = vmatpush1.bf16.msra.mxu1 %v5780_v42  ;;  %3957 = vmatprep.subr.bf16.mxu0 %v5785_v62  ;;  %v5804_v42 = vld [vmem:[#allocation5 + $0xfa0] ss:$16 sps:$4 sm:$0xff]   ;;  %v5809_v62 = vld [vmem:[#allocation5 + $0xd84] ss:$16 sps:$4 sm:$0xff]  }
 0x135   : > { %4030 = vmatprep.subr.bf16.mxu1 %v5788_v0  ;;  %3975 = vmatprep.mubr.bf16.mxu0 %v6785_v1  ;;  %v5812_v0 = vld [vmem:[#allocation5 + $0xf84] ss:$16 sps:$4 sm:$0xff]  }
 0x136   : > { %4048 = vmatprep.mubr.bf16.mxu1 %v6787_v8  ;;  %v249_v8 = vld [vmem:[%s6533_s6 + $0xf0] sm:$0xff] }
 0x137   : > { %3958 = vmatpush1.bf16.msra.mxu0 %v5783_v26  ;;  %v5807_v26 = vld [vmem:[#allocation5 + $0xd80] ss:$16 sps:$4 sm:$0xff]  }
 0x138   : > { %4031 = vmatpush1.bf16.msra.mxu1 %v5786_v15  ;;  %3959 = vmatprep.subr.bf16.mxu0 %v5791_v5  ;;  %v5810_v15 = vld [vmem:[#allocation5 + $0xf80] ss:$16 sps:$4 sm:$0xff]   ;;  %v5815_v5 = vld [vmem:[#allocation5 + $0xd64] ss:$16 sps:$4 sm:$0xff]  }
 0x139   : > { %4032 = vmatprep.subr.bf16.mxu1 %v5794_v7  ;;  %v5818_v7 = vld [vmem:[#allocation5 + $0xf64] ss:$16 sps:$4 sm:$0xff]  }
 0x13b   : > { %3960 = vmatpush2.bf16.msra.mxu0 %v5789_v18  ;;  %v5813_v18 = vld [vmem:[#allocation5 + $0xd60] ss:$16 sps:$4 sm:$0xff]  }
 0x13c   : > { %4033 = vmatpush2.bf16.msra.mxu1 %v5792_v56  ;;  %3961 = vmatprep.subr.bf16.mxu0 %v5797_v29  ;;  %v5816_v56 = vld [vmem:[#allocation5 + $0xf60] ss:$16 sps:$4 sm:$0xff]   ;;  %v5821_v29 = vld [vmem:[#allocation5 + $0xd44] ss:$16 sps:$4 sm:$0xff]  }
 0x13d   : > { %4034 = vmatprep.subr.bf16.mxu1 %v5800_v33  ;;  %v5824_v33 = vld [vmem:[#allocation5 + $0xf44] ss:$16 sps:$4 sm:$0xff]  }
 0x13f   : > { %3962 = vmatpush2.bf16.msra.mxu0 %v5795_v35  ;;  %v5819_v35 = vld [vmem:[#allocation5 + $0xd40] ss:$16 sps:$4 sm:$0xff]  }
 0x140   : > { %4035 = vmatpush2.bf16.msra.mxu1 %v5798_v37  ;;  %3963 = vmatprep.subr.bf16.mxu0 %v5803_v38  ;;  %v5822_v37 = vld [vmem:[#allocation5 + $0xf40] ss:$16 sps:$4 sm:$0xff]   ;;  %v925_v38 = vlaneseq }
 0x141   : > { %4036 = vmatprep.subr.bf16.mxu1 %v5806_v51  ;;  %v5827_v51 = vld [vmem:[#allocation5 + $0xd24] ss:$16 sps:$4 sm:$0xff]  }
 0x143   : > { %3964 = vmatpush2.bf16.msra.mxu0 %v5801_v60  ;;  %v5830_v60 = vld [vmem:[#allocation5 + $0xf24] ss:$16 sps:$4 sm:$0xff]  }
 0x144   : > { %4037 = vmatpush2.bf16.msra.mxu1 %v5804_v42  ;;  %3965 = vmatprep.subr.bf16.mxu0 %v5809_v62  ;;  %v5825_v42 = vld [vmem:[#allocation5 + $0xd20] ss:$16 sps:$4 sm:$0xff]  }
 0x145   : > { %4038 = vmatprep.subr.bf16.mxu1 %v5812_v0  ;;  %v5828_v62 = vld [vmem:[#allocation5 + $0xf20] ss:$16 sps:$4 sm:$0xff]   ;;  %v6793_v0 = vshrl.u32 %v925_v38, 7  ;;  %v5842_v38 = vld [vmem:[#allocation5 + $0x2ec] ss:$16 sps:$4 sm:$0xff]  }
 0x147   : > { %3966 = vmatpush2.bf16.msra.mxu0 %v5807_v26  ;;  %7571 = vst [vmem:[#allocation28_spill] sm:$0xff] %v6793_v0  ;;  %v5833_v26 = vld [vmem:[#allocation5 + $0xd04] ss:$16 sps:$4 sm:$0xff]   ;;  %v931_v1 = vsub.s32 1, %v6793_v0 }
 0x148   : > { %4039 = vmatpush2.bf16.msra.mxu1 %v5810_v15  ;;  %3967 = vmatprep.subr.bf16.mxu0 %v5815_v5  ;;  %v5836_v15 = vld [vmem:[#allocation5 + $0xf04] ss:$16 sps:$4 sm:$0xff]   ;;  %v5831_v5 = vld [vmem:[#allocation5 + $0xd00] ss:$16 sps:$4 sm:$0xff]  }
 0x149   : > { %4040 = vmatprep.subr.bf16.mxu1 %v5818_v7  ;;  %v5834_v7 = vld [vmem:[#allocation5 + $0xf00] ss:$16 sps:$4 sm:$0xff]  }
 0x14b   : > { %3968 = vmatpush2.bf16.msra.mxu0 %v5813_v18  ;;  %v231_v18 = vld [vmem:[%s6533_s6 + $0x60] sm:$0xff] }
 0x14c   : > { %4041 = vmatpush2.bf16.msra.mxu1 %v5816_v56  ;;  %3969 = vmatprep.subr.bf16.mxu0 %v5821_v29  ;;  %v247_v56 = vld [vmem:[%s6533_s6 + $0xe0] sm:$0xff]  ;;  %v233_v29 = vld [vmem:[%s6533_s6 + $0x70] sm:$0xff] }
 0x14d   : > { %4042 = vmatprep.subr.bf16.mxu1 %v5824_v33  ;;  %v923_v33 = vld [vmem:[#allocation7] sm:$0xf]  ;;  %v6804_v9 = vpack.c.bf16 %v247_v56, %v231_v18  ;;  %v6806_v55 = vpack.c.bf16 %v249_v8, %v233_v29  ;;  %v5846_v18 = vld [vmem:[#allocation5 + $0x2c8] ss:$16 sps:$4 sm:$0xff]  }
 0x14e   : > { %v263_v8 = vld [vmem:[%s6533_s6 + $0x160] sm:$0xff] }
 0x14f   : > { %3970 = vmatpush2.bf16.msra.mxu0 %v5819_v35  ;;  %v927_v35 = vsub.s32 0, %v6793_v0  ;;  %7572 = vst [vmem:[#allocation29_spill] sm:$0xff] %v6804_v9  ;;  %7573 = vst [vmem:[#allocation30_spill] sm:$0xff] %v6806_v55  ;;  %v6811_v0 = vrot.slane %v923_v33, %v931_v1  ;;  %v279_v29 = vld [vmem:[%s6533_s6 + $0x1e0] sm:$0xff] }
 0x150   : > { %4043 = vmatpush2.bf16.msra.mxu1 %v5822_v37  ;;  %3971 = vmatprep.subr.bf16.mxu0 %v5827_v51  ;;  %v5839_v37 = vld [vmem:[#allocation5 + $0xec] ss:$16 sps:$4 sm:$0xff]   ;;  %v6832_v3 = vpack.c.bf16 %v279_v29, %v263_v8 }
 0x151   : > { %4044 = vmatprep.subr.bf16.mxu1 %v5830_v60  ;;  %v264_v51 = vld [vmem:[%s6533_s6 + $0x168] sm:$0xff] }
 0x152   : > { %v5837_v60 = vld [vmem:[#allocation5 + $0xe8] ss:$16 sps:$4 sm:$0xff]   ;;  %v6813_v56 = vpack.c.bf16 %v280_v50, %v264_v51  ;;  %v281_v50 = vld [vmem:[%s6533_s6 + $0x1f0] sm:$0xff]  ;;  %7576 = vst [vmem:[#allocation33_spill] sm:$0xff] %v6832_v3  ;;  %v5857_v8 = vld [vmem:[#allocation5 + $0x8c] ss:$16 sps:$4 sm:$0xff]  }
 0x153   : > { %3972 = vmatpush2.bf16.msra.mxu0 %v5825_v42  ;;  %v282_v42 = vld [vmem:[%s6533_s6 + $0x1f8] sm:$0xff]  ;;  %v296_v51 = vld [vmem:[%s6533_s6 + $0x268] sm:$0xff] }
 0x154   : > { %4045 = vmatpush2.bf16.msra.mxu1 %v5828_v62  ;;  %3973 = vmatprep.subr.bf16.mxu0 %v5833_v26  ;;  %v6809_v62 = vrot.slane %v923_v33, %v927_v35  ;;  %v5840_v26 = vld [vmem:[#allocation5 + $0x2e8] ss:$16 sps:$4 sm:$0xff]   ;;  %7574 = vst [vmem:[#allocation31_spill] sm:$0xff] %v6813_v56  ;;  %v6817_v4 = vpack.c.bf16 %v282_v42, %v266_v41  ;;  %v5851_v35 = vld [vmem:[#allocation5 + $0xac] ss:$16 sps:$4 sm:$0xff]  }
 0x155   : > { %4046 = vmatprep.subr.bf16.mxu1 %v5836_v15  ;;  %v5845_v15 = vld [vmem:[#allocation5 + $0xcc] ss:$16 sps:$4 sm:$0xff]  }
 0x156   : > { %7575 = vst [vmem:[#allocation32_spill] sm:$0xff] %v6817_v4  ;;  %v5860_v29 = vld [vmem:[#allocation5 + $0x28c] ss:$16 sps:$4 sm:$0xff]  }
 0x157   : > { %3974 = vmatpush2.bf16.msra.mxu0 %v5831_v5 }
 0x158   : > { %4047 = vmatpush2.bf16.msra.mxu1 %v5834_v7  ;;  %4089 = vmatprep.subr.bf16.mxu0 %v5839_v37  ;;  %v265_v37 = vld [vmem:[%s6533_s6 + $0x170] sm:$0xff] }
 0x159   : > { %4162 = vmatprep.subr.bf16.mxu1 %v5842_v38  ;;  %v5854_v38 = vld [vmem:[#allocation5 + $0x2ac] ss:$16 sps:$4 sm:$0xff]   ;;  %v6834_v46 = vpack.c.bf16 %v281_v50, %v265_v37  ;;  %v5855_v50 = vld [vmem:[#allocation5 + $0x88] ss:$16 sps:$4 sm:$0xff]  }
 0x15a   : > { %v3539_v5 = vpop.f32.mrf.mxu0  ;;  %3976 = vmatmul.mubr.bf16.vlgmr.msra.gmra.mxu0 %v6804_v9  ;;  %v5849_v9 = vld [vmem:[#allocation5 + $0xa8] ss:$16 sps:$4 sm:$0xff]  }
 0x15b   : > { %v3612_v7 = vpop.f32.mrf.mxu1  ;;  %4049 = vmatmul.mubr.bf16.vlgmr.msra.gmra.mxu1 %v6806_v55  ;;  %v3540_v1 = vadd.f32 %v3539_v5, %v6809_v62  ;;  %4090 = vmatpush1.bf16.msra.mxu0 %v5837_v60  ;;  %v312_v5 = vld [vmem:[%s6533_s6 + $0x2e8] sm:$0xff]  ;;  %v298_v60 = vld [vmem:[%s6533_s6 + $0x278] sm:$0xff]  ;;  %7577 = vst [vmem:[#allocation34_spill] sm:$0xff] %v6834_v46 }
 0x15c   : > { %4163 = vmatpush1.bf16.msra.mxu1 %v5840_v26  ;;  %v3541_v33 = vpop.f32.mrf.mxu0  ;;  %4091 = vmatprep.subr.bf16.mxu0 %v5845_v15  ;;  %v314_v15 = vld [vmem:[%s6533_s6 + $0x2f8] sm:$0xff] }
 0x15d   : > { %v3614_v41 = vpop.f32.mrf.mxu1  ;;  %4164 = vmatprep.subr.bf16.mxu1 %v5848_v17  ;;  %v6825_v42 = vadd.f32 %v3612_v7, %v3540_v1  ;;  %v3542_v55 = vadd.f32 %v3541_v33, %v6811_v0  ;;  %3985 = vmatprep.mubr.bf16.mxu0 %v6813_v56  ;;  %v5852_v33 = vld [vmem:[#allocation5 + $0x2a8] ss:$16 sps:$4 sm:$0xff]   ;;  %v295_v56 = vld [vmem:[%s6533_s6 + $0x260] sm:$0xff] }
 0x15e   : > { %4058 = vmatprep.mubr.bf16.mxu1 %v6817_v4  ;;  %v3543_v26 = vpop.f32.mrf.mxu0 }
 0x15f   : > { %v6837_v17 = vadd.f32 %v3614_v41, %v3542_v55  ;;  %v3544_v7 = vadd.f32 %v3543_v26, %v6809_v62  ;;  %v3616_v1 = vpop.f32.mrf.mxu1  ;;  %4092 = vmatpush1.bf16.msra.mxu0 %v5843_v16  ;;  %v5858_v55 = vld [vmem:[#allocation5 + $0x288] ss:$16 sps:$4 sm:$0xff]   ;;  %v6844_v41 = vpack.c.bf16 %v312_v5, %v296_v51  ;;  %v311_v26 = vld [vmem:[%s6533_s6 + $0x2e0] sm:$0xff]  ;;  %v6848_v16 = vpack.c.bf16 %v314_v15, %v298_v60  ;;  %v313_v51 = vld [vmem:[%s6533_s6 + $0x2f0] sm:$0xff] }
 0x160   : > { %4165 = vmatpush1.bf16.msra.mxu1 %v5846_v18  ;;  %v6840_v4 = vpop.f32.mrf.mxu0  ;;  %4093 = vmatprep.subr.bf16.mxu0 %v5851_v35  ;;  %v5863_v18 = vld [vmem:[#allocation5 + $0x6c] ss:$16 sps:$4 sm:$0xff]   ;;  %v297_v35 = vld [vmem:[%s6533_s6 + $0x270] sm:$0xff] }
 0x161   : > { %4166 = vmatprep.subr.bf16.mxu1 %v5854_v38  ;;  %v6842_v37 = vadd.f32 %v3616_v1, %v3544_v7  ;;  %7579 = vst [vmem:[#allocation36_spill] sm:$0xff] %v6844_v41  ;;  %7580 = vst [vmem:[#allocation37_spill] sm:$0xff] %v6848_v16  ;;  %v6853_v7 = vpop.f32.mrf.mxu1  ;;  %v5866_v60 = vld [vmem:[#allocation5 + $0x26c] ss:$16 sps:$4 sm:$0xff]   ;;  %v6865_v22 = vpack.c.bf16 %v313_v51, %v297_v35  ;;  %v5867_v51 = vld [vmem:[#allocation5 + $0x48] ss:$16 sps:$4 sm:$0xff]  }
 0x162   : > { %3986 = vmatmul.mubr.bf16.gmra.mxu0 %v6832_v3  ;;  %v3549_v38 = vpop.f32.mrf.mxu0  ;;  %v328_v15 = vld [vmem:[%s6533_s6 + $0x368] sm:$0xff] }
 0x163   : > { %7578 = vst [vmem:[#allocation35_spill] sm:$0xff] %v6842_v37  ;;  %4059 = vmatmul.mubr.bf16.gmra.mxu1 %v6834_v46  ;;  %4094 = vmatpush1.bf16.msra.mxu0 %v5849_v9  ;;  %v3550_v5 = vadd.f32 %v3549_v38, %v6809_v62  ;;  %v5861_v46 = vld [vmem:[#allocation5 + $0x68] ss:$16 sps:$4 sm:$0xff]   ;;  %v3622_v9 = vpop.f32.mrf.mxu1  ;;  %7582 = vst [vmem:[#allocation39_spill] sm:$0xff] %v6865_v22 }
 0x164   : > { %4167 = vmatpush1.bf16.msra.mxu1 %v5852_v33  ;;  %4095 = vmatprep.subr.bf16.mxu0 %v5857_v8  ;;  %v3551_v1 = vpop.f32.mrf.mxu0  ;;  %v344_v3 = vld [vmem:[%s6533_s6 + $0x3e8] sm:$0xff]  ;;  %v6863_v33 = vpack.c.bf16 %v311_v26, %v295_v56  ;;  %v346_v38 = vld [vmem:[%s6533_s6 + $0x3f8] sm:$0xff] }
 0x165   : > { %4168 = vmatprep.subr.bf16.mxu1 %v5860_v29  ;;  %3995 = vmatprep.mubr.bf16.mxu0 %v6844_v41  ;;  %v3552_v23 = vadd.f32 %v3551_v1, %v6811_v0  ;;  %v6868_v8 = vadd.f32 %v3622_v9, %v3550_v5  ;;  %v5864_v41 = vld [vmem:[#allocation5 + $0x268] ss:$16 sps:$4 sm:$0xff]   ;;  %v3624_v37 = vpop.f32.mrf.mxu1  ;;  %v5869_v1 = vld [vmem:[#allocation5 + $0x4c] ss:$16 sps:$4 sm:$0xff]   ;;  %v6875_v9 = vpack.c.bf16 %v344_v3, %v328_v15 }
 0x166   : > { %4068 = vmatprep.mubr.bf16.mxu1 %v6848_v16  ;;  %7581 = vst [vmem:[#allocation38_spill] sm:$0xff] %v6863_v33  ;;  %v3553_v29 = vpop.f32.mrf.mxu0  ;;  %v5872_v56 = vld [vmem:[#allocation5 + $0x24c] ss:$16 sps:$4 sm:$0xff]   ;;  %v5870_v5 = vld [vmem:[#allocation5 + $0x248] ss:$16 sps:$4 sm:$0xff]  }
 0x167   : > { %7583 = vst [vmem:[#allocation40_spill] sm:$0xff] %v6868_v8  ;;  %4096 = vmatpush1.bf16.msra.mxu0 %v5855_v50  ;;  %v3554_v16 = vadd.f32 %v3553_v29, %v6809_v62  ;;  %v6871_v26 = vadd.f32 %v3624_v37, %v3552_v23  ;;  %7585 = vst [vmem:[#allocation42_spill] sm:$0xff] %v6875_v9  ;;  %v327_v50 = vld [vmem:[%s6533_s6 + $0x360] sm:$0xff]  ;;  %v6879_v8 = vpack.c.bf16 %v346_v38, %v330_v40  ;;  %v3626_v29 = vpop.f32.mrf.mxu1  ;;  %v345_v37 = vld [vmem:[%s6533_s6 + $0x3f0] sm:$0xff] }
 0x168   : > { %4169 = vmatpush1.bf16.msra.mxu1 %v5858_v55  ;;  %4097 = vmatprep.subr.bf16.mxu0 %v5863_v18  ;;  %v6873_v35 = vpop.f32.mrf.mxu0  ;;  %v343_v55 = vld [vmem:[%s6533_s6 + $0x3e0] sm:$0xff]  ;;  %v329_v18 = vld [vmem:[%s6533_s6 + $0x370] sm:$0xff]  ;;  %v5875_v40 = vld [vmem:[#allocation5 + $0x2c] ss:$16 sps:$4 sm:$0xff]  }
 0x169   : > { %4170 = vmatprep.subr.bf16.mxu1 %v5866_v60  ;;  %7584 = vst [vmem:[#allocation41_spill] sm:$0xff] %v6871_v26  ;;  %7586 = vst [vmem:[#allocation43_spill] sm:$0xff] %v6879_v8  ;;  %v6884_v60 = vadd.f32 %v3626_v29, %v3554_v16  ;;  %v6888_v3 = vpop.f32.mrf.mxu1  ;;  %v5878_v15 = vld [vmem:[#allocation5 + $0x22c] ss:$16 sps:$4 sm:$0xff]  }
 0x16a   : > { %3996 = vmatmul.mubr.bf16.gmra.mxu0 %v6863_v33  ;;  %v3559_v23 = vpop.f32.mrf.mxu0 }
 0x16b   : > { %4069 = vmatmul.mubr.bf16.gmra.mxu1 %v6865_v22  ;;  %7587 = vst [vmem:[#allocation44_spill] sm:$0xff] %v6884_v60  ;;  %4098 = vmatpush1.bf16.msra.mxu0 %v5861_v46  ;;  %v3560_v26 = vadd.f32 %v3559_v23, %v6809_v62  ;;  %v3632_v29 = vpop.f32.mrf.mxu1  ;;  %v6893_v22 = vpack.c.bf16 %v343_v55, %v327_v50  ;;  %v5873_v46 = vld [vmem:[#allocation5 + $0x28] ss:$16 sps:$4 sm:$0xff]  }
 0x16c   : > { %4171 = vmatpush1.bf16.msra.mxu1 %v5864_v41  ;;  %4099 = vmatprep.subr.bf16.mxu0 %v5869_v1  ;;  %v3561_v38 = vpop.f32.mrf.mxu0  ;;  %v6895_v41 = vpack.c.bf16 %v345_v37, %v329_v18  ;;  %v5876_v1 = vld [vmem:[#allocation5 + $0x228] ss:$16 sps:$4 sm:$0xff]  }
 0x16d   : > { %4172 = vmatprep.subr.bf16.mxu1 %v5872_v56  ;;  %4005 = vmatprep.mubr.bf16.mxu0 %v6875_v9  ;;  %v3562_v16 = vadd.f32 %v3561_v38, %v6811_v0  ;;  %7588 = vst [vmem:[#allocation45_spill] sm:$0xff] %v6893_v22  ;;  %v6897_v23 = vadd.f32 %v3632_v29, %v3560_v26  ;;  %v3634_v60 = vpop.f32.mrf.mxu1  ;;  %v5884_v9 = vld [vmem:[#allocation5 + $0x20c] ss:$16 sps:$4 sm:$0xff]   ;;  %v5879_v26 = vld [vmem:[#allocation5 + $0x8] ss:$16 sps:$4 sm:$0xff]  }
 0x16e   : > { %4078 = vmatprep.mubr.bf16.mxu1 %v6879_v8  ;;  %7589 = vst [vmem:[#allocation46_spill] sm:$0xff] %v6895_v41  ;;  %v3563_v33 = vpop.f32.mrf.mxu0  ;;  %v5881_v8 = vld [vmem:[#allocation5 + $0xc] ss:$16 sps:$4 sm:$0xff]  }
 0x16f   : > { %4100 = vmatpush1.bf16.msra.mxu0 %v5867_v51  ;;  %v3564_v56 = vadd.f32 %v3563_v33, %v6809_v62  ;;  %v6900_v38 = vadd.f32 %v3634_v60, %v3562_v16  ;;  %v3636_v55 = vpop.f32.mrf.mxu1  ;;  %v5882_v33 = vld [vmem:[#allocation5 + $0x208] ss:$16 sps:$4 sm:$0xff]   ;;  %v5887_v60 = vld [vmem:[#allocation5 + $0x1ec] ss:$16 sps:$4 sm:$0xff]  }
 0x170   : > { %4173 = vmatpush1.bf16.msra.mxu1 %v5870_v5  ;;  %4101 = vmatprep.subr.bf16.mxu0 %v5875_v40  ;;  %v6902_v50 = vpop.f32.mrf.mxu0  ;;  %v5890_v40 = vld [vmem:[#allocation5 + $0x3ec] ss:$16 sps:$4 sm:$0xff]  }
 0x171   : > { %4174 = vmatprep.subr.bf16.mxu1 %v5878_v15  ;;  %v6906_v51 = vadd.f32 %v3636_v55, %v3564_v56  ;;  %v6909_v37 = vpop.f32.mrf.mxu1  ;;  %v5885_v56 = vld [vmem:[#allocation5 + $0x1e8] ss:$16 sps:$4 sm:$0xff]  }
 0x172   : > { %4006 = vmatmul.mubr.bf16.gmra.mxu0 %v6893_v22  ;;  %v3569_v5 = vpop.f32.mrf.mxu0  ;;  %v5888_v55 = vld [vmem:[#allocation5 + $0x3e8] ss:$16 sps:$4 sm:$0xff]  }
 0x173   : > { %4079 = vmatmul.mubr.bf16.gmra.mxu1 %v6895_v41  ;;  %7590 = vst [vmem:[#allocation47_spill] sm:$0xff] %v6906_v51  ;;  %4102 = vmatpush1.bf16.msra.mxu0 %v5873_v46  ;;  %v3570_v18 = vadd.f32 %v3569_v5, %v6809_v62  ;;  %v3642_v29 = vpop.f32.mrf.mxu1  ;;  %v5893_v5 = vld [vmem:[#allocation5 + $0x1cc] ss:$16 sps:$4 sm:$0xff]  }
 0x174   : > { %4175 = vmatpush1.bf16.msra.mxu1 %v5876_v1  ;;  %4103 = vmatprep.subr.bf16.mxu0 %v5881_v8  ;;  %v3571_v15 = vpop.f32.mrf.mxu0  ;;  %v5896_v41 = vld [vmem:[#allocation5 + $0x3cc] ss:$16 sps:$4 sm:$0xff]  }
 0x175   : > { %4176 = vmatprep.subr.bf16.mxu1 %v5884_v9  ;;  %v3572_v16 = vadd.f32 %v3571_v15, %v6811_v0  ;;  %4121 = vmatprep.mubr.bf16.mxu0 %v6547_v53  ;;  %v6914_v46 = vadd.f32 %v3642_v29, %v3570_v18  ;;  %v3644_v9 = vpop.f32.mrf.mxu1  ;;  %v5891_v53 = vld [vmem:[#allocation5 + $0x1c8] ss:$16 sps:$4 sm:$0xff]   ;;  %v5911_v29 = vld [vmem:[#allocation5 + $0x16c] ss:$16 sps:$4 sm:$0xff]  }
 0x176   : > { %4194 = vmatprep.mubr.bf16.mxu1 %v6549_v54  ;;  %v3573_v1 = vpop.f32.mrf.mxu0  ;;  %v5894_v54 = vld [vmem:[#allocation5 + $0x3c8] ss:$16 sps:$4 sm:$0xff]  }
 0x177   : > { %7591 = vst [vmem:[#allocation48_spill] sm:$0xff] %v6914_v46  ;;  %4104 = vmatpush1.bf16.msra.mxu0 %v5879_v26  ;;  %v3574_v8 = vadd.f32 %v3573_v1, %v6809_v62  ;;  %v6917_v15 = vadd.f32 %v3644_v9, %v3572_v16  ;;  %v3646_v22 = vpop.f32.mrf.mxu1  ;;  %v5899_v26 = vld [vmem:[#allocation5 + $0x1ac] ss:$16 sps:$4 sm:$0xff]   ;;  %v5897_v18 = vld [vmem:[#allocation5 + $0x1a8] ss:$16 sps:$4 sm:$0xff]  }
 0x178   : > { %4177 = vmatpush1.bf16.msra.mxu1 %v5882_v33  ;;  %4105 = vmatprep.subr.bf16.mxu0 %v5887_v60  ;;  %v5902_v33 = vld [vmem:[#allocation5 + $0x3ac] ss:$16 sps:$4 sm:$0xff]   ;;  %v5900_v62 = vld [vmem:[#allocation5 + $0x3a8] ss:$16 sps:$4 sm:$0xff]  }
 0x179   : > { %4178 = vmatprep.subr.bf16.mxu1 %v5890_v40  ;;  %7592 = vst [vmem:[#allocation49_spill] sm:$0xff] %v6917_v15  ;;  %v6919_v51 = vadd.f32 %v3646_v22, %v3574_v8  ;;  %v5905_v60 = vld [vmem:[#allocation5 + $0x18c] ss:$16 sps:$4 sm:$0xff]   ;;  %v5903_v16 = vld [vmem:[#allocation5 + $0x188] ss:$16 sps:$4 sm:$0xff]  }
 0x17a   : > { %v5908_v40 = vld [vmem:[#allocation5 + $0x38c] ss:$16 sps:$4 sm:$0xff]   ;;  %v5906_v22 = vld [vmem:[#allocation5 + $0x388] ss:$16 sps:$4 sm:$0xff]  }
 0x17b   : > { %7593 = vst [vmem:[#allocation50_spill] sm:$0xff] %v6919_v51  ;;  %4106 = vmatpush2.bf16.msra.mxu0 %v5885_v56  ;;  %v5914_v56 = vld [vmem:[#allocation5 + $0x36c] ss:$16 sps:$4 sm:$0xff]   ;;  %v5909_v1 = vld [vmem:[#allocation5 + $0x168] ss:$16 sps:$4 sm:$0xff]  }
 0x17c   : > { %4179 = vmatpush2.bf16.msra.mxu1 %v5888_v55  ;;  %4107 = vmatprep.subr.bf16.mxu0 %v5893_v5  ;;  %v5917_v55 = vld [vmem:[#allocation5 + $0x14c] ss:$16 sps:$4 sm:$0xff]   ;;  %v5915_v9 = vld [vmem:[#allocation5 + $0x148] ss:$16 sps:$4 sm:$0xff]  }
 0x17d   : > { %4180 = vmatprep.subr.bf16.mxu1 %v5896_v41  ;;  %v5912_v41 = vld [vmem:[#allocation5 + $0x368] ss:$16 sps:$4 sm:$0xff]   ;;  %v5920_v8 = vld [vmem:[#allocation5 + $0x34c] ss:$16 sps:$4 sm:$0xff]  }
 0x17e   : > { %v5918_v5 = vld [vmem:[#allocation5 + $0x348] ss:$16 sps:$4 sm:$0xff]   ;;  %v6013_v51 = vld [vmem:[#allocation5 + $0x54c] ss:$16 sps:$4 sm:$0xff]  }
 0x17f   : > { %4108 = vmatpush2.bf16.msra.mxu0 %v5891_v53  ;;  %v5923_v53 = vld [vmem:[#allocation5 + $0x12c] ss:$16 sps:$4 sm:$0xff]   ;;  %v6011_v15 = vld [vmem:[#allocation5 + $0x548] ss:$16 sps:$4 sm:$0xff]  }
 0x180   : > { %4181 = vmatpush2.bf16.msra.mxu1 %v5894_v54  ;;  %4109 = vmatprep.subr.bf16.mxu0 %v5899_v26  ;;  %v5926_v54 = vld [vmem:[#allocation5 + $0x32c] ss:$16 sps:$4 sm:$0xff]   ;;  %v5921_v26 = vld [vmem:[#allocation5 + $0x128] ss:$16 sps:$4 sm:$0xff]  }
 0x181   : > { %4182 = vmatprep.subr.bf16.mxu1 %v5902_v33  ;;  %v5924_v33 = vld [vmem:[#allocation5 + $0x328] ss:$16 sps:$4 sm:$0xff]   ;;  %v6019_v46 = vld [vmem:[#allocation5 + $0x52c] ss:$16 sps:$4 sm:$0xff]  }
 0x183   : > { %4110 = vmatpush2.bf16.msra.mxu0 %v5897_v18  ;;  %v5929_v18 = vld [vmem:[#allocation5 + $0x10c] ss:$16 sps:$4 sm:$0xff]  }
 0x184   : > { %4183 = vmatpush2.bf16.msra.mxu1 %v5900_v62  ;;  %4111 = vmatprep.subr.bf16.mxu0 %v5905_v60  ;;  %v5932_v62 = vld [vmem:[#allocation5 + $0x30c] ss:$16 sps:$4 sm:$0xff]   ;;  %v5927_v60 = vld [vmem:[#allocation5 + $0x108] ss:$16 sps:$4 sm:$0xff]  }
 0x185   : > { %4184 = vmatprep.subr.bf16.mxu1 %v5908_v40  ;;  %v5930_v40 = vld [vmem:[#allocation5 + $0x308] ss:$16 sps:$4 sm:$0xff]  }
 0x187   : > { %4112 = vmatpush2.bf16.msra.mxu0 %v5903_v16  ;;  %v5935_v16 = vld [vmem:[#allocation5 + $0x4ec] ss:$16 sps:$4 sm:$0xff]  }
 0x188   : > { %4185 = vmatpush2.bf16.msra.mxu1 %v5906_v22  ;;  %4113 = vmatprep.subr.bf16.mxu0 %v5911_v29  ;;  %v5938_v22 = vld [vmem:[#allocation5 + $0x6ec] ss:$16 sps:$4 sm:$0xff]   ;;  %v5933_v29 = vld [vmem:[#allocation5 + $0x4e8] ss:$16 sps:$4 sm:$0xff]  }
 0x189   : > { %4186 = vmatprep.subr.bf16.mxu1 %v5914_v56  ;;  %v5936_v56 = vld [vmem:[#allocation5 + $0x6e8] ss:$16 sps:$4 sm:$0xff]  }
 0x18b   : > { %4114 = vmatpush2.bf16.msra.mxu0 %v5909_v1  ;;  %v5941_v1 = vld [vmem:[#allocation5 + $0x4cc] ss:$16 sps:$4 sm:$0xff]  }
 0x18c   : > { %4187 = vmatpush2.bf16.msra.mxu1 %v5912_v41  ;;  %4115 = vmatprep.subr.bf16.mxu0 %v5917_v55  ;;  %v5944_v41 = vld [vmem:[#allocation5 + $0x6cc] ss:$16 sps:$4 sm:$0xff]   ;;  %v5939_v55 = vld [vmem:[#allocation5 + $0x4c8] ss:$16 sps:$4 sm:$0xff]  }
 0x18d   : > { %4188 = vmatprep.subr.bf16.mxu1 %v5920_v8  ;;  %v5942_v8 = vld [vmem:[#allocation5 + $0x6c8] ss:$16 sps:$4 sm:$0xff]  }
 0x18f   : > { %4116 = vmatpush2.bf16.msra.mxu0 %v5915_v9  ;;  %v6923_v9 = vpop.f32.mrf.mxu0 }
 0x190   : > { %4189 = vmatpush2.bf16.msra.mxu1 %v5918_v5  ;;  %4117 = vmatprep.subr.bf16.mxu0 %v5923_v53  ;;  %v5947_v5 = vld [vmem:[#allocation5 + $0x4ac] ss:$16 sps:$4 sm:$0xff]  }
 0x191   : > { %4190 = vmatprep.subr.bf16.mxu1 %v5926_v54  ;;  %v5950_v53 = vld [vmem:[#allocation5 + $0x6ac] ss:$16 sps:$4 sm:$0xff]  }
 0x193   : > { %4118 = vmatpush2.bf16.msra.mxu0 %v5921_v26  ;;  %v5945_v26 = vld [vmem:[#allocation5 + $0x4a8] ss:$16 sps:$4 sm:$0xff]  }
 0x194   : > { %4191 = vmatpush2.bf16.msra.mxu1 %v5924_v33  ;;  %4119 = vmatprep.subr.bf16.mxu0 %v5929_v18  ;;  %v5953_v33 = vld [vmem:[#allocation5 + $0x48c] ss:$16 sps:$4 sm:$0xff]  }
 0x195   : > { %4192 = vmatprep.subr.bf16.mxu1 %v5932_v62  ;;  %v5956_v18 = vld [vmem:[#allocation5 + $0x68c] ss:$16 sps:$4 sm:$0xff]  }
 0x197   : > { %4120 = vmatpush2.bf16.msra.mxu0 %v5927_v60 }
 0x198   : > { %4193 = vmatpush2.bf16.msra.mxu1 %v5930_v40  ;;  %4235 = vmatprep.subr.bf16.mxu0 %v5935_v16  ;;  %v5951_v40 = vld [vmem:[#allocation5 + $0x488] ss:$16 sps:$4 sm:$0xff]   ;;  %v5962_v16 = vld [vmem:[#allocation5 + $0x66c] ss:$16 sps:$4 sm:$0xff]  }
 0x199   : > { %4308 = vmatprep.subr.bf16.mxu1 %v5938_v22 }
 0x19a   : > { %4122 = vmatmul.mubr.bf16.vlgmr.msra.gmra.mxu0 %v6557_v12  ;;  %v6927_v54 = vpop.f32.mrf.mxu0  ;;  %v5948_v12 = vld [vmem:[#allocation5 + $0x6a8] ss:$16 sps:$4 sm:$0xff]  }
 0x19b   : > { %4195 = vmatmul.mubr.bf16.vlgmr.msra.gmra.mxu1 %v6559_v13  ;;  %4236 = vmatpush1.bf16.msra.mxu0 %v5933_v29  ;;  %v6929_v13 = vpop.f32.mrf.mxu1 }
 0x19c   : > { %4309 = vmatpush1.bf16.msra.mxu1 %v5936_v56  ;;  %4237 = vmatprep.subr.bf16.mxu0 %v5941_v1  ;;  %7594 = vst [vmem:[#allocation51_spill] sm:$0xff] %v6929_v13  ;;  %v6933_v60 = vpop.f32.mrf.mxu0  ;;  %v5957_v56 = vld [vmem:[#allocation5 + $0x468] ss:$16 sps:$4 sm:$0xff]   ;;  %v5968_v1 = vld [vmem:[#allocation5 + $0x64c] ss:$16 sps:$4 sm:$0xff]  }
 0x19d   : > { %4310 = vmatprep.subr.bf16.mxu1 %v5944_v41  ;;  %4131 = vmatprep.mubr.bf16.mxu0 %v6565_v24  ;;  %v6931_v62 = vpop.f32.mrf.mxu1  ;;  %v5954_v24 = vld [vmem:[#allocation5 + $0x688] ss:$16 sps:$4 sm:$0xff]  }
 0x19e   : > { %4204 = vmatprep.mubr.bf16.mxu1 %v6573_v32  ;;  %v5959_v32 = vld [vmem:[#allocation5 + $0x46c] ss:$16 sps:$4 sm:$0xff]   ;;  %v6941_v29 = vpop.f32.mrf.mxu0  ;;  %v6017_v13 = vld [vmem:[#allocation5 + $0x528] ss:$16 sps:$4 sm:$0xff]  }
 0x19f   : > { %4238 = vmatpush1.bf16.msra.mxu0 %v5939_v55  ;;  %v6939_v22 = vpop.f32.mrf.mxu1 }
 0x1a0   : > { %4311 = vmatpush1.bf16.msra.mxu1 %v5942_v8  ;;  %4239 = vmatprep.subr.bf16.mxu0 %v5947_v5  ;;  %v6945_v55 = vpop.f32.mrf.mxu0  ;;  %v5963_v8 = vld [vmem:[#allocation5 + $0x448] ss:$16 sps:$4 sm:$0xff]   ;;  %v5974_v5 = vld [vmem:[#allocation5 + $0x62c] ss:$16 sps:$4 sm:$0xff]  }
 0x1a1   : > { %4312 = vmatprep.subr.bf16.mxu1 %v5950_v53  ;;  %v6943_v41 = vpop.f32.mrf.mxu1 }
 0x1a2   : > { %4132 = vmatmul.mubr.bf16.gmra.mxu0 %v6570_v28  ;;  %v5960_v28 = vld [vmem:[#allocation5 + $0x668] ss:$16 sps:$4 sm:$0xff]  }
 0x1a3   : > { %4205 = vmatmul.mubr.bf16.gmra.mxu1 %v6580_v39  ;;  %4240 = vmatpush1.bf16.msra.mxu0 %v5945_v26  ;;  %v5965_v39 = vld [vmem:[#allocation5 + $0x44c] ss:$16 sps:$4 sm:$0xff]   ;;  %v6951_v53 = vpop.f32.mrf.mxu1  ;;  %v6953_v26 = vpop.f32.mrf.mxu0 }
 0x1a4   : > { %4313 = vmatpush1.bf16.msra.mxu1 %v5948_v12  ;;  %4241 = vmatprep.subr.bf16.mxu0 %v5953_v33  ;;  %v5969_v12 = vld [vmem:[#allocation5 + $0x428] ss:$16 sps:$4 sm:$0xff]   ;;  %v5977_v33 = vld [vmem:[#allocation5 + $0x40c] ss:$16 sps:$4 sm:$0xff]  }
 0x1a5   : > { %4314 = vmatprep.subr.bf16.mxu1 %v5956_v18  ;;  %4141 = vmatprep.mubr.bf16.mxu0 %v6585_v44  ;;  %v5966_v44 = vld [vmem:[#allocation5 + $0x648] ss:$16 sps:$4 sm:$0xff]   ;;  %v5980_v18 = vld [vmem:[#allocation5 + $0x60c] ss:$16 sps:$4 sm:$0xff]  }
 0x1a6   : > { %4214 = vmatprep.mubr.bf16.mxu1 %v6593_v52  ;;  %v5971_v52 = vld [vmem:[#allocation5 + $0x42c] ss:$16 sps:$4 sm:$0xff]  }
 0x1a7   : > { %4242 = vmatpush1.bf16.msra.mxu0 %v5951_v40  ;;  %v6957_v40 = vpop.f32.mrf.mxu0 }
 0x1a8   : > { %4315 = vmatpush1.bf16.msra.mxu1 %v5954_v24  ;;  %4243 = vmatprep.subr.bf16.mxu0 %v5959_v32  ;;  %v5975_v24 = vld [vmem:[#allocation5 + $0x408] ss:$16 sps:$4 sm:$0xff]   ;;  %v5983_v32 = vld [vmem:[#allocation5 + $0x5ec] ss:$16 sps:$4 sm:$0xff]  }
 0x1a9   : > { %4316 = vmatprep.subr.bf16.mxu1 %v5962_v16  ;;  %v5986_v16 = vld [vmem:[#allocation5 + $0x7ec] ss:$16 sps:$4 sm:$0xff]  }
 0x1aa   : > { %4142 = vmatmul.mubr.bf16.gmra.mxu0 %v6590_v48  ;;  %v5972_v48 = vld [vmem:[#allocation5 + $0x628] ss:$16 sps:$4 sm:$0xff]  }
 0x1ab   : > { %4215 = vmatmul.mubr.bf16.gmra.mxu1 %v6600_v61  ;;  %4244 = vmatpush1.bf16.msra.mxu0 %v5957_v56  ;;  %v6955_v61 = vpop.f32.mrf.mxu1  ;;  %v6965_v56 = vpop.f32.mrf.mxu0 }
 0x1ac   : > { %4317 = vmatpush1.bf16.msra.mxu1 %v5960_v28  ;;  %4245 = vmatprep.subr.bf16.mxu0 %v5965_v39  ;;  %v5981_v28 = vld [vmem:[#allocation5 + $0x5e8] ss:$16 sps:$4 sm:$0xff]   ;;  %v5989_v39 = vld [vmem:[#allocation5 + $0x5cc] ss:$16 sps:$4 sm:$0xff]  }
 0x1ad   : > { %4318 = vmatprep.subr.bf16.mxu1 %v5968_v1  ;;  %4151 = vmatprep.mubr.bf16.mxu0 %v6605_v2  ;;  %v5978_v2 = vld [vmem:[#allocation5 + $0x608] ss:$16 sps:$4 sm:$0xff]   ;;  %v5992_v1 = vld [vmem:[#allocation5 + $0x7cc] ss:$16 sps:$4 sm:$0xff]  }
 0x1ae   : > { %4224 = vmatprep.mubr.bf16.mxu1 %v6613_v10  ;;  %v6961_v10 = vpop.f32.mrf.mxu1 }
 0x1af   : > { %4246 = vmatpush1.bf16.msra.mxu0 %v5963_v8  ;;  %v6969_v8 = vpop.f32.mrf.mxu0 }
 0x1b0   : > { %4319 = vmatpush1.bf16.msra.mxu1 %v5966_v44  ;;  %4247 = vmatprep.subr.bf16.mxu0 %v5971_v52  ;;  %v5987_v44 = vld [vmem:[#allocation5 + $0x5c8] ss:$16 sps:$4 sm:$0xff]  }
 0x1b1   : > { %4320 = vmatprep.subr.bf16.mxu1 %v5974_v5  ;;  %v5998_v5 = vld [vmem:[#allocation5 + $0x7ac] ss:$16 sps:$4 sm:$0xff]  }
 0x1b2   : > { %4152 = vmatmul.mubr.bf16.gmra.mxu0 %v6610_v6  ;;  %v5984_v6 = vld [vmem:[#allocation5 + $0x7e8] ss:$16 sps:$4 sm:$0xff]  }
 0x1b3   : > { %4225 = vmatmul.mubr.bf16.gmra.mxu1 %v6620_v19  ;;  %4248 = vmatpush1.bf16.msra.mxu0 %v5969_v12  ;;  %v6967_v19 = vpop.f32.mrf.mxu1  ;;  %v6973_v12 = vpop.f32.mrf.mxu0 }
 0x1b4   : > { %4321 = vmatpush1.bf16.msra.mxu1 %v5972_v48  ;;  %4249 = vmatprep.subr.bf16.mxu0 %v5977_v33  ;;  %v5993_v48 = vld [vmem:[#allocation5 + $0x5a8] ss:$16 sps:$4 sm:$0xff]  }
 0x1b5   : > { %4322 = vmatprep.subr.bf16.mxu1 %v5980_v18  ;;  %4267 = vmatprep.mubr.bf16.mxu0 %v6626_v31  ;;  %v5990_v31 = vld [vmem:[#allocation5 + $0x7c8] ss:$16 sps:$4 sm:$0xff]   ;;  %v6971_v52 = vpop.f32.mrf.mxu1 }
 0x1b6   : > { %4340 = vmatprep.mubr.bf16.mxu1 %v6629_v34  ;;  %v5995_v34 = vld [vmem:[#allocation5 + $0x5ac] ss:$16 sps:$4 sm:$0xff]   ;;  %v5996_v33 = vld [vmem:[#allocation5 + $0x7a8] ss:$16 sps:$4 sm:$0xff]  }
 0x1b7   : > { %4250 = vmatpush1.bf16.msra.mxu0 %v5975_v24  ;;  %v6975_v18 = vpop.f32.mrf.mxu1  ;;  %v6001_v24 = vld [vmem:[#allocation5 + $0x58c] ss:$16 sps:$4 sm:$0xff]  }
 0x1b8   : > { %4323 = vmatpush1.bf16.msra.mxu1 %v5978_v2  ;;  %4251 = vmatprep.subr.bf16.mxu0 %v5983_v32  ;;  %v6004_v2 = vld [vmem:[#allocation5 + $0x78c] ss:$16 sps:$4 sm:$0xff]   ;;  %v6977_v32 = vpop.f32.mrf.mxu0 }
 0x1b9   : > { %4324 = vmatprep.subr.bf16.mxu1 %v5986_v16  ;;  %v5999_v16 = vld [vmem:[#allocation5 + $0x588] ss:$16 sps:$4 sm:$0xff]  }
 0x1bb   : > { %4252 = vmatpush2.bf16.msra.mxu0 %v5981_v28  ;;  %v6002_v28 = vld [vmem:[#allocation5 + $0x788] ss:$16 sps:$4 sm:$0xff]  }
 0x1bc   : > { %4325 = vmatpush2.bf16.msra.mxu1 %v5984_v6  ;;  %4253 = vmatprep.subr.bf16.mxu0 %v5989_v39  ;;  %v6979_v6 = vpop.f32.mrf.mxu1  ;;  %v6007_v39 = vld [vmem:[#allocation5 + $0x56c] ss:$16 sps:$4 sm:$0xff]  }
 0x1bd   : > { %4326 = vmatprep.subr.bf16.mxu1 %v5992_v1  ;;  %v6010_v1 = vld [vmem:[#allocation5 + $0x76c] ss:$16 sps:$4 sm:$0xff]  }
 0x1bf   : > { %4254 = vmatpush2.bf16.msra.mxu0 %v5987_v44  ;;  %v6981_v44 = vpop.f32.mrf.mxu0 }
 0x1c0   : > { %4327 = vmatpush2.bf16.msra.mxu1 %v5990_v31  ;;  %4255 = vmatprep.subr.bf16.mxu0 %v5995_v34  ;;  %v6005_v31 = vld [vmem:[#allocation5 + $0x568] ss:$16 sps:$4 sm:$0xff]  }
 0x1c1   : > { %4328 = vmatprep.subr.bf16.mxu1 %v5998_v5  ;;  %v6008_v34 = vld [vmem:[#allocation5 + $0x768] ss:$16 sps:$4 sm:$0xff]   ;;  %v6983_v5 = vpop.f32.mrf.mxu1 }
 0x1c2   : > { %7595 = vst [vmem:[#allocation52_spill] sm:$0xff] %v6983_v5  ;;  %v6025_v5 = vld [vmem:[#allocation5 + $0x50c] ss:$16 sps:$4 sm:$0xff]  }
 0x1c3   : > { %4256 = vmatpush2.bf16.msra.mxu0 %v5993_v48  ;;  %v6016_v48 = vld [vmem:[#allocation5 + $0x74c] ss:$16 sps:$4 sm:$0xff]  }
 0x1c4   : > { %4329 = vmatpush2.bf16.msra.mxu1 %v5996_v33  ;;  %4257 = vmatprep.subr.bf16.mxu0 %v6001_v24  ;;  %v6985_v33 = vpop.f32.mrf.mxu0  ;;  %v6014_v24 = vld [vmem:[#allocation5 + $0x748] ss:$16 sps:$4 sm:$0xff]  }
 0x1c5   : > { %4330 = vmatprep.subr.bf16.mxu1 %v6004_v2  ;;  %7596 = vst [vmem:[#allocation53_spill] sm:$0xff] %v6985_v33  ;;  %v6987_v2 = vpop.f32.mrf.mxu1  ;;  %v6023_v33 = vld [vmem:[#allocation5 + $0x508] ss:$16 sps:$4 sm:$0xff]  }
 0x1c6   : > { %7597 = vst [vmem:[#allocation54_spill] sm:$0xff] %v6987_v2  ;;  %v6031_v2 = vld [vmem:[#allocation5 + $0x8ec] ss:$16 sps:$4 sm:$0xff]  }
 0x1c7   : > { %4258 = vmatpush2.bf16.msra.mxu0 %v5999_v16  ;;  %v6022_v16 = vld [vmem:[#allocation5 + $0x72c] ss:$16 sps:$4 sm:$0xff]  }
 0x1c8   : > { %4331 = vmatpush2.bf16.msra.mxu1 %v6002_v28  ;;  %4259 = vmatprep.subr.bf16.mxu0 %v6007_v39  ;;  %v6989_v28 = vpop.f32.mrf.mxu0  ;;  %v6020_v39 = vld [vmem:[#allocation5 + $0x728] ss:$16 sps:$4 sm:$0xff]  }
 0x1c9   : > { %4332 = vmatprep.subr.bf16.mxu1 %v6010_v1  ;;  %v6991_v1 = vpop.f32.mrf.mxu1 }
 0x1ca   : > { %7598 = vst [vmem:[#allocation55_spill] sm:$0xff] %v6991_v1 }
 0x1cb   : > { %4260 = vmatpush2.bf16.msra.mxu0 %v6005_v31  ;;  %v6028_v31 = vld [vmem:[#allocation5 + $0x70c] ss:$16 sps:$4 sm:$0xff]  }
 0x1cc   : > { %4333 = vmatpush2.bf16.msra.mxu1 %v6008_v34  ;;  %4261 = vmatprep.subr.bf16.mxu0 %v6013_v51  ;;  %v6993_v34 = vpop.f32.mrf.mxu0  ;;  %v6026_v51 = vld [vmem:[#allocation5 + $0x708] ss:$16 sps:$4 sm:$0xff]  }
 0x1cd   : > { %4334 = vmatprep.subr.bf16.mxu1 %v6016_v48  ;;  %7599 = vst [vmem:[#allocation56_spill] sm:$0xff] %v6993_v34  ;;  %v6995_v48 = vpop.f32.mrf.mxu1  ;;  %v6037_v34 = vld [vmem:[#allocation5 + $0x8cc] ss:$16 sps:$4 sm:$0xff]  }
 0x1ce   : > { %7600 = vst [vmem:[#allocation57_spill] sm:$0xff] %v6995_v48 }
 0x1cf   : > { %4262 = vmatpush2.bf16.msra.mxu0 %v6011_v15  ;;  %v6034_v15 = vld [vmem:[#allocation5 + $0xaec] ss:$16 sps:$4 sm:$0xff]   ;;  %v6999_v1 = vpop.f32.mrf.mxu1 }
 0x1d0   : > { %4335 = vmatpush2.bf16.msra.mxu1 %v6014_v24  ;;  %4263 = vmatprep.subr.bf16.mxu0 %v6019_v46  ;;  %v6997_v24 = vpop.f32.mrf.mxu0  ;;  %v6029_v46 = vld [vmem:[#allocation5 + $0x8e8] ss:$16 sps:$4 sm:$0xff]   ;;  %7602 = vst [vmem:[#allocation59_spill] sm:$0xff] %v6999_v1 }
 0x1d1   : > { %4336 = vmatprep.subr.bf16.mxu1 %v6022_v16  ;;  %7601 = vst [vmem:[#allocation58_spill] sm:$0xff] %v6997_v24  ;;  %v6032_v16 = vld [vmem:[#allocation5 + $0xae8] ss:$16 sps:$4 sm:$0xff]  }
 0x1d2   : > { %v6092_v24 = vld [vmem:[#allocation5 + $0xba8] ss:$16 sps:$4 sm:$0xff]  }
 0x1d3   : > { %4264 = vmatpush2.bf16.msra.mxu0 %v6017_v13  ;;  %v6040_v13 = vld [vmem:[#allocation5 + $0xacc] ss:$16 sps:$4 sm:$0xff]  }
 0x1d4   : > { %4337 = vmatpush2.bf16.msra.mxu1 %v6020_v39  ;;  %4265 = vmatprep.subr.bf16.mxu0 %v6025_v5  ;;  %v7001_v39 = vpop.f32.mrf.mxu0  ;;  %v6035_v5 = vld [vmem:[#allocation5 + $0x8c8] ss:$16 sps:$4 sm:$0xff]  }
 0x1d5   : > { %4338 = vmatprep.subr.bf16.mxu1 %v6028_v31  ;;  %7603 = vst [vmem:[#allocation60_spill] sm:$0xff] %v7001_v39  ;;  %v6038_v31 = vld [vmem:[#allocation5 + $0xac8] ss:$16 sps:$4 sm:$0xff]   ;;  %v6076_v39 = vld [vmem:[#allocation5 + $0xa0c] ss:$16 sps:$4 sm:$0xff]  }
 0x1d7   : > { %4266 = vmatpush2.bf16.msra.mxu0 %v6023_v33  ;;  %v7005_v33 = vpop.f32.mrf.mxu1 }
 0x1d8   : > { %4339 = vmatpush2.bf16.msra.mxu1 %v6026_v51  ;;  %4381 = vmatprep.subr.bf16.mxu0 %v6031_v2  ;;  %7604 = vst [vmem:[#allocation61_spill] sm:$0xff] %v7005_v33  ;;  %v6043_v2 = vld [vmem:[#allocation5 + $0x8ac] ss:$16 sps:$4 sm:$0xff]  }
 0x1d9   : > { %4454 = vmatprep.subr.bf16.mxu1 %v6034_v15  ;;  %v6046_v15 = vld [vmem:[#allocation5 + $0xaac] ss:$16 sps:$4 sm:$0xff]  }
 0x1da   : > { %4268 = vmatmul.mubr.bf16.vlgmr.msra.gmra.mxu0 %v6639_v20  ;;  %v7007_v51 = vpop.f32.mrf.mxu0  ;;  %v6041_v20 = vld [vmem:[#allocation5 + $0x8a8] ss:$16 sps:$4 sm:$0xff]   ;;  %v6052_v33 = vld [vmem:[#allocation5 + $0xa8c] ss:$16 sps:$4 sm:$0xff]  }
 0x1db   : > { %4341 = vmatmul.mubr.bf16.vlgmr.msra.gmra.mxu1 %v6641_v21  ;;  %4382 = vmatpush1.bf16.msra.mxu0 %v6029_v46  ;;  %v7011_v1 = vpop.f32.mrf.mxu1  ;;  %v6044_v21 = vld [vmem:[#allocation5 + $0xaa8] ss:$16 sps:$4 sm:$0xff]  }
 0x1dc   : > { %4455 = vmatpush1.bf16.msra.mxu1 %v6032_v16  ;;  %4383 = vmatprep.subr.bf16.mxu0 %v6037_v34  ;;  %v7013_v46 = vpop.f32.mrf.mxu0  ;;  %v6049_v16 = vld [vmem:[#allocation5 + $0x88c] ss:$16 sps:$4 sm:$0xff]  }
 0x1dd   : > { %4456 = vmatprep.subr.bf16.mxu1 %v6040_v13  ;;  %4277 = vmatprep.mubr.bf16.mxu0 %v6645_v30  ;;  %v7015_v34 = vpop.f32.mrf.mxu1  ;;  %v6047_v30 = vld [vmem:[#allocation5 + $0x888] ss:$16 sps:$4 sm:$0xff]  }
 0x1de   : > { %4350 = vmatprep.mubr.bf16.mxu1 %v6649_v36  ;;  %v6050_v36 = vld [vmem:[#allocation5 + $0xa88] ss:$16 sps:$4 sm:$0xff]   ;;  %v7019_v13 = vpop.f32.mrf.mxu0 }
 0x1df   : > { %4384 = vmatpush1.bf16.msra.mxu0 %v6035_v5  ;;  %v6055_v5 = vld [vmem:[#allocation5 + $0x86c] ss:$16 sps:$4 sm:$0xff]  }
 0x1e0   : > { %4457 = vmatpush1.bf16.msra.mxu1 %v6038_v31  ;;  %4385 = vmatprep.subr.bf16.mxu0 %v6043_v2  ;;  %v6058_v31 = vld [vmem:[#allocation5 + $0xa6c] ss:$16 sps:$4 sm:$0xff]   ;;  %v7023_v2 = vpop.f32.mrf.mxu1 }
 0x1e1   : > { %4458 = vmatprep.subr.bf16.mxu1 %v6046_v15  ;;  %v7025_v15 = vpop.f32.mrf.mxu0 }
 0x1e2   : > { %4278 = vmatmul.mubr.bf16.gmra.mxu0 %v6659_v47  ;;  %v6053_v47 = vld [vmem:[#allocation5 + $0x868] ss:$16 sps:$4 sm:$0xff]  }
 0x1e3   : > { %4351 = vmatmul.mubr.bf16.gmra.mxu1 %v6661_v49  ;;  %4386 = vmatpush1.bf16.msra.mxu0 %v6041_v20  ;;  %v6056_v49 = vld [vmem:[#allocation5 + $0xa68] ss:$16 sps:$4 sm:$0xff]   ;;  %v6061_v20 = vld [vmem:[#allocation5 + $0x84c] ss:$16 sps:$4 sm:$0xff]  }
 0x1e4   : > { %4459 = vmatpush1.bf16.msra.mxu1 %v6044_v21  ;;  %4387 = vmatprep.subr.bf16.mxu0 %v6049_v16  ;;  %v6064_v21 = vld [vmem:[#allocation5 + $0xa4c] ss:$16 sps:$4 sm:$0xff]   ;;  %v7027_v16 = vpop.f32.mrf.mxu1 }
 0x1e5   : > { %4460 = vmatprep.subr.bf16.mxu1 %v6052_v33  ;;  %4287 = vmatprep.mubr.bf16.mxu0 %v6665_v59  ;;  %v6059_v59 = vld [vmem:[#allocation5 + $0x848] ss:$16 sps:$4 sm:$0xff]   ;;  %v7031_v33 = vpop.f32.mrf.mxu0 }
 0x1e6   : > { %4360 = vmatprep.mubr.bf16.mxu1 %v6669_v63  ;;  %v6062_v63 = vld [vmem:[#allocation5 + $0xa48] ss:$16 sps:$4 sm:$0xff]  }
 0x1e7   : > { %4388 = vmatpush1.bf16.msra.mxu0 %v6047_v30  ;;  %v7033_v30 = vpop.f32.mrf.mxu1 }
 0x1e8   : > { %4461 = vmatpush1.bf16.msra.mxu1 %v6050_v36  ;;  %4389 = vmatprep.subr.bf16.mxu0 %v6055_v5  ;;  %v6067_v36 = vld [vmem:[#allocation5 + $0x82c] ss:$16 sps:$4 sm:$0xff]  }
 0x1e9   : > { %4462 = vmatprep.subr.bf16.mxu1 %v6058_v31  ;;  %v6070_v5 = vld [vmem:[#allocation5 + $0xa2c] ss:$16 sps:$4 sm:$0xff]   ;;  %v7037_v31 = vpop.f32.mrf.mxu0 }
 0x1ea   : > { %4288 = vmatmul.mubr.bf16.gmra.mxu0 %v6679_v11  ;;  %v6065_v11 = vld [vmem:[#allocation5 + $0x828] ss:$16 sps:$4 sm:$0xff]  }
 0x1eb   : > { %4361 = vmatmul.mubr.bf16.gmra.mxu1 %v6681_v14  ;;  %4390 = vmatpush1.bf16.msra.mxu0 %v6053_v47  ;;  %v6068_v14 = vld [vmem:[#allocation5 + $0xa28] ss:$16 sps:$4 sm:$0xff]   ;;  %v7039_v47 = vpop.f32.mrf.mxu1 }
 0x1ec   : > { %4463 = vmatpush1.bf16.msra.mxu1 %v6056_v49  ;;  %4391 = vmatprep.subr.bf16.mxu0 %v6061_v20  ;;  %v6073_v49 = vld [vmem:[#allocation5 + $0x80c] ss:$16 sps:$4 sm:$0xff]   ;;  %v7043_v20 = vpop.f32.mrf.mxu0 }
 0x1ed   : > { %4464 = vmatprep.subr.bf16.mxu1 %v6064_v21  ;;  %4297 = vmatprep.mubr.bf16.mxu0 %v6685_v25  ;;  %v6071_v25 = vld [vmem:[#allocation5 + $0x808] ss:$16 sps:$4 sm:$0xff]   ;;  %v7045_v21 = vpop.f32.mrf.mxu1 }
 0x1ee   : > { %4370 = vmatprep.mubr.bf16.mxu1 %v6688_v27  ;;  %v6074_v27 = vld [vmem:[#allocation5 + $0xa08] ss:$16 sps:$4 sm:$0xff]  }
 0x1ef   : > { %4392 = vmatpush1.bf16.msra.mxu0 %v6059_v59  ;;  %v6079_v59 = vld [vmem:[#allocation5 + $0x9ec] ss:$16 sps:$4 sm:$0xff]  }
 0x1f0   : > { %4465 = vmatpush1.bf16.msra.mxu1 %v6062_v63  ;;  %4393 = vmatprep.subr.bf16.mxu0 %v6067_v36  ;;  %v6082_v63 = vld [vmem:[#allocation5 + $0xbec] ss:$16 sps:$4 sm:$0xff]   ;;  %v7049_v36 = vpop.f32.mrf.mxu0 }
 0x1f1   : > { %4466 = vmatprep.subr.bf16.mxu1 %v6070_v5  ;;  %v7051_v5 = vpop.f32.mrf.mxu1 }
 0x1f2   : > { %4298 = vmatmul.mubr.bf16.gmra.mxu0 %v6698_v43  ;;  %v6077_v43 = vld [vmem:[#allocation5 + $0x9e8] ss:$16 sps:$4 sm:$0xff]   ;;  %7605 = vst [vmem:[#allocation62_spill] sm:$0xff] %v7051_v5  ;;  %v7053_v48 = vpop.f32.mrf.mxu0 }
 0x1f3   : > { %4371 = vmatmul.mubr.bf16.gmra.mxu1 %v6700_v45  ;;  %4394 = vmatpush1.bf16.msra.mxu0 %v6065_v11  ;;  %v6080_v45 = vld [vmem:[#allocation5 + $0xbe8] ss:$16 sps:$4 sm:$0xff]   ;;  %v6085_v11 = vld [vmem:[#allocation5 + $0x9cc] ss:$16 sps:$4 sm:$0xff]  }
 0x1f4   : > { %4467 = vmatpush1.bf16.msra.mxu1 %v6068_v14  ;;  %4395 = vmatprep.subr.bf16.mxu0 %v6073_v49  ;;  %v6088_v14 = vld [vmem:[#allocation5 + $0xbcc] ss:$16 sps:$4 sm:$0xff]   ;;  %v6086_v49 = vld [vmem:[#allocation5 + $0xbc8] ss:$16 sps:$4 sm:$0xff]  }
 0x1f5   : > { %4468 = vmatprep.subr.bf16.mxu1 %v6076_v39  ;;  %4413 = vmatprep.mubr.bf16.mxu0 %v6705_v57  ;;  %v6083_v39 = vld [vmem:[#allocation5 + $0x9c8] ss:$16 sps:$4 sm:$0xff]   ;;  %v7055_v57 = vpop.f32.mrf.mxu1 }
 0x1f6   : > { %4486 = vmatprep.mubr.bf16.mxu1 %v6707_v58  ;;  %7606 = vst [vmem:[#allocation63_spill] sm:$0xff] %v7055_v57  ;;  %v6091_v58 = vld [vmem:[#allocation5 + $0x9ac] ss:$16 sps:$4 sm:$0xff]   ;;  %v6095_v5 = vld [vmem:[#allocation5 + $0x988] ss:$16 sps:$4 sm:$0xff]  }
 0x1f7   : > { %4396 = vmatpush1.bf16.msra.mxu0 %v6071_v25  ;;  %v6094_v25 = vld [vmem:[#allocation5 + $0xbac] ss:$16 sps:$4 sm:$0xff]   ;;  %v6098_v57 = vld [vmem:[#allocation5 + $0xb88] ss:$16 sps:$4 sm:$0xff]  }
 0x1f8   : > { %4469 = vmatpush1.bf16.msra.mxu1 %v6074_v27  ;;  %4397 = vmatprep.subr.bf16.mxu0 %v6079_v59  ;;  %v6089_v27 = vld [vmem:[#allocation5 + $0x9a8] ss:$16 sps:$4 sm:$0xff]   ;;  %v7057_v59 = vpop.f32.mrf.mxu0 }
 0x1f9   : > { %4470 = vmatprep.subr.bf16.mxu1 %v6082_v63  ;;  %7607 = vst [vmem:[#allocation64_spill] sm:$0xff] %v7057_v59  ;;  %v7059_v63 = vpop.f32.mrf.mxu1  ;;  %v6101_v59 = vld [vmem:[#allocation5 + $0x968] ss:$16 sps:$4 sm:$0xff]  }
 0x1fa   : > { %7608 = vst [vmem:[#allocation65_spill] sm:$0xff] %v7059_v63  ;;  %v6104_v63 = vld [vmem:[#allocation5 + $0xb68] ss:$16 sps:$4 sm:$0xff]  }
 0x1fb   : > { %4398 = vmatpush2.bf16.msra.mxu0 %v6077_v43  ;;  %v6097_v43 = vld [vmem:[#allocation5 + $0x98c] ss:$16 sps:$4 sm:$0xff]  }
 0x1fc   : > { %4471 = vmatpush2.bf16.msra.mxu1 %v6080_v45  ;;  %4399 = vmatprep.subr.bf16.mxu0 %v6085_v11  ;;  %v6100_v45 = vld [vmem:[#allocation5 + $0xb8c] ss:$16 sps:$4 sm:$0xff]   ;;  %v7061_v11 = vpop.f32.mrf.mxu0 }
 0x1fd   : > { %4472 = vmatprep.subr.bf16.mxu1 %v6088_v14  ;;  %7609 = vst [vmem:[#allocation66_spill] sm:$0xff] %v7061_v11  ;;  %v7063_v14 = vpop.f32.mrf.mxu1  ;;  %v6107_v11 = vld [vmem:[#allocation5 + $0x948] ss:$16 sps:$4 sm:$0xff]  }
 0x1fe   : > { %7610 = vst [vmem:[#allocation67_spill] sm:$0xff] %v7063_v14  ;;  %v6110_v14 = vld [vmem:[#allocation5 + $0xb48] ss:$16 sps:$4 sm:$0xff]  }
 0x1ff   : > { %4400 = vmatpush2.bf16.msra.mxu0 %v6083_v39  ;;  %v6103_v39 = vld [vmem:[#allocation5 + $0x96c] ss:$16 sps:$4 sm:$0xff]  }
 0x200   : > { %4473 = vmatpush2.bf16.msra.mxu1 %v6086_v49  ;;  %4401 = vmatprep.subr.bf16.mxu0 %v6091_v58  ;;  %v6106_v49 = vld [vmem:[#allocation5 + $0xb6c] ss:$16 sps:$4 sm:$0xff]   ;;  %v7065_v58 = vpop.f32.mrf.mxu0 }
 0x201   : > { %4474 = vmatprep.subr.bf16.mxu1 %v6094_v25  ;;  %7611 = vst [vmem:[#allocation68_spill] sm:$0xff] %v7065_v58  ;;  %v7067_v25 = vpop.f32.mrf.mxu1  ;;  %v3546_v58 = vadd.f32 %v6840_v4, %v6811_v0 }
 0x202   : > { %7612 = vst [vmem:[#allocation69_spill] sm:$0xff] %v7067_v25 }
 0x203   : > { %4402 = vmatpush2.bf16.msra.mxu0 %v6089_v27  ;;  %v6112_v27 = vld [vmem:[#allocation5 + $0xb4c] ss:$16 sps:$4 sm:$0xff]   ;;  %v3619_v4 = vadd.f32 %v6853_v7, %v3546_v58  ;;  %v7618_v58 = vld [vmem:[#allocation40_spill] sm:$0xff] }
 0x204   : > { %4475 = vmatpush2.bf16.msra.mxu1 %v6092_v24  ;;  %4403 = vmatprep.subr.bf16.mxu0 %v6097_v43  ;;  %v6109_v24 = vld [vmem:[#allocation5 + $0x94c] ss:$16 sps:$4 sm:$0xff]   ;;  %v7069_v43 = vpop.f32.mrf.mxu0 }
 0x205   : > { %4476 = vmatprep.subr.bf16.mxu1 %v6100_v45  ;;  %7613 = vst [vmem:[#allocation70_spill] sm:$0xff] %v7069_v43  ;;  %v7071_v45 = vpop.f32.mrf.mxu1 }
 0x206   : > { %7614 = vst [vmem:[#allocation71_spill] sm:$0xff] %v7071_v45  ;;  %v3688_v45 = vadd.f32 %v6933_v60, %v6837_v17  ;;  %v3556_v17 = vadd.f32 %v6873_v35, %v6811_v0  ;;  %v6128_v35 = vld [vmem:[#allocation5 + $0xee8] ss:$16 sps:$4 sm:$0xff]  }
 0x207   : > { %4404 = vmatpush2.bf16.msra.mxu0 %v6095_v5  ;;  %v6115_v5 = vld [vmem:[#allocation5 + $0x92c] ss:$16 sps:$4 sm:$0xff]   ;;  %v7079_v25 = vpop.f32.mrf.mxu1 }
 0x208   : > { %4477 = vmatpush2.bf16.msra.mxu1 %v6098_v57  ;;  %4405 = vmatprep.subr.bf16.mxu0 %v6103_v39  ;;  %v6118_v57 = vld [vmem:[#allocation5 + $0xb2c] ss:$16 sps:$4 sm:$0xff]   ;;  %v3686_v39 = vadd.f32 %v6927_v54, %v6825_v42  ;;  %7616 = vst [vmem:[#allocation73_spill] sm:$0xff] %v7079_v25  ;;  %v3761_v7 = vadd.f32 %v6939_v22, %v3688_v45 }
 0x209   : > { %4478 = vmatprep.subr.bf16.mxu1 %v6106_v49  ;;  %v7077_v49 = vpop.f32.mrf.mxu0  ;;  %v7617_v42 = vld [vmem:[#allocation35_spill] sm:$0xff] }
 0x20a   : > { %7615 = vst [vmem:[#allocation72_spill] sm:$0xff] %v7077_v49  ;;  %v3759_v43 = vadd.f32 %v6931_v62, %v3686_v39  ;;  %v3690_v54 = vadd.f32 %v6941_v29, %v7617_v42  ;;  %v6130_v25 = vld [vmem:[#allocation5 + $0xeec] ss:$16 sps:$4 sm:$0xff]   ;;  %v3692_v62 = vadd.f32 %v6945_v55, %v3619_v4  ;;  %v3566_v29 = vadd.f32 %v6902_v50, %v6811_v0  ;;  %v7620_v42 = vld [vmem:[#allocation44_spill] sm:$0xff] }
 0x20b   : > { %4406 = vmatpush2.bf16.msra.mxu0 %v6101_v59  ;;  %v6113_v59 = vld [vmem:[#allocation5 + $0x928] ss:$16 sps:$4 sm:$0xff]   ;;  %v7087_v49 = vpop.f32.mrf.mxu0  ;;  %v3696_v39 = vadd.f32 %v6953_v26, %v7618_v58  ;;  %v6133_v50 = vld [vmem:[#allocation5 + $0xccc] ss:$16 sps:$4 sm:$0xff]  }
 0x20c   : > { %4479 = vmatpush2.bf16.msra.mxu1 %v6104_v63  ;;  %4407 = vmatprep.subr.bf16.mxu0 %v6109_v24  ;;  %v6116_v63 = vld [vmem:[#allocation5 + $0xb28] ss:$16 sps:$4 sm:$0xff]   ;;  %v6121_v24 = vld [vmem:[#allocation5 + $0x90c] ss:$16 sps:$4 sm:$0xff]   ;;  %v3832_v60 = vadd.f32 %v7007_v51, %v3759_v43  ;;  %v7113_v4 = vadd.f32 %v6909_v37, %v3566_v29 }
 0x20d   : > { %4480 = vmatprep.subr.bf16.mxu1 %v6112_v27  ;;  %v6124_v27 = vld [vmem:[#allocation5 + $0xb0c] ss:$16 sps:$4 sm:$0xff]   ;;  %v7104_v55 = vpop.f32.mrf.mxu0  ;;  %v6131_v37 = vld [vmem:[#allocation5 + $0xcc8] ss:$16 sps:$4 sm:$0xff]  }
 0x20e   : > { %v6136_v26 = vld [vmem:[#allocation5 + $0xecc] ss:$16 sps:$4 sm:$0xff]   ;;  %v3905_v43 = vadd.f32 %v7011_v1, %v3832_v60 }
 0x20f   : > { %4408 = vmatpush2.bf16.msra.mxu0 %v6107_v11  ;;  %v6119_v11 = vld [vmem:[#allocation5 + $0x908] ss:$16 sps:$4 sm:$0xff]   ;;  %v6139_v60 = vld [vmem:[#allocation5 + $0xcac] ss:$16 sps:$4 sm:$0xff]  }
 0x210   : > { %4481 = vmatpush2.bf16.msra.mxu1 %v6110_v14  ;;  %4409 = vmatprep.subr.bf16.mxu0 %v6115_v5  ;;  %v6122_v14 = vld [vmem:[#allocation5 + $0xb08] ss:$16 sps:$4 sm:$0xff]   ;;  %v7089_v5 = vpop.f32.mrf.mxu1 }
 0x211   : > { %4482 = vmatprep.subr.bf16.mxu1 %v6118_v57  ;;  %v6127_v57 = vld [vmem:[#allocation5 + $0xcec] ss:$16 sps:$4 sm:$0xff]  }
 0x212   : > { %v7106_v51 = vpop.f32.mrf.mxu1 }
 0x213   : > { %4410 = vmatpush2.bf16.msra.mxu0 %v6113_v59  ;;  %v3763_v59 = vadd.f32 %v6943_v41, %v3690_v54  ;;  %v3629_v41 = vadd.f32 %v6888_v3, %v3556_v17  ;;  %v3700_v54 = vadd.f32 %v6965_v56, %v7620_v42 }
 0x214   : > { %4483 = vmatpush2.bf16.msra.mxu1 %v6116_v63  ;;  %4411 = vmatprep.subr.bf16.mxu0 %v6121_v24  ;;  %v3834_v63 = vadd.f32 %v7013_v46, %v3761_v7  ;;  %v6125_v24 = vld [vmem:[#allocation5 + $0xce8] ss:$16 sps:$4 sm:$0xff]   ;;  %v3765_v46 = vadd.f32 %v6951_v53, %v3692_v62 }
 0x215   : > { %4484 = vmatprep.subr.bf16.mxu1 %v6124_v27  ;;  %v7619_v27 = vld [vmem:[#allocation41_spill] sm:$0xff]  ;;  %v3836_v45 = vadd.f32 %v7019_v13, %v3763_v59  ;;  %v6134_v13 = vld [vmem:[#allocation5 + $0xec8] ss:$16 sps:$4 sm:$0xff]   ;;  %v3702_v56 = vadd.f32 %v6969_v8, %v3629_v41  ;;  %v7624_v59 = vld [vmem:[#allocation15_spill] sm:$0xff]  ;;  %v3773_v8 = vadd.f32 %v6967_v19, %v3700_v54 }
 0x216   : > { %v3698_v22 = vadd.f32 %v6957_v40, %v7619_v27  ;;  %v3769_v40 = vadd.f32 %v6955_v61, %v3696_v39  ;;  %v3907_v3 = vadd.f32 %v7015_v34, %v3834_v63  ;;  %v3838_v53 = vadd.f32 %v7025_v15, %v3765_v46  ;;  %v6142_v34 = vld [vmem:[#allocation5 + $0xeac] ss:$16 sps:$4 sm:$0xff]   ;;  %v7623_v39 = vld [vmem:[#allocation14_spill] sm:$0xff]  ;;  %v7626_v54 = vld [vmem:[#allocation16_spill] sm:$0xff] }
 0x217   : > { %4412 = vmatpush2.bf16.msra.mxu0 %v6119_v11  ;;  %v3909_v15 = vadd.f32 %v7023_v2, %v3836_v45  ;;  %v6140_v41 = vld [vmem:[#allocation5 + $0xea8] ss:$16 sps:$4 sm:$0xff]   ;;  %v3846_v46 = vadd.f32 %v7043_v20, %v3773_v8 }
 0x218   : > { %4485 = vmatpush2.bf16.msra.mxu1 %v6122_v14  ;;  %4527 = vmatprep.subr.bf16.mxu0 %v6127_v57  ;;  %v7621_v14 = vld [vmem:[#allocation12_spill] sm:$0xff]  ;;  %v7622_v57 = vld [vmem:[#allocation13_spill] sm:$0xff]  ;;  %v3771_v61 = vadd.f32 %v6961_v10, %v3698_v22  ;;  %v3842_v17 = vadd.f32 %v7031_v33, %v3769_v40  ;;  %v3576_v10 = vadd.f32 %v6923_v9, %v6811_v0 }
 0x219   : > { %4600 = vmatprep.subr.bf16.mxu1 %v6130_v25  ;;  %v3706_v33 = vadd.f32 %v6973_v12, %v6897_v23  ;;  %v3911_v2 = vadd.f32 %v7027_v16, %v3838_v53  ;;  %v3775_v0 = vadd.f32 %v6971_v52, %v3702_v56  ;;  %v3708_v9 = vadd.f32 %v6977_v32, %v6900_v38  ;;  %v6145_v16 = vld [vmem:[#allocation5 + $0xc8c] ss:$16 sps:$4 sm:$0xff]   ;;  %v6146_v53 = vld [vmem:[#allocation5 + $0xe88] ss:$16 sps:$4 sm:$0xff]  }
 0x21a   : > { %v3977_v25 = vpop.f32.mrf.mxu0  ;;  %4414 = vmatmul.mubr.bf16.vlgmr.msra.gmra.mxu0 %v7621_v14  ;;  %v3844_v63 = vadd.f32 %v7037_v31, %v3771_v61  ;;  %v3915_v23 = vadd.f32 %v7033_v30, %v3842_v17  ;;  %v6148_v31 = vld [vmem:[#allocation5 + $0xe8c] ss:$16 sps:$4 sm:$0xff]   ;;  %v3919_v17 = vadd.f32 %v7045_v21, %v3846_v46  ;;  %v7635_v21 = vld [vmem:[#allocation62_spill] sm:$0xff] }
 0x21b   : > { %v4050_v11 = vpop.f32.mrf.mxu1  ;;  %4487 = vmatmul.mubr.bf16.vlgmr.msra.gmra.mxu1 %v7622_v57  ;;  %v3978_v1 = vadd.f32 %v3977_v25, %v3905_v43  ;;  %4528 = vmatpush1.bf16.msra.mxu0 %v6125_v24  ;;  %v3779_v38 = vadd.f32 %v6975_v18, %v3706_v33  ;;  %v7625_v32 = vld [vmem:[#allocation47_spill] sm:$0xff]  ;;  %v7627_v25 = vld [vmem:[#allocation17_spill] sm:$0xff]  ;;  %v6143_v18 = vld [vmem:[#allocation5 + $0xc88] ss:$16 sps:$4 sm:$0xff]  }
 0x21c   : > { %4601 = vmatpush1.bf16.msra.mxu1 %v6128_v35  ;;  %v3979_v7 = vpop.f32.mrf.mxu0  ;;  %4529 = vmatprep.subr.bf16.mxu0 %v6133_v50  ;;  %v3710_v30 = vadd.f32 %v6981_v44, %v7625_v32  ;;  %v3917_v40 = vadd.f32 %v7039_v47, %v3844_v63  ;;  %v3781_v44 = vadd.f32 %v6979_v6, %v3708_v9  ;;  %v7628_v47 = vld [vmem:[#allocation53_spill] sm:$0xff]  ;;  %v7630_v6 = vld [vmem:[#allocation19_spill] sm:$0xff]  ;;  %v7640_v46 = vld [vmem:[#allocation66_spill] sm:$0xff] }
 0x21d   : > { %v4052_v62 = vpop.f32.mrf.mxu1  ;;  %4602 = vmatprep.subr.bf16.mxu1 %v6136_v26  ;;  %v4051_v29 = vadd.f32 %v4050_v11, %v3978_v1  ;;  %v3980_v58 = vadd.f32 %v3979_v7, %v3907_v3  ;;  %4423 = vmatprep.mubr.bf16.mxu0 %v7623_v39  ;;  %v6137_v26 = vld [vmem:[#allocation5 + $0xca8] ss:$16 sps:$4 sm:$0xff]   ;;  %v3848_v11 = vadd.f32 %v7049_v36, %v3775_v0  ;;  %v6151_v36 = vld [vmem:[#allocation5 + $0xc6c] ss:$16 sps:$4 sm:$0xff]  }
 0x21e   : > { %4496 = vmatprep.mubr.bf16.mxu1 %v7624_v59  ;;  %v3981_v24 = vpop.f32.mrf.mxu0  ;;  %v3712_v1 = vadd.f32 %v7628_v47, %v7113_v4  ;;  %v6154_v56 = vld [vmem:[#allocation5 + $0xe6c] ss:$16 sps:$4 sm:$0xff]   ;;  %v7634_v59 = vld [vmem:[#allocation64_spill] sm:$0xff] }
 0x21f   : > { %v4054_v35 = vpop.f32.mrf.mxu1  ;;  %v4673_v27 = vmax.f32 %v4051_v29, 0.0  ;;  %v4053_v22 = vadd.f32 %v4052_v62, %v3980_v58  ;;  %v3982_v50 = vadd.f32 %v3981_v24, %v3909_v15  ;;  %4530 = vmatpush1.bf16.msra.mxu0 %v6131_v37  ;;  %v3852_v37 = vadd.f32 %v7053_v48, %v3779_v38  ;;  %v7631_v4 = vld [vmem:[#allocation51_spill] sm:$0xff]  ;;  %v7632_v48 = vld [vmem:[#allocation52_spill] sm:$0xff] }
 0x220   : > { %4603 = vmatpush1.bf16.msra.mxu1 %v6134_v13  ;;  %v3983_v19 = vpop.f32.mrf.mxu0  ;;  %4531 = vmatprep.subr.bf16.mxu0 %v6139_v60  ;;  %v3649_v15 = vadd.f32 %v7631_v4, %v3576_v10  ;;  %v3783_v29 = vadd.f32 %v7632_v48, %v3710_v30  ;;  %v7633_v58 = vld [vmem:[#allocation48_spill] sm:$0xff]  ;;  %v3854_v8 = vadd.f32 %v7634_v59, %v3781_v44  ;;  %v7639_v9 = vld [vmem:[#allocation63_spill] sm:$0xff] }
 0x221   : > { %v4056_v12 = vpop.f32.mrf.mxu1  ;;  %4604 = vmatprep.subr.bf16.mxu1 %v6142_v34  ;;  %4705 = vst [vmem:[%s7143_s20] sm:$0xff] %v4673_v27  ;;  %v4674_v52 = vmax.f32 %v4053_v22, 0.0  ;;  %v4055_v43 = vadd.f32 %v4054_v35, %v3982_v50  ;;  %v3984_v45 = vadd.f32 %v3983_v19, %v3911_v2  ;;  %v7629_v34 = vld [vmem:[#allocation18_spill] sm:$0xff]  ;;  %v3716_v39 = vadd.f32 %v6989_v28, %v7633_v58  ;;  %v7638_v0 = vld [vmem:[#allocation56_spill] sm:$0xff]  ;;  %v7641_v32 = vld [vmem:[#allocation55_spill] sm:$0xff] }
 0x222   : > { %v3987_v42 = vpop.f32.mrf.mxu0  ;;  %4424 = vmatmul.mubr.bf16.gmra.mxu0 %v7626_v54  ;;  %v3921_v24 = vadd.f32 %v7635_v21, %v3848_v11  ;;  %v6149_v22 = vld [vmem:[#allocation5 + $0xc68] ss:$16 sps:$4 sm:$0xff]   ;;  %v6166_v4 = vld [vmem:[#allocation5 + $0xe2c] ss:$16 sps:$4 sm:$0xff]  }
 0x223   : > { %v4060_v20 = vpop.f32.mrf.mxu1  ;;  %4497 = vmatmul.mubr.bf16.gmra.mxu1 %v7627_v25  ;;  %4706 = vst [vmem:[%s7143_s20 + $0x8] sm:$0xff] %v4674_v52  ;;  %v4677_v14 = vmax.f32 %v4055_v43, 0.0  ;;  %v4057_v57 = vadd.f32 %v4056_v12, %v3984_v45  ;;  %v3988_v3 = vadd.f32 %v3987_v42, %v3915_v23  ;;  %4532 = vmatpush1.bf16.msra.mxu0 %v6137_v26  ;;  %v6152_v10 = vld [vmem:[#allocation5 + $0xe68] ss:$16 sps:$4 sm:$0xff]   ;;  %v7651_v48 = vld [vmem:[#allocation67_spill] sm:$0xff] }
 0x224   : > { %4605 = vmatpush1.bf16.msra.mxu1 %v6140_v41  ;;  %v3989_v13 = vpop.f32.mrf.mxu0  ;;  %4533 = vmatprep.subr.bf16.mxu0 %v6145_v16  ;;  %v7636_v50 = vld [vmem:[#allocation54_spill] sm:$0xff]  ;;  %v7637_v41 = vld [vmem:[#allocation49_spill] sm:$0xff]  ;;  %v3925_v23 = vadd.f32 %v7639_v9, %v3852_v37  ;;  %v3856_v52 = vadd.f32 %v7640_v46, %v3783_v29  ;;  %v3789_v30 = vadd.f32 %v7641_v32, %v3716_v39  ;;  %v7655_v21 = vld [vmem:[#allocation72_spill] sm:$0xff] }
 0x225   : > { %v4062_v61 = vpop.f32.mrf.mxu1  ;;  %4606 = vmatprep.subr.bf16.mxu1 %v6148_v31  ;;  %4709 = vst [vmem:[%s7143_s20 + $0x20] sm:$0xff] %v4677_v14  ;;  %v4678_v7 = vmax.f32 %v4057_v57, 0.0  ;;  %v3990_v62 = vadd.f32 %v3989_v13, %v3917_v40  ;;  %v4061_v60 = vadd.f32 %v4060_v20, %v3988_v3  ;;  %4433 = vmatprep.mubr.bf16.mxu0 %v7629_v34  ;;  %v6157_v16 = vld [vmem:[#allocation5 + $0xc4c] ss:$16 sps:$4 sm:$0xff]   ;;  %v7642_v40 = vld [vmem:[#allocation50_spill] sm:$0xff]  ;;  %v7645_v14 = vld [vmem:[#allocation20_spill] sm:$0xff] }
 0x226   : > { %4506 = vmatprep.mubr.bf16.mxu1 %v7630_v6  ;;  %v3991_v33 = vpop.f32.mrf.mxu0  ;;  %v3785_v26 = vadd.f32 %v7636_v50, %v3712_v1  ;;  %v3718_v28 = vadd.f32 %v7638_v0, %v7637_v41  ;;  %v6160_v31 = vld [vmem:[#allocation5 + $0xe4c] ss:$16 sps:$4 sm:$0xff]   ;;  %v7643_v42 = vld [vmem:[#allocation58_spill] sm:$0xff]  ;;  %v3929_v29 = vadd.f32 %v7651_v48, %v3856_v52 }
 0x227   : > { %v4064_v63 = vpop.f32.mrf.mxu1  ;;  %4710 = vst [vmem:[%s7143_s20 + $0x28] sm:$0xff] %v4678_v7  ;;  %v4681_v35 = vmax.f32 %v4061_v60, 0.0  ;;  %v3992_v2 = vadd.f32 %v3991_v33, %v3919_v17  ;;  %v4063_v27 = vadd.f32 %v4062_v61, %v3990_v62  ;;  %4534 = vmatpush1.bf16.msra.mxu0 %v6143_v18  ;;  %v3720_v54 = vadd.f32 %v7643_v42, %v7642_v40  ;;  %v7644_v20 = vld [vmem:[#allocation65_spill] sm:$0xff]  ;;  %v7647_v18 = vld [vmem:[#allocation68_spill] sm:$0xff]  ;;  %v7650_v7 = vld [vmem:[#allocation70_spill] sm:$0xff] }
 0x228   : > { %4607 = vmatpush1.bf16.msra.mxu1 %v6146_v53  ;;  %v3993_v19 = vpop.f32.mrf.mxu0  ;;  %4535 = vmatprep.subr.bf16.mxu0 %v6151_v36  ;;  %v3927_v25 = vadd.f32 %v7644_v20, %v3854_v8  ;;  %v7646_v3 = vld [vmem:[#allocation21_spill] sm:$0xff]  ;;  %v3858_v53 = vadd.f32 %v7647_v18, %v3785_v26  ;;  %v6155_v37 = vld [vmem:[#allocation5 + $0xc48] ss:$16 sps:$4 sm:$0xff]   ;;  %v3862_v62 = vadd.f32 %v7650_v7, %v3789_v30  ;;  %v7653_v33 = vld [vmem:[#allocation23_spill] sm:$0xff] }
 0x229   : > { %v4066_v12 = vpop.f32.mrf.mxu1  ;;  %4608 = vmatprep.subr.bf16.mxu1 %v6154_v56  ;;  %4713 = vst [vmem:[%s7143_s20 + $0x40] sm:$0xff] %v4681_v35  ;;  %v4682_v43 = vmax.f32 %v4063_v27, 0.0  ;;  %v3994_v45 = vadd.f32 %v3993_v19, %v3921_v24  ;;  %v4065_v38 = vadd.f32 %v4064_v63, %v3992_v2  ;;  %v6158_v13 = vld [vmem:[#allocation5 + $0xe48] ss:$16 sps:$4 sm:$0xff]   ;;  %v7648_v61 = vld [vmem:[#allocation57_spill] sm:$0xff] }
 0x22a   : > { %v3997_v11 = vpop.f32.mrf.mxu0  ;;  %4434 = vmatmul.mubr.bf16.gmra.mxu0 %v7645_v14  ;;  %v3791_v36 = vadd.f32 %v7648_v61, %v3718_v28  ;;  %v7649_v56 = vld [vmem:[#allocation60_spill] sm:$0xff]  ;;  %v6163_v6 = vld [vmem:[#allocation5 + $0xc2c] ss:$16 sps:$4 sm:$0xff]   ;;  %v7652_v8 = vld [vmem:[#allocation22_spill] sm:$0xff] }
 0x22b   : > { %v4070_v57 = vpop.f32.mrf.mxu1  ;;  %4507 = vmatmul.mubr.bf16.gmra.mxu1 %v7646_v3  ;;  %4714 = vst [vmem:[%s7143_s20 + $0x48] sm:$0xff] %v4682_v43  ;;  %v4685_v44 = vmax.f32 %v4065_v38, 0.0  ;;  %v3998_v47 = vadd.f32 %v3997_v11, %v3925_v23  ;;  %v4067_v1 = vadd.f32 %v4066_v12, %v3994_v45  ;;  %4536 = vmatpush1.bf16.msra.mxu0 %v6149_v22  ;;  %v7656_v27 = vld [vmem:[#allocation69_spill] sm:$0xff]  ;;  %v6161_v41 = vld [vmem:[#allocation5 + $0xc28] ss:$16 sps:$4 sm:$0xff]   ;;  %v7658_v23 = vld [vmem:[#allocation71_spill] sm:$0xff] }
 0x22c   : > { %4609 = vmatpush1.bf16.msra.mxu1 %v6152_v10  ;;  %v3722_v17 = vadd.f32 %v7649_v56, %v3649_v15  ;;  %v3999_v60 = vpop.f32.mrf.mxu0  ;;  %4537 = vmatprep.subr.bf16.mxu0 %v6157_v16  ;;  %v7654_v15 = vld [vmem:[#allocation59_spill] sm:$0xff]  ;;  %v3864_v24 = vadd.f32 %v7655_v21, %v3791_v36  ;;  %v3931_v22 = vadd.f32 %v7656_v27, %v3858_v53  ;;  %v6164_v0 = vld [vmem:[#allocation5 + $0xe28] ss:$16 sps:$4 sm:$0xff]   ;;  %v7657_v28 = vld [vmem:[#allocation61_spill] sm:$0xff] }
 0x22d   : > { %v4072_v34 = vpop.f32.mrf.mxu1  ;;  %4610 = vmatprep.subr.bf16.mxu1 %v6160_v31  ;;  %4717 = vst [vmem:[%s7143_s20 + $0x60] sm:$0xff] %v4685_v44  ;;  %v4686_v58 = vmax.f32 %v4067_v1, 0.0  ;;  %v4000_v39 = vadd.f32 %v3999_v60, %v3927_v25  ;;  %v4071_v59 = vadd.f32 %v4070_v57, %v3998_v47  ;;  %4443 = vmatprep.mubr.bf16.mxu0 %v7652_v8  ;;  %v6169_v31 = vld [vmem:[#allocation5 + $0xc0c] ss:$16 sps:$4 sm:$0xff]   ;;  %v7660_v42 = vld [vmem:[#allocation24_spill] sm:$0xff]  ;;  %v7662_v61 = vld [vmem:[#allocation26_spill] sm:$0xff] }
 0x22e   : > { %4516 = vmatprep.mubr.bf16.mxu1 %v7653_v33  ;;  %v3793_v63 = vadd.f32 %v7654_v15, %v3720_v54  ;;  %v4001_v35 = vpop.f32.mrf.mxu0  ;;  %v3795_v9 = vadd.f32 %v7657_v28, %v3722_v17  ;;  %v3935_v19 = vadd.f32 %v7658_v23, %v3862_v62  ;;  %v6172_v46 = vld [vmem:[#allocation5 + $0xe0c] ss:$16 sps:$4 sm:$0xff]   ;;  %v6170_v3 = vld [vmem:[#allocation5 + $0xe08] ss:$16 sps:$4 sm:$0xff]  }
 0x22f   : > { %v4074_v2 = vpop.f32.mrf.mxu1  ;;  %4718 = vst [vmem:[%s7143_s20 + $0x68] sm:$0xff] %v4686_v58  ;;  %v4689_v10 = vmax.f32 %v4071_v59, 0.0  ;;  %v4002_v50 = vadd.f32 %v4001_v35, %v3929_v29  ;;  %v4073_v26 = vadd.f32 %v4072_v34, %v4000_v39  ;;  %4538 = vmatpush1.bf16.msra.mxu0 %v6155_v37  ;;  %v7659_v32 = vld [vmem:[#allocation73_spill] sm:$0xff]  ;;  %v7663_v36 = vld [vmem:[#allocation27_spill] sm:$0xff]  ;;  %v6179_v15 = vld [vmem:[#allocation5 + $0xdc8] ss:$16 sps:$4 sm:$0xff]  }
 0x230   : > { %4611 = vmatpush1.bf16.msra.mxu1 %v6158_v13  ;;  %v4003_v12 = vpop.f32.mrf.mxu0  ;;  %4539 = vmatprep.subr.bf16.mxu0 %v6163_v6  ;;  %v3866_v52 = vadd.f32 %v7087_v49, %v3793_v63  ;;  %v3937_v30 = vadd.f32 %v7659_v32, %v3864_v24  ;;  %v7661_v20 = vld [vmem:[#allocation25_spill] sm:$0xff]  ;;  %v3868_v25 = vadd.f32 %v7104_v55, %v3795_v9  ;;  %v6167_v49 = vld [vmem:[#allocation5 + $0xc08] ss:$16 sps:$4 sm:$0xff]  }
 0x231   : > { %v4076_v16 = vpop.f32.mrf.mxu1  ;;  %4612 = vmatprep.subr.bf16.mxu1 %v6166_v4  ;;  %4721 = vst [vmem:[%s7143_s20 + $0x80] sm:$0xff] %v4689_v10  ;;  %v4690_v43 = vmax.f32 %v4073_v26, 0.0  ;;  %v4004_v45 = vadd.f32 %v4003_v12, %v3931_v22  ;;  %v4075_v38 = vadd.f32 %v4074_v2, %v4002_v50  ;;  %v6175_v44 = vld [vmem:[#allocation5 + $0xdec] ss:$16 sps:$4 sm:$0xff]   ;;  %v6176_v6 = vld [vmem:[#allocation5 + $0xfe8] ss:$16 sps:$4 sm:$0xff]  }
 0x232   : > { %v4007_v40 = vpop.f32.mrf.mxu0  ;;  %4444 = vmatmul.mubr.bf16.gmra.mxu0 %v7660_v42  ;;  %v6178_v47 = vld [vmem:[#allocation5 + $0xfec] ss:$16 sps:$4 sm:$0xff]   ;;  %v3939_v1 = vadd.f32 %v7089_v5, %v3866_v52  ;;  %v3941_v7 = vadd.f32 %v7106_v51, %v3868_v25  ;;  %v6173_v5 = vld [vmem:[#allocation5 + $0xde8] ss:$16 sps:$4 sm:$0xff]  }
 0x233   : > { %v4080_v54 = vpop.f32.mrf.mxu1  ;;  %4517 = vmatmul.mubr.bf16.gmra.mxu1 %v7661_v20  ;;  %4722 = vst [vmem:[%s7143_s20 + $0x88] sm:$0xff] %v4690_v43  ;;  %v4693_v11 = vmax.f32 %v4075_v38, 0.0  ;;  %v4008_v14 = vadd.f32 %v4007_v40, %v3935_v19  ;;  %v4077_v57 = vadd.f32 %v4076_v16, %v4004_v45  ;;  %4540 = vmatpush1.bf16.msra.mxu0 %v6161_v41  ;;  %v6181_v29 = vld [vmem:[#allocation5 + $0xdcc] ss:$16 sps:$4 sm:$0xff]   ;;  %v6182_v63 = vld [vmem:[#allocation5 + $0xfc8] ss:$16 sps:$4 sm:$0xff]  }
 0x234   : > { %4613 = vmatpush1.bf16.msra.mxu1 %v6164_v0  ;;  %v4009_v18 = vpop.f32.mrf.mxu0  ;;  %4541 = vmatprep.subr.bf16.mxu0 %v6169_v31  ;;  %v6184_v58 = vld [vmem:[#allocation5 + $0xfcc] ss:$16 sps:$4 sm:$0xff]   ;;  %v6185_v2 = vld [vmem:[#allocation5 + $0xda8] ss:$16 sps:$4 sm:$0xff]   ;;  %v6221_v20 = vld [vmem:[#allocation7] sm:$0xf] }
 0x235   : > { %v4082_v53 = vpop.f32.mrf.mxu1  ;;  %4614 = vmatprep.subr.bf16.mxu1 %v6172_v46  ;;  %4725 = vst [vmem:[%s7143_s20 + $0xa0] sm:$0xff] %v4693_v11  ;;  %v4694_v55 = vmax.f32 %v4077_v57, 0.0  ;;  %v4010_v37 = vadd.f32 %v4009_v18, %v3937_v30  ;;  %v4081_v13 = vadd.f32 %v4080_v54, %v4008_v14  ;;  %4559 = vmatprep.mubr.bf16.mxu0 %v7662_v61  ;;  %v6187_v21 = vld [vmem:[#allocation5 + $0xdac] ss:$16 sps:$4 sm:$0xff]   ;;  %v6188_v27 = vld [vmem:[#allocation5 + $0xfa8] ss:$16 sps:$4 sm:$0xff]  }
 0x236   : > { %4632 = vmatprep.mubr.bf16.mxu1 %v7663_v36  ;;  %v4011_v56 = vpop.f32.mrf.mxu0  ;;  %v6190_v24 = vld [vmem:[#allocation5 + $0xfac] ss:$16 sps:$4 sm:$0xff]   ;;  %v6191_v50 = vld [vmem:[#allocation5 + $0xd88] ss:$16 sps:$4 sm:$0xff]  }
 0x237   : > { %v4084_v17 = vpop.f32.mrf.mxu1  ;;  %4726 = vst [vmem:[%s7143_s20 + $0xa8] sm:$0xff] %v4694_v55  ;;  %v4697_v62 = vmax.f32 %v4081_v13, 0.0  ;;  %v4012_v60 = vadd.f32 %v4011_v56, %v3939_v1  ;;  %v4083_v34 = vadd.f32 %v4082_v53, %v4010_v37  ;;  %4542 = vmatpush1.bf16.msra.mxu0 %v6167_v49  ;;  %v6193_v22 = vld [vmem:[#allocation5 + $0xd8c] ss:$16 sps:$4 sm:$0xff]   ;;  %v6194_v26 = vld [vmem:[#allocation5 + $0xf88] ss:$16 sps:$4 sm:$0xff]  }
 0x238   : > { %4615 = vmatpush1.bf16.msra.mxu1 %v6170_v3  ;;  %v4013_v4 = vpop.f32.mrf.mxu0  ;;  %4543 = vmatprep.subr.bf16.mxu0 %v6175_v44  ;;  %v6196_v10 = vld [vmem:[#allocation5 + $0xf8c] ss:$16 sps:$4 sm:$0xff]   ;;  %v6197_v28 = vld [vmem:[#allocation5 + $0xd68] ss:$16 sps:$4 sm:$0xff]  }
 0x239   : > { %v4086_v48 = vpop.f32.mrf.mxu1  ;;  %4616 = vmatprep.subr.bf16.mxu1 %v6178_v47  ;;  %4729 = vst [vmem:[%s7143_s20 + $0xc0] sm:$0xff] %v4697_v62  ;;  %v4698_v39 = vmax.f32 %v4083_v34, 0.0  ;;  %v4014_v51 = vadd.f32 %v4013_v4, %v3941_v7  ;;  %v4085_v59 = vadd.f32 %v4084_v17, %v4012_v60  ;;  %v6199_v41 = vld [vmem:[#allocation5 + $0xd6c] ss:$16 sps:$4 sm:$0xff]   ;;  %v6200_v9 = vld [vmem:[#allocation5 + $0xf68] ss:$16 sps:$4 sm:$0xff]  }
 0x23a   : > { %v6202_v0 = vld [vmem:[#allocation5 + $0xf6c] ss:$16 sps:$4 sm:$0xff]   ;;  %v6203_v12 = vld [vmem:[#allocation5 + $0xd48] ss:$16 sps:$4 sm:$0xff]  }
 0x23b   : > { %4730 = vst [vmem:[%s7143_s20 + $0xc8] sm:$0xff] %v4698_v39  ;;  %v4701_v8 = vmax.f32 %v4085_v59, 0.0  ;;  %v4087_v33 = vadd.f32 %v4086_v48, %v4014_v51  ;;  %4544 = vmatpush2.bf16.msra.mxu0 %v6173_v5  ;;  %v6205_v23 = vld [vmem:[#allocation5 + $0xd4c] ss:$16 sps:$4 sm:$0xff]   ;;  %v6206_v16 = vld [vmem:[#allocation5 + $0xf48] ss:$16 sps:$4 sm:$0xff]  }
 0x23c   : > { %4617 = vmatpush2.bf16.msra.mxu1 %v6176_v6  ;;  %4545 = vmatprep.subr.bf16.mxu0 %v6181_v29  ;;  %v6208_v19 = vld [vmem:[#allocation5 + $0xf4c] ss:$16 sps:$4 sm:$0xff]   ;;  %v6209_v52 = vld [vmem:[#allocation5 + $0xd28] ss:$16 sps:$4 sm:$0xff]  }
 0x23d   : > { %4618 = vmatprep.subr.bf16.mxu1 %v6184_v58  ;;  %4733 = vst [vmem:[%s7143_s20 + $0xe0] sm:$0xff] %v4701_v8  ;;  %v4702_v35 = vmax.f32 %v4087_v33, 0.0  ;;  %v6211_v31 = vld [vmem:[#allocation5 + $0xd2c] ss:$16 sps:$4 sm:$0xff]   ;;  %v6212_v43 = vld [vmem:[#allocation5 + $0xf28] ss:$16 sps:$4 sm:$0xff]  }
 0x23e   : > { %v6214_v46 = vld [vmem:[#allocation5 + $0xf2c] ss:$16 sps:$4 sm:$0xff]   ;;  %v6215_v32 = vld [vmem:[#allocation5 + $0xd08] ss:$16 sps:$4 sm:$0xff]  }
 0x23f   : > { %4734 = vst [vmem:[%s7143_s20 + $0xe8] sm:$0xff] %v4702_v35  ;;  %4546 = vmatpush2.bf16.msra.mxu0 %v6179_v15  ;;  %v6217_v45 = vld [vmem:[#allocation5 + $0xd0c] ss:$16 sps:$4 sm:$0xff]   ;;  %v6218_v30 = vld [vmem:[#allocation5 + $0xf08] ss:$16 sps:$4 sm:$0xff]  }
 0x240   : > { %4619 = vmatpush2.bf16.msra.mxu1 %v6182_v63  ;;  %4547 = vmatprep.subr.bf16.mxu0 %v6187_v21  ;;  %v6220_v38 = vld [vmem:[#allocation5 + $0xf0c] ss:$16 sps:$4 sm:$0xff]   ;;  %v7664_v40 = vld [vmem:[#allocation28_spill] sm:$0xff]  ;;  %v7666_v3 = vld [vmem:[#allocation30_spill] sm:$0xff] }
 0x241   : > { %4620 = vmatprep.subr.bf16.mxu1 %v6190_v24  ;;  %v935_v42 = vsub.s32 2, %v7664_v40  ;;  %v939_v54 = vsub.s32 3, %v7664_v40  ;;  %v7665_v49 = vld [vmem:[#allocation29_spill] sm:$0xff]  ;;  %v7667_v53 = vld [vmem:[#allocation31_spill] sm:$0xff]  ;;  %v7668_v44 = vld [vmem:[#allocation32_spill] sm:$0xff] }
 0x242   : > { %v7669_v34 = vld [vmem:[#allocation33_spill] sm:$0xff]  ;;  %v7670_v5 = vld [vmem:[#allocation34_spill] sm:$0xff]  ;;  %v7671_v29 = vld [vmem:[#allocation36_spill] sm:$0xff] }
 0x243   : > { %4548 = vmatpush2.bf16.msra.mxu0 %v6185_v2  ;;  %v7215_v25 = vrot.slane %v6221_v20, %v935_v42  ;;  %v7217_v11 = vrot.slane %v6221_v20, %v939_v54  ;;  %v7672_v58 = vld [vmem:[#allocation37_spill] sm:$0xff]  ;;  %v7678_v54 = vld [vmem:[#allocation46_spill] sm:$0xff] }
 0x244   : > { %4621 = vmatpush2.bf16.msra.mxu1 %v6188_v27  ;;  %4549 = vmatprep.subr.bf16.mxu0 %v6193_v22  ;;  %v7677_v42 = vld [vmem:[#allocation45_spill] sm:$0xff] }
 0x245   : > { %4622 = vmatprep.subr.bf16.mxu1 %v6196_v10  ;;  %v7673_v10 = vld [vmem:[#allocation38_spill] sm:$0xff] }
 0x247   : > { %4550 = vmatpush2.bf16.msra.mxu0 %v6191_v50  ;;  %v7674_v50 = vld [vmem:[#allocation39_spill] sm:$0xff] }
 0x248   : > { %4623 = vmatpush2.bf16.msra.mxu1 %v6194_v26  ;;  %4551 = vmatprep.subr.bf16.mxu0 %v6199_v41 }
 0x249   : > { %4624 = vmatprep.subr.bf16.mxu1 %v6202_v0  ;;  %v7675_v0 = vld [vmem:[#allocation42_spill] sm:$0xff] }
 0x24b   : > { %4552 = vmatpush2.bf16.msra.mxu0 %v6197_v28  ;;  %v7676_v28 = vld [vmem:[#allocation43_spill] sm:$0xff] }
 0x24c   : > { %4625 = vmatpush2.bf16.msra.mxu1 %v6200_v9  ;;  %4553 = vmatprep.subr.bf16.mxu0 %v6205_v23 }
 0x24d   : > { %4626 = vmatprep.subr.bf16.mxu1 %v6208_v19 }
 0x24f   : > { %4554 = vmatpush2.bf16.msra.mxu0 %v6203_v12 }
 0x250   : > { %4627 = vmatpush2.bf16.msra.mxu1 %v6206_v16  ;;  %4555 = vmatprep.subr.bf16.mxu0 %v6211_v31 }
 0x251   : > { %4628 = vmatprep.subr.bf16.mxu1 %v6214_v46 }
 0x253   : > { %4556 = vmatpush2.bf16.msra.mxu0 %v6209_v52 }
 0x254   : > { %4629 = vmatpush2.bf16.msra.mxu1 %v6212_v43  ;;  %4557 = vmatprep.subr.bf16.mxu0 %v6217_v45 }
 0x255   : > { %4630 = vmatprep.subr.bf16.mxu1 %v6220_v38 }
 0x257   : > { %4558 = vmatpush2.bf16.msra.mxu0 %v6215_v32 }
 0x258   : > { %4631 = vmatpush2.bf16.msra.mxu1 %v6218_v30 }
 0x25a   : > { %v4123_v14 = vpop.f32.mrf.mxu0  ;;  %4560 = vmatmul.mubr.bf16.vlgmr.msra.gmra.mxu0 %v7665_v49 }
 0x25b   : > { %v4196_v57 = vpop.f32.mrf.mxu1  ;;  %4633 = vmatmul.mubr.bf16.vlgmr.msra.gmra.mxu1 %v7666_v3  ;;  %v4124_v18 = vadd.f32 %v4123_v14, %v7215_v25  ;;  %4569 = vmatprep.mubr.bf16.mxu0 %v7667_v53 }
 0x25c   : > { %4642 = vmatprep.mubr.bf16.mxu1 %v7668_v44  ;;  %v4125_v47 = vpop.f32.mrf.mxu0 }
 0x25d   : > { %v4198_v1 = vpop.f32.mrf.mxu1  ;;  %v7224_v55 = vadd.f32 %v4196_v57, %v4124_v18  ;;  %v4126_v37 = vadd.f32 %v4125_v47, %v7217_v11 }
 0x25e   : > { %v4127_v13 = vpop.f32.mrf.mxu0 }
 0x25f   : > { %v4200_v61 = vpop.f32.mrf.mxu1  ;;  %v7227_v36 = vadd.f32 %v4198_v1, %v4126_v37  ;;  %v4128_v56 = vadd.f32 %v4127_v13, %v7215_v25 }
 0x260   : > { %v4129_v17 = vpop.f32.mrf.mxu0 }
 0x261   : > { %v4202_v7 = vpop.f32.mrf.mxu1  ;;  %v7230_v62 = vadd.f32 %v4200_v61, %v4128_v56  ;;  %v4130_v60 = vadd.f32 %v4129_v17, %v7217_v11 }
 0x262   : > { %4570 = vmatmul.mubr.bf16.gmra.mxu0 %v7669_v34  ;;  %v4133_v6 = vpop.f32.mrf.mxu0 }
 0x263   : > { %4643 = vmatmul.mubr.bf16.gmra.mxu1 %v7670_v5  ;;  %v4206_v4 = vpop.f32.mrf.mxu1  ;;  %v7235_v48 = vadd.f32 %v4202_v7, %v4130_v60  ;;  %4579 = vmatprep.mubr.bf16.mxu0 %v7671_v29  ;;  %v4134_v39 = vadd.f32 %v4133_v6, %v7215_v25 }
 0x264   : > { %4652 = vmatprep.mubr.bf16.mxu1 %v7672_v58  ;;  %v4135_v51 = vpop.f32.mrf.mxu0 }
 0x265   : > { %v4208_v59 = vpop.f32.mrf.mxu1  ;;  %v4136_v8 = vadd.f32 %v4135_v51, %v7217_v11  ;;  %v7241_v33 = vadd.f32 %v4206_v4, %v4134_v39 }
 0x266   : > { %v4137_v15 = vpop.f32.mrf.mxu0 }
 0x267   : > { %v4210_v63 = vpop.f32.mrf.mxu1  ;;  %v4138_v21 = vadd.f32 %v4137_v15, %v7215_v25  ;;  %v7244_v24 = vadd.f32 %v4208_v59, %v4136_v8 }
 0x268   : > { %v4139_v35 = vpop.f32.mrf.mxu0 }
 0x269   : > { %v4212_v2 = vpop.f32.mrf.mxu1  ;;  %v4140_v27 = vadd.f32 %v4139_v35, %v7217_v11  ;;  %v7247_v22 = vadd.f32 %v4210_v63, %v4138_v21 }
 0x26a   : > { %4580 = vmatmul.mubr.bf16.gmra.mxu0 %v7673_v10  ;;  %v4143_v26 = vpop.f32.mrf.mxu0 }
 0x26b   : > { %4653 = vmatmul.mubr.bf16.gmra.mxu1 %v7674_v50  ;;  %v4216_v41 = vpop.f32.mrf.mxu1  ;;  %4589 = vmatprep.mubr.bf16.mxu0 %v7675_v0  ;;  %v4144_v9 = vadd.f32 %v4143_v26, %v7215_v25  ;;  %v7254_v23 = vadd.f32 %v4212_v2, %v4140_v27 }
 0x26c   : > { %4662 = vmatprep.mubr.bf16.mxu1 %v7676_v28  ;;  %v4145_v19 = vpop.f32.mrf.mxu0 }
 0x26d   : > { %v4218_v12 = vpop.f32.mrf.mxu1  ;;  %v4146_v16 = vadd.f32 %v4145_v19, %v7217_v11  ;;  %v7257_v31 = vadd.f32 %v4216_v41, %v4144_v9 }
 0x26e   : > { %v4147_v46 = vpop.f32.mrf.mxu0 }
 0x26f   : > { %v4220_v52 = vpop.f32.mrf.mxu1  ;;  %v4148_v43 = vadd.f32 %v4147_v46, %v7215_v25  ;;  %v7260_v45 = vadd.f32 %v4218_v12, %v4146_v16 }
 0x270   : > { %v4149_v38 = vpop.f32.mrf.mxu0 }
 0x271   : > { %v4222_v32 = vpop.f32.mrf.mxu1  ;;  %v4150_v30 = vadd.f32 %v4149_v38, %v7217_v11  ;;  %v7263_v40 = vadd.f32 %v4220_v52, %v4148_v43 }
 0x272   : > { %4590 = vmatmul.mubr.bf16.gmra.mxu0 %v7677_v42  ;;  %v4153_v20 = vpop.f32.mrf.mxu0 }
 0x273   : > { %4663 = vmatmul.mubr.bf16.gmra.mxu1 %v7678_v54  ;;  %v4226_v14 = vpop.f32.mrf.mxu1  ;;  %v4154_v57 = vadd.f32 %v4153_v20, %v7215_v25  ;;  %v7268_v49 = vadd.f32 %v4222_v32, %v4150_v30 }
 0x274   : > { %v4155_v3 = vpop.f32.mrf.mxu0 }
 0x275   : > { %v4228_v18 = vpop.f32.mrf.mxu1  ;;  %v4156_v53 = vadd.f32 %v4155_v3, %v7217_v11  ;;  %v7271_v44 = vadd.f32 %v4226_v14, %v4154_v57 }
 0x276   : > { %v4157_v47 = vpop.f32.mrf.mxu0 }
 0x277   : > { %v4230_v1 = vpop.f32.mrf.mxu1  ;;  %v4158_v37 = vadd.f32 %v4157_v47, %v7215_v25  ;;  %v7274_v13 = vadd.f32 %v4228_v18, %v4156_v53 }
 0x278   : > { %v4159_v61 = vpop.f32.mrf.mxu0 }
 0x279   : > { %7679 = vst [vmem:[#allocation35_spill] sm:$0xff] %v7274_v13  ;;  %v4232_v56 = vpop.f32.mrf.mxu1  ;;  %v4160_v17 = vadd.f32 %v4159_v61, %v7217_v11  ;;  %v7277_v7 = vadd.f32 %v4230_v1, %v4158_v37 }
 0x27b   : > { %7680 = vst [vmem:[#allocation40_spill] sm:$0xff] %v7277_v7  ;;  %v7279_v60 = vadd.f32 %v4232_v56, %v4160_v17 }
 0x27d   : > { %7681 = vst [vmem:[#allocation41_spill] sm:$0xff] %v7279_v60 }
 0x29a   : > { %v4269_v34 = vpop.f32.mrf.mxu0 }
 0x29b   : > { %v4342_v5 = vpop.f32.mrf.mxu1 }
 0x29c   : > { %v4271_v6 = vpop.f32.mrf.mxu0 }
 0x29d   : > { %v7281_v4 = vpop.f32.mrf.mxu1 }
 0x29e   : > { %v4273_v29 = vpop.f32.mrf.mxu0 }
 0x29f   : > { %v7283_v58 = vpop.f32.mrf.mxu1 }
 0x2a0   : > { %v4275_v39 = vpop.f32.mrf.mxu0 }
 0x2a1   : > { %v7285_v25 = vpop.f32.mrf.mxu1 }
 0x2a2   : > { %v4279_v51 = vpop.f32.mrf.mxu0 }
 0x2a3   : > { %v7287_v59 = vpop.f32.mrf.mxu1 }
 0x2a4   : > { %v4281_v8 = vpop.f32.mrf.mxu0 }
 0x2a5   : > { %v7289_v11 = vpop.f32.mrf.mxu1 }
 0x2a6   : > { %v7291_v15 = vpop.f32.mrf.mxu0 }
 0x2a7   : > { %v7293_v63 = vpop.f32.mrf.mxu1 }
 0x2a8   : > { %v7295_v21 = vpop.f32.mrf.mxu0 }
 0x2a9   : > { %v7297_v35 = vpop.f32.mrf.mxu1 }
 0x2aa   : > { %v7299_v2 = vpop.f32.mrf.mxu0 }
 0x2ab   : > { %v7301_v27 = vpop.f32.mrf.mxu1 }
 0x2ac   : > { %v7303_v10 = vpop.f32.mrf.mxu0 }
 0x2ad   : > { %v7305_v50 = vpop.f32.mrf.mxu1 }
 0x2ae   : > { %v7307_v26 = vpop.f32.mrf.mxu0 }
 0x2af   : > { %v7309_v41 = vpop.f32.mrf.mxu1 }
 0x2b0   : > { %v7311_v0 = vpop.f32.mrf.mxu0 }
 0x2b1   : > { %v7313_v28 = vpop.f32.mrf.mxu1 }
 0x2b2   : > { %7682 = vst [vmem:[#allocation44_spill] sm:$0xff] %v7313_v28  ;;  %v7315_v9 = vpop.f32.mrf.mxu0  ;;  %v4270_v28 = vadd.f32 %v4269_v34, %v7224_v55  ;;  %v4280_v55 = vadd.f32 %v4279_v51, %v7241_v33 }
 0x2b3   : > { %v7317_v19 = vpop.f32.mrf.mxu1 }
 0x2b4   : > { %7683 = vst [vmem:[#allocation12_spill] sm:$0xff] %v7317_v19  ;;  %v7319_v12 = vpop.f32.mrf.mxu0 }
 0x2b5   : > { %7684 = vst [vmem:[#allocation13_spill] sm:$0xff] %v7319_v12  ;;  %v7321_v16 = vpop.f32.mrf.mxu1 }
 0x2b6   : > { %7685 = vst [vmem:[#allocation14_spill] sm:$0xff] %v7321_v16  ;;  %v7323_v46 = vpop.f32.mrf.mxu0 }
 0x2b7   : > { %7686 = vst [vmem:[#allocation15_spill] sm:$0xff] %v7323_v46  ;;  %v7325_v52 = vpop.f32.mrf.mxu1 }
 0x2b8   : > { %7687 = vst [vmem:[#allocation47_spill] sm:$0xff] %v7325_v52  ;;  %v7327_v43 = vpop.f32.mrf.mxu0 }
 0x2b9   : > { %7688 = vst [vmem:[#allocation16_spill] sm:$0xff] %v7327_v43  ;;  %v7329_v38 = vpop.f32.mrf.mxu1 }
 0x2ba   : > { %7689 = vst [vmem:[#allocation17_spill] sm:$0xff] %v7329_v38 }
 0x2da   : > { %v4415_v32 = vpop.f32.mrf.mxu0 }
 0x2db   : > { %v4488_v30 = vpop.f32.mrf.mxu1 }
 0x2dc   : > { %v4417_v42 = vpop.f32.mrf.mxu0 }
 0x2dd   : > { %v4490_v54 = vpop.f32.mrf.mxu1 }
 0x2de   : > { %v4419_v20 = vpop.f32.mrf.mxu0 }
 0x2df   : > { %v4492_v14 = vpop.f32.mrf.mxu1 }
 0x2e0   : > { %v4421_v57 = vpop.f32.mrf.mxu0 }
 0x2e1   : > { %v4494_v3 = vpop.f32.mrf.mxu1 }
 0x2e2   : > { %v4425_v18 = vpop.f32.mrf.mxu0 }
 0x2e3   : > { %v7331_v53 = vpop.f32.mrf.mxu1 }
 0x2e4   : > { %v4427_v47 = vpop.f32.mrf.mxu0 }
 0x2e5   : > { %v7333_v1 = vpop.f32.mrf.mxu1 }
 0x2e6   : > { %v7335_v37 = vpop.f32.mrf.mxu0 }
 0x2e7   : > { %v7337_v61 = vpop.f32.mrf.mxu1 }
 0x2e8   : > { %v7339_v56 = vpop.f32.mrf.mxu0 }
 0x2e9   : > { %v7341_v17 = vpop.f32.mrf.mxu1 }
 0x2ea   : > { %7690 = vst [vmem:[#allocation53_spill] sm:$0xff] %v7341_v17  ;;  %v7343_v38 = vpop.f32.mrf.mxu0 }
 0x2eb   : > { %v7345_v52 = vpop.f32.mrf.mxu1 }
 0x2ec   : > { %7691 = vst [vmem:[#allocation18_spill] sm:$0xff] %v7345_v52  ;;  %v7347_v43 = vpop.f32.mrf.mxu0 }
 0x2ed   : > { %7692 = vst [vmem:[#allocation19_spill] sm:$0xff] %v7347_v43  ;;  %v7349_v60 = vpop.f32.mrf.mxu1  ;;  %v4343_v43 = vadd.f32 %v4342_v5, %v4270_v28 }
 0x2ee   : > { %7693 = vst [vmem:[#allocation51_spill] sm:$0xff] %v7349_v60  ;;  %v7351_v16 = vpop.f32.mrf.mxu0  ;;  %v4272_v60 = vadd.f32 %v4271_v6, %v7227_v36 }
 0x2ef   : > { %7694 = vst [vmem:[#allocation52_spill] sm:$0xff] %v7351_v16  ;;  %v7353_v46 = vpop.f32.mrf.mxu1  ;;  %v4274_v16 = vadd.f32 %v4273_v29, %v7230_v62 }
 0x2f0   : > { %7695 = vst [vmem:[#allocation48_spill] sm:$0xff] %v7353_v46  ;;  %v7355_v7 = vpop.f32.mrf.mxu0 }
 0x2f1   : > { %7696 = vst [vmem:[#allocation64_spill] sm:$0xff] %v7355_v7  ;;  %v7357_v19 = vpop.f32.mrf.mxu1  ;;  %v4347_v34 = vadd.f32 %v7283_v58, %v4274_v16 }
 0x2f2   : > { %7697 = vst [vmem:[#allocation62_spill] sm:$0xff] %v7357_v19  ;;  %v7359_v12 = vpop.f32.mrf.mxu0  ;;  %v4345_v19 = vadd.f32 %v7281_v4, %v4272_v60  ;;  %v4353_v60 = vadd.f32 %v7287_v59, %v4280_v55 }
 0x2f3   : > { %7698 = vst [vmem:[#allocation54_spill] sm:$0xff] %v7359_v12  ;;  %v7361_v13 = vpop.f32.mrf.mxu1  ;;  %v4276_v12 = vadd.f32 %v4275_v39, %v7235_v48  ;;  %v4420_v29 = vadd.f32 %v4419_v20, %v4347_v34  ;;  %v4284_v48 = vadd.f32 %v7291_v15, %v7247_v22  ;;  %v4290_v22 = vadd.f32 %v7299_v2, %v7257_v31 }
 0x2f4   : > { %7699 = vst [vmem:[#allocation49_spill] sm:$0xff] %v7361_v13  ;;  %v7364_v17 = vpop.f32.mrf.mxu0  ;;  %v4416_v13 = vadd.f32 %v4415_v32, %v4343_v43  ;;  %v4426_v28 = vadd.f32 %v4425_v18, %v4353_v60  ;;  %v7702_v60 = vld [vmem:[#allocation19_spill] sm:$0xff] }
 0x2f5   : > { %7700 = vst [vmem:[#allocation56_spill] sm:$0xff] %v7364_v17  ;;  %v7366_v52 = vpop.f32.mrf.mxu1  ;;  %v4418_v17 = vadd.f32 %v4417_v42, %v4345_v19  ;;  %v4349_v62 = vadd.f32 %v7285_v25, %v4276_v12  ;;  %v4357_v59 = vadd.f32 %v7293_v63, %v4284_v48 }
 0x2f6   : > { %7701 = vst [vmem:[#allocation63_spill] sm:$0xff] %v7366_v52  ;;  %v7370_v46 = vpop.f32.mrf.mxu0  ;;  %v4282_v52 = vadd.f32 %v4281_v8, %v7244_v24  ;;  %v4489_v6 = vadd.f32 %v4488_v30, %v4416_v13  ;;  %v4286_v8 = vadd.f32 %v7295_v21, %v7254_v23  ;;  %v4493_v13 = vadd.f32 %v4492_v14, %v4420_v29 }
 0x2f7   : > { %v7372_v7 = vpop.f32.mrf.mxu1  ;;  %v4491_v39 = vadd.f32 %v4490_v54, %v4418_v17  ;;  %v4422_v58 = vadd.f32 %v4421_v57, %v4349_v62  ;;  %v4292_v21 = vadd.f32 %v7303_v10, %v7260_v45  ;;  %v4499_v54 = vadd.f32 %v7331_v53, %v4426_v28  ;;  %v7707_v28 = vld [vmem:[#allocation18_spill] sm:$0xff] }
 0x2f8   : > { %v7379_v36 = vpop.f32.mrf.mxu0  ;;  %v4355_v24 = vadd.f32 %v7289_v11, %v4282_v52  ;;  %v4359_v23 = vadd.f32 %v7297_v35, %v4286_v8  ;;  %v4430_v14 = vadd.f32 %v7335_v37, %v4357_v59  ;;  %v4294_v35 = vadd.f32 %v7307_v26, %v7263_v40  ;;  %v7706_v8 = vld [vmem:[#allocation13_spill] sm:$0xff] }
 0x2f9   : > { %v7381_v5 = vpop.f32.mrf.mxu1  ;;  %v4495_v30 = vadd.f32 %v4494_v3, %v4422_v58  ;;  %v4363_v3 = vadd.f32 %v7301_v27, %v4290_v22  ;;  %v4365_v55 = vadd.f32 %v7305_v50, %v4292_v21  ;;  %v4296_v27 = vadd.f32 %v7311_v0, %v7268_v49  ;;  %v7703_v0 = vld [vmem:[#allocation53_spill] sm:$0xff]  ;;  %v7704_v58 = vld [vmem:[#allocation44_spill] sm:$0xff] }
 0x2fa   : > { %v4428_v15 = vadd.f32 %v4427_v47, %v4355_v24  ;;  %v4432_v10 = vadd.f32 %v7339_v56, %v4359_v23  ;;  %v4503_v26 = vadd.f32 %v7337_v61, %v4430_v14  ;;  %v4367_v29 = vadd.f32 %v7309_v41, %v4294_v35  ;;  %v7705_v24 = vld [vmem:[#allocation35_spill] sm:$0xff]  ;;  %v7709_v22 = vld [vmem:[#allocation12_spill] sm:$0xff] }
 0x2fb   : > { %v4436_v34 = vadd.f32 %v7343_v38, %v4363_v3  ;;  %v4300_v50 = vadd.f32 %v7315_v9, %v7271_v44  ;;  %v4438_v48 = vadd.f32 %v7702_v60, %v4365_v55  ;;  %v4302_v41 = vadd.f32 %v7706_v8, %v7705_v24  ;;  %v7708_v9 = vld [vmem:[#allocation52_spill] sm:$0xff] }
 0x2fc   : > { %v4501_v18 = vadd.f32 %v7333_v1, %v4428_v15  ;;  %v4505_v38 = vadd.f32 %v7703_v0, %v4432_v10  ;;  %v7713_v21 = vld [vmem:[#allocation64_spill] sm:$0xff]  ;;  %v7723_v0 = vld [vmem:[#allocation49_spill] sm:$0xff] }
 0x2fd   : > { %v4373_v15 = vadd.f32 %v7709_v22, %v4300_v50  ;;  %v7716_v3 = vld [vmem:[#allocation16_spill] sm:$0xff]  ;;  %v7724_v8 = vld [vmem:[#allocation63_spill] sm:$0xff] }
 0x31a   : > { %v4561_v4 = vpop.f32.mrf.mxu0 }
 0x31b   : > { %v4634_v33 = vpop.f32.mrf.mxu1  ;;  %v4562_v51 = vadd.f32 %v4561_v4, %v4489_v6 }
 0x31c   : > { %v4563_v19 = vpop.f32.mrf.mxu0 }
 0x31d   : > { %v4636_v25 = vpop.f32.mrf.mxu1  ;;  %v4635_v12 = vadd.f32 %v4634_v33, %v4562_v51  ;;  %v4564_v16 = vadd.f32 %v4563_v19, %v4491_v39  ;;  %v4369_v51 = vadd.f32 %v7704_v58, %v4296_v27  ;;  %v4509_v19 = vadd.f32 %v7707_v28, %v4436_v34  ;;  %v7719_v34 = vld [vmem:[#allocation47_spill] sm:$0xff] }
 0x31e   : > { %v4565_v43 = vpop.f32.mrf.mxu0 }
 0x31f   : > { %v4638_v32 = vpop.f32.mrf.mxu1  ;;  %v4675_v11 = vmax.f32 %v4635_v12, 0.0  ;;  %v4637_v52 = vadd.f32 %v4636_v25, %v4564_v16  ;;  %v4566_v42 = vadd.f32 %v4565_v43, %v4493_v13  ;;  %v4440_v13 = vadd.f32 %v7708_v9, %v4367_v29  ;;  %v7710_v43 = vld [vmem:[#allocation40_spill] sm:$0xff] }
 0x320   : > { %v4567_v20 = vpop.f32.mrf.mxu0 }
 0x321   : > { %v4640_v63 = vpop.f32.mrf.mxu1  ;;  %4707 = vst [vmem:[%s7143_s20 + $0x10] sm:$0xff] %v4675_v11  ;;  %v4676_v31 = vmax.f32 %v4637_v52, 0.0  ;;  %v4639_v2 = vadd.f32 %v4638_v32, %v4566_v42  ;;  %v4568_v57 = vadd.f32 %v4567_v20, %v4495_v30  ;;  %v7711_v32 = vld [vmem:[#allocation15_spill] sm:$0xff] }
 0x322   : > { %v4571_v47 = vpop.f32.mrf.mxu0  ;;  %v4304_v30 = vadd.f32 %v7711_v32, %v7710_v43  ;;  %v7712_v11 = vld [vmem:[#allocation51_spill] sm:$0xff] }
 0x323   : > { %v4644_v45 = vpop.f32.mrf.mxu1  ;;  %4708 = vst [vmem:[%s7143_s20 + $0x18] sm:$0xff] %v4676_v31  ;;  %v4679_v53 = vmax.f32 %v4639_v2, 0.0  ;;  %v4641_v17 = vadd.f32 %v4640_v63, %v4568_v57  ;;  %v4572_v37 = vadd.f32 %v4571_v47, %v4499_v54  ;;  %v4511_v52 = vadd.f32 %v7712_v11, %v4438_v48  ;;  %v7714_v31 = vld [vmem:[#allocation14_spill] sm:$0xff]  ;;  %v7715_v57 = vld [vmem:[#allocation41_spill] sm:$0xff] }
 0x324   : > { %v4573_v62 = vpop.f32.mrf.mxu0  ;;  %v4442_v54 = vadd.f32 %v7713_v21, %v4369_v51  ;;  %v4375_v2 = vadd.f32 %v7714_v31, %v4302_v41  ;;  %v4306_v35 = vadd.f32 %v7716_v3, %v7715_v57 }
 0x325   : > { %v4646_v40 = vpop.f32.mrf.mxu1  ;;  %4711 = vst [vmem:[%s7143_s20 + $0x30] sm:$0xff] %v4679_v53  ;;  %v4680_v1 = vmax.f32 %v4641_v17, 0.0  ;;  %v4645_v6 = vadd.f32 %v4644_v45, %v4572_v37  ;;  %v4574_v56 = vadd.f32 %v4573_v62, %v4501_v18  ;;  %v7717_v18 = vld [vmem:[#allocation54_spill] sm:$0xff]  ;;  %v7718_v53 = vld [vmem:[#allocation48_spill] sm:$0xff]  ;;  %v4377_v62 = vadd.f32 %v7719_v34, %v4304_v30 }
 0x326   : > { %v4575_v4 = vpop.f32.mrf.mxu0  ;;  %v4446_v47 = vadd.f32 %v7717_v18, %v4373_v15  ;;  %v4513_v17 = vadd.f32 %v7718_v53, %v4440_v13 }
 0x327   : > { %v4648_v49 = vpop.f32.mrf.mxu1  ;;  %4712 = vst [vmem:[%s7143_s20 + $0x38] sm:$0xff] %v4680_v1  ;;  %v4683_v33 = vmax.f32 %v4645_v6, 0.0  ;;  %v4647_v39 = vadd.f32 %v4646_v40, %v4574_v56  ;;  %v4576_v61 = vadd.f32 %v4575_v4, %v4503_v26  ;;  %v7720_v40 = vld [vmem:[#allocation56_spill] sm:$0xff]  ;;  %v7721_v56 = vld [vmem:[#allocation62_spill] sm:$0xff]  ;;  %v7722_v4 = vld [vmem:[#allocation17_spill] sm:$0xff] }
 0x328   : > { %v4577_v25 = vpop.f32.mrf.mxu0  ;;  %v4448_v26 = vadd.f32 %v7720_v40, %v4375_v2  ;;  %v4515_v29 = vadd.f32 %v7721_v56, %v4442_v54 }
 0x329   : > { %v4650_v44 = vpop.f32.mrf.mxu1  ;;  %4715 = vst [vmem:[%s7143_s20 + $0x50] sm:$0xff] %v4683_v33  ;;  %v4684_v12 = vmax.f32 %v4647_v39, 0.0  ;;  %v4649_v16 = vadd.f32 %v4648_v49, %v4576_v61  ;;  %v4578_v59 = vadd.f32 %v4577_v25, %v4505_v38  ;;  %v4379_v49 = vadd.f32 %v7722_v4, %v4306_v35 }
 0x32a   : > { %v4581_v42 = vpop.f32.mrf.mxu0  ;;  %v4519_v38 = vadd.f32 %v7723_v0, %v4446_v47  ;;  %v4450_v61 = vadd.f32 %v7370_v46, %v4377_v62  ;;  %v4521_v41 = vadd.f32 %v7724_v8, %v4448_v26 }
 0x32b   : > { %v4654_v23 = vpop.f32.mrf.mxu1  ;;  %4716 = vst [vmem:[%s7143_s20 + $0x58] sm:$0xff] %v4684_v12  ;;  %v4687_v20 = vmax.f32 %v4649_v16, 0.0  ;;  %v4651_v63 = vadd.f32 %v4650_v44, %v4578_v59  ;;  %v4582_v14 = vadd.f32 %v4581_v42, %v4509_v19  ;;  %v4452_v25 = vadd.f32 %v7379_v36, %v4379_v49 }
 0x32c   : > { %v4583_v45 = vpop.f32.mrf.mxu0  ;;  %v4523_v46 = vadd.f32 %v7372_v7, %v4450_v61 }
 0x32d   : > { %v4656_v10 = vpop.f32.mrf.mxu1  ;;  %4719 = vst [vmem:[%s7143_s20 + $0x70] sm:$0xff] %v4687_v20  ;;  %v4688_v37 = vmax.f32 %v4651_v63, 0.0  ;;  %v4655_v55 = vadd.f32 %v4654_v23, %v4582_v14  ;;  %v4584_v27 = vadd.f32 %v4583_v45, %v4511_v52  ;;  %v4525_v36 = vadd.f32 %v7381_v5, %v4452_v25 }
 0x32e   : > { %v4585_v1 = vpop.f32.mrf.mxu0 }
 0x32f   : > { %v4658_v6 = vpop.f32.mrf.mxu1  ;;  %4720 = vst [vmem:[%s7143_s20 + $0x78] sm:$0xff] %v4688_v37  ;;  %v4691_v50 = vmax.f32 %v4655_v55, 0.0  ;;  %v4657_v60 = vadd.f32 %v4656_v10, %v4584_v27  ;;  %v4586_v48 = vadd.f32 %v4585_v1, %v4513_v17 }
 0x330   : > { %v4587_v33 = vpop.f32.mrf.mxu0 }
 0x331   : > { %v4660_v39 = vpop.f32.mrf.mxu1  ;;  %4723 = vst [vmem:[%s7143_s20 + $0x90] sm:$0xff] %v4691_v50  ;;  %v4692_v58 = vmax.f32 %v4657_v60, 0.0  ;;  %v4659_v51 = vadd.f32 %v4658_v6, %v4586_v48  ;;  %v4588_v24 = vadd.f32 %v4587_v33, %v4515_v29 }
 0x332   : > { %v4591_v28 = vpop.f32.mrf.mxu0 }
 0x333   : > { %v4664_v19 = vpop.f32.mrf.mxu1  ;;  %4724 = vst [vmem:[%s7143_s20 + $0x98] sm:$0xff] %v4692_v58  ;;  %v4695_v44 = vmax.f32 %v4659_v51, 0.0  ;;  %v4661_v9 = vadd.f32 %v4660_v39, %v4588_v24  ;;  %v4592_v13 = vadd.f32 %v4591_v28, %v4519_v38 }
 0x334   : > { %v4593_v12 = vpop.f32.mrf.mxu0 }
 0x335   : > { %v4666_v16 = vpop.f32.mrf.mxu1  ;;  %4727 = vst [vmem:[%s7143_s20 + $0xb0] sm:$0xff] %v4695_v44  ;;  %v4696_v59 = vmax.f32 %v4661_v9, 0.0  ;;  %v4665_v22 = vadd.f32 %v4664_v19, %v4592_v13  ;;  %v4594_v15 = vadd.f32 %v4593_v12, %v4521_v41 }
 0x336   : > { %v4595_v43 = vpop.f32.mrf.mxu0 }
 0x337   : > { %v4668_v32 = vpop.f32.mrf.mxu1  ;;  %4728 = vst [vmem:[%s7143_s20 + $0xb8] sm:$0xff] %v4696_v59  ;;  %v4699_v30 = vmax.f32 %v4665_v22, 0.0  ;;  %v4667_v11 = vadd.f32 %v4666_v16, %v4594_v15  ;;  %v4596_v52 = vadd.f32 %v4595_v43, %v4523_v46 }
 0x338   : > { %v4597_v42 = vpop.f32.mrf.mxu0 }
 0x339   : > { %4731 = vst [vmem:[%s7143_s20 + $0xd0] sm:$0xff] %v4699_v30  ;;  %v4700_v7 = vmax.f32 %v4667_v11, 0.0  ;;  %v4669_v23 = vadd.f32 %v4668_v32, %v4596_v52  ;;  %v4598_v21 = vadd.f32 %v4597_v42, %v4525_v36  ;;  %v4670_v54 = vpop.f32.mrf.mxu1 }
 0x33b   : > { %4732 = vst [vmem:[%s7143_s20 + $0xd8] sm:$0xff] %v4700_v7  ;;  %v4703_v20 = vmax.f32 %v4669_v23, 0.0  ;;  %v4671_v63 = vadd.f32 %v4670_v54, %v4598_v21 }
 0x33d   : > { %4735 = vst [vmem:[%s7143_s20 + $0xf0] sm:$0xff] %v4703_v20  ;;  %v4704_v5 = vmax.f32 %v4671_v63, 0.0 }
 0x33f   : > { %4736 = vst [vmem:[%s7143_s20 + $0xf8] sm:$0xff] %v4704_v5 }
 0x340   : > { %6315 = shalt.err (!%p6312_p9)
}
 0x341   : > { %s6316_s23 = scalar_lea.hbm %s7457_s8, 4096  ;;  %s6320_s4 = scalar_lea.hbm %s7507_s3, 8192 }
 0x342   : > { %p6317_p13 = scmp.ne.s32.totalorder %s7457_s8, %s6316_s23  ;;  %p6321_p4 = scmp.lt.s32.totalorder %s7457_s8, %s7507_s3 }
 0x343   : > { %p6322_p8 = scmp.lt.s32.totalorder %s6320_s4, %s6316_s23 }
 0x344   : > { %p6318_p5 = pnand %p6317_p13, %p7725_p10 }
 0x345   : > { %p6323_p3 = por %p6322_p8, %p6321_p4 }
 0x346   : > { %p6319_p0 = pneg %p6318_p5 }
 0x348   : > { %p6324_p11 = pnand %p6323_p3, %p6319_p0 }
 0x34a   : > { %6327 = shalt.err (!%p6324_p11)
}
 0x34b   : > { %s6380_s18 = smov 512   ;;  %s6381_s20 = smov 32  }
 0x34c   : > { %5390 = dma.vmem_to_hbm [thread:$0]  (%p7725_p10), %s7459_s27, 4096, %s7457_s8, %s4738_s9, %s6380_s18, %s6380_s18, %s6381_s20  }
 0x34d PF: > { %s4767_s25 = sand.u32 1, %s6358_s12   ;;  %p7726_p1 = scmp.ne.s32.totalorder %s7545_s19, 0 }
 0x34e   : > { %p7727_p2 = scmp.ge.s32.totalorder %s6370_s15, 2  ;;  %s4768_s28 = scalar_lea.sflag [#allocation4], %s4767_s25 }
 0x350   : > { %p5404_p6 = pnand %p7727_p2, %p7726_p1 }
 0x352   : > { %p5405_p12 = pneg %p5404_p6 }
 0x354   : > { %6353 = dma.done.wait (%p5405_p12), %s4768_s28, 4096  }
 0x355   : > { %6355 = vsyncadd (%p5405_p12), %s4768_s28, 4294963200  ;;  %p17_p7 = scmp.ge.s32.totalorder %s6474_s7, 4   ;;  %s7728_s12 = smov %s6362_s13 }
 0x356   : > { %s7729_s13 = smov %s6366_s14  ;;  %s7730_s14 = smov %s6490_s11 }
 0x357   : > { %s7731_s15 = smov %s6474_s7  ;;  %19 = sbr.rel (!%p17_p7) target bundleno = 6 (0x6), region = 85 }
 0x35c   :  { %4773 = vsyncpa [#allocation3], 1 }
 0x35d   :  { %4775 = vsyncpa [#allocation3 + $0x1], 1 }
 0x35e   :  { %4776 = vsyncpa [#allocation6], 1 }
 0x35f   :  { %4777 = vsyncpa [#allocation4], 1 }
 0x360   :  { %4779 = vsyncpa [#allocation4 + $0x1], 1 }

</bundles_post_ra>
